<compile_context>
chip_gen: v7x
topology: tpu7x:2x2x1
jax: 0.10.0
libtpu: 0.0.40
codegen_flags: <defaults>
</compile_context>

<pallas_src>
import functools
import numpy as np

import jax
import jax.numpy as jnp
from jax.experimental import pallas as pl
from jax.experimental.pallas import tpu as pltpu


# ----------------------------------------------------------------------------- in-kernel math
_SQRT1_2 = 0.7071067811865476


def _erf(x):
    # Abramowitz & Stegun 7.1.26; divide replaced by EUP approx reciprocal (frees VALU).
    a1, a2, a3, a4, a5 = 0.254829592, -0.284496736, 1.421413741, -1.453152027, 1.061405429
    p = 0.3275911
    ax = jnp.abs(x)
    t = pl.reciprocal(1.0 + p * ax, approx=True)
    poly = ((((a5 * t + a4) * t + a3) * t + a2) * t + a1) * t
    y = 1.0 - poly * jnp.exp(-ax * ax)
    return jnp.where(x >= 0, y, -y)


def _gelu(x):
    return 0.5 * x * (1.0 + _erf(x * _SQRT1_2))


def _layernorm(x, g, b, eps=1e-5):
    mu = jnp.mean(x, axis=-1, keepdims=True)
    xc = x - mu
    var = jnp.mean(xc * xc, axis=-1, keepdims=True)
    return xc * jax.lax.rsqrt(var + eps) * g + b


def _block_tile(total, candidates, min_steps):
    # largest candidate tile that divides `total` AND gives >= min_steps grid steps
    for t in candidates:
        if total % t == 0 and total // t >= min_steps:
            return t
    for t in candidates:
        if total % t == 0:
            return t
    return total


# ----------------------------------------------------------------------------- K1: LN1 + [q|kv]
def _ln_qkv_kernel(x_ref, g_ref, b_ref, w_ref, bb_ref, q_ref, kv_ref):
    C = q_ref.shape[-1]
    y = _layernorm(x_ref[...], g_ref[...], b_ref[...])                 # f32 stats
    r = jnp.dot(y.astype(jnp.bfloat16), w_ref[...],                    # ONE matmul for q and kv
                preferred_element_type=jnp.float32) + bb_ref[...]
    q_ref[...] = r[:, :C].astype(q_ref.dtype)
    kv_ref[...] = r[:, C:].astype(kv_ref.dtype)


def ln_qkv(x, g, b, w_cat, b_cat, tm):
    # TODO(synk): add K/N weight tiling (reduction grid axis + VMEM accumulator + pl.when) and
    # single-buffered weight specs (pipeline_mode=pl.Buffered(1)) before scaling C to SR dims.
    M, C = x.shape
    Cout = w_cat.shape[1]
    Ckv = Cout - C
    assert M % tm == 0
    return pl.pallas_call(
        _ln_qkv_kernel,
        out_shape=(jax.ShapeDtypeStruct((M, C), jnp.bfloat16),
                   jax.ShapeDtypeStruct((M, Ckv), jnp.bfloat16)),
        grid_spec=pltpu.PrefetchScalarGridSpec(
            num_scalar_prefetch=0,
            grid=(M // tm,),
            in_specs=[pl.BlockSpec((tm, C), lambda i: (i, 0)),
                      pl.BlockSpec((1, C), lambda i: (0, 0)),
                      pl.BlockSpec((1, C), lambda i: (0, 0)),
                      pl.BlockSpec((C, Cout), lambda i: (0, 0)),
                      pl.BlockSpec((1, Cout), lambda i: (0, 0))],
            out_specs=[pl.BlockSpec((tm, C), lambda i: (i, 0)),
                       pl.BlockSpec((tm, Ckv), lambda i: (i, 0))],
        ),
        compiler_params=pltpu.CompilerParams(dimension_semantics=("parallel",)),
    )(x, g.reshape(1, C), b.reshape(1, C), w_cat, b_cat)


# ----------------------------------------------------------------------------- K2: attention + proj + residual
def _psa_attn_kernel(q_ref, kv_ref, bias_ref, wp_ref, bp_ref, sc_ref, o_ref, *, scale):
    TB, N, C = o_ref.shape
    heads = bias_ref.shape[0]
    hd = C // heads

    q = q_ref[...]                      # (TB, N, C)  bf16, heads live on the lane axis
    k = kv_ref[:, 0]                    # (TB, P, C)  bf16
    v = kv_ref[:, 1]
    bias = bias_ref[...]                # (heads, N, P) f32

    ctx_parts = []
    for h in range(heads):              # per-head QK/PV (K=hd is intrinsic), batched over TB
        qh = q[:, :, h * hd:(h + 1) * hd]
        kh = k[:, :, h * hd:(h + 1) * hd]
        vh = v[:, :, h * hd:(h + 1) * hd]
        s = jnp.einsum('bnd,bpd->bnp', qh, kh,
                       preferred_element_type=jnp.float32) * scale       # (TB, N, P) f32
        s = s + bias[h][None]
        s = s - jnp.max(s, axis=-1, keepdims=True)
        e = jnp.exp(s)
        p = e * pl.reciprocal(jnp.sum(e, axis=-1, keepdims=True), approx=True)
        ctx_parts.append(jnp.einsum('bnp,bpd->bnd', p.astype(jnp.bfloat16), vh,
                                    preferred_element_type=jnp.float32))  # (TB, N, hd) f32

    # lane-concat heads, then ONE K=C projection + bias + residual in the epilogue
    ctx = jnp.concatenate(ctx_parts, axis=-1).reshape(TB * N, C)
    out = jnp.dot(ctx.astype(jnp.bfloat16), wp_ref[...],
                  preferred_element_type=jnp.float32)
    out = out + bp_ref[...] + sc_ref[...].reshape(TB * N, C)
    o_ref[...] = out.reshape(TB, N, C)


def psa_attention(q, kv, bias, wp, bp, shortcut_w, scale, tb):
    # q: (B_, N, C) bf16, kv: (B_, 2, P, C) bf16 (spatially folded, lane-dense),
    # bias: (heads, N, P) f32, shortcut_w: (B_, N, C) f32 (pre-LN tokens in window order).
    # TODO(synk): shift_size == 0 here, so the shifted-window roll + attn_mask branch is unused.
    B_, N, C = q.shape
    P = kv.shape[2]
    heads = bias.shape[0]
    assert B_ % tb == 0
    return pl.pallas_call(
        functools.partial(_psa_attn_kernel, scale=scale),
        out_shape=jax.ShapeDtypeStruct((B_, N, C), jnp.float32),
        grid_spec=pltpu.PrefetchScalarGridSpec(
            num_scalar_prefetch=0,
            grid=(B_ // tb,),
            in_specs=[pl.BlockSpec((tb, N, C), lambda i: (i, 0, 0)),
                      pl.BlockSpec((tb, 2, P, C), lambda i: (i, 0, 0, 0)),
                      pl.BlockSpec((heads, N, P), lambda i: (0, 0, 0)),
                      pl.BlockSpec((C, C), lambda i: (0, 0)),
                      pl.BlockSpec((1, C), lambda i: (0, 0)),
                      pl.BlockSpec((tb, N, C), lambda i: (i, 0, 0))],
            out_specs=pl.BlockSpec((tb, N, C), lambda i: (i, 0, 0)),
        ),
        compiler_params=pltpu.CompilerParams(dimension_semantics=("parallel",)),
    )(q, kv, bias, wp, bp.reshape(1, C), shortcut_w)


# ----------------------------------------------------------------------------- K3: LN2 + fc1 + GELU (bf16 out)
def _ln_fc1_kernel(x_ref, g_ref, b_ref, w1_ref, b1_ref, o_ref):
    y = _layernorm(x_ref[...], g_ref[...], b_ref[...])
    h = jnp.dot(y.astype(jnp.bfloat16), w1_ref[...],
                preferred_element_type=jnp.float32) + b1_ref[...]
    o_ref[...] = _gelu(h).astype(o_ref.dtype)


def ln_fc1_gelu(x, g, b, w1, b1, tm):
    M, C = x.shape
    Hf = w1.shape[1]
    assert M % tm == 0
    return pl.pallas_call(
        _ln_fc1_kernel,
        out_shape=jax.ShapeDtypeStruct((M, Hf), jnp.bfloat16),          # bf16: halves HBM traffic
        grid_spec=pltpu.PrefetchScalarGridSpec(
            num_scalar_prefetch=0,
            grid=(M // tm,),
            in_specs=[pl.BlockSpec((tm, C), lambda i: (i, 0)),
                      pl.BlockSpec((1, C), lambda i: (0, 0)),
                      pl.BlockSpec((1, C), lambda i: (0, 0)),
                      pl.BlockSpec((C, Hf), lambda i: (0, 0)),
                      pl.BlockSpec((1, Hf), lambda i: (0, 0))],
            out_specs=pl.BlockSpec((tm, Hf), lambda i: (i, 0)),
        ),
        compiler_params=pltpu.CompilerParams(dimension_semantics=("parallel",)),
    )(x, g.reshape(1, C), b.reshape(1, C), w1, b1.reshape(1, Hf))


# ----------------------------------------------------------------------------- K4: dwconv3d + GELU + add + fc2 + residual
def _convffn_tail_kernel(y1_ref, sc_ref, wdw_ref, bdw_ref, w2_ref, b2_ref, o_ref, xpad_ref,
                         *, D, H, W):
    # y1_ref : (1, D, H, W, Ch) bf16   GELU(fc1(LN2(x1))) for one batch element
    # sc_ref : (1, D, H*W, C)  f32     attention-half output x1 (residual for fc2)
    # wdw    : (27, Ch) f32 taps (kd*9 + kh*3 + kw);  bdw: (1, Ch);  w2: (Ch, C) bf16;  b2: (1, C)
    # o_ref  : (1, D, H*W, C) f32  <-  x1 + fc2( y1 + GELU(dwconv3d(y1) + bdw) )
    # xpad_ref: VMEM scratch (D+2, H+2, W, Ch) f32 -- D/H zero halo; W halo via roll + mask.
    Ch = y1_ref.shape[-1]

    # ---- stage y1 (bf16 -> f32 once) with D/H halos zeroed; no host-side jnp.pad needed.
    zd = jnp.zeros((1, H + 2, W, Ch), jnp.float32)
    xpad_ref[0:1, :, :, :] = zd
    xpad_ref[D + 1:D + 2, :, :, :] = zd
    zh = jnp.zeros((D, 1, W, Ch), jnp.float32)
    xpad_ref[1:D + 1, 0:1, :, :] = zh
    xpad_ref[1:D + 1, H + 1:H + 2, :, :] = zh
    xpad_ref[1:D + 1, 1:H + 1, :, :] = y1_ref[0].astype(jnp.float32)

    # ---- invariants hoisted out of the depth loop (JAX does not CSE broadcast_in_dim)
    taps = wdw_ref[...]                                   # (27, Ch) f32
    bdw = bdw_ref[...]                                    # (1, Ch)
    w2 = w2_ref[...]                                      # (Ch, C) bf16
    b2 = b2_ref[...]                                      # (1, C)
    wi = jax.lax.broadcasted_iota(jnp.int32, (H, W, Ch), 1)
    mask_lo = (wi > 0).astype(jnp.float32)                # zero the wrapped row for the kw=0 tap
    mask_hi = (wi < W - 1).astype(jnp.float32)            # zero the wrapped row for the kw=2 tap

    def body(d, carry):
        # 9 aligned slab loads; the W-direction shift is applied once per kw partial sum
        # (linearity), using pltpu.roll on the sublane axis (XLU) instead of misaligned slices.
        parts = [jnp.zeros((H, W, Ch), jnp.float32) for _ in range(3)]
        for kd in range(3):
            for kh in range(3):
                slab = xpad_ref[d + kd, kh:kh + H, :, :]               # (H, W, Ch) f32
                for kw in range(3):
                    parts[kw] = parts[kw] + slab * taps[kd * 9 + kh * 3 + kw][None, None, :]
        conv = (parts[1]
                + pltpu.roll(parts[0], 1, axis=1) * mask_lo
                + pltpu.roll(parts[2], W - 1, axis=1) * mask_hi)

        center = xpad_ref[d + 1, 1:1 + H, :, :]                        # y1 slab (f32)
        z = center + _gelu(conv + bdw)                                 # y1 + GELU(dwconv(y1)+b)

        # fused fc2 + attention-half residual (old K5): no HBM round-trip of the hidden act.
        out = jnp.dot(z.reshape(H * W, Ch).astype(jnp.bfloat16), w2,
                      preferred_element_type=jnp.float32)
        out = out + b2 + sc_ref[0, d]
        o_ref[0, d] = out
        return carry

    jax.lax.fori_loop(0, D, body, 0)


def convffn_tail(y1_vol, x1_vol, wdw, bdw, w2, b2):
    # y1_vol: (B, D, H, W, Ch) bf16; x1_vol: (B, D, H*W, C) f32.  Returns (B, D, H*W, C) f32.
    # TODO(synk): for SR-scale volumes, tile the grid over D with an overlapping halo window and
    # set vmem_limit_bytes (generation-aware: ~24 MiB budget on v7x vs ~48 MiB on v5e/v6e).
    B, D, H, W, Ch = y1_vol.shape
    C = x1_vol.shape[-1]
    return pl.pallas_call(
        functools.partial(_convffn_tail_kernel, D=D, H=H, W=W),
        out_shape=jax.ShapeDtypeStruct((B, D, H * W, C), jnp.float32),
        grid_spec=pltpu.PrefetchScalarGridSpec(
            num_scalar_prefetch=0,
            grid=(B,),
            in_specs=[pl.BlockSpec((1, D, H, W, Ch), lambda b: (b, 0, 0, 0, 0)),
                      pl.BlockSpec((1, D, H * W, C), lambda b: (b, 0, 0, 0)),
                      pl.BlockSpec((27, Ch), lambda b: (0, 0)),
                      pl.BlockSpec((1, Ch), lambda b: (0, 0)),
                      pl.BlockSpec((Ch, C), lambda b: (0, 0)),
                      pl.BlockSpec((1, C), lambda b: (0, 0))],
            out_specs=pl.BlockSpec((1, D, H * W, C), lambda b: (b, 0, 0, 0)),
            scratch_shapes=[pltpu.VMEM((D + 2, H + 2, W, Ch), jnp.float32)],
        ),
        compiler_params=pltpu.CompilerParams(dimension_semantics=("parallel",)),
    )(y1_vol, x1_vol, wdw, bdw.reshape(1, Ch), w2, b2.reshape(1, C))


# ----------------------------------------------------------------------------- glue: rel-pos index
def make_aligned_relative_position_index(pws):
    pd, ph, pw = pws
    coords = np.stack(np.meshgrid(np.arange(pd), np.arange(ph), np.arange(pw), indexing="ij"))
    cf = coords.reshape(3, -1)
    rel = (cf[:, :, None] - cf[:, None, :]).transpose(1, 2, 0).astype(np.int64)
    rel[:, :, 0] += pd - 1
    rel[:, :, 1] += ph - 1
    rel[:, :, 2] += pw - 1
    rel[:, :, 0] *= (2 * ph - 1) * (2 * pw - 1)
    rel[:, :, 1] *= (2 * pw - 1)
    idx = rel.sum(-1)                                  # (P, P)
    P = pd * ph * pw
    idx = idx.reshape(pd, ph, pw, 1, 1, 1, P)
    idx = np.tile(idx, (1, 1, 1, 2, 2, 2, 1))
    idx = idx.transpose(0, 3, 1, 4, 2, 5, 6).reshape(8 * P, P)
    return idx.astype(np.int32)                        # (N, P)


# ----------------------------------------------------------------------------- full forward
def psa_block3d_forward(x, x_size, p, cfg):
    D, H, W = x_size
    B, L, C = x.shape
    wd, wh, ww = cfg["window_size"]
    heads = cfg["num_heads"]
    hd = C // heads
    pd, ph, pw = wd // 2, wh // 2, ww // 2
    P = pd * ph * pw
    N = wd * wh * ww
    scale = hd ** (-0.5)

    # ---------------- attention half ----------------
    xr = x.reshape(B, D, H, W, C)
    xw = xr.reshape(B, D // wd, wd, H // wh, wh, W // ww, ww, C)
    xw = xw.transpose(0, 1, 3, 5, 2, 4, 6, 7).reshape(-1, N, C)          # window partition (glue)
    B_ = xw.shape[0]
    xwf = xw.reshape(B_ * N, C)

    # K1: LN + single [q|kv] projection (one MXU weight push)
    w_cat = jnp.concatenate([p["wq"], p["wkv"]], axis=1)                 # (C, C + C/4) bf16
    b_cat = jnp.concatenate([p["bq"], p["bkv"]]).reshape(1, -1)          # (1, C + C/4) f32
    tm = _block_tile(B_ * N, (512, 256, 128, 64, 32, 16, 8), min_steps=8)
    q_flat, kv_flat = ln_qkv(xwf, p["ln1_g"], p["ln1_b"], w_cat, b_cat, tm)

    # q stays token-major (B_, N, C): heads are sliced on lanes inside K2 (no HBM transpose).
    q = q_flat.reshape(B_, N, C)

    # TODO(synk): reference's kv reshape chain is inconsistent with Linear(dim, dim//2) (element
    # counts don't match); implemented the consistent SRFormer permuted-KV: Linear(dim, dim//4)
    # with the 2x2x2 spatial neighbourhood folded into the head dim.  The fold itself is a small
    # (C/4-wide) tensor and stays in glue, but it now produces lane-dense (B_, 2, P, C) k/v.
    hd8 = C // (8 * heads)
    kv = kv_flat.reshape(B_, pd, 2, ph, 2, pw, 2, 2, heads, hd8)
    kv = kv.transpose(0, 7, 1, 3, 5, 8, 2, 4, 6, 9).reshape(B_, 2, P, C)

    bias = p["rpb_table"][cfg["rpi"].reshape(-1)].reshape(N, P, heads).transpose(2, 0, 1)

    tb = _block_tile(B_, (16, 8, 4, 2), min_steps=4)
    attn = psa_attention(q, kv, bias, p["wproj"], p["bproj"], xw, scale, tb)  # (B_, N, C) + residual

    aw = attn.reshape(B, D // wd, H // wh, W // ww, wd, wh, ww, C)
    x1 = aw.transpose(0, 1, 4, 2, 5, 3, 6, 7).reshape(B, L, C)           # window reverse (glue)

    # ---------------- ConvFFN half ----------------
    x1f = x1.reshape(B * L, C)
    tm2 = _block_tile(B * L, (512, 256, 128, 64, 32, 16, 8), min_steps=8)
    y1 = ln_fc1_gelu(x1f, p["ln2_g"], p["ln2_b"], p["w1"], p["b1"], tm2)     # (B*L, hidden) bf16
    hidden = y1.shape[-1]
    out = convffn_tail(y1.reshape(B, D, H, W, hidden),
                       x1.reshape(B, D, H * W, C),
                       p["wdw"], p["bdw"], p["w2"], p["b2"])                 # dwconv + fc2 + residual
    return out.reshape(B, L, C)


# ----------------------------------------------------------------------------- params
def init_params(key, C, heads, hidden, pws):
    n_table = (2 * pws[0] - 1) * (2 * pws[1] - 1) * (2 * pws[2] - 1)
    ks = jax.random.split(key, 13)
    r = lambda k, shape, s=0.02: (s * jax.random.normal(k, shape)).astype(jnp.float32)
    bf = lambda k, shape: r(k, shape).astype(jnp.bfloat16)       # MXU operands pre-cast to bf16 once
    return {
        "ln1_g": jnp.ones((C,), jnp.float32), "ln1_b": jnp.zeros((C,), jnp.float32),
        "ln2_g": jnp.ones((C,), jnp.float32), "ln2_b": jnp.zeros((C,), jnp.float32),
        "wq": bf(ks[0], (C, C)), "bq": r(ks[1], (C,)),
        "wkv": bf(ks[2], (C, C // 4)), "bkv": r(ks[3], (C // 4,)),
        "wproj": bf(ks[4], (C, C)), "bproj": r(ks[5], (C,)),
        "rpb_table": r(ks[6], (n_table, heads)),                 # ~ trunc_normal(std=0.02)
        "w1": bf(ks[7], (C, hidden)), "b1": r(ks[8], (hidden,)),
        "w2": bf(ks[9], (hidden, C)), "b2": r(ks[10], (C,)),
        "wdw": r(ks[11], (27, hidden)),                          # depthwise 3x3x3 taps, channels-last
        "bdw": r(ks[12], (hidden,)),
    }


# ----------------------------------------------------------------------------- main
if __name__ == "__main__":
    B = 2
    D = H = W = 8
    C = 64
    num_heads = 4
    window_size = (4, 4, 4)          # permuted window = (2, 2, 2); shift_size = 0
    mlp_ratio = 2.0
    hidden = int(C * mlp_ratio)      # 128 -> full 128-lane slabs on the FFN / dwconv path
    L = D * H * W

    pws = tuple(w // 2 for w in window_size)
    cfg = {
        "window_size": window_size,
        "num_heads": num_heads,
        "rpi": make_aligned_relative_position_index(pws),
    }

    root = jax.random.PRNGKey(0)
    k_in, k_par = jax.random.split(root)
    x = jax.random.normal(k_in, (B, L, C), jnp.float32)
    params = init_params(k_par, C, num_heads, hidden, pws)

    fwd = jax.jit(lambda xx, pp: psa_block3d_forward(xx, (D, H, W), pp, cfg))
    out = fwd(x, params)
    out = jax.block_until_ready(out)

    assert out.shape == (B, L, C), out.shape
    assert bool(jnp.all(jnp.isfinite(out)))
    print("KERNEL_OK")
</pallas_src>

<mosaic_0001>
module attributes {stable_mosaic.version = 11 : i64} {
  func.func @_ln_qkv_kernel(%arg0: i32, %arg1: memref<128x64xf32, #tpu.memory_space<vmem>>, %arg2: memref<1x64xf32, #tpu.memory_space<vmem>>, %arg3: memref<1x64xf32, #tpu.memory_space<vmem>>, %arg4: memref<64x80xbf16, #tpu.memory_space<vmem>>, %arg5: memref<1x80xf32, #tpu.memory_space<vmem>>, %arg6: memref<128x64xbf16, #tpu.memory_space<vmem>>, %arg7: memref<128x16xbf16, #tpu.memory_space<vmem>>) attributes {dimension_semantics = [#tpu.dimension_semantics<parallel>], iteration_bounds = array<i64: 8>, scalar_prefetch = 0 : i64, scratch_operands = 0 : i64, tpu.core_type = #tpu.core_type<tc>, window_params = [{transform_indices = @transform_0, window_bounds = array<i64: 128, 64>}, {pipeline_mode = #tpu.pipeline_mode<synchronous>, transform_indices = @transform_1, window_bounds = array<i64: 1, 64>}, {pipeline_mode = #tpu.pipeline_mode<synchronous>, transform_indices = @transform_2, window_bounds = array<i64: 1, 64>}, {pipeline_mode = #tpu.pipeline_mode<synchronous>, transform_indices = @transform_3, window_bounds = array<i64: 64, 80>}, {pipeline_mode = #tpu.pipeline_mode<synchronous>, transform_indices = @transform_4, window_bounds = array<i64: 1, 80>}, {transform_indices = @transform_5, window_bounds = array<i64: 128, 64>}, {transform_indices = @transform_6, window_bounds = array<i64: 128, 16>}]} {
    %c0 = arith.constant 0 : index
    %c0_0 = arith.constant 0 : index
    %0 = vector.load %arg1[%c0, %c0_0] : memref<128x64xf32, #tpu.memory_space<vmem>>, vector<128x64xf32>
    %c0_1 = arith.constant 0 : index
    %c0_2 = arith.constant 0 : index
    %1 = vector.load %arg2[%c0_1, %c0_2] : memref<1x64xf32, #tpu.memory_space<vmem>>, vector<1x64xf32>
    %c0_3 = arith.constant 0 : index
    %c0_4 = arith.constant 0 : index
    %2 = vector.load %arg3[%c0_3, %c0_4] : memref<1x64xf32, #tpu.memory_space<vmem>>, vector<1x64xf32>
    %cst = arith.constant dense<0.000000e+00> : vector<128xf32>
    %3 = vector.multi_reduction <add>, %0, %cst [1] : vector<128x64xf32> to vector<128xf32>
    %4 = vector.shape_cast %3 : vector<128xf32> to vector<128x1xf32>
    %cst_5 = arith.constant 6.400000e+01 : f32
    %5 = vector.broadcast %cst_5 : f32 to vector<128x1xf32>
    %6 = arith.divf %4, %5 : vector<128x1xf32>
    %7 = vector.broadcast %6 : vector<128x1xf32> to vector<128x64xf32>
    %8 = arith.subf %0, %7 : vector<128x64xf32>
    %9 = arith.mulf %8, %8 : vector<128x64xf32>
    %cst_6 = arith.constant dense<0.000000e+00> : vector<128xf32>
    %10 = vector.multi_reduction <add>, %9, %cst_6 [1] : vector<128x64xf32> to vector<128xf32>
    %11 = vector.shape_cast %10 : vector<128xf32> to vector<128x1xf32>
    %cst_7 = arith.constant 6.400000e+01 : f32
    %12 = vector.broadcast %cst_7 : f32 to vector<128x1xf32>
    %13 = arith.divf %11, %12 : vector<128x1xf32>
    %cst_8 = arith.constant 9.99999974E-6 : f32
    %14 = vector.broadcast %cst_8 : f32 to vector<128x1xf32>
    %15 = arith.addf %13, %14 : vector<128x1xf32>
    %16 = math.rsqrt %15 : vector<128x1xf32>
    %17 = vector.broadcast %16 : vector<128x1xf32> to vector<128x64xf32>
    %18 = arith.mulf %8, %17 : vector<128x64xf32>
    %19 = vector.broadcast %1 : vector<1x64xf32> to vector<128x64xf32>
    %20 = arith.mulf %18, %19 : vector<128x64xf32>
    %21 = vector.broadcast %2 : vector<1x64xf32> to vector<128x64xf32>
    %22 = arith.addf %20, %21 : vector<128x64xf32>
    %23 = arith.truncf %22 : vector<128x64xf32> to vector<128x64xbf16>
    %c0_9 = arith.constant 0 : index
    %c0_10 = arith.constant 0 : index
    %24 = vector.load %arg4[%c0_9, %c0_10] : memref<64x80xbf16, #tpu.memory_space<vmem>>, vector<64x80xbf16>
    %cst_11 = arith.constant dense<0.000000e+00> : vector<128x80xf32>
    %25 = tpu.matmul %23, %24, %cst_11 {dimension_numbers = #tpu.dot_dimension_numbers<[1], [0], [0], [1], [0, 0, 1, 1], [], []>} : vector<128x64xbf16>, vector<64x80xbf16>, vector<128x80xf32> -> vector<128x80xf32>
    %c0_12 = arith.constant 0 : index
    %c0_13 = arith.constant 0 : index
    %26 = vector.load %arg5[%c0_12, %c0_13] : memref<1x80xf32, #tpu.memory_space<vmem>>, vector<1x80xf32>
    %27 = vector.broadcast %26 : vector<1x80xf32> to vector<128x80xf32>
    %28 = arith.addf %25, %27 : vector<128x80xf32>
    %29 = vector.extract_strided_slice %28 {offsets = [0, 0], sizes = [128, 64], strides = [1, 1]} : vector<128x80xf32> to vector<128x64xf32>
    %30 = arith.truncf %29 : vector<128x64xf32> to vector<128x64xbf16>
    %c0_14 = arith.constant 0 : index
    %c0_15 = arith.constant 0 : index
    %31 = vector.load %arg6[%c0_14, %c0_15] : memref<128x64xbf16, #tpu.memory_space<vmem>>, vector<128x64xbf16>
    tpu.vector_store %arg6[%c0_14, %c0_15], %30 {strides = array<i32>} : memref<128x64xbf16, #tpu.memory_space<vmem>>, vector<128x64xbf16>,
    %32 = vector.extract_strided_slice %28 {offsets = [0, 64], sizes = [128, 16], strides = [1, 1]} : vector<128x80xf32> to vector<128x16xf32>
    %33 = arith.truncf %32 : vector<128x16xf32> to vector<128x16xbf16>
    %c0_16 = arith.constant 0 : index
    %c0_17 = arith.constant 0 : index
    %34 = vector.load %arg7[%c0_16, %c0_17] : memref<128x16xbf16, #tpu.memory_space<vmem>>, vector<128x16xbf16>
    tpu.vector_store %arg7[%c0_16, %c0_17], %33 {strides = array<i32>} : memref<128x16xbf16, #tpu.memory_space<vmem>>, vector<128x16xbf16>,
    return
  }
  func.func @transform_0(%arg0: i32) -> (i32, i32) {
    %c0_i32 = arith.constant 0 : i32
    %c0_i32_0 = arith.constant 0 : i32
    return %arg0, %c0_i32 : i32, i32
  }
  func.func @transform_1(%arg0: i32) -> (i32, i32) {
    %c0_i32 = arith.constant 0 : i32
    %c0_i32_0 = arith.constant 0 : i32
    %c0_i32_1 = arith.constant 0 : i32
    return %c0_i32, %c0_i32_0 : i32, i32
  }
  func.func @transform_2(%arg0: i32) -> (i32, i32) {
    %c0_i32 = arith.constant 0 : i32
    %c0_i32_0 = arith.constant 0 : i32
    %c0_i32_1 = arith.constant 0 : i32
    return %c0_i32, %c0_i32_0 : i32, i32
  }
  func.func @transform_3(%arg0: i32) -> (i32, i32) {
    %c0_i32 = arith.constant 0 : i32
    %c0_i32_0 = arith.constant 0 : i32
    %c0_i32_1 = arith.constant 0 : i32
    return %c0_i32, %c0_i32_0 : i32, i32
  }
  func.func @transform_4(%arg0: i32) -> (i32, i32) {
    %c0_i32 = arith.constant 0 : i32
    %c0_i32_0 = arith.constant 0 : i32
    %c0_i32_1 = arith.constant 0 : i32
    return %c0_i32, %c0_i32_0 : i32, i32
  }
  func.func @transform_5(%arg0: i32) -> (i32, i32) {
    %c0_i32 = arith.constant 0 : i32
    %c0_i32_0 = arith.constant 0 : i32
    return %arg0, %c0_i32 : i32, i32
  }
  func.func @transform_6(%arg0: i32) -> (i32, i32) {
    %c0_i32 = arith.constant 0 : i32
    %c0_i32_0 = arith.constant 0 : i32
    return %arg0, %c0_i32 : i32, i32
  }
}

module attributes {stable_mosaic.version = 11 : i64} {
  func.func @_psa_attn_kernel(%arg0: i32, %arg1: memref<4x64x64xbf16, #tpu.memory_space<vmem>>, %arg2: memref<4x2x8x64xbf16, #tpu.memory_space<vmem>>, %arg3: memref<4x64x8xf32, #tpu.memory_space<vmem>>, %arg4: memref<64x64xbf16, #tpu.memory_space<vmem>>, %arg5: memref<1x64xf32, #tpu.memory_space<vmem>>, %arg6: memref<4x64x64xf32, #tpu.memory_space<vmem>>, %arg7: memref<4x64x64xf32, #tpu.memory_space<vmem>>) attributes {dimension_semantics = [#tpu.dimension_semantics<parallel>], iteration_bounds = array<i64: 4>, scalar_prefetch = 0 : i64, scratch_operands = 0 : i64, tpu.core_type = #tpu.core_type<tc>, window_params = [{transform_indices = @transform_0, window_bounds = array<i64: 4, 64, 64>}, {transform_indices = @transform_1, window_bounds = array<i64: 4, 2, 8, 64>}, {pipeline_mode = #tpu.pipeline_mode<synchronous>, transform_indices = @transform_2, window_bounds = array<i64: 4, 64, 8>}, {pipeline_mode = #tpu.pipeline_mode<synchronous>, transform_indices = @transform_3, window_bounds = array<i64: 64, 64>}, {pipeline_mode = #tpu.pipeline_mode<synchronous>, transform_indices = @transform_4, window_bounds = array<i64: 1, 64>}, {transform_indices = @transform_5, window_bounds = array<i64: 4, 64, 64>}, {transform_indices = @transform_6, window_bounds = array<i64: 4, 64, 64>}]} {
    %c0 = arith.constant 0 : index
    %c0_0 = arith.constant 0 : index
    %c0_1 = arith.constant 0 : index
    %0 = vector.load %arg1[%c0, %c0_0, %c0_1] : memref<4x64x64xbf16, #tpu.memory_space<vmem>>, vector<4x64x64xbf16>
    %c0_2 = arith.constant 0 : index
    %c0_3 = arith.constant 0 : index
    %c0_4 = arith.constant 0 : index
    %c0_5 = arith.constant 0 : index
    %1 = vector.load %arg2[%c0_2, %c0_3, %c0_4, %c0_5] : memref<4x2x8x64xbf16, #tpu.memory_space<vmem>>, vector<4x1x8x64xbf16>
    %2 = vector.shape_cast %1 : vector<4x1x8x64xbf16> to vector<4x8x64xbf16>
    %c0_6 = arith.constant 0 : index
    %c1 = arith.constant 1 : index
    %c0_7 = arith.constant 0 : index
    %c0_8 = arith.constant 0 : index
    %3 = vector.load %arg2[%c0_6, %c1, %c0_7, %c0_8] : memref<4x2x8x64xbf16, #tpu.memory_space<vmem>>, vector<4x1x8x64xbf16>
    %4 = vector.shape_cast %3 : vector<4x1x8x64xbf16> to vector<4x8x64xbf16>
    %c0_9 = arith.constant 0 : index
    %c0_10 = arith.constant 0 : index
    %c0_11 = arith.constant 0 : index
    %5 = vector.load %arg3[%c0_9, %c0_10, %c0_11] : memref<4x64x8xf32, #tpu.memory_space<vmem>>, vector<4x64x8xf32>
    %6 = vector.extract_strided_slice %0 {offsets = [0, 0, 0], sizes = [4, 64, 16], strides = [1, 1, 1]} : vector<4x64x64xbf16> to vector<4x64x16xbf16>
    %7 = vector.extract_strided_slice %2 {offsets = [0, 0, 0], sizes = [4, 8, 16], strides = [1, 1, 1]} : vector<4x8x64xbf16> to vector<4x8x16xbf16>
    %8 = vector.extract_strided_slice %4 {offsets = [0, 0, 0], sizes = [4, 8, 16], strides = [1, 1, 1]} : vector<4x8x64xbf16> to vector<4x8x16xbf16>
    "tpu.trace_start"() <{level = 10 : i32, message = "bnd,bpd->bnp"}> : () -> ()
    %cst = arith.constant dense<0.000000e+00> : vector<4x64x8xf32>
    %9 = tpu.matmul %6, %7, %cst {dimension_numbers = #tpu.dot_dimension_numbers<[2], [2], [1], [1], [0, 0, 0, 1, 1, 1], [0], [0]>} : vector<4x64x16xbf16>, vector<4x8x16xbf16>, vector<4x64x8xf32> -> vector<4x64x8xf32>
    "tpu.trace_stop"() : () -> ()
    %cst_12 = arith.constant 2.500000e-01 : f32
    %10 = vector.broadcast %cst_12 : f32 to vector<4x64x8xf32>
    %11 = arith.mulf %9, %10 : vector<4x64x8xf32>
    %12 = vector.extract_strided_slice %5 {offsets = [0, 0, 0], sizes = [1, 64, 8], strides = [1, 1, 1]} : vector<4x64x8xf32> to vector<1x64x8xf32>
    %13 = vector.shape_cast %12 : vector<1x64x8xf32> to vector<64x8xf32>
    %14 = vector.shape_cast %13 : vector<64x8xf32> to vector<1x64x8xf32>
    %15 = vector.broadcast %14 : vector<1x64x8xf32> to vector<4x64x8xf32>
    %16 = arith.addf %11, %15 : vector<4x64x8xf32>
    %cst_13 = arith.constant dense<0xFF800000> : vector<4x64xf32>
    %17 = vector.multi_reduction <maximumf>, %16, %cst_13 [2] : vector<4x64x8xf32> to vector<4x64xf32>
    %18 = vector.shape_cast %17 : vector<4x64xf32> to vector<4x64x1xf32>
    %19 = vector.broadcast %18 : vector<4x64x1xf32> to vector<4x64x8xf32>
    %20 = arith.subf %16, %19 : vector<4x64x8xf32>
    %21 = math.exp %20 : vector<4x64x8xf32>
    %cst_14 = arith.constant dense<0.000000e+00> : vector<4x64xf32>
    %22 = vector.multi_reduction <add>, %21, %cst_14 [2] : vector<4x64x8xf32> to vector<4x64xf32>
    %23 = vector.shape_cast %22 : vector<4x64xf32> to vector<4x64x1xf32>
    %24 = tpu.reciprocal %23 {approx = true} : vector<4x64x1xf32> -> vector<4x64x1xf32>
    %25 = vector.broadcast %24 : vector<4x64x1xf32> to vector<4x64x8xf32>
    %26 = arith.mulf %21, %25 : vector<4x64x8xf32>
    %27 = arith.truncf %26 : vector<4x64x8xf32> to vector<4x64x8xbf16>
    "tpu.trace_start"() <{level = 10 : i32, message = "bnp,bpd->bnd"}> : () -> ()
    %cst_15 = arith.constant dense<0.000000e+00> : vector<4x64x16xf32>
    %28 = tpu.matmul %27, %8, %cst_15 {dimension_numbers = #tpu.dot_dimension_numbers<[2], [1], [1], [2], [0, 0, 0, 1, 1, 2], [0], [0]>} : vector<4x64x8xbf16>, vector<4x8x16xbf16>, vector<4x64x16xf32> -> vector<4x64x16xf32>
    "tpu.trace_stop"() : () -> ()
    %29 = vector.extract_strided_slice %0 {offsets = [0, 0, 16], sizes = [4, 64, 16], strides = [1, 1, 1]} : vector<4x64x64xbf16> to vector<4x64x16xbf16>
    %30 = vector.extract_strided_slice %2 {offsets = [0, 0, 16], sizes = [4, 8, 16], strides = [1, 1, 1]} : vector<4x8x64xbf16> to vector<4x8x16xbf16>
    %31 = vector.extract_strided_slice %4 {offsets = [0, 0, 16], sizes = [4, 8, 16], strides = [1, 1, 1]} : vector<4x8x64xbf16> to vector<4x8x16xbf16>
    "tpu.trace_start"() <{level = 10 : i32, message = "bnd,bpd->bnp"}> : () -> ()
    %cst_16 = arith.constant dense<0.000000e+00> : vector<4x64x8xf32>
    %32 = tpu.matmul %29, %30, %cst_16 {dimension_numbers = #tpu.dot_dimension_numbers<[2], [2], [1], [1], [0, 0, 0, 1, 1, 1], [0], [0]>} : vector<4x64x16xbf16>, vector<4x8x16xbf16>, vector<4x64x8xf32> -> vector<4x64x8xf32>
    "tpu.trace_stop"() : () -> ()
    %cst_17 = arith.constant 2.500000e-01 : f32
    %33 = vector.broadcast %cst_17 : f32 to vector<4x64x8xf32>
    %34 = arith.mulf %32, %33 : vector<4x64x8xf32>
    %35 = vector.extract_strided_slice %5 {offsets = [1, 0, 0], sizes = [1, 64, 8], strides = [1, 1, 1]} : vector<4x64x8xf32> to vector<1x64x8xf32>
    %36 = vector.shape_cast %35 : vector<1x64x8xf32> to vector<64x8xf32>
    %37 = vector.shape_cast %36 : vector<64x8xf32> to vector<1x64x8xf32>
    %38 = vector.broadcast %37 : vector<1x64x8xf32> to vector<4x64x8xf32>
    %39 = arith.addf %34, %38 : vector<4x64x8xf32>
    %cst_18 = arith.constant dense<0xFF800000> : vector<4x64xf32>
    %40 = vector.multi_reduction <maximumf>, %39, %cst_18 [2] : vector<4x64x8xf32> to vector<4x64xf32>
    %41 = vector.shape_cast %40 : vector<4x64xf32> to vector<4x64x1xf32>
    %42 = vector.broadcast %41 : vector<4x64x1xf32> to vector<4x64x8xf32>
    %43 = arith.subf %39, %42 : vector<4x64x8xf32>
    %44 = math.exp %43 : vector<4x64x8xf32>
    %cst_19 = arith.constant dense<0.000000e+00> : vector<4x64xf32>
    %45 = vector.multi_reduction <add>, %44, %cst_19 [2] : vector<4x64x8xf32> to vector<4x64xf32>
    %46 = vector.shape_cast %45 : vector<4x64xf32> to vector<4x64x1xf32>
    %47 = tpu.reciprocal %46 {approx = true} : vector<4x64x1xf32> -> vector<4x64x1xf32>
    %48 = vector.broadcast %47 : vector<4x64x1xf32> to vector<4x64x8xf32>
    %49 = arith.mulf %44, %48 : vector<4x64x8xf32>
    %50 = arith.truncf %49 : vector<4x64x8xf32> to vector<4x64x8xbf16>
    "tpu.trace_start"() <{level = 10 : i32, message = "bnp,bpd->bnd"}> : () -> ()
    %cst_20 = arith.constant dense<0.000000e+00> : vector<4x64x16xf32>
    %51 = tpu.matmul %50, %31, %cst_20 {dimension_numbers = #tpu.dot_dimension_numbers<[2], [1], [1], [2], [0, 0, 0, 1, 1, 2], [0], [0]>} : vector<4x64x8xbf16>, vector<4x8x16xbf16>, vector<4x64x16xf32> -> vector<4x64x16xf32>
    "tpu.trace_stop"() : () -> ()
    %52 = vector.extract_strided_slice %0 {offsets = [0, 0, 32], sizes = [4, 64, 16], strides = [1, 1, 1]} : vector<4x64x64xbf16> to vector<4x64x16xbf16>
    %53 = vector.extract_strided_slice %2 {offsets = [0, 0, 32], sizes = [4, 8, 16], strides = [1, 1, 1]} : vector<4x8x64xbf16> to vector<4x8x16xbf16>
    %54 = vector.extract_strided_slice %4 {offsets = [0, 0, 32], sizes = [4, 8, 16], strides = [1, 1, 1]} : vector<4x8x64xbf16> to vector<4x8x16xbf16>
    "tpu.trace_start"() <{level = 10 : i32, message = "bnd,bpd->bnp"}> : () -> ()
    %cst_21 = arith.constant dense<0.000000e+00> : vector<4x64x8xf32>
    %55 = tpu.matmul %52, %53, %cst_21 {dimension_numbers = #tpu.dot_dimension_numbers<[2], [2], [1], [1], [0, 0, 0, 1, 1, 1], [0], [0]>} : vector<4x64x16xbf16>, vector<4x8x16xbf16>, vector<4x64x8xf32> -> vector<4x64x8xf32>
    "tpu.trace_stop"() : () -> ()
    %cst_22 = arith.constant 2.500000e-01 : f32
    %56 = vector.broadcast %cst_22 : f32 to vector<4x64x8xf32>
    %57 = arith.mulf %55, %56 : vector<4x64x8xf32>
    %58 = vector.extract_strided_slice %5 {offsets = [2, 0, 0], sizes = [1, 64, 8], strides = [1, 1, 1]} : vector<4x64x8xf32> to vector<1x64x8xf32>
    %59 = vector.shape_cast %58 : vector<1x64x8xf32> to vector<64x8xf32>
    %60 = vector.shape_cast %59 : vector<64x8xf32> to vector<1x64x8xf32>
    %61 = vector.broadcast %60 : vector<1x64x8xf32> to vector<4x64x8xf32>
    %62 = arith.addf %57, %61 : vector<4x64x8xf32>
    %cst_23 = arith.constant dense<0xFF800000> : vector<4x64xf32>
    %63 = vector.multi_reduction <maximumf>, %62, %cst_23 [2] : vector<4x64x8xf32> to vector<4x64xf32>
    %64 = vector.shape_cast %63 : vector<4x64xf32> to vector<4x64x1xf32>
    %65 = vector.broadcast %64 : vector<4x64x1xf32> to vector<4x64x8xf32>
    %66 = arith.subf %62, %65 : vector<4x64x8xf32>
    %67 = math.exp %66 : vector<4x64x8xf32>
    %cst_24 = arith.constant dense<0.000000e+00> : vector<4x64xf32>
    %68 = vector.multi_reduction <add>, %67, %cst_24 [2] : vector<4x64x8xf32> to vector<4x64xf32>
    %69 = vector.shape_cast %68 : vector<4x64xf32> to vector<4x64x1xf32>
    %70 = tpu.reciprocal %69 {approx = true} : vector<4x64x1xf32> -> vector<4x64x1xf32>
    %71 = vector.broadcast %70 : vector<4x64x1xf32> to vector<4x64x8xf32>
    %72 = arith.mulf %67, %71 : vector<4x64x8xf32>
    %73 = arith.truncf %72 : vector<4x64x8xf32> to vector<4x64x8xbf16>
    "tpu.trace_start"() <{level = 10 : i32, message = "bnp,bpd->bnd"}> : () -> ()
    %cst_25 = arith.constant dense<0.000000e+00> : vector<4x64x16xf32>
    %74 = tpu.matmul %73, %54, %cst_25 {dimension_numbers = #tpu.dot_dimension_numbers<[2], [1], [1], [2], [0, 0, 0, 1, 1, 2], [0], [0]>} : vector<4x64x8xbf16>, vector<4x8x16xbf16>, vector<4x64x16xf32> -> vector<4x64x16xf32>
    "tpu.trace_stop"() : () -> ()
    %75 = vector.extract_strided_slice %0 {offsets = [0, 0, 48], sizes = [4, 64, 16], strides = [1, 1, 1]} : vector<4x64x64xbf16> to vector<4x64x16xbf16>
    %76 = vector.extract_strided_slice %2 {offsets = [0, 0, 48], sizes = [4, 8, 16], strides = [1, 1, 1]} : vector<4x8x64xbf16> to vector<4x8x16xbf16>
    %77 = vector.extract_strided_slice %4 {offsets = [0, 0, 48], sizes = [4, 8, 16], strides = [1, 1, 1]} : vector<4x8x64xbf16> to vector<4x8x16xbf16>
    "tpu.trace_start"() <{level = 10 : i32, message = "bnd,bpd->bnp"}> : () -> ()
    %cst_26 = arith.constant dense<0.000000e+00> : vector<4x64x8xf32>
    %78 = tpu.matmul %75, %76, %cst_26 {dimension_numbers = #tpu.dot_dimension_numbers<[2], [2], [1], [1], [0, 0, 0, 1, 1, 1], [0], [0]>} : vector<4x64x16xbf16>, vector<4x8x16xbf16>, vector<4x64x8xf32> -> vector<4x64x8xf32>
    "tpu.trace_stop"() : () -> ()
    %cst_27 = arith.constant 2.500000e-01 : f32
    %79 = vector.broadcast %cst_27 : f32 to vector<4x64x8xf32>
    %80 = arith.mulf %78, %79 : vector<4x64x8xf32>
    %81 = vector.extract_strided_slice %5 {offsets = [3, 0, 0], sizes = [1, 64, 8], strides = [1, 1, 1]} : vector<4x64x8xf32> to vector<1x64x8xf32>
    %82 = vector.shape_cast %81 : vector<1x64x8xf32> to vector<64x8xf32>
    %83 = vector.shape_cast %82 : vector<64x8xf32> to vector<1x64x8xf32>
    %84 = vector.broadcast %83 : vector<1x64x8xf32> to vector<4x64x8xf32>
    %85 = arith.addf %80, %84 : vector<4x64x8xf32>
    %cst_28 = arith.constant dense<0xFF800000> : vector<4x64xf32>
    %86 = vector.multi_reduction <maximumf>, %85, %cst_28 [2] : vector<4x64x8xf32> to vector<4x64xf32>
    %87 = vector.shape_cast %86 : vector<4x64xf32> to vector<4x64x1xf32>
    %88 = vector.broadcast %87 : vector<4x64x1xf32> to vector<4x64x8xf32>
    %89 = arith.subf %85, %88 : vector<4x64x8xf32>
    %90 = math.exp %89 : vector<4x64x8xf32>
    %cst_29 = arith.constant dense<0.000000e+00> : vector<4x64xf32>
    %91 = vector.multi_reduction <add>, %90, %cst_29 [2] : vector<4x64x8xf32> to vector<4x64xf32>
    %92 = vector.shape_cast %91 : vector<4x64xf32> to vector<4x64x1xf32>
    %93 = tpu.reciprocal %92 {approx = true} : vector<4x64x1xf32> -> vector<4x64x1xf32>
    %94 = vector.broadcast %93 : vector<4x64x1xf32> to vector<4x64x8xf32>
    %95 = arith.mulf %90, %94 : vector<4x64x8xf32>
    %96 = arith.truncf %95 : vector<4x64x8xf32> to vector<4x64x8xbf16>
    "tpu.trace_start"() <{level = 10 : i32, message = "bnp,bpd->bnd"}> : () -> ()
    %cst_30 = arith.constant dense<0.000000e+00> : vector<4x64x16xf32>
    %97 = tpu.matmul %96, %77, %cst_30 {dimension_numbers = #tpu.dot_dimension_numbers<[2], [1], [1], [2], [0, 0, 0, 1, 1, 2], [0], [0]>} : vector<4x64x8xbf16>, vector<4x8x16xbf16>, vector<4x64x16xf32> -> vector<4x64x16xf32>
    "tpu.trace_stop"() : () -> ()
    %98 = tpu.concatenate %28, %51, %74, %97 in 2 : vector<4x64x16xf32>, vector<4x64x16xf32>, vector<4x64x16xf32>, vector<4x64x16xf32> -> vector<4x64x64xf32>
    %99 = vector.shape_cast %98 : vector<4x64x64xf32> to vector<256x64xf32>
    %100 = arith.truncf %99 : vector<256x64xf32> to vector<256x64xbf16>
    %c0_31 = arith.constant 0 : index
    %c0_32 = arith.constant 0 : index
    %101 = vector.load %arg4[%c0_31, %c0_32] : memref<64x64xbf16, #tpu.memory_space<vmem>>, vector<64x64xbf16>
    %cst_33 = arith.constant dense<0.000000e+00> : vector<256x64xf32>
    %102 = tpu.matmul %100, %101, %cst_33 {dimension_numbers = #tpu.dot_dimension_numbers<[1], [0], [0], [1], [0, 0, 1, 1], [], []>} : vector<256x64xbf16>, vector<64x64xbf16>, vector<256x64xf32> -> vector<256x64xf32>
    %c0_34 = arith.constant 0 : index
    %c0_35 = arith.constant 0 : index
    %103 = vector.load %arg5[%c0_34, %c0_35] : memref<1x64xf32, #tpu.memory_space<vmem>>, vector<1x64xf32>
    %104 = vector.broadcast %103 : vector<1x64xf32> to vector<256x64xf32>
    %105 = arith.addf %102, %104 : vector<256x64xf32>
    %c0_36 = arith.constant 0 : index
    %c0_37 = arith.constant 0 : index
    %c0_38 = arith.constant 0 : index
    %106 = vector.load %arg6[%c0_36, %c0_37, %c0_38] : memref<4x64x64xf32, #tpu.memory_space<vmem>>, vector<4x64x64xf32>
    %107 = vector.shape_cast %106 : vector<4x64x64xf32> to vector<256x64xf32>
    %108 = arith.addf %105, %107 : vector<256x64xf32>
    %109 = vector.shape_cast %108 : vector<256x64xf32> to vector<4x64x64xf32>
    %c0_39 = arith.constant 0 : index
    %c0_40 = arith.constant 0 : index
    %c0_41 = arith.constant 0 : index
    %110 = vector.load %arg7[%c0_39, %c0_40, %c0_41] : memref<4x64x64xf32, #tpu.memory_space<vmem>>, vector<4x64x64xf32>
    tpu.vector_store %arg7[%c0_39, %c0_40, %c0_41], %109 {strides = array<i32>} : memref<4x64x64xf32, #tpu.memory_space<vmem>>, vector<4x64x64xf32>,
    return
  }
  func.func @transform_0(%arg0: i32) -> (i32, i32, i32) {
    %c0_i32 = arith.constant 0 : i32
    %c0_i32_0 = arith.constant 0 : i32
    %c0_i32_1 = arith.constant 0 : i32
    return %arg0, %c0_i32, %c0_i32_0 : i32, i32, i32
  }
  func.func @transform_1(%arg0: i32) -> (i32, i32, i32, i32) {
    %c0_i32 = arith.constant 0 : i32
    %c0_i32_0 = arith.constant 0 : i32
    %c0_i32_1 = arith.constant 0 : i32
    %c0_i32_2 = arith.constant 0 : i32
    return %arg0, %c0_i32, %c0_i32_0, %c0_i32_1 : i32, i32, i32, i32
  }
  func.func @transform_2(%arg0: i32) -> (i32, i32, i32) {
    %c0_i32 = arith.constant 0 : i32
    %c0_i32_0 = arith.constant 0 : i32
    %c0_i32_1 = arith.constant 0 : i32
    %c0_i32_2 = arith.constant 0 : i32
    return %c0_i32, %c0_i32_0, %c0_i32_1 : i32, i32, i32
  }
  func.func @transform_3(%arg0: i32) -> (i32, i32) {
    %c0_i32 = arith.constant 0 : i32
    %c0_i32_0 = arith.constant 0 : i32
    %c0_i32_1 = arith.constant 0 : i32
    return %c0_i32, %c0_i32_0 : i32, i32
  }
  func.func @transform_4(%arg0: i32) -> (i32, i32) {
    %c0_i32 = arith.constant 0 : i32
    %c0_i32_0 = arith.constant 0 : i32
    %c0_i32_1 = arith.constant 0 : i32
    return %c0_i32, %c0_i32_0 : i32, i32
  }
  func.func @transform_5(%arg0: i32) -> (i32, i32, i32) {
    %c0_i32 = arith.constant 0 : i32
    %c0_i32_0 = arith.constant 0 : i32
    %c0_i32_1 = arith.constant 0 : i32
    return %arg0, %c0_i32, %c0_i32_0 : i32, i32, i32
  }
  func.func @transform_6(%arg0: i32) -> (i32, i32, i32) {
    %c0_i32 = arith.constant 0 : i32
    %c0_i32_0 = arith.constant 0 : i32
    %c0_i32_1 = arith.constant 0 : i32
    return %arg0, %c0_i32, %c0_i32_0 : i32, i32, i32
  }
}

module attributes {stable_mosaic.version = 11 : i64} {
  func.func @_ln_fc1_kernel(%arg0: i32, %arg1: memref<128x64xf32, #tpu.memory_space<vmem>>, %arg2: memref<1x64xf32, #tpu.memory_space<vmem>>, %arg3: memref<1x64xf32, #tpu.memory_space<vmem>>, %arg4: memref<64x128xbf16, #tpu.memory_space<vmem>>, %arg5: memref<1x128xf32, #tpu.memory_space<vmem>>, %arg6: memref<128x128xbf16, #tpu.memory_space<vmem>>) attributes {dimension_semantics = [#tpu.dimension_semantics<parallel>], iteration_bounds = array<i64: 8>, scalar_prefetch = 0 : i64, scratch_operands = 0 : i64, tpu.core_type = #tpu.core_type<tc>, window_params = [{transform_indices = @transform_0, window_bounds = array<i64: 128, 64>}, {pipeline_mode = #tpu.pipeline_mode<synchronous>, transform_indices = @transform_1, window_bounds = array<i64: 1, 64>}, {pipeline_mode = #tpu.pipeline_mode<synchronous>, transform_indices = @transform_2, window_bounds = array<i64: 1, 64>}, {pipeline_mode = #tpu.pipeline_mode<synchronous>, transform_indices = @transform_3, window_bounds = array<i64: 64, 128>}, {pipeline_mode = #tpu.pipeline_mode<synchronous>, transform_indices = @transform_4, window_bounds = array<i64: 1, 128>}, {transform_indices = @transform_5, window_bounds = array<i64: 128, 128>}]} {
    %c0 = arith.constant 0 : index
    %c0_0 = arith.constant 0 : index
    %0 = vector.load %arg1[%c0, %c0_0] : memref<128x64xf32, #tpu.memory_space<vmem>>, vector<128x64xf32>
    %c0_1 = arith.constant 0 : index
    %c0_2 = arith.constant 0 : index
    %1 = vector.load %arg2[%c0_1, %c0_2] : memref<1x64xf32, #tpu.memory_space<vmem>>, vector<1x64xf32>
    %c0_3 = arith.constant 0 : index
    %c0_4 = arith.constant 0 : index
    %2 = vector.load %arg3[%c0_3, %c0_4] : memref<1x64xf32, #tpu.memory_space<vmem>>, vector<1x64xf32>
    %cst = arith.constant dense<0.000000e+00> : vector<128xf32>
    %3 = vector.multi_reduction <add>, %0, %cst [1] : vector<128x64xf32> to vector<128xf32>
    %4 = vector.shape_cast %3 : vector<128xf32> to vector<128x1xf32>
    %cst_5 = arith.constant 6.400000e+01 : f32
    %5 = vector.broadcast %cst_5 : f32 to vector<128x1xf32>
    %6 = arith.divf %4, %5 : vector<128x1xf32>
    %7 = vector.broadcast %6 : vector<128x1xf32> to vector<128x64xf32>
    %8 = arith.subf %0, %7 : vector<128x64xf32>
    %9 = arith.mulf %8, %8 : vector<128x64xf32>
    %cst_6 = arith.constant dense<0.000000e+00> : vector<128xf32>
    %10 = vector.multi_reduction <add>, %9, %cst_6 [1] : vector<128x64xf32> to vector<128xf32>
    %11 = vector.shape_cast %10 : vector<128xf32> to vector<128x1xf32>
    %cst_7 = arith.constant 6.400000e+01 : f32
    %12 = vector.broadcast %cst_7 : f32 to vector<128x1xf32>
    %13 = arith.divf %11, %12 : vector<128x1xf32>
    %cst_8 = arith.constant 9.99999974E-6 : f32
    %14 = vector.broadcast %cst_8 : f32 to vector<128x1xf32>
    %15 = arith.addf %13, %14 : vector<128x1xf32>
    %16 = math.rsqrt %15 : vector<128x1xf32>
    %17 = vector.broadcast %16 : vector<128x1xf32> to vector<128x64xf32>
    %18 = arith.mulf %8, %17 : vector<128x64xf32>
    %19 = vector.broadcast %1 : vector<1x64xf32> to vector<128x64xf32>
    %20 = arith.mulf %18, %19 : vector<128x64xf32>
    %21 = vector.broadcast %2 : vector<1x64xf32> to vector<128x64xf32>
    %22 = arith.addf %20, %21 : vector<128x64xf32>
    %23 = arith.truncf %22 : vector<128x64xf32> to vector<128x64xbf16>
    %c0_9 = arith.constant 0 : index
    %c0_10 = arith.constant 0 : index
    %24 = vector.load %arg4[%c0_9, %c0_10] : memref<64x128xbf16, #tpu.memory_space<vmem>>, vector<64x128xbf16>
    %cst_11 = arith.constant dense<0.000000e+00> : vector<128x128xf32>
    %25 = tpu.matmul %23, %24, %cst_11 {dimension_numbers = #tpu.dot_dimension_numbers<[1], [0], [0], [1], [0, 0, 1, 1], [], []>} : vector<128x64xbf16>, vector<64x128xbf16>, vector<128x128xf32> -> vector<128x128xf32>
    %c0_12 = arith.constant 0 : index
    %c0_13 = arith.constant 0 : index
    %26 = vector.load %arg5[%c0_12, %c0_13] : memref<1x128xf32, #tpu.memory_space<vmem>>, vector<1x128xf32>
    %27 = vector.broadcast %26 : vector<1x128xf32> to vector<128x128xf32>
    %28 = arith.addf %25, %27 : vector<128x128xf32>
    %cst_14 = arith.constant 5.000000e-01 : f32
    %29 = vector.broadcast %cst_14 : f32 to vector<128x128xf32>
    %30 = arith.mulf %29, %28 : vector<128x128xf32>
    %cst_15 = arith.constant 0.707106769 : f32
    %31 = vector.broadcast %cst_15 : f32 to vector<128x128xf32>
    %32 = arith.mulf %28, %31 : vector<128x128xf32>
    %33 = math.absf %32 : vector<128x128xf32>
    %cst_16 = arith.constant 0.327591091 : f32
    %34 = vector.broadcast %cst_16 : f32 to vector<128x128xf32>
    %35 = arith.mulf %34, %33 : vector<128x128xf32>
    %cst_17 = arith.constant 1.000000e+00 : f32
    %36 = vector.broadcast %cst_17 : f32 to vector<128x128xf32>
    %37 = arith.addf %36, %35 : vector<128x128xf32>
    %38 = tpu.reciprocal %37 {approx = true} : vector<128x128xf32> -> vector<128x128xf32>
    %cst_18 = arith.constant 1.06140542 : f32
    %39 = vector.broadcast %cst_18 : f32 to vector<128x128xf32>
    %40 = arith.mulf %39, %38 : vector<128x128xf32>
    %cst_19 = arith.constant -1.45315206 : f32
    %41 = vector.broadcast %cst_19 : f32 to vector<128x128xf32>
    %42 = arith.addf %40, %41 : vector<128x128xf32>
    %43 = arith.mulf %42, %38 : vector<128x128xf32>
    %cst_20 = arith.constant 1.42141378 : f32
    %44 = vector.broadcast %cst_20 : f32 to vector<128x128xf32>
    %45 = arith.addf %43, %44 : vector<128x128xf32>
    %46 = arith.mulf %45, %38 : vector<128x128xf32>
    %cst_21 = arith.constant -0.284496725 : f32
    %47 = vector.broadcast %cst_21 : f32 to vector<128x128xf32>
    %48 = arith.addf %46, %47 : vector<128x128xf32>
    %49 = arith.mulf %48, %38 : vector<128x128xf32>
    %cst_22 = arith.constant 0.254829586 : f32
    %50 = vector.broadcast %cst_22 : f32 to vector<128x128xf32>
    %51 = arith.addf %49, %50 : vector<128x128xf32>
    %52 = arith.mulf %51, %38 : vector<128x128xf32>
    %cst_23 = arith.constant 0.000000e+00 : f32
    %53 = vector.broadcast %cst_23 : f32 to vector<128x128xf32>
    %54 = arith.subf %53, %33 : vector<128x128xf32>
    %55 = arith.mulf %54, %33 : vector<128x128xf32>
    %56 = math.exp %55 : vector<128x128xf32>
    %57 = arith.mulf %52, %56 : vector<128x128xf32>
    %cst_24 = arith.constant 1.000000e+00 : f32
    %58 = vector.broadcast %cst_24 : f32 to vector<128x128xf32>
    %59 = arith.subf %58, %57 : vector<128x128xf32>
    %cst_25 = arith.constant 0.000000e+00 : f32
    %60 = vector.broadcast %cst_25 : f32 to vector<128x128xf32>
    %61 = arith.cmpf oge, %32, %60 : vector<128x128xf32>
    %cst_26 = arith.constant 0.000000e+00 : f32
    %62 = vector.broadcast %cst_26 : f32 to vector<128x128xf32>
    %63 = arith.subf %62, %59 : vector<128x128xf32>
    %64 = arith.select %61, %59, %63 : vector<128x128xi1>, vector<128x128xf32>
    %cst_27 = arith.constant 1.000000e+00 : f32
    %65 = vector.broadcast %cst_27 : f32 to vector<128x128xf32>
    %66 = arith.addf %65, %64 : vector<128x128xf32>
    %67 = arith.mulf %30, %66 : vector<128x128xf32>
    %68 = arith.truncf %67 : vector<128x128xf32> to vector<128x128xbf16>
    %c0_28 = arith.constant 0 : index
    %c0_29 = arith.constant 0 : index
    %69 = vector.load %arg6[%c0_28, %c0_29] : memref<128x128xbf16, #tpu.memory_space<vmem>>, vector<128x128xbf16>
    tpu.vector_store %arg6[%c0_28, %c0_29], %68 {strides = array<i32>} : memref<128x128xbf16, #tpu.memory_space<vmem>>, vector<128x128xbf16>,
    return
  }
  func.func @transform_0(%arg0: i32) -> (i32, i32) {
    %c0_i32 = arith.constant 0 : i32
    %c0_i32_0 = arith.constant 0 : i32
    return %arg0, %c0_i32 : i32, i32
  }
  func.func @transform_1(%arg0: i32) -> (i32, i32) {
    %c0_i32 = arith.constant 0 : i32
    %c0_i32_0 = arith.constant 0 : i32
    %c0_i32_1 = arith.constant 0 : i32
    return %c0_i32, %c0_i32_0 : i32, i32
  }
  func.func @transform_2(%arg0: i32) -> (i32, i32) {
    %c0_i32 = arith.constant 0 : i32
    %c0_i32_0 = arith.constant 0 : i32
    %c0_i32_1 = arith.constant 0 : i32
    return %c0_i32, %c0_i32_0 : i32, i32
  }
  func.func @transform_3(%arg0: i32) -> (i32, i32) {
    %c0_i32 = arith.constant 0 : i32
    %c0_i32_0 = arith.constant 0 : i32
    %c0_i32_1 = arith.constant 0 : i32
    return %c0_i32, %c0_i32_0 : i32, i32
  }
  func.func @transform_4(%arg0: i32) -> (i32, i32) {
    %c0_i32 = arith.constant 0 : i32
    %c0_i32_0 = arith.constant 0 : i32
    %c0_i32_1 = arith.constant 0 : i32
    return %c0_i32, %c0_i32_0 : i32, i32
  }
  func.func @transform_5(%arg0: i32) -> (i32, i32) {
    %c0_i32 = arith.constant 0 : i32
    %c0_i32_0 = arith.constant 0 : i32
    return %arg0, %c0_i32 : i32, i32
  }
}

module attributes {stable_mosaic.version = 11 : i64} {
  func.func @_convffn_tail_kernel(%arg0: i32, %arg1: memref<1x8x8x8x128xbf16, #tpu.memory_space<vmem>>, %arg2: memref<1x8x64x64xf32, #tpu.memory_space<vmem>>, %arg3: memref<27x128xf32, #tpu.memory_space<vmem>>, %arg4: memref<1x128xf32, #tpu.memory_space<vmem>>, %arg5: memref<128x64xbf16, #tpu.memory_space<vmem>>, %arg6: memref<1x64xf32, #tpu.memory_space<vmem>>, %arg7: memref<1x8x64x64xf32, #tpu.memory_space<vmem>>, %arg8: memref<10x10x8x128xf32, #tpu.memory_space<vmem>>) attributes {dimension_semantics = [#tpu.dimension_semantics<parallel>], iteration_bounds = array<i64: 2>, scalar_prefetch = 0 : i64, scratch_operands = 1 : i64, tpu.core_type = #tpu.core_type<tc>, window_params = [{transform_indices = @transform_0, window_bounds = array<i64: 1, 8, 8, 8, 128>}, {transform_indices = @transform_1, window_bounds = array<i64: 1, 8, 64, 64>}, {pipeline_mode = #tpu.pipeline_mode<synchronous>, transform_indices = @transform_2, window_bounds = array<i64: 27, 128>}, {pipeline_mode = #tpu.pipeline_mode<synchronous>, transform_indices = @transform_3, window_bounds = array<i64: 1, 128>}, {pipeline_mode = #tpu.pipeline_mode<synchronous>, transform_indices = @transform_4, window_bounds = array<i64: 128, 64>}, {pipeline_mode = #tpu.pipeline_mode<synchronous>, transform_indices = @transform_5, window_bounds = array<i64: 1, 64>}, {transform_indices = @transform_6, window_bounds = array<i64: 1, 8, 64, 64>}]} {
    %cst = arith.constant 0.000000e+00 : f32
    %0 = vector.broadcast %cst : f32 to vector<1x10x8x128xf32>
    %c0 = arith.constant 0 : index
    %c0_0 = arith.constant 0 : index
    %c0_1 = arith.constant 0 : index
    %c0_2 = arith.constant 0 : index
    %1 = vector.load %arg8[%c0, %c0_0, %c0_1, %c0_2] : memref<10x10x8x128xf32, #tpu.memory_space<vmem>>, vector<1x10x8x128xf32>
    tpu.vector_store %arg8[%c0, %c0_0, %c0_1, %c0_2], %0 {strides = array<i32>} : memref<10x10x8x128xf32, #tpu.memory_space<vmem>>, vector<1x10x8x128xf32>,
    %c9 = arith.constant 9 : index
    %c0_3 = arith.constant 0 : index
    %c0_4 = arith.constant 0 : index
    %c0_5 = arith.constant 0 : index
    %2 = vector.load %arg8[%c9, %c0_3, %c0_4, %c0_5] : memref<10x10x8x128xf32, #tpu.memory_space<vmem>>, vector<1x10x8x128xf32>
    tpu.vector_store %arg8[%c9, %c0_3, %c0_4, %c0_5], %0 {strides = array<i32>} : memref<10x10x8x128xf32, #tpu.memory_space<vmem>>, vector<1x10x8x128xf32>,
    %cst_6 = arith.constant 0.000000e+00 : f32
    %3 = vector.broadcast %cst_6 : f32 to vector<8x1x8x128xf32>
    %c1 = arith.constant 1 : index
    %c0_7 = arith.constant 0 : index
    %c0_8 = arith.constant 0 : index
    %c0_9 = arith.constant 0 : index
    %4 = vector.load %arg8[%c1, %c0_7, %c0_8, %c0_9] : memref<10x10x8x128xf32, #tpu.memory_space<vmem>>, vector<8x1x8x128xf32>
    tpu.vector_store %arg8[%c1, %c0_7, %c0_8, %c0_9], %3 {strides = array<i32>} : memref<10x10x8x128xf32, #tpu.memory_space<vmem>>, vector<8x1x8x128xf32>,
    %c1_10 = arith.constant 1 : index
    %c9_11 = arith.constant 9 : index
    %c0_12 = arith.constant 0 : index
    %c0_13 = arith.constant 0 : index
    %5 = vector.load %arg8[%c1_10, %c9_11, %c0_12, %c0_13] : memref<10x10x8x128xf32, #tpu.memory_space<vmem>>, vector<8x1x8x128xf32>
    tpu.vector_store %arg8[%c1_10, %c9_11, %c0_12, %c0_13], %3 {strides = array<i32>} : memref<10x10x8x128xf32, #tpu.memory_space<vmem>>, vector<8x1x8x128xf32>,
    %c0_14 = arith.constant 0 : index
    %c0_15 = arith.constant 0 : index
    %c0_16 = arith.constant 0 : index
    %c0_17 = arith.constant 0 : index
    %c0_18 = arith.constant 0 : index
    %6 = vector.load %arg1[%c0_14, %c0_15, %c0_16, %c0_17, %c0_18] : memref<1x8x8x8x128xbf16, #tpu.memory_space<vmem>>, vector<1x8x8x8x128xbf16>
    %7 = vector.shape_cast %6 : vector<1x8x8x8x128xbf16> to vector<8x8x8x128xbf16>
    %8 = arith.extf %7 : vector<8x8x8x128xbf16> to vector<8x8x8x128xf32>
    %c1_19 = arith.constant 1 : index
    %c1_20 = arith.constant 1 : index
    %c0_21 = arith.constant 0 : index
    %c0_22 = arith.constant 0 : index
    %9 = vector.load %arg8[%c1_19, %c1_20, %c0_21, %c0_22] : memref<10x10x8x128xf32, #tpu.memory_space<vmem>>, vector<8x8x8x128xf32>
    tpu.vector_store %arg8[%c1_19, %c1_20, %c0_21, %c0_22], %8 {strides = array<i32>} : memref<10x10x8x128xf32, #tpu.memory_space<vmem>>, vector<8x8x8x128xf32>,
    %c0_23 = arith.constant 0 : index
    %c0_24 = arith.constant 0 : index
    %10 = vector.load %arg3[%c0_23, %c0_24] : memref<27x128xf32, #tpu.memory_space<vmem>>, vector<27x128xf32>
    %c0_25 = arith.constant 0 : index
    %c0_26 = arith.constant 0 : index
    %11 = vector.load %arg4[%c0_25, %c0_26] : memref<1x128xf32, #tpu.memory_space<vmem>>, vector<1x128xf32>
    %c0_27 = arith.constant 0 : index
    %c0_28 = arith.constant 0 : index
    %12 = vector.load %arg5[%c0_27, %c0_28] : memref<128x64xbf16, #tpu.memory_space<vmem>>, vector<128x64xbf16>
    %c0_29 = arith.constant 0 : index
    %c0_30 = arith.constant 0 : index
    %13 = vector.load %arg6[%c0_29, %c0_30] : memref<1x64xf32, #tpu.memory_space<vmem>>, vector<1x64xf32>
    %14 = tpu.iota {dimensions = array<i32: 1>} : vector<8x8x128xi32>
    %c0_i32 = arith.constant 0 : i32
    %15 = vector.broadcast %c0_i32 : i32 to vector<8x8x128xi32>
    %16 = arith.cmpi sgt, %14, %15 : vector<8x8x128xi32>
    %17 = arith.extui %16 : vector<8x8x128xi1> to vector<8x8x128xi32>
    %18 = arith.sitofp %17 : vector<8x8x128xi32> to vector<8x8x128xf32>
    %c7_i32 = arith.constant 7 : i32
    %19 = vector.broadcast %c7_i32 : i32 to vector<8x8x128xi32>
    %20 = arith.cmpi slt, %14, %19 : vector<8x8x128xi32>
    %21 = arith.extui %20 : vector<8x8x128xi1> to vector<8x8x128xi32>
    %22 = arith.sitofp %21 : vector<8x8x128xi32> to vector<8x8x128xf32>
    %c0_i32_31 = arith.constant 0 : i32
    %c8_i32 = arith.constant 8 : i32
    %23 = arith.addi %c0_i32_31, %c8_i32 : i32
    %c1_i32 = arith.constant 1 : i32
    scf.for %arg9 = %c0_i32_31 to %23 step %c1_i32  : i32 {
      %cst_33 = arith.constant 0.000000e+00 : f32
      %24 = vector.broadcast %cst_33 : f32 to vector<8x8x128xf32>
      %cst_34 = arith.constant 0.000000e+00 : f32
      %25 = vector.broadcast %cst_34 : f32 to vector<8x8x128xf32>
      %cst_35 = arith.constant 0.000000e+00 : f32
      %26 = vector.broadcast %cst_35 : f32 to vector<8x8x128xf32>
      %c0_i32_36 = arith.constant 0 : i32
      %27 = arith.addi %arg9, %c0_i32_36 : i32
      %28 = arith.index_cast %27 : i32 to index
      %c0_37 = arith.constant 0 : index
      %c0_38 = arith.constant 0 : index
      %c0_39 = arith.constant 0 : index
      %29 = vector.load %arg8[%28, %c0_37, %c0_38, %c0_39] : memref<10x10x8x128xf32, #tpu.memory_space<vmem>>, vector<1x8x8x128xf32>
      %30 = vector.shape_cast %29 : vector<1x8x8x128xf32> to vector<8x8x128xf32>
      %31 = vector.extract_strided_slice %10 {offsets = [0, 0], sizes = [1, 128], strides = [1, 1]} : vector<27x128xf32> to vector<1x128xf32>
      %32 = vector.shape_cast %31 : vector<1x128xf32> to vector<128xf32>
      %33 = vector.shape_cast %32 : vector<128xf32> to vector<1x1x128xf32>
      %34 = vector.broadcast %33 : vector<1x1x128xf32> to vector<8x8x128xf32>
      %35 = arith.mulf %30, %34 : vector<8x8x128xf32>
      %36 = arith.addf %24, %35 : vector<8x8x128xf32>
      %37 = vector.extract_strided_slice %10 {offsets = [1, 0], sizes = [1, 128], strides = [1, 1]} : vector<27x128xf32> to vector<1x128xf32>
      %38 = vector.shape_cast %37 : vector<1x128xf32> to vector<128xf32>
      %39 = vector.shape_cast %38 : vector<128xf32> to vector<1x1x128xf32>
      %40 = vector.broadcast %39 : vector<1x1x128xf32> to vector<8x8x128xf32>
      %41 = arith.mulf %30, %40 : vector<8x8x128xf32>
      %42 = arith.addf %25, %41 : vector<8x8x128xf32>
      %43 = vector.extract_strided_slice %10 {offsets = [2, 0], sizes = [1, 128], strides = [1, 1]} : vector<27x128xf32> to vector<1x128xf32>
      %44 = vector.shape_cast %43 : vector<1x128xf32> to vector<128xf32>
      %45 = vector.shape_cast %44 : vector<128xf32> to vector<1x1x128xf32>
      %46 = vector.broadcast %45 : vector<1x1x128xf32> to vector<8x8x128xf32>
      %47 = arith.mulf %30, %46 : vector<8x8x128xf32>
      %48 = arith.addf %26, %47 : vector<8x8x128xf32>
      %c0_i32_40 = arith.constant 0 : i32
      %49 = arith.addi %arg9, %c0_i32_40 : i32
      %50 = arith.index_cast %49 : i32 to index
      %c1_41 = arith.constant 1 : index
      %c0_42 = arith.constant 0 : index
      %c0_43 = arith.constant 0 : index
      %51 = vector.load %arg8[%50, %c1_41, %c0_42, %c0_43] : memref<10x10x8x128xf32, #tpu.memory_space<vmem>>, vector<1x8x8x128xf32>
      %52 = vector.shape_cast %51 : vector<1x8x8x128xf32> to vector<8x8x128xf32>
      %53 = vector.extract_strided_slice %10 {offsets = [3, 0], sizes = [1, 128], strides = [1, 1]} : vector<27x128xf32> to vector<1x128xf32>
      %54 = vector.shape_cast %53 : vector<1x128xf32> to vector<128xf32>
      %55 = vector.shape_cast %54 : vector<128xf32> to vector<1x1x128xf32>
      %56 = vector.broadcast %55 : vector<1x1x128xf32> to vector<8x8x128xf32>
      %57 = arith.mulf %52, %56 : vector<8x8x128xf32>
      %58 = arith.addf %36, %57 : vector<8x8x128xf32>
      %59 = vector.extract_strided_slice %10 {offsets = [4, 0], sizes = [1, 128], strides = [1, 1]} : vector<27x128xf32> to vector<1x128xf32>
      %60 = vector.shape_cast %59 : vector<1x128xf32> to vector<128xf32>
      %61 = vector.shape_cast %60 : vector<128xf32> to vector<1x1x128xf32>
      %62 = vector.broadcast %61 : vector<1x1x128xf32> to vector<8x8x128xf32>
      %63 = arith.mulf %52, %62 : vector<8x8x128xf32>
      %64 = arith.addf %42, %63 : vector<8x8x128xf32>
      %65 = vector.extract_strided_slice %10 {offsets = [5, 0], sizes = [1, 128], strides = [1, 1]} : vector<27x128xf32> to vector<1x128xf32>
      %66 = vector.shape_cast %65 : vector<1x128xf32> to vector<128xf32>
      %67 = vector.shape_cast %66 : vector<128xf32> to vector<1x1x128xf32>
      %68 = vector.broadcast %67 : vector<1x1x128xf32> to vector<8x8x128xf32>
      %69 = arith.mulf %52, %68 : vector<8x8x128xf32>
      %70 = arith.addf %48, %69 : vector<8x8x128xf32>
      %c0_i32_44 = arith.constant 0 : i32
      %71 = arith.addi %arg9, %c0_i32_44 : i32
      %72 = arith.index_cast %71 : i32 to index
      %c2 = arith.constant 2 : index
      %c0_45 = arith.constant 0 : index
      %c0_46 = arith.constant 0 : index
      %73 = vector.load %arg8[%72, %c2, %c0_45, %c0_46] : memref<10x10x8x128xf32, #tpu.memory_space<vmem>>, vector<1x8x8x128xf32>
      %74 = vector.shape_cast %73 : vector<1x8x8x128xf32> to vector<8x8x128xf32>
      %75 = vector.extract_strided_slice %10 {offsets = [6, 0], sizes = [1, 128], strides = [1, 1]} : vector<27x128xf32> to vector<1x128xf32>
      %76 = vector.shape_cast %75 : vector<1x128xf32> to vector<128xf32>
      %77 = vector.shape_cast %76 : vector<128xf32> to vector<1x1x128xf32>
      %78 = vector.broadcast %77 : vector<1x1x128xf32> to vector<8x8x128xf32>
      %79 = arith.mulf %74, %78 : vector<8x8x128xf32>
      %80 = arith.addf %58, %79 : vector<8x8x128xf32>
      %81 = vector.extract_strided_slice %10 {offsets = [7, 0], sizes = [1, 128], strides = [1, 1]} : vector<27x128xf32> to vector<1x128xf32>
      %82 = vector.shape_cast %81 : vector<1x128xf32> to vector<128xf32>
      %83 = vector.shape_cast %82 : vector<128xf32> to vector<1x1x128xf32>
      %84 = vector.broadcast %83 : vector<1x1x128xf32> to vector<8x8x128xf32>
      %85 = arith.mulf %74, %84 : vector<8x8x128xf32>
      %86 = arith.addf %64, %85 : vector<8x8x128xf32>
      %87 = vector.extract_strided_slice %10 {offsets = [8, 0], sizes = [1, 128], strides = [1, 1]} : vector<27x128xf32> to vector<1x128xf32>
      %88 = vector.shape_cast %87 : vector<1x128xf32> to vector<128xf32>
      %89 = vector.shape_cast %88 : vector<128xf32> to vector<1x1x128xf32>
      %90 = vector.broadcast %89 : vector<1x1x128xf32> to vector<8x8x128xf32>
      %91 = arith.mulf %74, %90 : vector<8x8x128xf32>
      %92 = arith.addf %70, %91 : vector<8x8x128xf32>
      %c1_i32_47 = arith.constant 1 : i32
      %93 = arith.addi %arg9, %c1_i32_47 : i32
      %94 = arith.index_cast %93 : i32 to index
      %c0_48 = arith.constant 0 : index
      %c0_49 = arith.constant 0 : index
      %c0_50 = arith.constant 0 : index
      %95 = vector.load %arg8[%94, %c0_48, %c0_49, %c0_50] : memref<10x10x8x128xf32, #tpu.memory_space<vmem>>, vector<1x8x8x128xf32>
      %96 = vector.shape_cast %95 : vector<1x8x8x128xf32> to vector<8x8x128xf32>
      %97 = vector.extract_strided_slice %10 {offsets = [9, 0], sizes = [1, 128], strides = [1, 1]} : vector<27x128xf32> to vector<1x128xf32>
      %98 = vector.shape_cast %97 : vector<1x128xf32> to vector<128xf32>
      %99 = vector.shape_cast %98 : vector<128xf32> to vector<1x1x128xf32>
      %100 = vector.broadcast %99 : vector<1x1x128xf32> to vector<8x8x128xf32>
      %101 = arith.mulf %96, %100 : vector<8x8x128xf32>
      %102 = arith.addf %80, %101 : vector<8x8x128xf32>
      %103 = vector.extract_strided_slice %10 {offsets = [10, 0], sizes = [1, 128], strides = [1, 1]} : vector<27x128xf32> to vector<1x128xf32>
      %104 = vector.shape_cast %103 : vector<1x128xf32> to vector<128xf32>
      %105 = vector.shape_cast %104 : vector<128xf32> to vector<1x1x128xf32>
      %106 = vector.broadcast %105 : vector<1x1x128xf32> to vector<8x8x128xf32>
      %107 = arith.mulf %96, %106 : vector<8x8x128xf32>
      %108 = arith.addf %86, %107 : vector<8x8x128xf32>
      %109 = vector.extract_strided_slice %10 {offsets = [11, 0], sizes = [1, 128], strides = [1, 1]} : vector<27x128xf32> to vector<1x128xf32>
      %110 = vector.shape_cast %109 : vector<1x128xf32> to vector<128xf32>
      %111 = vector.shape_cast %110 : vector<128xf32> to vector<1x1x128xf32>
      %112 = vector.broadcast %111 : vector<1x1x128xf32> to vector<8x8x128xf32>
      %113 = arith.mulf %96, %112 : vector<8x8x128xf32>
      %114 = arith.addf %92, %113 : vector<8x8x128xf32>
      %c1_i32_51 = arith.constant 1 : i32
      %115 = arith.addi %arg9, %c1_i32_51 : i32
      %116 = arith.index_cast %115 : i32 to index
      %c1_52 = arith.constant 1 : index
      %c0_53 = arith.constant 0 : index
      %c0_54 = arith.constant 0 : index
      %117 = vector.load %arg8[%116, %c1_52, %c0_53, %c0_54] : memref<10x10x8x128xf32, #tpu.memory_space<vmem>>, vector<1x8x8x128xf32>
      %118 = vector.shape_cast %117 : vector<1x8x8x128xf32> to vector<8x8x128xf32>
      %119 = vector.extract_strided_slice %10 {offsets = [12, 0], sizes = [1, 128], strides = [1, 1]} : vector<27x128xf32> to vector<1x128xf32>
      %120 = vector.shape_cast %119 : vector<1x128xf32> to vector<128xf32>
      %121 = vector.shape_cast %120 : vector<128xf32> to vector<1x1x128xf32>
      %122 = vector.broadcast %121 : vector<1x1x128xf32> to vector<8x8x128xf32>
      %123 = arith.mulf %118, %122 : vector<8x8x128xf32>
      %124 = arith.addf %102, %123 : vector<8x8x128xf32>
      %125 = vector.extract_strided_slice %10 {offsets = [13, 0], sizes = [1, 128], strides = [1, 1]} : vector<27x128xf32> to vector<1x128xf32>
      %126 = vector.shape_cast %125 : vector<1x128xf32> to vector<128xf32>
      %127 = vector.shape_cast %126 : vector<128xf32> to vector<1x1x128xf32>
      %128 = vector.broadcast %127 : vector<1x1x128xf32> to vector<8x8x128xf32>
      %129 = arith.mulf %118, %128 : vector<8x8x128xf32>
      %130 = arith.addf %108, %129 : vector<8x8x128xf32>
      %131 = vector.extract_strided_slice %10 {offsets = [14, 0], sizes = [1, 128], strides = [1, 1]} : vector<27x128xf32> to vector<1x128xf32>
      %132 = vector.shape_cast %131 : vector<1x128xf32> to vector<128xf32>
      %133 = vector.shape_cast %132 : vector<128xf32> to vector<1x1x128xf32>
      %134 = vector.broadcast %133 : vector<1x1x128xf32> to vector<8x8x128xf32>
      %135 = arith.mulf %118, %134 : vector<8x8x128xf32>
      %136 = arith.addf %114, %135 : vector<8x8x128xf32>
      %c1_i32_55 = arith.constant 1 : i32
      %137 = arith.addi %arg9, %c1_i32_55 : i32
      %138 = arith.index_cast %137 : i32 to index
      %c2_56 = arith.constant 2 : index
      %c0_57 = arith.constant 0 : index
      %c0_58 = arith.constant 0 : index
      %139 = vector.load %arg8[%138, %c2_56, %c0_57, %c0_58] : memref<10x10x8x128xf32, #tpu.memory_space<vmem>>, vector<1x8x8x128xf32>
      %140 = vector.shape_cast %139 : vector<1x8x8x128xf32> to vector<8x8x128xf32>
      %141 = vector.extract_strided_slice %10 {offsets = [15, 0], sizes = [1, 128], strides = [1, 1]} : vector<27x128xf32> to vector<1x128xf32>
      %142 = vector.shape_cast %141 : vector<1x128xf32> to vector<128xf32>
      %143 = vector.shape_cast %142 : vector<128xf32> to vector<1x1x128xf32>
      %144 = vector.broadcast %143 : vector<1x1x128xf32> to vector<8x8x128xf32>
      %145 = arith.mulf %140, %144 : vector<8x8x128xf32>
      %146 = arith.addf %124, %145 : vector<8x8x128xf32>
      %147 = vector.extract_strided_slice %10 {offsets = [16, 0], sizes = [1, 128], strides = [1, 1]} : vector<27x128xf32> to vector<1x128xf32>
      %148 = vector.shape_cast %147 : vector<1x128xf32> to vector<128xf32>
      %149 = vector.shape_cast %148 : vector<128xf32> to vector<1x1x128xf32>
      %150 = vector.broadcast %149 : vector<1x1x128xf32> to vector<8x8x128xf32>
      %151 = arith.mulf %140, %150 : vector<8x8x128xf32>
      %152 = arith.addf %130, %151 : vector<8x8x128xf32>
      %153 = vector.extract_strided_slice %10 {offsets = [17, 0], sizes = [1, 128], strides = [1, 1]} : vector<27x128xf32> to vector<1x128xf32>
      %154 = vector.shape_cast %153 : vector<1x128xf32> to vector<128xf32>
      %155 = vector.shape_cast %154 : vector<128xf32> to vector<1x1x128xf32>
      %156 = vector.broadcast %155 : vector<1x1x128xf32> to vector<8x8x128xf32>
      %157 = arith.mulf %140, %156 : vector<8x8x128xf32>
      %158 = arith.addf %136, %157 : vector<8x8x128xf32>
      %c2_i32 = arith.constant 2 : i32
      %159 = arith.addi %arg9, %c2_i32 : i32
      %160 = arith.index_cast %159 : i32 to index
      %c0_59 = arith.constant 0 : index
      %c0_60 = arith.constant 0 : index
      %c0_61 = arith.constant 0 : index
      %161 = vector.load %arg8[%160, %c0_59, %c0_60, %c0_61] : memref<10x10x8x128xf32, #tpu.memory_space<vmem>>, vector<1x8x8x128xf32>
      %162 = vector.shape_cast %161 : vector<1x8x8x128xf32> to vector<8x8x128xf32>
      %163 = vector.extract_strided_slice %10 {offsets = [18, 0], sizes = [1, 128], strides = [1, 1]} : vector<27x128xf32> to vector<1x128xf32>
      %164 = vector.shape_cast %163 : vector<1x128xf32> to vector<128xf32>
      %165 = vector.shape_cast %164 : vector<128xf32> to vector<1x1x128xf32>
      %166 = vector.broadcast %165 : vector<1x1x128xf32> to vector<8x8x128xf32>
      %167 = arith.mulf %162, %166 : vector<8x8x128xf32>
      %168 = arith.addf %146, %167 : vector<8x8x128xf32>
      %169 = vector.extract_strided_slice %10 {offsets = [19, 0], sizes = [1, 128], strides = [1, 1]} : vector<27x128xf32> to vector<1x128xf32>
      %170 = vector.shape_cast %169 : vector<1x128xf32> to vector<128xf32>
      %171 = vector.shape_cast %170 : vector<128xf32> to vector<1x1x128xf32>
      %172 = vector.broadcast %171 : vector<1x1x128xf32> to vector<8x8x128xf32>
      %173 = arith.mulf %162, %172 : vector<8x8x128xf32>
      %174 = arith.addf %152, %173 : vector<8x8x128xf32>
      %175 = vector.extract_strided_slice %10 {offsets = [20, 0], sizes = [1, 128], strides = [1, 1]} : vector<27x128xf32> to vector<1x128xf32>
      %176 = vector.shape_cast %175 : vector<1x128xf32> to vector<128xf32>
      %177 = vector.shape_cast %176 : vector<128xf32> to vector<1x1x128xf32>
      %178 = vector.broadcast %177 : vector<1x1x128xf32> to vector<8x8x128xf32>
      %179 = arith.mulf %162, %178 : vector<8x8x128xf32>
      %180 = arith.addf %158, %179 : vector<8x8x128xf32>
      %c2_i32_62 = arith.constant 2 : i32
      %181 = arith.addi %arg9, %c2_i32_62 : i32
      %182 = arith.index_cast %181 : i32 to index
      %c1_63 = arith.constant 1 : index
      %c0_64 = arith.constant 0 : index
      %c0_65 = arith.constant 0 : index
      %183 = vector.load %arg8[%182, %c1_63, %c0_64, %c0_65] : memref<10x10x8x128xf32, #tpu.memory_space<vmem>>, vector<1x8x8x128xf32>
      %184 = vector.shape_cast %183 : vector<1x8x8x128xf32> to vector<8x8x128xf32>
      %185 = vector.extract_strided_slice %10 {offsets = [21, 0], sizes = [1, 128], strides = [1, 1]} : vector<27x128xf32> to vector<1x128xf32>
      %186 = vector.shape_cast %185 : vector<1x128xf32> to vector<128xf32>
      %187 = vector.shape_cast %186 : vector<128xf32> to vector<1x1x128xf32>
      %188 = vector.broadcast %187 : vector<1x1x128xf32> to vector<8x8x128xf32>
      %189 = arith.mulf %184, %188 : vector<8x8x128xf32>
      %190 = arith.addf %168, %189 : vector<8x8x128xf32>
      %191 = vector.extract_strided_slice %10 {offsets = [22, 0], sizes = [1, 128], strides = [1, 1]} : vector<27x128xf32> to vector<1x128xf32>
      %192 = vector.shape_cast %191 : vector<1x128xf32> to vector<128xf32>
      %193 = vector.shape_cast %192 : vector<128xf32> to vector<1x1x128xf32>
      %194 = vector.broadcast %193 : vector<1x1x128xf32> to vector<8x8x128xf32>
      %195 = arith.mulf %184, %194 : vector<8x8x128xf32>
      %196 = arith.addf %174, %195 : vector<8x8x128xf32>
      %197 = vector.extract_strided_slice %10 {offsets = [23, 0], sizes = [1, 128], strides = [1, 1]} : vector<27x128xf32> to vector<1x128xf32>
      %198 = vector.shape_cast %197 : vector<1x128xf32> to vector<128xf32>
      %199 = vector.shape_cast %198 : vector<128xf32> to vector<1x1x128xf32>
      %200 = vector.broadcast %199 : vector<1x1x128xf32> to vector<8x8x128xf32>
      %201 = arith.mulf %184, %200 : vector<8x8x128xf32>
      %202 = arith.addf %180, %201 : vector<8x8x128xf32>
      %c2_i32_66 = arith.constant 2 : i32
      %203 = arith.addi %arg9, %c2_i32_66 : i32
      %204 = arith.index_cast %203 : i32 to index
      %c2_67 = arith.constant 2 : index
      %c0_68 = arith.constant 0 : index
      %c0_69 = arith.constant 0 : index
      %205 = vector.load %arg8[%204, %c2_67, %c0_68, %c0_69] : memref<10x10x8x128xf32, #tpu.memory_space<vmem>>, vector<1x8x8x128xf32>
      %206 = vector.shape_cast %205 : vector<1x8x8x128xf32> to vector<8x8x128xf32>
      %207 = vector.extract_strided_slice %10 {offsets = [24, 0], sizes = [1, 128], strides = [1, 1]} : vector<27x128xf32> to vector<1x128xf32>
      %208 = vector.shape_cast %207 : vector<1x128xf32> to vector<128xf32>
      %209 = vector.shape_cast %208 : vector<128xf32> to vector<1x1x128xf32>
      %210 = vector.broadcast %209 : vector<1x1x128xf32> to vector<8x8x128xf32>
      %211 = arith.mulf %206, %210 : vector<8x8x128xf32>
      %212 = arith.addf %190, %211 : vector<8x8x128xf32>
      %213 = vector.extract_strided_slice %10 {offsets = [25, 0], sizes = [1, 128], strides = [1, 1]} : vector<27x128xf32> to vector<1x128xf32>
      %214 = vector.shape_cast %213 : vector<1x128xf32> to vector<128xf32>
      %215 = vector.shape_cast %214 : vector<128xf32> to vector<1x1x128xf32>
      %216 = vector.broadcast %215 : vector<1x1x128xf32> to vector<8x8x128xf32>
      %217 = arith.mulf %206, %216 : vector<8x8x128xf32>
      %218 = arith.addf %196, %217 : vector<8x8x128xf32>
      %219 = vector.extract_strided_slice %10 {offsets = [26, 0], sizes = [1, 128], strides = [1, 1]} : vector<27x128xf32> to vector<1x128xf32>
      %220 = vector.shape_cast %219 : vector<1x128xf32> to vector<128xf32>
      %221 = vector.shape_cast %220 : vector<128xf32> to vector<1x1x128xf32>
      %222 = vector.broadcast %221 : vector<1x1x128xf32> to vector<8x8x128xf32>
      %223 = arith.mulf %206, %222 : vector<8x8x128xf32>
      %224 = arith.addf %202, %223 : vector<8x8x128xf32>
      %c1_i32_70 = arith.constant 1 : i32
      %225 = tpu.dynamic_rotate %212 by %c1_i32_70 dim 1 : vector<8x8x128xf32>, i32 -> vector<8x8x128xf32>
      %226 = arith.mulf %225, %18 : vector<8x8x128xf32>
      %227 = arith.addf %218, %226 : vector<8x8x128xf32>
      %c7_i32_71 = arith.constant 7 : i32
      %228 = tpu.dynamic_rotate %224 by %c7_i32_71 dim 1 : vector<8x8x128xf32>, i32 -> vector<8x8x128xf32>
      %229 = arith.mulf %228, %22 : vector<8x8x128xf32>
      %230 = arith.addf %227, %229 : vector<8x8x128xf32>
      %c1_i32_72 = arith.constant 1 : i32
      %231 = arith.addi %arg9, %c1_i32_72 : i32
      %232 = arith.index_cast %231 : i32 to index
      %c1_73 = arith.constant 1 : index
      %c0_74 = arith.constant 0 : index
      %c0_75 = arith.constant 0 : index
      %233 = vector.load %arg8[%232, %c1_73, %c0_74, %c0_75] : memref<10x10x8x128xf32, #tpu.memory_space<vmem>>, vector<1x8x8x128xf32>
      %234 = vector.shape_cast %233 : vector<1x8x8x128xf32> to vector<8x8x128xf32>
      %235 = vector.shape_cast %11 : vector<1x128xf32> to vector<1x1x128xf32>
      %236 = vector.broadcast %235 : vector<1x1x128xf32> to vector<8x8x128xf32>
      %237 = arith.addf %230, %236 : vector<8x8x128xf32>
      %cst_76 = arith.constant 5.000000e-01 : f32
      %238 = vector.broadcast %cst_76 : f32 to vector<8x8x128xf32>
      %239 = arith.mulf %238, %237 : vector<8x8x128xf32>
      %cst_77 = arith.constant 0.707106769 : f32
      %240 = vector.broadcast %cst_77 : f32 to vector<8x8x128xf32>
      %241 = arith.mulf %237, %240 : vector<8x8x128xf32>
      %242 = math.absf %241 : vector<8x8x128xf32>
      %cst_78 = arith.constant 0.327591091 : f32
      %243 = vector.broadcast %cst_78 : f32 to vector<8x8x128xf32>
      %244 = arith.mulf %243, %242 : vector<8x8x128xf32>
      %cst_79 = arith.constant 1.000000e+00 : f32
      %245 = vector.broadcast %cst_79 : f32 to vector<8x8x128xf32>
      %246 = arith.addf %245, %244 : vector<8x8x128xf32>
      %247 = tpu.reciprocal %246 {approx = true} : vector<8x8x128xf32> -> vector<8x8x128xf32>
      %cst_80 = arith.constant 1.06140542 : f32
      %248 = vector.broadcast %cst_80 : f32 to vector<8x8x128xf32>
      %249 = arith.mulf %248, %247 : vector<8x8x128xf32>
      %cst_81 = arith.constant -1.45315206 : f32
      %250 = vector.broadcast %cst_81 : f32 to vector<8x8x128xf32>
      %251 = arith.addf %249, %250 : vector<8x8x128xf32>
      %252 = arith.mulf %251, %247 : vector<8x8x128xf32>
      %cst_82 = arith.constant 1.42141378 : f32
      %253 = vector.broadcast %cst_82 : f32 to vector<8x8x128xf32>
      %254 = arith.addf %252, %253 : vector<8x8x128xf32>
      %255 = arith.mulf %254, %247 : vector<8x8x128xf32>
      %cst_83 = arith.constant -0.284496725 : f32
      %256 = vector.broadcast %cst_83 : f32 to vector<8x8x128xf32>
      %257 = arith.addf %255, %256 : vector<8x8x128xf32>
      %258 = arith.mulf %257, %247 : vector<8x8x128xf32>
      %cst_84 = arith.constant 0.254829586 : f32
      %259 = vector.broadcast %cst_84 : f32 to vector<8x8x128xf32>
      %260 = arith.addf %258, %259 : vector<8x8x128xf32>
      %261 = arith.mulf %260, %247 : vector<8x8x128xf32>
      %cst_85 = arith.constant 0.000000e+00 : f32
      %262 = vector.broadcast %cst_85 : f32 to vector<8x8x128xf32>
      %263 = arith.subf %262, %242 : vector<8x8x128xf32>
      %264 = arith.mulf %263, %242 : vector<8x8x128xf32>
      %265 = math.exp %264 : vector<8x8x128xf32>
      %266 = arith.mulf %261, %265 : vector<8x8x128xf32>
      %cst_86 = arith.constant 1.000000e+00 : f32
      %267 = vector.broadcast %cst_86 : f32 to vector<8x8x128xf32>
      %268 = arith.subf %267, %266 : vector<8x8x128xf32>
      %cst_87 = arith.constant 0.000000e+00 : f32
      %269 = vector.broadcast %cst_87 : f32 to vector<8x8x128xf32>
      %270 = arith.cmpf oge, %241, %269 : vector<8x8x128xf32>
      %cst_88 = arith.constant 0.000000e+00 : f32
      %271 = vector.broadcast %cst_88 : f32 to vector<8x8x128xf32>
      %272 = arith.subf %271, %268 : vector<8x8x128xf32>
      %273 = arith.select %270, %268, %272 : vector<8x8x128xi1>, vector<8x8x128xf32>
      %cst_89 = arith.constant 1.000000e+00 : f32
      %274 = vector.broadcast %cst_89 : f32 to vector<8x8x128xf32>
      %275 = arith.addf %274, %273 : vector<8x8x128xf32>
      %276 = arith.mulf %239, %275 : vector<8x8x128xf32>
      %277 = arith.addf %234, %276 : vector<8x8x128xf32>
      %278 = vector.shape_cast %277 : vector<8x8x128xf32> to vector<64x128xf32>
      %279 = arith.truncf %278 : vector<64x128xf32> to vector<64x128xbf16>
      %cst_90 = arith.constant dense<0.000000e+00> : vector<64x64xf32>
      %280 = tpu.matmul %279, %12, %cst_90 {dimension_numbers = #tpu.dot_dimension_numbers<[1], [0], [0], [1], [0, 0, 1, 1], [], []>} : vector<64x128xbf16>, vector<128x64xbf16>, vector<64x64xf32> -> vector<64x64xf32>
      %281 = vector.broadcast %13 : vector<1x64xf32> to vector<64x64xf32>
      %282 = arith.addf %280, %281 : vector<64x64xf32>
      %c0_91 = arith.constant 0 : index
      %283 = arith.index_cast %arg9 : i32 to index
      %c0_92 = arith.constant 0 : index
      %c0_93 = arith.constant 0 : index
      %284 = vector.load %arg2[%c0_91, %283, %c0_92, %c0_93] : memref<1x8x64x64xf32, #tpu.memory_space<vmem>>, vector<1x1x64x64xf32>
      %285 = vector.shape_cast %284 : vector<1x1x64x64xf32> to vector<64x64xf32>
      %286 = arith.addf %282, %285 : vector<64x64xf32>
      %c0_94 = arith.constant 0 : index
      %287 = arith.index_cast %arg9 : i32 to index
      %c0_95 = arith.constant 0 : index
      %c0_96 = arith.constant 0 : index
      %288 = vector.load %arg7[%c0_94, %287, %c0_95, %c0_96] : memref<1x8x64x64xf32, #tpu.memory_space<vmem>>, vector<1x1x64x64xf32>
      %289 = vector.shape_cast %288 : vector<1x1x64x64xf32> to vector<64x64xf32>
      %290 = vector.shape_cast %286 : vector<64x64xf32> to vector<1x1x64x64xf32>
      tpu.vector_store %arg7[%c0_94, %287, %c0_95, %c0_96], %290 {strides = array<i32>} : memref<1x8x64x64xf32, #tpu.memory_space<vmem>>, vector<1x1x64x64xf32>,
    }
    %c8_i32_32 = arith.constant 8 : i32
    return
  }
  func.func @transform_0(%arg0: i32) -> (i32, i32, i32, i32, i32) {
    %c0_i32 = arith.constant 0 : i32
    %c0_i32_0 = arith.constant 0 : i32
    %c0_i32_1 = arith.constant 0 : i32
    %c0_i32_2 = arith.constant 0 : i32
    %c0_i32_3 = arith.constant 0 : i32
    return %arg0, %c0_i32, %c0_i32_0, %c0_i32_1, %c0_i32_2 : i32, i32, i32, i32, i32
  }
  func.func @transform_1(%arg0: i32) -> (i32, i32, i32, i32) {
    %c0_i32 = arith.constant 0 : i32
    %c0_i32_0 = arith.constant 0 : i32
    %c0_i32_1 = arith.constant 0 : i32
    %c0_i32_2 = arith.constant 0 : i32
    return %arg0, %c0_i32, %c0_i32_0, %c0_i32_1 : i32, i32, i32, i32
  }
  func.func @transform_2(%arg0: i32) -> (i32, i32) {
    %c0_i32 = arith.constant 0 : i32
    %c0_i32_0 = arith.constant 0 : i32
    %c0_i32_1 = arith.constant 0 : i32
    return %c0_i32, %c0_i32_0 : i32, i32
  }
  func.func @transform_3(%arg0: i32) -> (i32, i32) {
    %c0_i32 = arith.constant 0 : i32
    %c0_i32_0 = arith.constant 0 : i32
    %c0_i32_1 = arith.constant 0 : i32
    return %c0_i32, %c0_i32_0 : i32, i32
  }
  func.func @transform_4(%arg0: i32) -> (i32, i32) {
    %c0_i32 = arith.constant 0 : i32
    %c0_i32_0 = arith.constant 0 : i32
    %c0_i32_1 = arith.constant 0 : i32
    return %c0_i32, %c0_i32_0 : i32, i32
  }
  func.func @transform_5(%arg0: i32) -> (i32, i32) {
    %c0_i32 = arith.constant 0 : i32
    %c0_i32_0 = arith.constant 0 : i32
    %c0_i32_1 = arith.constant 0 : i32
    return %c0_i32, %c0_i32_0 : i32, i32
  }
  func.func @transform_6(%arg0: i32) -> (i32, i32, i32, i32) {
    %c0_i32 = arith.constant 0 : i32
    %c0_i32_0 = arith.constant 0 : i32
    %c0_i32_1 = arith.constant 0 : i32
    %c0_i32_2 = arith.constant 0 : i32
    return %arg0, %c0_i32, %c0_i32_0, %c0_i32_1 : i32, i32, i32, i32
  }
}

</mosaic_0001>

<bundles_post_ra>
// kernel: _lambda_.4
= control target key start
LH: loop header
LB: loop body
LE: loop exit
PB: predicated region body
PF: predicated region fallthrough
CT: control target
= control target key end

     0   :  { %12 = vsyncpa [#allocation3], 0  ;;  %s1721_s0 = inlined_call_operand.vmem [shape: f32[1024,64], index: 0, kind: input, shape index: {}]   ;;  %s1722_s1 = inlined_call_operand.hbm [shape: f32[1,64], index: 1, kind: input, shape index: {}]   ;;  %s1723_s2 = inlined_call_operand.hbm [shape: f32[1,64], index: 2, kind: input, shape index: {}]   ;;  %s1724_s3 = inlined_call_operand.vmem [shape: bf16[64,80], index: 3, kind: input, shape index: {}]   ;;  %s1725_s4 = inlined_call_operand.vmem [shape: f32[1,80], index: 4, kind: input, shape index: {}]   ;;  %s1726_s5 = inlined_call_operand.vmem [shape: bf16[1024,64], index: 5, kind: output, shape index: {0}]   ;;  %s1727_s6 = inlined_call_operand.vmem [shape: bf16[1024,16], index: 6, kind: output, shape index: {1}]  }
   0x1   :  { %13 = vsyncpa [#allocation5], 0  ;;  %s1278_s21 = smov 0  }
   0x2 LB: > { %s994_s22 = sadd.s32 4294967295, %s1238_s21   ;;  %p996_p0 = scmp.ge.s32.totalorder %s1238_s21, 1  ;;  %s1238_s21 = sphi %s1278_s21, %s19_s21  }
   0x3   : > { %p186_p1 = scmp.lt.s32.totalorder %s1238_s21, 9  ;;  %p1288_p2 = scmp.eq.s32.totalorder %s994_s22, 0 }
   0x4   : > { %s1240_s25 = smov [#allocation2]   ;;  %s1241_s27 = smov [#allocation4]  }
   0x5   : > { %s1731_s23 = scalar_select %p1288_p2, 1, 0 }
   0x6   : > { %p1292_p3 = pnand %p996_p0, %p186_p1  ;;  %s199_s26 = sshll.u32 %s1240_s25, 4  ;;  %s200_s26 = int_to_ptr.vmem [resolvable:$true] %s199_s26 }
   0x7   : > { %s210_s28 = sshll.u32 %s1241_s27, 4  ;;  %s1168_s8 = scalar_lea.hbm %s1722_s1, 16  ;;  %s1304_s28 = int_to_ptr.vmem [resolvable:$true] %s210_s28 }
   0x8   : > { %s1732_s24 = scalar_select %p1292_p3, 1, 0 }
   0x9   : > { %p1110_p4 = pneg %p1292_p3  ;;  %p1169_p6 = scmp.ne.s32.totalorder %s1722_s1, %s1168_s8 }
   0xa   : > { %p1175_p10 = scmp.lt.u32.totalorder %s1168_s8, %s1722_s1 }
   0xb   : > { %p1300_p5 = pnand %p1288_p2, %p1110_p4 }
   0xd   : > { %p1170_p7 = pneg %p1300_p5 }
   0xf   : > { %p1171_p8 = pnand %p1170_p7, %p1169_p6 }
  0x11   : > { %p1172_p9 = pneg %p1171_p8 }
  0x13   : > { %p1177_p11 = pnand %p1175_p10, %p1172_p9 }
  0x15   : > { %1180 = shalt.err (!%p1177_p11)
}
  0x16   : > { %s1181_s13 = scalar_lea.vmem %s200_s26, 16  ;;  %s1188_s14 = scalar_lea.vmem %s200_s26, 32 }
  0x17   : > { %p1182_p12 = scmp.ne.s32.totalorder %s200_s26, %s1181_s13  ;;  %p1189_p1 = scmp.lt.s32.totalorder %s200_s26, %s200_s26 }
  0x18   : > { %p1190_p4 = scmp.lt.s32.totalorder %s1188_s14, %s1181_s13 }
  0x19   : > { %p1184_p13 = pnand %p1182_p12, %p1170_p7 }
  0x1a   : > { %p1191_p2 = por %p1190_p4, %p1189_p1 }
  0x1b   : > { %p1185_p0 = pneg %p1184_p13 }
  0x1d   : > { %p1192_p3 = pnand %p1191_p2, %p1185_p0 }
  0x1f   : > { %1195 = shalt.err (!%p1192_p3)
}
  0x20   : > { %1113 = dma.hbm_to_vmem [thread:$0]  (!%p1300_p5), %s1722_s1, 16, %s200_s26, [#allocation3]  }
  0x21   : > { %s1196_s19 = scalar_lea.hbm %s1723_s2, 16 }
  0x22   : > { %p1197_p6 = scmp.ne.s32.totalorder %s1723_s2, %s1196_s19  ;;  %p1203_p3 = scmp.lt.u32.totalorder %s1196_s19, %s1723_s2 }
  0x24   : > { %p1199_p8 = pnand %p1197_p6, %p1170_p7 }
  0x26   : > { %p1200_p2 = pneg %p1199_p8 }
  0x28   : > { %p1205_p9 = pnand %p1203_p3, %p1200_p2 }
  0x2a   : > { %1208 = shalt.err (!%p1205_p9)
}
  0x2b   : > { %s1209_s26 = scalar_lea.vmem %s1304_s28, 16  ;;  %s1216_s7 = scalar_lea.vmem %s1304_s28, 32 }
  0x2c   : > { %p1210_p10 = scmp.ne.s32.totalorder %s1304_s28, %s1209_s26  ;;  %p1217_p13 = scmp.lt.s32.totalorder %s1304_s28, %s1304_s28 }
  0x2d   : > { %p1218_p0 = scmp.lt.s32.totalorder %s1216_s7, %s1209_s26 }
  0x2e   : > { %p1212_p11 = pnand %p1210_p10, %p1170_p7 }
  0x2f   : > { %p1219_p1 = por %p1218_p0, %p1217_p13 }
  0x30   : > { %p1213_p12 = pneg %p1212_p11 }
  0x32   : > { %p1220_p4 = pnand %p1219_p1, %p1213_p12 }
  0x34   : > { %1223 = shalt.err (!%p1220_p4)
}
  0x35   : > { %1116 = dma.hbm_to_vmem [thread:$0]  (!%p1300_p5), %s1723_s2, 16, %s1304_s28, [#allocation5]  }
  0x36   : > { %p1734_p6 = scmp.ne.s32.totalorder %s1732_s24, 0 }
  0x37   : > { %p1735_p7 = scmp.ne.s32.totalorder (!%p1734_p6), %s1731_s23, 0 }
  0x38   : > { %238 = sbr.rel (%p1734_p6) target bundleno = 764 (0x2fc), region = 40 }
  0x3f   : > { %1229 = dma.done.wait (%p1735_p7), [#allocation3], 16  }
  0x40   : > { %1231 = vsyncadd (%p1735_p7), [#allocation3], 4294967280 }
  0x41   : > { %1233 = dma.done.wait (%p1735_p7), [#allocation5], 16  }
  0x42   : > { %1235 = vsyncadd (%p1735_p7), [#allocation5], 4294967280  ;;  %s1003_s29 = sshll.u32 %s994_s22, 4  ;;  %vm314_vm0 = vcmask 523264   ;;  %vm800_vm1 = vcmask 519168   ;;  %s1242_s26 = smov 64  }
  0x43   : > { %p278_p8 = scmp.lt.s32.totalorder %s1003_s29, 127  ;;  %vm865_vm2 = vcmask 125952  }
  0x45   : > { %s1737_s29 = smov (!%p278_p8, %s1003_s29), 127 }
  0x46   : > { %s1004_s24 = sshll.u32 %s1737_s29, 3  ;;  %s1006_s20 = sshll.u32 %s1737_s29, 2 }
  0x47   : > { %s1372_s11 = scalar_lea.vmem %s1721_s0, %s1004_s24  ;;  %s1614_s30 = scalar_lea.vmem %s1726_s5, %s1006_s20 }
  0x48   : > { %v296_v0 = vld [vmem:[%s1372_s11] sm:$0xff]  ;;  %v297_v2 = vld [vmem:[%s1372_s11 + $0x8] sm:$0xff]  ;;  %v1381_v6 = vld [vmem:[%s1372_s11 + $0x10] sm:$0xff]  ;;  %s1684_s9 = scalar_lea.vmem %s1727_s6, %s1006_s20 }
  0x49   : > { %v304_v1 = vld [vmem:[%s1372_s11 + $0x40] sm:$0xff]  ;;  %v315_v3 = vsel %vm314_vm0, %v296_v0, 0.0  ;;  %v305_v5 = vld [vmem:[%s1372_s11 + $0x48] sm:$0xff]  ;;  %v318_v7 = vsel %vm314_vm0, %v297_v2, 0.0  ;;  %v299_v9 = vld [vmem:[%s1372_s11 + $0x18] sm:$0xff]  ;;  %v321_v10 = vsel %vm314_vm0, %v1381_v6, 0.0 }
  0x4a   : > { %v339_v4 = vsel %vm314_vm0, %v304_v1, 0.0  ;;  %316 = vadd.xlane.f32.xlu0 %v315_v3  ;;  %v342_v8 = vsel %vm314_vm0, %v305_v5, 0.0  ;;  %v324_v11 = vsel %vm314_vm0, %v299_v9, 0.0  ;;  %v1390_v12 = vld [vmem:[%s1372_s11 + $0x50] sm:$0xff]  ;;  %v1393_v13 = vld [vmem:[%s1372_s11 + $0x58] sm:$0xff]  ;;  %v1400_v16 = vld [vmem:[%s1372_s11 + $0x20] sm:$0xff] }
  0x4b   : > { %340 = vadd.xlane.f32.xlu1 %v339_v4  ;;  %v345_v14 = vsel %vm314_vm0, %v1390_v12, 0.0  ;;  %v348_v15 = vsel %vm314_vm0, %v1393_v13, 0.0  ;;  %v1403_v17 = vld [vmem:[%s1372_s11 + $0x28] sm:$0xff]  ;;  %v327_v18 = vsel %vm314_vm0, %v1400_v16, 0.0  ;;  %v1410_v20 = vld [vmem:[%s1372_s11 + $0x60] sm:$0xff]  ;;  %v1420_v24 = vld [vmem:[%s1372_s11 + $0x30] sm:$0xff] }
  0x4c   : > { %v330_v19 = vsel %vm314_vm0, %v1403_v17, 0.0  ;;  %v1413_v21 = vld [vmem:[%s1372_s11 + $0x68] sm:$0xff]  ;;  %v351_v22 = vsel %vm314_vm0, %v1410_v20, 0.0  ;;  %v1423_v25 = vld [vmem:[%s1372_s11 + $0x38] sm:$0xff]  ;;  %v333_v26 = vsel %vm314_vm0, %v1420_v24, 0.0  ;;  %v1430_v28 = vld [vmem:[%s1372_s11 + $0x70] sm:$0xff] }
  0x4d   : > { %v354_v23 = vsel %vm314_vm0, %v1413_v21, 0.0  ;;  %v336_v27 = vsel %vm314_vm0, %v1423_v25, 0.0  ;;  %v1433_v29 = vld [vmem:[%s1372_s11 + $0x78] sm:$0xff]  ;;  %v357_v30 = vsel %vm314_vm0, %v1430_v28, 0.0 }
  0x4e   : > { %319 = vadd.xlane.f32.xlu0 %v318_v7  ;;  %v360_v31 = vsel %vm314_vm0, %v1433_v29, 0.0 }
  0x4f   : > { %343 = vadd.xlane.f32.xlu1 %v342_v8 }
  0x52   : > { %322 = vadd.xlane.f32.xlu0 %v321_v10 }
  0x53   : > { %325 = vadd.xlane.f32.xlu1 %v324_v11 }
  0x56   : > { %346 = vadd.xlane.f32.xlu0 %v345_v14 }
  0x57   : > { %349 = vadd.xlane.f32.xlu1 %v348_v15 }
  0x5a   : > { %328 = vadd.xlane.f32.xlu0 %v327_v18 }
  0x5b   : > { %331 = vadd.xlane.f32.xlu1 %v330_v19 }
  0x5e   : > { %352 = vadd.xlane.f32.xlu0 %v351_v22 }
  0x5f   : > { %355 = vadd.xlane.f32.xlu1 %v354_v23 }
  0x62   : > { %334 = vadd.xlane.f32.xlu0 %v333_v26 }
  0x63   : > { %337 = vadd.xlane.f32.xlu1 %v336_v27 }
  0x66   : > { %358 = vadd.xlane.f32.xlu0 %v357_v30 }
  0x67   : > { %361 = vadd.xlane.f32.xlu1 %v360_v31 }
  0xd7   : > { %v317_v32 = vpop.xlane.xlu0 %316 }
  0xd8   : > { %v341_v33 = vpop.xlane.xlu1 %340  ;;  %v364_v34 = vmul.f32 0.015625, %v317_v32 }
  0xd9   : > { %v372_v35 = vmul.f32 0.015625, %v341_v33 }
  0xda   : > { %v1439_v36 = vsub.f32 %v296_v0, %v364_v34 }
  0xdb   : > { %v1441_v37 = vsub.f32 %v304_v1, %v372_v35  ;;  %v320_v38 = vpop.xlane.xlu0 %319 }
  0xdc   : > { %v344_v39 = vpop.xlane.xlu1 %343  ;;  %v365_v40 = vmul.f32 0.015625, %v320_v38  ;;  %v396_v42 = vmul.f32 %v1439_v36, %v1439_v36 }
  0xdd   : > { %v373_v41 = vmul.f32 0.015625, %v344_v39  ;;  %v404_v43 = vmul.f32 %v1441_v37, %v1441_v37 }
  0xde   : > { %v1447_v44 = vsub.f32 %v297_v2, %v365_v40  ;;  %v412_v46 = vsel %vm314_vm0, %v396_v42, 0.0 }
  0xdf   : > { %v1449_v45 = vsub.f32 %v305_v5, %v373_v41  ;;  %413 = vadd.xlane.f32.xlu0 %v412_v46  ;;  %v323_v47 = vpop.xlane.xlu0 %322  ;;  %v436_v49 = vsel %vm314_vm0, %v404_v43, 0.0 }
  0xe0   : > { %v326_v48 = vpop.xlane.xlu1 %325  ;;  %v366_v50 = vmul.f32 0.015625, %v323_v47  ;;  %v397_v52 = vmul.f32 %v1447_v44, %v1447_v44 }
  0xe1   : > { %v367_v51 = vmul.f32 0.015625, %v326_v48  ;;  %v405_v53 = vmul.f32 %v1449_v45, %v1449_v45 }
  0xe2   : > { %v1458_v54 = vsub.f32 %v1381_v6, %v366_v50  ;;  %v415_v56 = vsel %vm314_vm0, %v397_v52, 0.0 }
  0xe3   : > { %v1460_v55 = vsub.f32 %v299_v9, %v367_v51  ;;  %437 = vadd.xlane.f32.xlu0 %v436_v49  ;;  %416 = vadd.xlane.f32.xlu1 %v415_v56  ;;  %v347_v57 = vpop.xlane.xlu0 %346  ;;  %v439_v59 = vsel %vm314_vm0, %v405_v53, 0.0  ;;  %v1133_v53 = vld [vmem:[%s1724_s3 + $0x8] sm:$0xff]   ;;  %v1134_v56 = vld [vmem:[%s1724_s3 + $0x10] sm:$0xff]  }
  0xe4   : > { %v350_v58 = vpop.xlane.xlu1 %349  ;;  %v374_v60 = vmul.f32 0.015625, %v347_v57  ;;  %v398_v62 = vmul.f32 %v1458_v54, %v1458_v54  ;;  %v1135_v57 = vld [vmem:[%s1724_s3 + $0x18] sm:$0xff]  }
  0xe5   : > { %v375_v61 = vmul.f32 0.015625, %v350_v58  ;;  %v399_v63 = vmul.f32 %v1460_v55, %v1460_v55 }
  0xe6   : > { %v1469_v0 = vsub.f32 %v1390_v12, %v374_v60  ;;  %v418_v2 = vsel %vm314_vm0, %v398_v62, 0.0 }
  0xe7   : > { %v1472_v1 = vsub.f32 %v1393_v13, %v375_v61  ;;  %440 = vadd.xlane.f32.xlu1 %v439_v59  ;;  %419 = vadd.xlane.f32.xlu0 %v418_v2  ;;  %v329_v3 = vpop.xlane.xlu0 %328  ;;  %v421_v5 = vsel %vm314_vm0, %v399_v63, 0.0 }
  0xe8   : > { %v332_v4 = vpop.xlane.xlu1 %331  ;;  %v368_v6 = vmul.f32 0.015625, %v329_v3  ;;  %v406_v8 = vmul.f32 %v1469_v0, %v1469_v0 }
  0xe9   : > { %v369_v7 = vmul.f32 0.015625, %v332_v4  ;;  %v407_v9 = vmul.f32 %v1472_v1, %v1472_v1 }
  0xea   : > { %v1481_v10 = vsub.f32 %v1400_v16, %v368_v6  ;;  %v442_v12 = vsel %vm314_vm0, %v406_v8, 0.0 }
  0xeb   : > { %v1484_v11 = vsub.f32 %v1403_v17, %v369_v7  ;;  %422 = vadd.xlane.f32.xlu1 %v421_v5  ;;  %443 = vadd.xlane.f32.xlu0 %v442_v12  ;;  %v353_v13 = vpop.xlane.xlu0 %352  ;;  %v445_v15 = vsel %vm314_vm0, %v407_v9, 0.0 }
  0xec   : > { %v356_v14 = vpop.xlane.xlu1 %355  ;;  %v376_v18 = vmul.f32 0.015625, %v353_v13  ;;  %v400_v22 = vmul.f32 %v1481_v10, %v1481_v10 }
  0xed   : > { %v377_v19 = vmul.f32 0.015625, %v356_v14  ;;  %v401_v16 = vmul.f32 %v1484_v11, %v1484_v11 }
  0xee   : > { %v1493_v23 = vsub.f32 %v1410_v20, %v376_v18  ;;  %v424_v26 = vsel %vm314_vm0, %v400_v22, 0.0 }
  0xef   : > { %v1496_v17 = vsub.f32 %v1413_v21, %v377_v19  ;;  %446 = vadd.xlane.f32.xlu1 %v445_v15  ;;  %425 = vadd.xlane.f32.xlu0 %v424_v26  ;;  %v335_v27 = vpop.xlane.xlu0 %334  ;;  %v427_v31 = vsel %vm314_vm0, %v401_v16, 0.0 }
  0xf0   : > { %v338_v30 = vpop.xlane.xlu1 %337  ;;  %v370_v32 = vmul.f32 0.015625, %v335_v27  ;;  %v408_v34 = vmul.f32 %v1493_v23, %v1493_v23 }
  0xf1   : > { %v371_v33 = vmul.f32 0.015625, %v338_v30  ;;  %v409_v20 = vmul.f32 %v1496_v17, %v1496_v17 }
  0xf2   : > { %v1505_v35 = vsub.f32 %v1420_v24, %v370_v32  ;;  %v448_v38 = vsel %vm314_vm0, %v408_v34, 0.0 }
  0xf3   : > { %v1508_v21 = vsub.f32 %v1423_v25, %v371_v33  ;;  %428 = vadd.xlane.f32.xlu1 %v427_v31  ;;  %449 = vadd.xlane.f32.xlu0 %v448_v38  ;;  %v359_v39 = vpop.xlane.xlu0 %358  ;;  %v451_v41 = vsel %vm314_vm0, %v409_v20, 0.0  ;;  %v1543_v33 = vld [vmem:[#allocation2] ss:$0 sm:$0xff] }
  0xf4   : > { %v362_v40 = vpop.xlane.xlu1 %361  ;;  %v378_v42 = vmul.f32 0.015625, %v359_v39  ;;  %v402_v46 = vmul.f32 %v1505_v35, %v1505_v35 }
  0xf5   : > { %v379_v43 = vmul.f32 0.015625, %v362_v40  ;;  %v403_v24 = vmul.f32 %v1508_v21, %v1508_v21 }
  0xf6   : > { %v1517_v47 = vsub.f32 %v1430_v28, %v378_v42  ;;  %v430_v48 = vsel %vm314_vm0, %v402_v46, 0.0 }
  0xf7   : > { %v1520_v25 = vsub.f32 %v1433_v29, %v379_v43  ;;  %452 = vadd.xlane.f32.xlu1 %v451_v41  ;;  %431 = vadd.xlane.f32.xlu0 %v430_v48  ;;  %v433_v49 = vsel %vm314_vm0, %v403_v24, 0.0  ;;  %v1132_v29 = vld [vmem:[%s1724_s3] sm:$0xff]  }
  0xf8   : > { %v410_v50 = vmul.f32 %v1517_v47, %v1517_v47  ;;  %1070 = vmatprep.subr.bf16.mxu0 %v1132_v29  ;;  %1094 = vmatprep.subr.bf16.mxu1 %v1132_v29 }
  0xf9   : > { %v411_v51 = vmul.f32 %v1520_v25, %v1520_v25  ;;  %1071 = vmatpush3.bf16.msra.mxu0 %v1132_v29  ;;  %1098 = vmatpush3.bf16.msra.mxu1 %v1132_v29 }
  0xfa   : > { %v454_v52 = vsel %vm314_vm0, %v410_v50, 0.0  ;;  %1072 = vmatprep.subr.bf16.mxu0 %v1133_v53  ;;  %1095 = vmatprep.subr.bf16.mxu1 %v1133_v53 }
  0xfb   : > { %434 = vadd.xlane.f32.xlu1 %v433_v49  ;;  %455 = vadd.xlane.f32.xlu0 %v454_v52  ;;  %v457_v28 = vsel %vm314_vm0, %v411_v51, 0.0 }
  0xfd   : > { %1073 = vmatpush3.bf16.msra.mxu0 %v1133_v53  ;;  %1099 = vmatpush3.bf16.msra.mxu1 %v1133_v53 }
  0xfe   : > { %1074 = vmatprep.subr.bf16.mxu0 %v1134_v56  ;;  %1096 = vmatprep.subr.bf16.mxu1 %v1134_v56 }
  0xff   : > { %458 = vadd.xlane.f32.xlu1 %v457_v28 }
 0x101   : > { %1075 = vmatpush3.bf16.msra.mxu0 %v1134_v56  ;;  %1100 = vmatpush3.bf16.msra.mxu1 %v1134_v56 }
 0x102   : > { %1076 = vmatprep.subr.bf16.mxu0 %v1135_v57  ;;  %1097 = vmatprep.subr.bf16.mxu1 %v1135_v57 }
 0x105   : > { %1077 = vmatpush3.bf16.msra.mxu0 %v1135_v57  ;;  %1101 = vmatpush3.bf16.msra.mxu1 %v1135_v57 }
 0x16c   : > { %v414_v58 = vpop.xlane.xlu0 %413 }
 0x16d   : > { %v460_v59 = vmul.f32 0.015625, %v414_v58 }
 0x16f   : > { %v476_v60 = vadd.f32 1e-05, %v460_v59 }
 0x170   : > { %v417_v61 = vpop.xlane.xlu1 %416  ;;  %v438_v62 = vpop.xlane.xlu0 %437 }
 0x171   : > { %1136 = vrsqrt.f32 %v476_v60  ;;  %v461_v63 = vmul.f32 0.015625, %v417_v61  ;;  %v468_v2 = vmul.f32 0.015625, %v438_v62 }
 0x173   : > { %v477_v3 = vadd.f32 1e-05, %v461_v63  ;;  %v484_v4 = vadd.f32 1e-05, %v468_v2 }
 0x174   : > { %v441_v5 = vpop.xlane.xlu1 %440  ;;  %v420_v6 = vpop.xlane.xlu0 %419 }
 0x175   : > { %1138 = vrsqrt.f32 %v477_v3  ;;  %v469_v7 = vmul.f32 0.015625, %v441_v5  ;;  %v462_v8 = vmul.f32 0.015625, %v420_v6 }
 0x176   : > { %1140 = vrsqrt.f32 %v484_v4 }
 0x177   : > { %v485_v9 = vadd.f32 1e-05, %v469_v7  ;;  %v478_v12 = vadd.f32 1e-05, %v462_v8 }
 0x178   : > { %v423_v13 = vpop.xlane.xlu1 %422  ;;  %v444_v14 = vpop.xlane.xlu0 %443 }
 0x179   : > { %1142 = vrsqrt.f32 %v485_v9  ;;  %v463_v15 = vmul.f32 0.015625, %v423_v13  ;;  %v470_v18 = vmul.f32 0.015625, %v444_v14 }
 0x17a   : > { %1144 = vrsqrt.f32 %v478_v12 }
 0x17b   : > { %v1137_v19 = vpop.eup %1136  ;;  %v479_v22 = vadd.f32 1e-05, %v463_v15  ;;  %v486_v16 = vadd.f32 1e-05, %v470_v18 }
 0x17c   : > { %v447_v26 = vpop.xlane.xlu1 %446  ;;  %v426_v27 = vpop.xlane.xlu0 %425  ;;  %v508_v30 = vmul.f32 %v1137_v19, %v1439_v36  ;;  %v1547_v36 = vld [vmem:[#allocation4] ss:$0 sm:$0xff] }
 0x17d   : > { %1146 = vrsqrt.f32 %v479_v22  ;;  %v471_v31 = vmul.f32 0.015625, %v447_v26  ;;  %v464_v32 = vmul.f32 0.015625, %v426_v27 }
 0x17e   : > { %1148 = vrsqrt.f32 %v486_v16  ;;  %v530_v43 = vmul.f32 %v1543_v33, %v508_v30 }
 0x17f   : > { %v1139_v34 = vpop.eup %1138  ;;  %v487_v20 = vadd.f32 1e-05, %v471_v31  ;;  %v480_v38 = vadd.f32 1e-05, %v464_v32 }
 0x180   : > { %v1141_v39 = vpop.eup %1140  ;;  %v429_v40 = vpop.xlane.xlu1 %428  ;;  %v509_v42 = vmul.f32 %v1139_v34, %v1447_v44  ;;  %v552_v44 = vadd.f32 %v1547_v36, %v530_v43 }
 0x181   : > { %v450_v41 = vpop.xlane.xlu0 %449  ;;  %1150 = vrsqrt.f32 %v487_v20  ;;  %v465_v46 = vmul.f32 0.015625, %v429_v40  ;;  %v516_v48 = vmul.f32 %v1141_v39, %v1441_v37 }
 0x182   : > { %v472_v24 = vmul.f32 0.015625, %v450_v41  ;;  %1152 = vrsqrt.f32 %v480_v38  ;;  %v531_v49 = vmul.f32 %v1543_v33, %v509_v42 }
 0x183   : > { %v1143_v50 = vpop.eup %1142  ;;  %v481_v51 = vadd.f32 1e-05, %v465_v46  ;;  %v538_v58 = vmul.f32 %v1543_v33, %v516_v48 }
 0x184   : > { %v488_v52 = vadd.f32 1e-05, %v472_v24  ;;  %v1145_v28 = vpop.eup %1144  ;;  %v453_v29 = vpop.xlane.xlu1 %452  ;;  %v553_v56 = vadd.f32 %v1547_v36, %v531_v49  ;;  %v517_v57 = vmul.f32 %v1143_v50, %v1449_v45 }
 0x185   : > { %v432_v53 = vpop.xlane.xlu0 %431  ;;  %v510_v59 = vmul.f32 %v1145_v28, %v1458_v54  ;;  %1154 = vrsqrt.f32 %v481_v51  ;;  %v473_v37 = vmul.f32 0.015625, %v453_v29  ;;  %v560_v7 = vadd.f32 %v1547_v36, %v538_v58 }
 0x186   : > { %v466_v60 = vmul.f32 0.015625, %v432_v53  ;;  %1156 = vrsqrt.f32 %v488_v52  ;;  %v568_v61 = vpack.c.bf16 %v553_v56, %v552_v44  ;;  %v539_v62 = vmul.f32 %v1543_v33, %v517_v57 }
 0x187   : > { %v1147_v63 = vpop.eup %1146  ;;  %v489_v2 = vadd.f32 1e-05, %v473_v37  ;;  %v532_v8 = vmul.f32 %v1543_v33, %v510_v59 }
 0x188   : > { %v482_v3 = vadd.f32 1e-05, %v466_v60  ;;  %v1149_v4 = vpop.eup %1148  ;;  %v511_v5 = vmul.f32 %v1147_v63, %v1460_v55  ;;  %v435_v6 = vpop.xlane.xlu1 %434  ;;  %1078 = vmatprep.mubr.msk.bf16.mxu0 %vm314_vm0, %v568_v61  ;;  %v561_v54 = vadd.f32 %v1547_v36, %v539_v62 }
 0x189   : > { %v456_v45 = vpop.xlane.xlu0 %455  ;;  %v518_v9 = vmul.f32 %v1149_v4, %v1469_v0  ;;  %1158 = vrsqrt.f32 %v489_v2  ;;  %v467_v12 = vmul.f32 0.015625, %v435_v6  ;;  %v554_v27 = vadd.f32 %v1547_v36, %v532_v8 }
 0x18a   : > { %v474_v13 = vmul.f32 0.015625, %v456_v45  ;;  %1160 = vrsqrt.f32 %v482_v3  ;;  %v572_v14 = vpack.c.bf16 %v561_v54, %v560_v7  ;;  %v533_v15 = vmul.f32 %v1543_v33, %v511_v5 }
 0x18b   : > { %v1151_v55 = vpop.eup %1150  ;;  %v483_v18 = vadd.f32 1e-05, %v467_v12  ;;  %v540_v30 = vmul.f32 %v1543_v33, %v518_v9 }
 0x18c   : > { %v490_v19 = vadd.f32 1e-05, %v474_v13  ;;  %v1153_v22 = vpop.eup %1152  ;;  %v519_v16 = vmul.f32 %v1151_v55, %v1472_v1  ;;  %v459_v26 = vpop.xlane.xlu1 %458  ;;  %1086 = vmatprep.mubr.msk.bf16.mxu1 %vm314_vm0, %v572_v14  ;;  %v555_v0 = vadd.f32 %v1547_v36, %v533_v15 }
 0x18d   : > { %v512_v31 = vmul.f32 %v1153_v22, %v1481_v10  ;;  %1162 = vrsqrt.f32 %v483_v18  ;;  %v475_v32 = vmul.f32 0.015625, %v459_v26  ;;  %v562_v41 = vadd.f32 %v1547_v36, %v540_v30 }
 0x18e   : > { %1164 = vrsqrt.f32 %v490_v19  ;;  %v569_v34 = vpack.c.bf16 %v555_v0, %v554_v27  ;;  %v541_v20 = vmul.f32 %v1543_v33, %v519_v16 }
 0x18f   : > { %v1155_v38 = vpop.eup %1154  ;;  %v491_v39 = vadd.f32 1e-05, %v475_v32  ;;  %v534_v43 = vmul.f32 %v1543_v33, %v512_v31 }
 0x190   : > { %v1157_v1 = vpop.eup %1156  ;;  %v513_v40 = vmul.f32 %v1155_v38, %v1484_v11  ;;  %1079 = vmatmul.mubr.msk.bf16.vlgmr.msra.gmra.mrb[0].mxu0 %vm314_vm0, %v569_v34  ;;  %v563_v42 = vadd.f32 %v1547_v36, %v541_v20 }
 0x191   : > { %v520_v10 = vmul.f32 %v1157_v1, %v1493_v23  ;;  %1166 = vrsqrt.f32 %v491_v39  ;;  %v556_v11 = vadd.f32 %v1547_v36, %v534_v43 }
 0x192   : > { %v573_v46 = vpack.c.bf16 %v563_v42, %v562_v41  ;;  %v535_v24 = vmul.f32 %v1543_v33, %v513_v40 }
 0x193   : > { %v1159_v48 = vpop.eup %1158  ;;  %v542_v52 = vmul.f32 %v1543_v33, %v520_v10 }
 0x194   : > { %v1161_v49 = vpop.eup %1160  ;;  %v521_v50 = vmul.f32 %v1159_v48, %v1496_v17  ;;  %1087 = vmatmul.mubr.msk.bf16.vlgmr.msra.gmra.mrb[0].mxu1 %vm314_vm0, %v573_v46  ;;  %v557_v51 = vadd.f32 %v1547_v36, %v535_v24 }
 0x195   : > { %v514_v28 = vmul.f32 %v1161_v49, %v1505_v35  ;;  %v564_v17 = vadd.f32 %v1547_v36, %v542_v52 }
 0x196   : > { %v570_v29 = vpack.c.bf16 %v557_v51, %v556_v11  ;;  %v543_v23 = vmul.f32 %v1543_v33, %v521_v50 }
 0x197   : > { %v1163_v53 = vpop.eup %1162  ;;  %v536_v58 = vmul.f32 %v1543_v33, %v514_v28 }
 0x198   : > { %v1165_v44 = vpop.eup %1164  ;;  %v515_v56 = vmul.f32 %v1163_v53, %v1508_v21  ;;  %1082 = vmatprep.mubr.msk.bf16.mxu0 %vm314_vm0, %v570_v29  ;;  %v565_v57 = vadd.f32 %v1547_v36, %v543_v23 }
 0x199   : > { %v522_v59 = vmul.f32 %v1165_v44, %v1517_v47  ;;  %v558_v21 = vadd.f32 %v1547_v36, %v536_v58 }
 0x19a   : > { %v574_v37 = vpack.c.bf16 %v565_v57, %v564_v17  ;;  %v537_v35 = vmul.f32 %v1543_v33, %v515_v56 }
 0x19b   : > { %v1167_v60 = vpop.eup %1166  ;;  %v544_v63 = vmul.f32 %v1543_v33, %v522_v59 }
 0x19c   : > { %v523_v61 = vmul.f32 %v1167_v60, %v1520_v25  ;;  %1090 = vmatprep.mubr.msk.bf16.mxu1 %vm314_vm0, %v574_v37  ;;  %v559_v62 = vadd.f32 %v1547_v36, %v537_v35  ;;  %v1605_v25 = vld [vmem:[%s1725_s4] ss:$0 sm:$0xff] }
 0x19d   : > { %v566_v47 = vadd.f32 %v1547_v36, %v544_v63 }
 0x19e   : > { %v571_v2 = vpack.c.bf16 %v559_v62, %v558_v21  ;;  %v545_v3 = vmul.f32 %v1543_v33, %v523_v61 }
 0x1a0   : > { %1083 = vmatmul.mubr.msk.bf16.gmra.mrb[4].mxu0 %vm314_vm0, %v571_v2  ;;  %v567_v4 = vadd.f32 %v1547_v36, %v545_v3 }
 0x1a2   : > { %v575_v5 = vpack.c.bf16 %v567_v4, %v566_v47 }
 0x1a4   : > { %1091 = vmatmul.mubr.msk.bf16.gmra.mrb[4].mxu1 %vm314_vm0, %v575_v5 }
 0x263   : > { %v1080_v6 = vpop.f32.mrb[0].mxu0 }
 0x264   : > { %v682_v45 = vadd.f32 %v1080_v6, %v1605_v25  ;;  %v673_v7 = vpop.f32.mrb[1].mxu0 }
 0x265   : > { %v674_v33 = vadd.f32 %v1605_v25, %v673_v7  ;;  %v1081_v36 = vpop.f32.mrb[2].mxu0 }
 0x266   : > { %v1044_v54 = vpack.c.bf16 %v682_v45, %v682_v45  ;;  %v685_v8 = vadd.f32 %v1081_v36, %v1605_v25  ;;  %v676_v9 = vpop.f32.mrb[3].mxu0 }
 0x267   : > { %v1042_v12 = vpack.c.bf16 %v674_v33, %v674_v33  ;;  %v677_v13 = vadd.f32 %v1605_v25, %v676_v9  ;;  %v1088_v14 = vpop.f32.mrb[0].mxu1 }
 0x268   : > { %803 = vst.msk [vmem:[%s1614_s30 + $0x8] sm:$0xf] %vm800_vm1, %v1044_v54  ;;  %v1045_v15 = vpack.c.bf16 %v685_v8, %v685_v8  ;;  %v714_v55 = vadd.f32 %v1088_v14, %v1605_v25  ;;  %821 = vrot.lane.b32.xlu1 %v1044_v54, %s1242_s26  ;;  %v705_v18 = vpop.f32.mrb[1].mxu1 }
 0x269   : > { %801 = vst.msk [vmem:[%s1614_s30] sm:$0xf] %vm800_vm1, %v1042_v12  ;;  %v1043_v19 = vpack.c.bf16 %v677_v13, %v677_v13  ;;  %v706_v22 = vadd.f32 %v1605_v25, %v705_v18  ;;  %v1089_v16 = vpop.f32.mrb[2].mxu1 }
 0x26a   : > { %804 = vst.msk [vmem:[%s1614_s30 + $0xc] sm:$0xf] %vm800_vm1, %v1045_v15  ;;  %v1052_v26 = vpack.c.bf16 %v714_v55, %v714_v55  ;;  %v717_v27 = vadd.f32 %v1089_v16, %v1605_v25  ;;  %v708_v0 = vpop.f32.mrb[3].mxu1 }
 0x26b   : > { %802 = vst.msk [vmem:[%s1614_s30 + $0x4] sm:$0xf] %vm800_vm1, %v1043_v19  ;;  %v1050_v30 = vpack.c.bf16 %v706_v22, %v706_v22  ;;  %v709_v31 = vadd.f32 %v1605_v25, %v708_v0 }
 0x26c   : > { %811 = vst.msk [vmem:[%s1614_s30 + $0x28] sm:$0xf] %vm800_vm1, %v1052_v26  ;;  %v1053_v32 = vpack.c.bf16 %v717_v27, %v717_v27  ;;  %823 = vrot.lane.b32.xlu1 %v1045_v15, %s1242_s26  ;;  %837 = vrot.lane.b32.xlu0 %v1052_v26, %s1242_s26 }
 0x26d   : > { %809 = vst.msk [vmem:[%s1614_s30 + $0x20] sm:$0xf] %vm800_vm1, %v1050_v30  ;;  %v1051_v34 = vpack.c.bf16 %v709_v31, %v709_v31 }
 0x26e   : > { %812 = vst.msk [vmem:[%s1614_s30 + $0x2c] sm:$0xf] %vm800_vm1, %v1053_v32 }
 0x26f   : > { %810 = vst.msk [vmem:[%s1614_s30 + $0x24] sm:$0xf] %vm800_vm1, %v1051_v34 }
 0x270   : > { %817 = vrot.lane.b32.xlu0 %v1042_v12, %s1242_s26  ;;  %839 = vrot.lane.b32.xlu1 %v1053_v32, %s1242_s26 }
 0x273   : > { %v1084_v20 = vpop.f32.mrb[4].mxu0 }
 0x274   : > { %v698_v38 = vadd.f32 %v1084_v20, %v1605_v25  ;;  %819 = vrot.lane.b32.xlu1 %v1043_v19, %s1242_s26  ;;  %833 = vrot.lane.b32.xlu0 %v1050_v30, %s1242_s26  ;;  %v689_v39 = vpop.f32.mrb[5].mxu0 }
 0x275   : > { %v690_v1 = vadd.f32 %v1605_v25, %v689_v39  ;;  %v1085_v40 = vpop.f32.mrb[6].mxu0 }
 0x276   : > { %v1048_v41 = vpack.c.bf16 %v698_v38, %v698_v38  ;;  %v701_v42 = vadd.f32 %v1085_v40, %v1605_v25  ;;  %v692_v43 = vpop.f32.mrb[7].mxu0 }
 0x277   : > { %v1046_v10 = vpack.c.bf16 %v690_v1, %v690_v1  ;;  %v693_v46 = vadd.f32 %v1605_v25, %v692_v43  ;;  %v1092_v24 = vpop.f32.mrb[4].mxu1 }
 0x278   : > { %807 = vst.msk [vmem:[%s1614_s30 + $0x18] sm:$0xf] %vm800_vm1, %v1048_v41  ;;  %v1049_v48 = vpack.c.bf16 %v701_v42, %v701_v42  ;;  %v730_v49 = vadd.f32 %v1092_v24, %v1605_v25  ;;  %835 = vrot.lane.b32.xlu1 %v1051_v34, %s1242_s26  ;;  %829 = vrot.lane.b32.xlu0 %v1048_v41, %s1242_s26  ;;  %v721_v50 = vpop.f32.mrb[5].mxu1 }
 0x279   : > { %805 = vst.msk [vmem:[%s1614_s30 + $0x10] sm:$0xf] %vm800_vm1, %v1046_v10  ;;  %v1047_v11 = vpack.c.bf16 %v693_v46, %v693_v46  ;;  %v722_v51 = vadd.f32 %v1605_v25, %v721_v50  ;;  %v1093_v52 = vpop.f32.mrb[6].mxu1 }
 0x27a   : > { %808 = vst.msk [vmem:[%s1614_s30 + $0x1c] sm:$0xf] %vm800_vm1, %v1049_v48  ;;  %v1056_v28 = vpack.c.bf16 %v730_v49, %v730_v49  ;;  %v733_v29 = vadd.f32 %v1093_v52, %v1605_v25  ;;  %v724_v23 = vpop.f32.mrb[7].mxu1 }
 0x27b   : > { %806 = vst.msk [vmem:[%s1614_s30 + $0x14] sm:$0xf] %vm800_vm1, %v1047_v11  ;;  %v1054_v53 = vpack.c.bf16 %v722_v51, %v722_v51  ;;  %v725_v44 = vadd.f32 %v1605_v25, %v724_v23 }
 0x27c   : > { %815 = vst.msk [vmem:[%s1614_s30 + $0x38] sm:$0xf] %vm800_vm1, %v1056_v28  ;;  %v1057_v56 = vpack.c.bf16 %v733_v29, %v733_v29  ;;  %831 = vrot.lane.b32.xlu1 %v1049_v48, %s1242_s26  ;;  %825 = vrot.lane.b32.xlu0 %v1046_v10, %s1242_s26 }
 0x27d   : > { %813 = vst.msk [vmem:[%s1614_s30 + $0x30] sm:$0xf] %vm800_vm1, %v1054_v53  ;;  %v1055_v17 = vpack.c.bf16 %v725_v44, %v725_v44 }
 0x27e   : > { %816 = vst.msk [vmem:[%s1614_s30 + $0x3c] sm:$0xf] %vm800_vm1, %v1057_v56 }
 0x27f   : > { %814 = vst.msk [vmem:[%s1614_s30 + $0x34] sm:$0xf] %vm800_vm1, %v1055_v17 }
 0x280   : > { %827 = vrot.lane.b32.xlu1 %v1047_v11, %s1242_s26  ;;  %841 = vrot.lane.b32.xlu0 %v1054_v53, %s1242_s26 }
 0x284   : > { %843 = vrot.lane.b32.xlu1 %v1055_v17, %s1242_s26  ;;  %845 = vrot.lane.b32.xlu0 %v1056_v28, %s1242_s26 }
 0x288   : > { %847 = vrot.lane.b32.xlu1 %v1057_v56, %s1242_s26 }
 0x2da   : > { %v822_v57 = vpop.permute.xlu1 %821 }
 0x2db   : > { %868 = vst.msk [vmem:[%s1684_s9 + $0x8] sm:$0xf] %vm865_vm2, %v822_v57 }
 0x2de   : > { %v824_v58 = vpop.permute.xlu1 %823  ;;  %v838_v59 = vpop.permute.xlu0 %837 }
 0x2df   : > { %869 = vst.msk [vmem:[%s1684_s9 + $0xc] sm:$0xf] %vm865_vm2, %v824_v58  ;;  %876 = vst.msk [vmem:[%s1684_s9 + $0x28] sm:$0xf] %vm865_vm2, %v838_v59 }
 0x2e2   : > { %v840_v37 = vpop.permute.xlu1 %839  ;;  %v818_v35 = vpop.permute.xlu0 %817 }
 0x2e3   : > { %877 = vst.msk [vmem:[%s1684_s9 + $0x2c] sm:$0xf] %vm865_vm2, %v840_v37  ;;  %866 = vst.msk [vmem:[%s1684_s9] sm:$0xf] %vm865_vm2, %v818_v35 }
 0x2e6   : > { %v820_v60 = vpop.permute.xlu1 %819  ;;  %v834_v61 = vpop.permute.xlu0 %833 }
 0x2e7   : > { %867 = vst.msk [vmem:[%s1684_s9 + $0x4] sm:$0xf] %vm865_vm2, %v820_v60  ;;  %874 = vst.msk [vmem:[%s1684_s9 + $0x20] sm:$0xf] %vm865_vm2, %v834_v61 }
 0x2ea   : > { %v836_v21 = vpop.permute.xlu1 %835  ;;  %v830_v62 = vpop.permute.xlu0 %829 }
 0x2eb   : > { %875 = vst.msk [vmem:[%s1684_s9 + $0x24] sm:$0xf] %vm865_vm2, %v836_v21  ;;  %872 = vst.msk [vmem:[%s1684_s9 + $0x18] sm:$0xf] %vm865_vm2, %v830_v62 }
 0x2ee   : > { %v832_v63 = vpop.permute.xlu1 %831  ;;  %v826_v2 = vpop.permute.xlu0 %825 }
 0x2ef   : > { %873 = vst.msk [vmem:[%s1684_s9 + $0x1c] sm:$0xf] %vm865_vm2, %v832_v63  ;;  %870 = vst.msk [vmem:[%s1684_s9 + $0x10] sm:$0xf] %vm865_vm2, %v826_v2 }
 0x2f2   : > { %v828_v3 = vpop.permute.xlu1 %827  ;;  %v842_v47 = vpop.permute.xlu0 %841 }
 0x2f3   : > { %871 = vst.msk [vmem:[%s1684_s9 + $0x14] sm:$0xf] %vm865_vm2, %v828_v3  ;;  %878 = vst.msk [vmem:[%s1684_s9 + $0x30] sm:$0xf] %vm865_vm2, %v842_v47 }
 0x2f6   : > { %v844_v4 = vpop.permute.xlu1 %843  ;;  %v846_v5 = vpop.permute.xlu0 %845 }
 0x2f7   : > { %879 = vst.msk [vmem:[%s1684_s9 + $0x34] sm:$0xf] %vm865_vm2, %v844_v4  ;;  %880 = vst.msk [vmem:[%s1684_s9 + $0x38] sm:$0xf] %vm865_vm2, %v846_v5 }
 0x2fa   : > { %v848_v25 = vpop.permute.xlu1 %847 }
 0x2fb   : > { %881 = vst.msk [vmem:[%s1684_s9 + $0x3c] sm:$0xf] %vm865_vm2, %v848_v25 }
 0x2fc PF: > { %s19_s21 = sadd.s32 1, %s1238_s21  }
 0x2fd   : > { %p16_p5 = scmp.ge.s32.totalorder %s19_s21, 10  }
 0x2ff   :  { %18 = sbr.rel (!%p16_p5) target bundleno = 2 (0x2), region = 91 }
 0x306   :  { %921 = vsyncpa [#allocation3], 1 }
 0x307   :  { %923 = vsyncpa [#allocation3 + $0x1], 1 }
 0x308   :  { %924 = vsyncpa [#allocation5], 1 }

// kernel: _lambda_.6
= control target key start
LH: loop header
LB: loop body
LE: loop exit
PB: predicated region body
PF: predicated region fallthrough
CT: control target
= control target key end

     0   :  { %s1516_s18 = smov 0   ;;  %s2108_s0 = inlined_call_operand.vmem [shape: f32[1024,64], index: 0, kind: input, shape index: {}]   ;;  %s2109_s1 = inlined_call_operand.vmem [shape: f32[1,64], index: 1, kind: input, shape index: {}]   ;;  %s2110_s2 = inlined_call_operand.vmem [shape: f32[1,64], index: 2, kind: input, shape index: {}]   ;;  %s2111_s3 = inlined_call_operand.vmem [shape: bf16[64,128], index: 3, kind: input, shape index: {}]   ;;  %s2112_s4 = inlined_call_operand.vmem [shape: f32[1,128], index: 4, kind: input, shape index: {}]   ;;  %s2113_s5 = inlined_call_operand.vmem [shape: bf16[1024,128], index: 5, kind: output, shape index: {}]  }
   0x1 LB: > { %s1221_s19 = sadd.s32 4294967295, %s1484_s18   ;;  %p1225_p0 = scmp.ge.s32.totalorder %s1484_s18, 1  ;;  %s1484_s18 = sphi %s1516_s18, %s15_s18  }
   0x2   : > { %p188_p1 = scmp.lt.s32.totalorder %s1484_s18, 9 }
   0x4   : > { %p189_p2 = pnand %p1225_p0, %p188_p1 }
   0x5   : > { %s1226_s20 = sshll.u32 (!%p189_p2), %s1221_s19, 4  ;;  %vm247_vm0 = vcmask (!%p189_p2), 523264  }
   0x6   : > { %192 = sbr.rel (%p189_p2) target bundleno = 681 (0x2a9), region = 40  ;;  %p217_p3 = scmp.lt.s32.totalorder (!%p189_p2), %s1226_s20, 127 }
   0xd   : > { %s2115_s20 = smov (!%p217_p3, %s1226_s20), 127 }
   0xe   : > { %s1227_s21 = sshll.u32 %s2115_s20, 3  ;;  %s1229_s14 = sshll.u32 %s2115_s20, 2 }
   0xf   : > { %s1530_s24 = scalar_lea.vmem %s2108_s0, %s1227_s21  ;;  %s1949_s17 = scalar_lea.vmem %s2113_s5, %s1229_s14 }
  0x10   : > { %v229_v0 = vld [vmem:[%s1530_s24] sm:$0xff]  ;;  %v230_v2 = vld [vmem:[%s1530_s24 + $0x8] sm:$0xff]  ;;  %v231_v8 = vld [vmem:[%s1530_s24 + $0x10] sm:$0xff] }
  0x11   : > { %v237_v1 = vld [vmem:[%s1530_s24 + $0x40] sm:$0xff]  ;;  %v248_v3 = vsel %vm247_vm0, %v229_v0, 0.0  ;;  %v238_v5 = vld [vmem:[%s1530_s24 + $0x48] sm:$0xff]  ;;  %v251_v6 = vsel %vm247_vm0, %v230_v2, 0.0  ;;  %v232_v9 = vld [vmem:[%s1530_s24 + $0x18] sm:$0xff]  ;;  %v254_v10 = vsel %vm247_vm0, %v231_v8, 0.0 }
  0x12   : > { %v272_v4 = vsel %vm247_vm0, %v237_v1, 0.0  ;;  %249 = vadd.xlane.f32.xlu0 %v248_v3  ;;  %v275_v7 = vsel %vm247_vm0, %v238_v5, 0.0  ;;  %v257_v11 = vsel %vm247_vm0, %v232_v9, 0.0  ;;  %v1545_v12 = vld [vmem:[%s1530_s24 + $0x50] sm:$0xff]  ;;  %v1548_v13 = vld [vmem:[%s1530_s24 + $0x58] sm:$0xff]  ;;  %v1555_v16 = vld [vmem:[%s1530_s24 + $0x20] sm:$0xff] }
  0x13   : > { %273 = vadd.xlane.f32.xlu1 %v272_v4  ;;  %v278_v14 = vsel %vm247_vm0, %v1545_v12, 0.0  ;;  %v281_v15 = vsel %vm247_vm0, %v1548_v13, 0.0  ;;  %v1558_v17 = vld [vmem:[%s1530_s24 + $0x28] sm:$0xff]  ;;  %v260_v18 = vsel %vm247_vm0, %v1555_v16, 0.0  ;;  %v1565_v20 = vld [vmem:[%s1530_s24 + $0x60] sm:$0xff]  ;;  %v1575_v24 = vld [vmem:[%s1530_s24 + $0x30] sm:$0xff] }
  0x14   : > { %v263_v19 = vsel %vm247_vm0, %v1558_v17, 0.0  ;;  %v1568_v21 = vld [vmem:[%s1530_s24 + $0x68] sm:$0xff]  ;;  %v284_v22 = vsel %vm247_vm0, %v1565_v20, 0.0  ;;  %v1578_v25 = vld [vmem:[%s1530_s24 + $0x38] sm:$0xff]  ;;  %v266_v26 = vsel %vm247_vm0, %v1575_v24, 0.0  ;;  %v1585_v28 = vld [vmem:[%s1530_s24 + $0x70] sm:$0xff] }
  0x15   : > { %v287_v23 = vsel %vm247_vm0, %v1568_v21, 0.0  ;;  %v269_v27 = vsel %vm247_vm0, %v1578_v25, 0.0  ;;  %v1588_v29 = vld [vmem:[%s1530_s24 + $0x78] sm:$0xff]  ;;  %v290_v30 = vsel %vm247_vm0, %v1585_v28, 0.0 }
  0x16   : > { %252 = vadd.xlane.f32.xlu0 %v251_v6  ;;  %v293_v31 = vsel %vm247_vm0, %v1588_v29, 0.0 }
  0x17   : > { %276 = vadd.xlane.f32.xlu1 %v275_v7 }
  0x1a   : > { %255 = vadd.xlane.f32.xlu0 %v254_v10 }
  0x1b   : > { %258 = vadd.xlane.f32.xlu1 %v257_v11 }
  0x1e   : > { %279 = vadd.xlane.f32.xlu0 %v278_v14 }
  0x1f   : > { %282 = vadd.xlane.f32.xlu1 %v281_v15 }
  0x22   : > { %261 = vadd.xlane.f32.xlu0 %v260_v18 }
  0x23   : > { %264 = vadd.xlane.f32.xlu1 %v263_v19 }
  0x26   : > { %285 = vadd.xlane.f32.xlu0 %v284_v22 }
  0x27   : > { %288 = vadd.xlane.f32.xlu1 %v287_v23 }
  0x2a   : > { %267 = vadd.xlane.f32.xlu0 %v266_v26 }
  0x2b   : > { %270 = vadd.xlane.f32.xlu1 %v269_v27 }
  0x2e   : > { %291 = vadd.xlane.f32.xlu0 %v290_v30 }
  0x2f   : > { %294 = vadd.xlane.f32.xlu1 %v293_v31 }
  0x9f   : > { %v250_v32 = vpop.xlane.xlu0 %249 }
  0xa0   : > { %v274_v33 = vpop.xlane.xlu1 %273  ;;  %v297_v34 = vmul.f32 0.015625, %v250_v32 }
  0xa1   : > { %v305_v35 = vmul.f32 0.015625, %v274_v33 }
  0xa2   : > { %v1594_v36 = vsub.f32 %v229_v0, %v297_v34 }
  0xa3   : > { %v1596_v37 = vsub.f32 %v237_v1, %v305_v35  ;;  %v253_v38 = vpop.xlane.xlu0 %252 }
  0xa4   : > { %v277_v39 = vpop.xlane.xlu1 %276  ;;  %v298_v40 = vmul.f32 0.015625, %v253_v38  ;;  %v329_v42 = vmul.f32 %v1594_v36, %v1594_v36 }
  0xa5   : > { %v306_v41 = vmul.f32 0.015625, %v277_v39  ;;  %v337_v43 = vmul.f32 %v1596_v37, %v1596_v37 }
  0xa6   : > { %v1602_v44 = vsub.f32 %v230_v2, %v298_v40  ;;  %v345_v46 = vsel %vm247_vm0, %v329_v42, 0.0 }
  0xa7   : > { %v1604_v45 = vsub.f32 %v238_v5, %v306_v41  ;;  %346 = vadd.xlane.f32.xlu0 %v345_v46  ;;  %v256_v47 = vpop.xlane.xlu0 %255  ;;  %v369_v49 = vsel %vm247_vm0, %v337_v43, 0.0 }
  0xa8   : > { %v259_v48 = vpop.xlane.xlu1 %258  ;;  %v299_v50 = vmul.f32 0.015625, %v256_v47  ;;  %v330_v52 = vmul.f32 %v1602_v44, %v1602_v44 }
  0xa9   : > { %v300_v51 = vmul.f32 0.015625, %v259_v48  ;;  %v338_v53 = vmul.f32 %v1604_v45, %v1604_v45 }
  0xaa   : > { %v1612_v54 = vsub.f32 %v231_v8, %v299_v50  ;;  %v348_v56 = vsel %vm247_vm0, %v330_v52, 0.0 }
  0xab   : > { %v1614_v55 = vsub.f32 %v232_v9, %v300_v51  ;;  %370 = vadd.xlane.f32.xlu0 %v369_v49  ;;  %349 = vadd.xlane.f32.xlu1 %v348_v56  ;;  %v280_v57 = vpop.xlane.xlu0 %279  ;;  %v372_v59 = vsel %vm247_vm0, %v338_v53, 0.0  ;;  %v1379_v53 = vld [vmem:[%s2111_s3 + $0x8] sm:$0xff]   ;;  %v1380_v56 = vld [vmem:[%s2111_s3 + $0x10] sm:$0xff]  }
  0xac   : > { %v283_v58 = vpop.xlane.xlu1 %282  ;;  %v307_v60 = vmul.f32 0.015625, %v280_v57  ;;  %v331_v62 = vmul.f32 %v1612_v54, %v1612_v54  ;;  %v1381_v57 = vld [vmem:[%s2111_s3 + $0x18] sm:$0xff]  }
  0xad   : > { %v308_v61 = vmul.f32 0.015625, %v283_v58  ;;  %v332_v63 = vmul.f32 %v1614_v55, %v1614_v55 }
  0xae   : > { %v1623_v0 = vsub.f32 %v1545_v12, %v307_v60  ;;  %v351_v2 = vsel %vm247_vm0, %v331_v62, 0.0 }
  0xaf   : > { %v1626_v1 = vsub.f32 %v1548_v13, %v308_v61  ;;  %373 = vadd.xlane.f32.xlu1 %v372_v59  ;;  %352 = vadd.xlane.f32.xlu0 %v351_v2  ;;  %v262_v3 = vpop.xlane.xlu0 %261  ;;  %v354_v5 = vsel %vm247_vm0, %v332_v63, 0.0 }
  0xb0   : > { %v265_v4 = vpop.xlane.xlu1 %264  ;;  %v301_v6 = vmul.f32 0.015625, %v262_v3  ;;  %v339_v8 = vmul.f32 %v1623_v0, %v1623_v0 }
  0xb1   : > { %v302_v7 = vmul.f32 0.015625, %v265_v4  ;;  %v340_v9 = vmul.f32 %v1626_v1, %v1626_v1 }
  0xb2   : > { %v1635_v10 = vsub.f32 %v1555_v16, %v301_v6  ;;  %v375_v12 = vsel %vm247_vm0, %v339_v8, 0.0 }
  0xb3   : > { %v1638_v11 = vsub.f32 %v1558_v17, %v302_v7  ;;  %355 = vadd.xlane.f32.xlu1 %v354_v5  ;;  %376 = vadd.xlane.f32.xlu0 %v375_v12  ;;  %v286_v13 = vpop.xlane.xlu0 %285  ;;  %v378_v15 = vsel %vm247_vm0, %v340_v9, 0.0 }
  0xb4   : > { %v289_v14 = vpop.xlane.xlu1 %288  ;;  %v309_v18 = vmul.f32 0.015625, %v286_v13  ;;  %v333_v22 = vmul.f32 %v1635_v10, %v1635_v10 }
  0xb5   : > { %v310_v19 = vmul.f32 0.015625, %v289_v14  ;;  %v334_v16 = vmul.f32 %v1638_v11, %v1638_v11 }
  0xb6   : > { %v1647_v23 = vsub.f32 %v1565_v20, %v309_v18  ;;  %v357_v26 = vsel %vm247_vm0, %v333_v22, 0.0 }
  0xb7   : > { %v1650_v17 = vsub.f32 %v1568_v21, %v310_v19  ;;  %379 = vadd.xlane.f32.xlu1 %v378_v15  ;;  %358 = vadd.xlane.f32.xlu0 %v357_v26  ;;  %v268_v27 = vpop.xlane.xlu0 %267  ;;  %v360_v31 = vsel %vm247_vm0, %v334_v16, 0.0 }
  0xb8   : > { %v271_v30 = vpop.xlane.xlu1 %270  ;;  %v303_v32 = vmul.f32 0.015625, %v268_v27  ;;  %v341_v34 = vmul.f32 %v1647_v23, %v1647_v23 }
  0xb9   : > { %v304_v33 = vmul.f32 0.015625, %v271_v30  ;;  %v342_v20 = vmul.f32 %v1650_v17, %v1650_v17 }
  0xba   : > { %v1659_v35 = vsub.f32 %v1575_v24, %v303_v32  ;;  %v381_v38 = vsel %vm247_vm0, %v341_v34, 0.0 }
  0xbb   : > { %v1662_v21 = vsub.f32 %v1578_v25, %v304_v33  ;;  %361 = vadd.xlane.f32.xlu1 %v360_v31  ;;  %382 = vadd.xlane.f32.xlu0 %v381_v38  ;;  %v292_v39 = vpop.xlane.xlu0 %291  ;;  %v384_v41 = vsel %vm247_vm0, %v342_v20, 0.0  ;;  %v1700_v33 = vld [vmem:[%s2109_s1] ss:$0 sm:$0xff] }
  0xbc   : > { %v295_v40 = vpop.xlane.xlu1 %294  ;;  %v311_v42 = vmul.f32 0.015625, %v292_v39  ;;  %v335_v46 = vmul.f32 %v1659_v35, %v1659_v35 }
  0xbd   : > { %v312_v43 = vmul.f32 0.015625, %v295_v40  ;;  %v336_v24 = vmul.f32 %v1662_v21, %v1662_v21 }
  0xbe   : > { %v1671_v47 = vsub.f32 %v1585_v28, %v311_v42  ;;  %v363_v48 = vsel %vm247_vm0, %v335_v46, 0.0 }
  0xbf   : > { %v1674_v25 = vsub.f32 %v1588_v29, %v312_v43  ;;  %385 = vadd.xlane.f32.xlu1 %v384_v41  ;;  %364 = vadd.xlane.f32.xlu0 %v363_v48  ;;  %v366_v49 = vsel %vm247_vm0, %v336_v24, 0.0  ;;  %v1378_v29 = vld [vmem:[%s2111_s3] sm:$0xff]  }
  0xc0   : > { %v343_v50 = vmul.f32 %v1671_v47, %v1671_v47  ;;  %1338 = vmatprep.subr.bf16.mxu0 %v1378_v29  ;;  %1362 = vmatprep.subr.bf16.mxu1 %v1378_v29  ;;  %v1707_v24 = vld [vmem:[%s2110_s2] ss:$0 sm:$0xff] }
  0xc1   : > { %v344_v51 = vmul.f32 %v1674_v25, %v1674_v25  ;;  %1339 = vmatpush3.bf16.msra.mxu0 %v1378_v29  ;;  %1366 = vmatpush3.bf16.msra.mxu1 %v1378_v29 }
  0xc2   : > { %v387_v52 = vsel %vm247_vm0, %v343_v50, 0.0  ;;  %1340 = vmatprep.subr.bf16.mxu0 %v1379_v53  ;;  %1363 = vmatprep.subr.bf16.mxu1 %v1379_v53 }
  0xc3   : > { %367 = vadd.xlane.f32.xlu1 %v366_v49  ;;  %388 = vadd.xlane.f32.xlu0 %v387_v52  ;;  %v390_v28 = vsel %vm247_vm0, %v344_v51, 0.0 }
  0xc5   : > { %1341 = vmatpush3.bf16.msra.mxu0 %v1379_v53  ;;  %1367 = vmatpush3.bf16.msra.mxu1 %v1379_v53 }
  0xc6   : > { %1342 = vmatprep.subr.bf16.mxu0 %v1380_v56  ;;  %1364 = vmatprep.subr.bf16.mxu1 %v1380_v56 }
  0xc7   : > { %391 = vadd.xlane.f32.xlu1 %v390_v28 }
  0xc9   : > { %1343 = vmatpush3.bf16.msra.mxu0 %v1380_v56  ;;  %1368 = vmatpush3.bf16.msra.mxu1 %v1380_v56 }
  0xca   : > { %1344 = vmatprep.subr.bf16.mxu0 %v1381_v57  ;;  %1365 = vmatprep.subr.bf16.mxu1 %v1381_v57 }
  0xcd   : > { %1345 = vmatpush3.bf16.msra.mxu0 %v1381_v57  ;;  %1369 = vmatpush3.bf16.msra.mxu1 %v1381_v57 }
 0x134   : > { %v347_v58 = vpop.xlane.xlu0 %346 }
 0x135   : > { %v393_v59 = vmul.f32 0.015625, %v347_v58 }
 0x137   : > { %v409_v60 = vadd.f32 1e-05, %v393_v59 }
 0x138   : > { %v350_v61 = vpop.xlane.xlu1 %349  ;;  %v371_v62 = vpop.xlane.xlu0 %370 }
 0x139   : > { %1382 = vrsqrt.f32 %v409_v60  ;;  %v394_v63 = vmul.f32 0.015625, %v350_v61  ;;  %v401_v2 = vmul.f32 0.015625, %v371_v62 }
 0x13b   : > { %v410_v3 = vadd.f32 1e-05, %v394_v63  ;;  %v417_v4 = vadd.f32 1e-05, %v401_v2 }
 0x13c   : > { %v374_v5 = vpop.xlane.xlu1 %373  ;;  %v353_v6 = vpop.xlane.xlu0 %352 }
 0x13d   : > { %1384 = vrsqrt.f32 %v410_v3  ;;  %v402_v7 = vmul.f32 0.015625, %v374_v5  ;;  %v395_v8 = vmul.f32 0.015625, %v353_v6 }
 0x13e   : > { %1386 = vrsqrt.f32 %v417_v4 }
 0x13f   : > { %v418_v9 = vadd.f32 1e-05, %v402_v7  ;;  %v411_v12 = vadd.f32 1e-05, %v395_v8 }
 0x140   : > { %v356_v13 = vpop.xlane.xlu1 %355  ;;  %v377_v14 = vpop.xlane.xlu0 %376 }
 0x141   : > { %1388 = vrsqrt.f32 %v418_v9  ;;  %v396_v15 = vmul.f32 0.015625, %v356_v13  ;;  %v403_v18 = vmul.f32 0.015625, %v377_v14 }
 0x142   : > { %1390 = vrsqrt.f32 %v411_v12 }
 0x143   : > { %v1383_v19 = vpop.eup %1382  ;;  %v412_v22 = vadd.f32 1e-05, %v396_v15  ;;  %v419_v16 = vadd.f32 1e-05, %v403_v18 }
 0x144   : > { %v380_v26 = vpop.xlane.xlu1 %379  ;;  %v359_v27 = vpop.xlane.xlu0 %358  ;;  %v441_v30 = vmul.f32 %v1383_v19, %v1594_v36 }
 0x145   : > { %1392 = vrsqrt.f32 %v412_v22  ;;  %v404_v31 = vmul.f32 0.015625, %v380_v26  ;;  %v397_v32 = vmul.f32 0.015625, %v359_v27 }
 0x146   : > { %1394 = vrsqrt.f32 %v419_v16  ;;  %v463_v43 = vmul.f32 %v1700_v33, %v441_v30 }
 0x147   : > { %v1385_v34 = vpop.eup %1384  ;;  %v420_v20 = vadd.f32 1e-05, %v404_v31  ;;  %v413_v38 = vadd.f32 1e-05, %v397_v32 }
 0x148   : > { %v1387_v39 = vpop.eup %1386  ;;  %v362_v40 = vpop.xlane.xlu1 %361  ;;  %v442_v42 = vmul.f32 %v1385_v34, %v1602_v44  ;;  %v485_v53 = vadd.f32 %v1707_v24, %v463_v43 }
 0x149   : > { %v383_v41 = vpop.xlane.xlu0 %382  ;;  %1396 = vrsqrt.f32 %v420_v20  ;;  %v398_v36 = vmul.f32 0.015625, %v362_v40  ;;  %v449_v48 = vmul.f32 %v1387_v39, %v1596_v37 }
 0x14a   : > { %v405_v46 = vmul.f32 0.015625, %v383_v41  ;;  %1398 = vrsqrt.f32 %v413_v38  ;;  %v464_v49 = vmul.f32 %v1700_v33, %v442_v42 }
 0x14b   : > { %v1389_v50 = vpop.eup %1388  ;;  %v414_v51 = vadd.f32 1e-05, %v398_v36  ;;  %v471_v58 = vmul.f32 %v1700_v33, %v449_v48 }
 0x14c   : > { %v421_v52 = vadd.f32 1e-05, %v405_v46  ;;  %v1391_v28 = vpop.eup %1390  ;;  %v386_v44 = vpop.xlane.xlu1 %385  ;;  %v486_v56 = vadd.f32 %v1707_v24, %v464_v49  ;;  %v450_v57 = vmul.f32 %v1389_v50, %v1604_v45 }
 0x14d   : > { %v365_v29 = vpop.xlane.xlu0 %364  ;;  %v443_v59 = vmul.f32 %v1391_v28, %v1612_v54  ;;  %1400 = vrsqrt.f32 %v414_v51  ;;  %v406_v37 = vmul.f32 0.015625, %v386_v44  ;;  %v493_v7 = vadd.f32 %v1707_v24, %v471_v58 }
 0x14e   : > { %v399_v60 = vmul.f32 0.015625, %v365_v29  ;;  %1402 = vrsqrt.f32 %v421_v52  ;;  %v501_v61 = vpack.c.bf16 %v486_v56, %v485_v53  ;;  %v472_v62 = vmul.f32 %v1700_v33, %v450_v57 }
 0x14f   : > { %v1393_v63 = vpop.eup %1392  ;;  %v422_v2 = vadd.f32 1e-05, %v406_v37  ;;  %v465_v8 = vmul.f32 %v1700_v33, %v443_v59 }
 0x150   : > { %v415_v3 = vadd.f32 1e-05, %v399_v60  ;;  %v1395_v4 = vpop.eup %1394  ;;  %v444_v5 = vmul.f32 %v1393_v63, %v1614_v55  ;;  %v368_v6 = vpop.xlane.xlu1 %367  ;;  %1346 = vmatprep.mubr.msk.bf16.mxu0 %vm247_vm0, %v501_v61  ;;  %v494_v54 = vadd.f32 %v1707_v24, %v472_v62 }
 0x151   : > { %v389_v45 = vpop.xlane.xlu0 %388  ;;  %v451_v9 = vmul.f32 %v1395_v4, %v1623_v0  ;;  %1404 = vrsqrt.f32 %v422_v2  ;;  %v400_v12 = vmul.f32 0.015625, %v368_v6  ;;  %v487_v27 = vadd.f32 %v1707_v24, %v465_v8 }
 0x152   : > { %v407_v13 = vmul.f32 0.015625, %v389_v45  ;;  %1406 = vrsqrt.f32 %v415_v3  ;;  %v505_v14 = vpack.c.bf16 %v494_v54, %v493_v7  ;;  %v466_v15 = vmul.f32 %v1700_v33, %v444_v5 }
 0x153   : > { %v1397_v55 = vpop.eup %1396  ;;  %v416_v18 = vadd.f32 1e-05, %v400_v12  ;;  %v473_v30 = vmul.f32 %v1700_v33, %v451_v9 }
 0x154   : > { %v423_v19 = vadd.f32 1e-05, %v407_v13  ;;  %v1399_v22 = vpop.eup %1398  ;;  %v452_v16 = vmul.f32 %v1397_v55, %v1626_v1  ;;  %v392_v26 = vpop.xlane.xlu1 %391  ;;  %1354 = vmatprep.mubr.msk.bf16.mxu1 %vm247_vm0, %v505_v14  ;;  %v488_v0 = vadd.f32 %v1707_v24, %v466_v15 }
 0x155   : > { %v445_v31 = vmul.f32 %v1399_v22, %v1635_v10  ;;  %1408 = vrsqrt.f32 %v416_v18  ;;  %v408_v32 = vmul.f32 0.015625, %v392_v26  ;;  %v495_v41 = vadd.f32 %v1707_v24, %v473_v30 }
 0x156   : > { %1410 = vrsqrt.f32 %v423_v19  ;;  %v502_v34 = vpack.c.bf16 %v488_v0, %v487_v27  ;;  %v474_v20 = vmul.f32 %v1700_v33, %v452_v16 }
 0x157   : > { %v1401_v38 = vpop.eup %1400  ;;  %v424_v39 = vadd.f32 1e-05, %v408_v32  ;;  %v467_v43 = vmul.f32 %v1700_v33, %v445_v31 }
 0x158   : > { %v1403_v1 = vpop.eup %1402  ;;  %v446_v40 = vmul.f32 %v1401_v38, %v1638_v11  ;;  %1347 = vmatmul.mubr.msk.bf16.vlgmr.msra.gmra.mrb[0].mxu0 %vm247_vm0, %v502_v34  ;;  %v496_v42 = vadd.f32 %v1707_v24, %v474_v20 }
 0x159   : > { %v453_v10 = vmul.f32 %v1403_v1, %v1647_v23  ;;  %1412 = vrsqrt.f32 %v424_v39  ;;  %v489_v11 = vadd.f32 %v1707_v24, %v467_v43 }
 0x15a   : > { %v506_v36 = vpack.c.bf16 %v496_v42, %v495_v41  ;;  %v468_v46 = vmul.f32 %v1700_v33, %v446_v40 }
 0x15b   : > { %v1405_v48 = vpop.eup %1404  ;;  %v475_v52 = vmul.f32 %v1700_v33, %v453_v10 }
 0x15c   : > { %v1407_v49 = vpop.eup %1406  ;;  %v454_v50 = vmul.f32 %v1405_v48, %v1650_v17  ;;  %1355 = vmatmul.mubr.msk.bf16.vlgmr.msra.gmra.mrb[0].mxu1 %vm247_vm0, %v506_v36  ;;  %v490_v51 = vadd.f32 %v1707_v24, %v468_v46 }
 0x15d   : > { %v447_v28 = vmul.f32 %v1407_v49, %v1659_v35  ;;  %v497_v17 = vadd.f32 %v1707_v24, %v475_v52 }
 0x15e   : > { %v503_v44 = vpack.c.bf16 %v490_v51, %v489_v11  ;;  %v476_v23 = vmul.f32 %v1700_v33, %v454_v50 }
 0x15f   : > { %v1409_v29 = vpop.eup %1408  ;;  %v469_v58 = vmul.f32 %v1700_v33, %v447_v28 }
 0x160   : > { %v1411_v53 = vpop.eup %1410  ;;  %v448_v56 = vmul.f32 %v1409_v29, %v1662_v21  ;;  %1350 = vmatprep.mubr.msk.bf16.mxu0 %vm247_vm0, %v503_v44  ;;  %v498_v57 = vadd.f32 %v1707_v24, %v476_v23 }
 0x161   : > { %v455_v59 = vmul.f32 %v1411_v53, %v1671_v47  ;;  %v491_v21 = vadd.f32 %v1707_v24, %v469_v58 }
 0x162   : > { %v507_v37 = vpack.c.bf16 %v498_v57, %v497_v17  ;;  %v470_v35 = vmul.f32 %v1700_v33, %v448_v56 }
 0x163   : > { %v1413_v60 = vpop.eup %1412  ;;  %v477_v63 = vmul.f32 %v1700_v33, %v455_v59 }
 0x164   : > { %v456_v61 = vmul.f32 %v1413_v60, %v1674_v25  ;;  %1358 = vmatprep.mubr.msk.bf16.mxu1 %vm247_vm0, %v507_v37  ;;  %v492_v62 = vadd.f32 %v1707_v24, %v470_v35  ;;  %v1765_v25 = vld [vmem:[%s2112_s4] ss:$0 sm:$0xff] }
 0x165   : > { %v499_v47 = vadd.f32 %v1707_v24, %v477_v63 }
 0x166   : > { %v504_v2 = vpack.c.bf16 %v492_v62, %v491_v21  ;;  %v478_v3 = vmul.f32 %v1700_v33, %v456_v61 }
 0x168   : > { %1351 = vmatmul.mubr.msk.bf16.gmra.mrb[4].mxu0 %vm247_vm0, %v504_v2  ;;  %v500_v4 = vadd.f32 %v1707_v24, %v478_v3 }
 0x16a   : > { %v508_v5 = vpack.c.bf16 %v500_v4, %v499_v47 }
 0x16c   : > { %1359 = vmatmul.mubr.msk.bf16.gmra.mrb[4].mxu1 %vm247_vm0, %v508_v5 }
 0x22b   : > { %v1348_v6 = vpop.f32.mrb[0].mxu0 }
 0x22c   : > { %v1768_v45 = vadd.f32 %v1348_v6, %v1765_v25  ;;  %v606_v7 = vpop.f32.mrb[1].mxu0 }
 0x22d   : > { %v1771_v33 = vadd.f32 %v1765_v25, %v606_v7  ;;  %v1349_v54 = vpop.f32.mrb[2].mxu0 }
 0x22e   : > { %v1774_v8 = vmul.f32 0.70710677, %v1768_v45  ;;  %v1777_v24 = vadd.f32 %v1349_v54, %v1765_v25  ;;  %v609_v9 = vpop.f32.mrb[3].mxu0 }
 0x22f   : > { %v1780_v12 = vmul.f32 0.70710677, %v1771_v33  ;;  %v1783_v13 = vadd.f32 %v1765_v25, %v609_v9  ;;  %v1356_v14 = vpop.f32.mrb[0].mxu1 }
 0x230   : > { %v703_v15 = vand.u32 2147483647, %v1774_v8  ;;  %v1787_v55 = vmul.f32 0.70710677, %v1777_v24  ;;  %v638_v38 = vpop.f32.mrb[1].mxu1  ;;  %v1796_v49 = vadd.f32 %v1356_v14, %v1765_v25  ;;  %vm1007_vm1 = vcmp.ge.f32.partialorder %v1774_v8, 0.0 }
 0x231   : > { %v701_v18 = vand.u32 2147483647, %v1780_v12  ;;  %v1791_v19 = vmul.f32 0.70710677, %v1783_v13  ;;  %v1357_v42 = vpop.f32.mrb[2].mxu1  ;;  %v1799_v50 = vadd.f32 %v1765_v25, %v638_v38  ;;  %vm1005_vm2 = vcmp.ge.f32.partialorder %v1780_v12, 0.0 }
 0x232   : > { %v719_v22 = vmul.f32 0.3275911, %v703_v15  ;;  %v911_v16 = vsub.f32 0.0, %v703_v15  ;;  %v704_v26 = vand.u32 2147483647, %v1787_v55  ;;  %v641_v36 = vpop.f32.mrb[3].mxu1  ;;  %v1802_v52 = vadd.f32 %v1357_v42, %v1765_v25 }
 0x233   : > { %v717_v27 = vmul.f32 0.3275911, %v701_v18  ;;  %v909_v0 = vsub.f32 0.0, %v701_v18  ;;  %v702_v30 = vand.u32 2147483647, %v1791_v19  ;;  %v1808_v23 = vadd.f32 %v1765_v25, %v641_v36 }
 0x234   : > { %v735_v31 = vadd.f32 1.0, %v719_v22  ;;  %v927_v32 = vmul.f32 %v911_v16, %v703_v15  ;;  %v720_v34 = vmul.f32 0.3275911, %v704_v26  ;;  %v912_v20 = vsub.f32 0.0, %v704_v26 }
 0x235   : > { %v733_v39 = vadd.f32 1.0, %v717_v27  ;;  %v925_v1 = vmul.f32 %v909_v0, %v701_v18  ;;  %v718_v40 = vmul.f32 0.3275911, %v702_v30  ;;  %v910_v41 = vsub.f32 0.0, %v702_v30 }
 0x236   : > { %1414 = vrcp.f32 %v735_v31  ;;  %v736_v43 = vadd.f32 1.0, %v720_v34  ;;  %v928_v10 = vmul.f32 %v912_v20, %v704_v26  ;;  %v945_v11 = vmul.f32 1.442695, %v927_v32 }
 0x237   : > { %1416 = vrcp.f32 %v733_v39  ;;  %v734_v46 = vadd.f32 1.0, %v718_v40  ;;  %v926_v48 = vmul.f32 %v910_v41, %v702_v30  ;;  %v941_v51 = vmul.f32 1.442695, %v925_v1 }
 0x238   : > { %1418 = vrcp.f32 %v736_v43  ;;  %v947_v28 = vmul.f32 1.442695, %v928_v10  ;;  %v1805_v44 = vmul.f32 0.70710677, %v1796_v49  ;;  %v1811_v29 = vmul.f32 0.70710677, %v1799_v50 }
 0x239   : > { %v1814_v53 = vmul.f32 0.70710677, %v1802_v52  ;;  %1420 = vrcp.f32 %v734_v46  ;;  %v943_v17 = vmul.f32 1.442695, %v926_v48  ;;  %v1824_v21 = vmul.f32 0.70710677, %v1808_v23 }
 0x23a   : > { %v711_v57 = vand.u32 2147483647, %v1805_v44  ;;  %v709_v59 = vand.u32 2147483647, %v1811_v29  ;;  %1422 = vpow2.f32 %v945_v11  ;;  %vm1008_vm3 = vcmp.ge.f32.partialorder %v1787_v55, 0.0 }
 0x23b   : > { %v1352_v56 = vpop.f32.mrb[4].mxu0  ;;  %v712_v37 = vand.u32 2147483647, %v1814_v53  ;;  %1424 = vpow2.f32 %v941_v51  ;;  %v710_v6 = vand.u32 2147483647, %v1824_v21  ;;  %vm1006_vm4 = vcmp.ge.f32.partialorder %v1791_v19, 0.0 }
 0x23c   : > { %v1817_v58 = vpop.f32.mrb[5].mxu0  ;;  %v727_v60 = vmul.f32 0.3275911, %v711_v57  ;;  %v919_v61 = vsub.f32 0.0, %v711_v57  ;;  %v725_v62 = vmul.f32 0.3275911, %v709_v59  ;;  %1426 = vpow2.f32 %v947_v28 }
 0x23d   : > { %v1821_v35 = vpop.f32.mrb[6].mxu0  ;;  %v917_v63 = vsub.f32 0.0, %v709_v59  ;;  %v728_v2 = vmul.f32 0.3275911, %v712_v37  ;;  %v920_v5 = vsub.f32 0.0, %v712_v37  ;;  %v918_v10 = vsub.f32 0.0, %v710_v6 }
 0x23e   : > { %v743_v47 = vadd.f32 1.0, %v727_v60  ;;  %v935_v4 = vmul.f32 %v919_v61, %v711_v57  ;;  %v1829_v7 = vpop.f32.mrb[7].mxu0  ;;  %v741_v15 = vadd.f32 1.0, %v725_v62  ;;  %v726_v31 = vmul.f32 0.3275911, %v710_v6 }
 0x23f   : > { %v1831_v54 = vpop.f32.mrb[4].mxu1  ;;  %v933_v18 = vmul.f32 %v917_v63, %v709_v59  ;;  %v744_v26 = vadd.f32 1.0, %v728_v2  ;;  %v936_v20 = vmul.f32 %v920_v5, %v712_v37  ;;  %v1851_v36 = vadd.f32 %v1352_v56, %v1765_v25 }
 0x240   : > { %v1826_v3 = vpop.eup %1414  ;;  %v1836_v22 = vpop.f32.mrb[5].mxu1  ;;  %1428 = vrcp.f32 %v743_v47  ;;  %v961_v30 = vmul.f32 1.442695, %v935_v4  ;;  %v742_v41 = vadd.f32 1.0, %v726_v31  ;;  %v1855_v28 = vmul.f32 0.5, %v1768_v45 }
 0x241   : > { %v1833_v9 = vpop.eup %1416  ;;  %v767_v14 = vmul.f32 1.0614054, %v1826_v3  ;;  %v1839_v27 = vpop.f32.mrb[6].mxu1  ;;  %1430 = vrcp.f32 %v741_v15  ;;  %v957_v40 = vmul.f32 1.442695, %v933_v18  ;;  %v1863_v62 = vmul.f32 0.5, %v1771_v33 }
 0x242   : > { %v765_v16 = vmul.f32 1.0614054, %v1833_v9  ;;  %v1841_v32 = vpop.eup %1418  ;;  %1432 = vpow2.f32 %v943_v17  ;;  %v1843_v38 = vpop.f32.mrb[7].mxu1  ;;  %v963_v57 = vmul.f32 1.442695, %v936_v20  ;;  %v934_v45 = vmul.f32 %v918_v10, %v710_v6 }
 0x243   : > { %v783_v0 = vadd.f32 -1.4531521, %v767_v14  ;;  %v768_v1 = vmul.f32 1.0614054, %v1841_v32  ;;  %v1847_v42 = vpop.eup %1420  ;;  %1434 = vrcp.f32 %v744_v26  ;;  %v1860_v56 = vmul.f32 0.70710677, %v1851_v36 }
 0x244   : > { %v781_v34 = vadd.f32 -1.4531521, %v765_v16  ;;  %v766_v11 = vmul.f32 1.0614054, %v1847_v42  ;;  %1436 = vpow2.f32 %v961_v30  ;;  %v1423_v51 = vpop.eup %1422  ;;  %v1873_v16 = vmul.f32 0.5, %v1777_v24 }
 0x245   : > { %v799_v39 = vmul.f32 %v1826_v3, %v783_v0  ;;  %v784_v48 = vadd.f32 -1.4531521, %v768_v1  ;;  %1438 = vrcp.f32 %v742_v41  ;;  %v1425_v59 = vpop.eup %1424  ;;  %v1868_v14 = vand.u32 2147483647, %v1860_v56 }
 0x246   : > { %v797_v43 = vmul.f32 %v1833_v9, %v781_v34  ;;  %v782_v61 = vadd.f32 -1.4531521, %v766_v11  ;;  %1440 = vpow2.f32 %v957_v40  ;;  %v1427_v2 = vpop.eup %1426  ;;  %v1876_v33 = vmul.f32 0.5, %v1783_v13 }
 0x247   : > { %v815_v46 = vadd.f32 1.4214138, %v799_v39  ;;  %v800_v60 = vmul.f32 %v1841_v32, %v784_v48  ;;  %1442 = vpow2.f32 %v963_v57  ;;  %v1885_v24 = vmul.f32 1.442695, %v934_v45 }
 0x248   : > { %v813_v17 = vadd.f32 1.4214138, %v797_v43  ;;  %v798_v5 = vmul.f32 %v1847_v42, %v782_v61  ;;  %v723_v13 = vmul.f32 0.3275911, %v1868_v14  ;;  %vm1015_vm5 = vcmp.ge.f32.partialorder %v1805_v44, 0.0 }
 0x249   : > { %v831_v37 = vmul.f32 %v1826_v3, %v815_v46  ;;  %v816_v4 = vadd.f32 1.4214138, %v800_v60  ;;  %vm1013_vm6 = vcmp.ge.f32.partialorder %v1811_v29, 0.0  ;;  %vm1016_vm7 = vcmp.ge.f32.partialorder %v1814_v53, 0.0 }
 0x24a   : > { %v829_v63 = vmul.f32 %v1833_v9, %v813_v17  ;;  %v1870_v15 = vpop.eup %1428  ;;  %v814_v30 = vadd.f32 1.4214138, %v798_v5  ;;  %v739_v11 = vadd.f32 1.0, %v723_v13  ;;  %v1894_v17 = vadd.f32 %v1765_v25, %v1817_v58 }
 0x24b   : > { %v847_v47 = vadd.f32 -0.28449672, %v831_v37  ;;  %v1878_v26 = vpop.eup %1430  ;;  %v832_v0 = vmul.f32 %v1841_v32, %v816_v4  ;;  %v775_v31 = vmul.f32 1.0614054, %v1870_v15  ;;  %v677_v53 = vmul.f32 0.5, %v1799_v50 }
 0x24c   : > { %v845_v18 = vadd.f32 -0.28449672, %v829_v63  ;;  %v1433_v34 = vpop.eup %1432  ;;  %v773_v39 = vmul.f32 1.0614054, %v1878_v26  ;;  %v830_v41 = vmul.f32 %v1847_v42, %v814_v30  ;;  %1444 = vrcp.f32 %v739_v11 }
 0x24d   : > { %v863_v6 = vmul.f32 %v1826_v3, %v847_v47  ;;  %v848_v40 = vadd.f32 -0.28449672, %v832_v0  ;;  %v791_v43 = vadd.f32 -1.4531521, %v775_v31  ;;  %v1889_v10 = vpop.eup %1434  ;;  %1446 = vpow2.f32 %v1885_v24 }
 0x24e   : > { %v861_v20 = vmul.f32 %v1833_v9, %v845_v18  ;;  %v789_v48 = vadd.f32 -1.4531521, %v773_v39  ;;  %v1896_v57 = vpop.eup %1436  ;;  %v846_v61 = vadd.f32 -0.28449672, %v830_v41  ;;  %v776_v58 = vmul.f32 1.0614054, %v1889_v10 }
 0x24f   : > { %v879_v1 = vadd.f32 0.2548296, %v863_v6  ;;  %v864_v60 = vmul.f32 %v1841_v32, %v848_v40  ;;  %v807_v63 = vmul.f32 %v1870_v15, %v791_v43  ;;  %v1902_v45 = vpop.eup %1438  ;;  %vm1014_vm8 = vcmp.ge.f32.partialorder %v1824_v21, 0.0 }
 0x250   : > { %v877_v46 = vadd.f32 0.2548296, %v861_v20  ;;  %v805_v4 = vmul.f32 %v1878_v26, %v789_v48  ;;  %v1441_v0 = vpop.eup %1440  ;;  %v792_v20 = vadd.f32 -1.4531521, %v776_v58  ;;  %v774_v39 = vmul.f32 1.0614054, %v1902_v45 }
 0x251   : > { %v895_v37 = vmul.f32 %v1826_v3, %v879_v1  ;;  %v880_v18 = vadd.f32 0.2548296, %v864_v60  ;;  %v862_v3 = vmul.f32 %v1847_v42, %v846_v61  ;;  %v823_v6 = vadd.f32 1.4214138, %v807_v63  ;;  %v1912_v41 = vpop.eup %1442 }
 0x252   : > { %v893_v47 = vmul.f32 %v1833_v9, %v877_v46  ;;  %v821_v31 = vadd.f32 1.4214138, %v805_v4  ;;  %v790_v46 = vadd.f32 -1.4531521, %v774_v39  ;;  %vm1011_vm9 = vcmp.ge.f32.partialorder %v1860_v56, 0.0 }
 0x253   : > { %v975_v5 = vmul.f32 %v1423_v51, %v895_v37  ;;  %v896_v9 = vmul.f32 %v1841_v32, %v880_v18  ;;  %v878_v1 = vadd.f32 0.2548296, %v862_v3  ;;  %v839_v40 = vmul.f32 %v1870_v15, %v823_v6 }
 0x254   : > { %v973_v30 = vmul.f32 %v1425_v59, %v893_v47  ;;  %v837_v43 = vmul.f32 %v1878_v26, %v821_v31  ;;  %v808_v59 = vmul.f32 %v1889_v10, %v792_v20  ;;  %v806_v47 = vmul.f32 %v1902_v45, %v790_v46 }
 0x255   : > { %v991_v13 = vsub.f32 1.0, %v975_v5  ;;  %v976_v11 = vmul.f32 %v1427_v2, %v896_v9  ;;  %v894_v37 = vmul.f32 %v1847_v42, %v878_v1  ;;  %v855_v60 = vadd.f32 -0.28449672, %v839_v40 }
 0x256   : > { %v989_v51 = vsub.f32 1.0, %v973_v30  ;;  %v853_v32 = vadd.f32 -0.28449672, %v837_v43  ;;  %v824_v63 = vadd.f32 1.4214138, %v808_v59  ;;  %v1929_v39 = vpop.eup %1444 }
 0x257   : > { %v1023_v48 = vsub.f32 0.0, %v991_v13  ;;  %v992_v58 = vsub.f32 1.0, %v976_v11  ;;  %v974_v5 = vmul.f32 %v1433_v34, %v894_v37  ;;  %v871_v18 = vmul.f32 %v1870_v15, %v855_v60 }
 0x258   : > { %v1021_v61 = vsub.f32 0.0, %v989_v51  ;;  %v869_v2 = vmul.f32 %v1878_v26, %v853_v32  ;;  %v840_v42 = vmul.f32 %v1889_v10, %v824_v63  ;;  %v1927_v6 = vmul.f32 0.70710677, %v1894_v17 }
 0x259   : > { %v1039_v4 = vsel %vm1007_vm1, %v991_v13, %v1023_v48  ;;  %v1024_v31 = vsub.f32 0.0, %v992_v58  ;;  %v990_v20 = vsub.f32 1.0, %v974_v5  ;;  %v887_v8 = vadd.f32 0.2548296, %v871_v18 }
 0x25a   : > { %v1037_v3 = vsel %vm1005_vm2, %v989_v51, %v1021_v61  ;;  %v1055_v30 = vadd.f32 1.0, %v1039_v4  ;;  %v885_v34 = vadd.f32 0.2548296, %v869_v2  ;;  %v856_v13 = vadd.f32 -0.28449672, %v840_v42 }
 0x25b   : > { %v822_v9 = vadd.f32 1.4214138, %v806_v47  ;;  %v1053_v12 = vadd.f32 1.0, %v1037_v3  ;;  %v1040_v1 = vsel %vm1008_vm3, %v992_v58, %v1024_v31  ;;  %v1022_v40 = vsub.f32 0.0, %v990_v20 }
 0x25c   : > { %v903_v51 = vmul.f32 %v1870_v15, %v887_v8  ;;  %v1056_v43 = vadd.f32 1.0, %v1040_v1  ;;  %v901_v59 = vmul.f32 %v1878_v26, %v885_v34  ;;  %v872_v46 = vmul.f32 %v1889_v10, %v856_v13 }
 0x25d   : > { %v838_v48 = vmul.f32 %v1902_v45, %v822_v9  ;;  %v1071_v11 = vmul.f32 %v1055_v30, %v1855_v28  ;;  %v1038_v24 = vsel %vm1006_vm4, %v990_v20, %v1022_v40  ;;  %v771_v55 = vmul.f32 1.0614054, %v1929_v39  ;;  %v1447_v30 = vpop.eup %1446 }
 0x25e   : > { %v983_v37 = vmul.f32 %v1896_v57, %v903_v51  ;;  %v1072_v60 = vmul.f32 %v1056_v43, %v1873_v16  ;;  %v1054_v15 = vadd.f32 1.0, %v1038_v24  ;;  %v981_v61 = vmul.f32 %v1441_v0, %v901_v59 }
 0x25f   : > { %v888_v32 = vadd.f32 0.2548296, %v872_v46  ;;  %v1069_v26 = vmul.f32 %v1053_v12, %v1863_v62  ;;  %v854_v19 = vadd.f32 -0.28449672, %v838_v48  ;;  %v787_v63 = vadd.f32 -1.4531521, %v771_v55 }
 0x260   : > { %v999_v28 = vsub.f32 1.0, %v983_v37  ;;  %v1287_v47 = vpack.c.bf16 %v1072_v60, %v1071_v11  ;;  %v1070_v57 = vmul.f32 %v1054_v15, %v1876_v33  ;;  %v997_v4 = vsub.f32 1.0, %v981_v61 }
 0x261   : > { %v904_v16 = vmul.f32 %v1889_v10, %v888_v32  ;;  %v870_v58 = vmul.f32 %v1902_v45, %v854_v19  ;;  %v803_v62 = vmul.f32 %v1929_v39, %v787_v63  ;;  %v1956_v5 = vand.u32 2147483647, %v1927_v6 }
 0x262   : > { %v1031_v0 = vsub.f32 0.0, %v999_v28  ;;  %1319 = vst [vmem:[%s1949_s17 + $0x8] sm:$0xff] %v1287_v47   ;;  %v1282_v18 = vpack.c.bf16 %v1070_v57, %v1069_v26  ;;  %v915_v33 = vsub.f32 0.0, %v1868_v14  ;;  %v1029_v20 = vsub.f32 0.0, %v997_v4 }
 0x263   : > { %v984_v3 = vmul.f32 %v1912_v41, %v904_v16  ;;  %v886_v2 = vadd.f32 0.2548296, %v870_v58  ;;  %v819_v42 = vadd.f32 1.4214138, %v803_v62  ;;  %v721_v10 = vmul.f32 0.3275911, %v1956_v5 }
 0x264   : > { %1283 = vst [vmem:[%s1949_s17] sm:$0xff] %v1282_v18   ;;  %v1047_v31 = vsel %vm1015_vm5, %v999_v28, %v1031_v0  ;;  %v1966_v34 = vadd.f32 %v1821_v35, %v1765_v25  ;;  %v679_v13 = vmul.f32 0.5, %v1796_v49  ;;  %v680_v12 = vmul.f32 0.5, %v1802_v52 }
 0x265   : > { %v1000_v8 = vsub.f32 1.0, %v984_v3  ;;  %v902_v44 = vmul.f32 %v1902_v45, %v886_v2  ;;  %v835_v41 = vmul.f32 %v1929_v39, %v819_v42  ;;  %v737_v9 = vadd.f32 1.0, %v721_v10 }
 0x266   : > { %v931_v40 = vmul.f32 %v915_v33, %v1868_v14  ;;  %v1063_v51 = vadd.f32 1.0, %v1047_v31  ;;  %v1045_v35 = vsel %vm1013_vm6, %v997_v4, %v1029_v20  ;;  %v1976_v49 = vmul.f32 0.70710677, %v1966_v34 }
 0x267   : > { %v1032_v1 = vsub.f32 0.0, %v1000_v8  ;;  %v982_v43 = vmul.f32 %v1447_v30, %v902_v44  ;;  %1448 = vrcp.f32 %v737_v9  ;;  %v1980_v45 = vadd.f32 %v1765_v25, %v1829_v7 }
 0x268   : > { %v851_v52 = vadd.f32 -0.28449672, %v835_v41  ;;  %v1984_v14 = vadd.f32 %v1831_v54, %v1765_v25  ;;  %v953_v48 = vmul.f32 1.442695, %v931_v40  ;;  %v708_v11 = vand.u32 2147483647, %v1976_v49 }
 0x269   : > { %v1048_v59 = vsel %vm1016_vm7, %v1000_v8, %v1032_v1  ;;  %v998_v46 = vsub.f32 1.0, %v982_v43  ;;  %v1079_v24 = vmul.f32 %v1063_v51, %v679_v13  ;;  %v1989_v60 = vmul.f32 0.70710677, %v1980_v45 }
 0x26a   : > { %v1064_v29 = vadd.f32 1.0, %v1048_v59  ;;  %v1061_v7 = vadd.f32 1.0, %v1045_v35  ;;  %v724_v15 = vmul.f32 0.3275911, %v708_v11  ;;  %v1993_v61 = vmul.f32 0.70710677, %v1984_v14 }
 0x26b   : > { %v1030_v55 = vsub.f32 0.0, %v998_v46  ;;  %v867_v50 = vmul.f32 %v1929_v39, %v851_v52  ;;  %v706_v26 = vand.u32 2147483647, %v1989_v60  ;;  %v678_v28 = vmul.f32 0.5, %v1808_v23 }
 0x26c   : > { %v1080_v37 = vmul.f32 %v1064_v29, %v680_v12  ;;  %1450 = vpow2.f32 %v953_v48  ;;  %v740_v63 = vadd.f32 1.0, %v724_v15  ;;  %v913_v47 = vsub.f32 0.0, %v1956_v5 }
 0x26d   : > { %v1046_v32 = vsel %vm1014_vm8, %v998_v46, %v1030_v55  ;;  %v722_v21 = vmul.f32 0.3275911, %v706_v26  ;;  %v715_v57 = vand.u32 2147483647, %v1993_v61  ;;  %v1077_v4 = vmul.f32 %v1061_v7, %v677_v53 }
 0x26e   : > { %v1307_v54 = vpack.c.bf16 %v1080_v37, %v1079_v24  ;;  %v1062_v19 = vadd.f32 1.0, %v1046_v32  ;;  %1452 = vrcp.f32 %v740_v63  ;;  %v883_v58 = vadd.f32 0.2548296, %v867_v50 }
 0x26f   : > { %v738_v62 = vadd.f32 1.0, %v722_v21  ;;  %v731_v18 = vmul.f32 0.3275911, %v715_v57  ;;  %v916_v23 = vsub.f32 0.0, %v708_v11  ;;  %v929_v2 = vmul.f32 %v913_v47, %v1956_v5 }
 0x270   : > { %1323 = vst [vmem:[%s1949_s17 + $0x28] sm:$0xff] %v1307_v54   ;;  %v1078_v16 = vmul.f32 %v1062_v19, %v678_v28  ;;  %v2005_v30 = vadd.f32 %v1765_v25, %v1836_v22  ;;  %v2009_v31 = vadd.f32 %v1839_v27, %v1765_v25  ;;  %v899_v20 = vmul.f32 %v1929_v39, %v883_v58 }
 0x271   : > { %v1449_v0 = vpop.eup %1448  ;;  %1454 = vrcp.f32 %v738_v62  ;;  %v747_v42 = vadd.f32 1.0, %v731_v18  ;;  %v932_v13 = vmul.f32 %v916_v23, %v708_v11  ;;  %v2014_v5 = vadd.f32 %v1765_v25, %v1843_v38 }
 0x272   : > { %v1302_v3 = vpack.c.bf16 %v1078_v16, %v1077_v4  ;;  %v769_v33 = vmul.f32 1.0614054, %v1449_v0  ;;  %v949_v44 = vmul.f32 1.442695, %v929_v2  ;;  %v2017_v41 = vmul.f32 0.70710677, %v2005_v30 }
 0x273   : > { %1456 = vrcp.f32 %v747_v42  ;;  %v2020_v22 = vmul.f32 0.70710677, %v2009_v31  ;;  %v914_v1 = vsub.f32 0.0, %v706_v26  ;;  %v955_v25 = vmul.f32 1.442695, %v932_v13 }
 0x274   : > { %1322 = vst [vmem:[%s1949_s17 + $0x20] sm:$0xff] %v1302_v3   ;;  %v785_v10 = vadd.f32 -1.4531521, %v769_v33  ;;  %v713_v39 = vand.u32 2147483647, %v2017_v41  ;;  %1458 = vpow2.f32 %v949_v44  ;;  %v923_v59 = vsub.f32 0.0, %v715_v57 }
 0x275   : > { %v716_v40 = vand.u32 2147483647, %v2020_v22  ;;  %v2027_v38 = vmul.f32 0.70710677, %v2014_v5  ;;  %v930_v37 = vmul.f32 %v914_v1, %v706_v26  ;;  %v2045_v13 = vmul.f32 0.5, %v1851_v36 }
 0x276   : > { %v801_v8 = vmul.f32 %v1449_v0, %v785_v10  ;;  %v1451_v9 = vpop.eup %1450  ;;  %v729_v29 = vmul.f32 0.3275911, %v713_v39  ;;  %v939_v28 = vmul.f32 %v923_v59, %v715_v57  ;;  %v921_v57 = vsub.f32 0.0, %v713_v39 }
 0x277   : > { %v979_v27 = vmul.f32 %v1451_v9, %v899_v20  ;;  %v732_v52 = vmul.f32 0.3275911, %v716_v40  ;;  %v2031_v53 = vand.u32 2147483647, %v2027_v38  ;;  %v951_v16 = vmul.f32 1.442695, %v930_v37 }
 0x278   : > { %v817_v12 = vadd.f32 1.4214138, %v801_v8  ;;  %v2024_v51 = vpop.eup %1452  ;;  %v745_v55 = vadd.f32 1.0, %v729_v29  ;;  %v969_v2 = vmul.f32 1.442695, %v939_v28  ;;  %v924_v42 = vsub.f32 0.0, %v716_v40 }
 0x279   : > { %v772_v35 = vmul.f32 1.0614054, %v2024_v51  ;;  %v995_v11 = vsub.f32 1.0, %v979_v27  ;;  %v748_v54 = vadd.f32 1.0, %v732_v52  ;;  %v730_v32 = vmul.f32 0.3275911, %v2031_v53 }
 0x27a   : > { %v833_v43 = vmul.f32 %v1449_v0, %v817_v12  ;;  %1460 = vrcp.f32 %v745_v55  ;;  %v937_v1 = vmul.f32 %v921_v57, %v713_v39  ;;  %vm1009_vm10 = vcmp.ge.f32.partialorder %v1927_v6, 0.0 }
 0x27b   : > { %v2033_v48 = vpop.eup %1454  ;;  %v788_v24 = vadd.f32 -1.4531521, %v772_v35  ;;  %1462 = vrcp.f32 %v748_v54  ;;  %v746_v21 = vadd.f32 1.0, %v730_v32  ;;  %v1027_v58 = vsub.f32 0.0, %v995_v11 }
 0x27c   : > { %v849_v46 = vadd.f32 -0.28449672, %v833_v43  ;;  %v770_v15 = vmul.f32 1.0614054, %v2033_v48  ;;  %1464 = vpow2.f32 %v955_v25  ;;  %v2051_v43 = vmul.f32 0.5, %v1894_v17 }
 0x27d   : > { %v804_v50 = vmul.f32 %v2024_v51, %v788_v24  ;;  %v2038_v19 = vpop.eup %1456  ;;  %1466 = vrcp.f32 %v746_v21  ;;  %v1043_v9 = vsel %vm1011_vm9, %v995_v11, %v1027_v58  ;;  %v940_v35 = vmul.f32 %v924_v42, %v716_v40 }
 0x27e   : > { %v865_v7 = vmul.f32 %v1449_v0, %v849_v46  ;;  %v786_v47 = vadd.f32 -1.4531521, %v770_v15  ;;  %v779_v26 = vmul.f32 1.0614054, %v2038_v19  ;;  %v1459_v10 = vpop.eup %1458  ;;  %1468 = vpow2.f32 %v951_v16 }
 0x27f   : > { %v820_v4 = vadd.f32 1.4214138, %v804_v50  ;;  %1470 = vpow2.f32 %v969_v2  ;;  %v676_v36 = vmul.f32 0.5, %v1966_v34  ;;  %v922_v46 = vsub.f32 0.0, %v2031_v53 }
 0x280   : > { %v881_v63 = vadd.f32 0.2548296, %v865_v7  ;;  %v802_v18 = vmul.f32 %v2033_v48, %v786_v47  ;;  %v795_v33 = vadd.f32 -1.4531521, %v779_v26  ;;  %v1059_v39 = vadd.f32 1.0, %v1043_v9 }
 0x281   : > { %v836_v3 = vmul.f32 %v2024_v51, %v820_v4  ;;  %vm1012_vm11 = vcmp.ge.f32.partialorder %v1976_v49, 0.0  ;;  %v965_v55 = vmul.f32 1.442695, %v937_v1  ;;  %v971_v32 = vmul.f32 1.442695, %v940_v35 }
 0x282   : > { %v897_v62 = vmul.f32 %v1449_v0, %v881_v63  ;;  %v818_v23 = vadd.f32 1.4214138, %v802_v18  ;;  %v811_v8 = vmul.f32 %v2038_v19, %v795_v33  ;;  %v938_v21 = vmul.f32 %v922_v46, %v2031_v53 }
 0x283   : > { %v852_v20 = vadd.f32 -0.28449672, %v836_v3  ;;  %1472 = vpow2.f32 %v965_v55  ;;  %vm1010_vm12 = vcmp.ge.f32.partialorder %v1989_v60, 0.0  ;;  %v1075_v6 = vmul.f32 %v1059_v39, %v2045_v13 }
 0x284   : > { %v977_v0 = vmul.f32 %v1459_v10, %v897_v62  ;;  %v834_v44 = vmul.f32 %v2033_v48, %v818_v23  ;;  %v827_v27 = vadd.f32 1.4214138, %v811_v8  ;;  %v2053_v59 = vpop.eup %1460  ;;  %1474 = vpow2.f32 %v971_v32 }
 0x285   : > { %v868_v12 = vmul.f32 %v2024_v51, %v852_v20  ;;  %v2059_v52 = vpop.eup %1462  ;;  %v777_v40 = vmul.f32 1.0614054, %v2053_v59  ;;  %v967_v10 = vmul.f32 1.442695, %v938_v21  ;;  %v674_v60 = vmul.f32 0.5, %v1980_v45 }
 0x286   : > { %v850_v25 = vadd.f32 -0.28449672, %v834_v44  ;;  %v843_v29 = vmul.f32 %v2038_v19, %v827_v27  ;;  %v993_v11 = vsub.f32 1.0, %v977_v0  ;;  %v780_v34 = vmul.f32 1.0614054, %v2059_v52  ;;  %v1465_v7 = vpop.eup %1464 }
 0x287   : > { %v884_v56 = vadd.f32 0.2548296, %v868_v12  ;;  %v793_v54 = vadd.f32 -1.4531521, %v777_v40  ;;  %v2066_v50 = vpop.eup %1466  ;;  %1476 = vpow2.f32 %v967_v10  ;;  %vm1019_vm13 = vcmp.ge.f32.partialorder %v1993_v61, 0.0 }
 0x288   : > { %v866_v17 = vmul.f32 %v2033_v48, %v850_v25  ;;  %v859_v37 = vadd.f32 -0.28449672, %v843_v29  ;;  %v796_v47 = vadd.f32 -1.4531521, %v780_v34  ;;  %v1025_v4 = vsub.f32 0.0, %v993_v11  ;;  %v1469_v58 = vpop.eup %1468 }
 0x289   : > { %v900_v24 = vmul.f32 %v2024_v51, %v884_v56  ;;  %v809_v51 = vmul.f32 %v2053_v59, %v793_v54  ;;  %v778_v26 = vmul.f32 1.0614054, %v2066_v50  ;;  %vm1017_vm14 = vcmp.ge.f32.partialorder %v2017_v41, 0.0 }
 0x28a   : > { %v882_v15 = vadd.f32 0.2548296, %v866_v17  ;;  %v875_v63 = vmul.f32 %v2038_v19, %v859_v37  ;;  %v812_v3 = vmul.f32 %v2059_v52, %v796_v47  ;;  %v1041_v20 = vsel %vm1009_vm10, %v993_v11, %v1025_v4 }
 0x28b   : > { %v980_v28 = vmul.f32 %v1465_v7, %v900_v24  ;;  %v825_v57 = vadd.f32 1.4214138, %v809_v51  ;;  %v794_v23 = vadd.f32 -1.4531521, %v778_v26  ;;  %v1057_v56 = vadd.f32 1.0, %v1041_v20 }
 0x28c   : > { %v898_v16 = vmul.f32 %v2033_v48, %v882_v15  ;;  %v891_v18 = vadd.f32 0.2548296, %v875_v63  ;;  %v828_v42 = vadd.f32 1.4214138, %v812_v3  ;;  %v1471_v48 = vpop.eup %1470  ;;  %vm1020_vm15 = vcmp.ge.f32.partialorder %v2020_v22, 0.0 }
 0x28d   : > { %v996_v62 = vsub.f32 1.0, %v980_v28  ;;  %v841_v0 = vmul.f32 %v2053_v59, %v825_v57  ;;  %v810_v44 = vmul.f32 %v2066_v50, %v794_v23  ;;  %v1473_v39 = vpop.eup %1472  ;;  %v1073_v7 = vmul.f32 %v1057_v56, %v2051_v43 }
 0x28e   : > { %v978_v33 = vmul.f32 %v1469_v58, %v898_v16  ;;  %v907_v53 = vmul.f32 %v2038_v19, %v891_v18  ;;  %v844_v27 = vmul.f32 %v2059_v52, %v828_v42  ;;  %v1475_v54 = vpop.eup %1474  ;;  %v683_v61 = vmul.f32 0.5, %v1984_v14 }
 0x28f   : > { %v1028_v2 = vsub.f32 0.0, %v996_v62  ;;  %v857_v25 = vadd.f32 -0.28449672, %v841_v0  ;;  %v826_v35 = vadd.f32 1.4214138, %v810_v44  ;;  %vm1018_vm0 = vcmp.ge.f32.partialorder %v2027_v38, 0.0 }
 0x290   : > { %v994_v8 = vsub.f32 1.0, %v978_v33  ;;  %v987_v12 = vmul.f32 %v1471_v48, %v907_v53  ;;  %v860_v29 = vadd.f32 -0.28449672, %v844_v27  ;;  %v681_v20 = vmul.f32 0.5, %v2005_v30 }
 0x291   : > { %v1044_v9 = vsel %vm1012_vm11, %v996_v62, %v1028_v2  ;;  %v873_v49 = vmul.f32 %v2053_v59, %v857_v25  ;;  %v842_v17 = vmul.f32 %v2066_v50, %v826_v35  ;;  %v1477_v26 = vpop.eup %1476  ;;  %v684_v2 = vmul.f32 0.5, %v2009_v31 }
 0x292   : > { %v1060_v19 = vadd.f32 1.0, %v1044_v9  ;;  %v1026_v1 = vsub.f32 0.0, %v994_v8  ;;  %v1003_v24 = vsub.f32 1.0, %v987_v12  ;;  %v876_v37 = vmul.f32 %v2059_v52, %v860_v29 }
 0x293   : > { %v889_v34 = vadd.f32 0.2548296, %v873_v49  ;;  %v858_v13 = vadd.f32 -0.28449672, %v842_v17  ;;  %v682_v22 = vmul.f32 0.5, %v2014_v5 }
 0x294   : > { %v1076_v46 = vmul.f32 %v1060_v19, %v676_v36  ;;  %v1042_v11 = vsel %vm1010_vm12, %v994_v8, %v1026_v1  ;;  %v892_v15 = vadd.f32 0.2548296, %v876_v37  ;;  %v1035_v63 = vsub.f32 0.0, %v1003_v24 }
 0x295   : > { %v1058_v40 = vadd.f32 1.0, %v1042_v11  ;;  %v905_v32 = vmul.f32 %v2053_v59, %v889_v34  ;;  %v874_v28 = vmul.f32 %v2066_v50, %v858_v13 }
 0x296   : > { %v1297_v55 = vpack.c.bf16 %v1076_v46, %v1075_v6  ;;  %v908_v47 = vmul.f32 %v2059_v52, %v892_v15  ;;  %v1051_v58 = vsel %vm1019_vm13, %v1003_v24, %v1035_v63 }
 0x297   : > { %v1074_v36 = vmul.f32 %v1058_v40, %v674_v60  ;;  %v985_v21 = vmul.f32 %v1473_v39, %v905_v32  ;;  %v890_v4 = vadd.f32 0.2548296, %v874_v28  ;;  %v1067_v33 = vadd.f32 1.0, %v1051_v58 }
 0x298   : > { %1321 = vst [vmem:[%s1949_s17 + $0x18] sm:$0xff] %v1297_v55   ;;  %v988_v16 = vmul.f32 %v1475_v54, %v908_v47 }
 0x299   : > { %v1292_v45 = vpack.c.bf16 %v1074_v36, %v1073_v7  ;;  %v1001_v51 = vsub.f32 1.0, %v985_v21  ;;  %v906_v43 = vmul.f32 %v2066_v50, %v890_v4  ;;  %v1083_v10 = vmul.f32 %v1067_v33, %v683_v61 }
 0x29a   : > { %v1004_v62 = vsub.f32 1.0, %v988_v16 }
 0x29b   : > { %1320 = vst [vmem:[%s1949_s17 + $0x10] sm:$0xff] %v1292_v45   ;;  %v1033_v18 = vsub.f32 0.0, %v1001_v51  ;;  %v986_v59 = vmul.f32 %v1477_v26, %v906_v43 }
 0x29c   : > { %v1036_v3 = vsub.f32 0.0, %v1004_v62 }
 0x29d   : > { %v1049_v57 = vsel %vm1017_vm14, %v1001_v51, %v1033_v18  ;;  %v1002_v52 = vsub.f32 1.0, %v986_v59 }
 0x29e   : > { %v1052_v23 = vsel %vm1020_vm15, %v1004_v62, %v1036_v3  ;;  %v1065_v42 = vadd.f32 1.0, %v1049_v57 }
 0x29f   : > { %v1068_v50 = vadd.f32 1.0, %v1052_v23  ;;  %v1034_v53 = vsub.f32 0.0, %v1002_v52 }
 0x2a0   : > { %v1081_v44 = vmul.f32 %v1065_v42, %v681_v20 }
 0x2a1   : > { %v1084_v41 = vmul.f32 %v1068_v50, %v684_v2  ;;  %v1050_v48 = vsel %vm1018_vm0, %v1002_v52, %v1034_v53 }
 0x2a2   : > { %v1066_v8 = vadd.f32 1.0, %v1050_v48 }
 0x2a3   : > { %v1317_v0 = vpack.c.bf16 %v1084_v41, %v1083_v10 }
 0x2a4   : > { %v1082_v9 = vmul.f32 %v1066_v8, %v682_v22 }
 0x2a5   : > { %1325 = vst [vmem:[%s1949_s17 + $0x38] sm:$0xff] %v1317_v0  }
 0x2a6   : > { %v1312_v14 = vpack.c.bf16 %v1082_v9, %v1081_v44 }
 0x2a8   : > { %1324 = vst [vmem:[%s1949_s17 + $0x30] sm:$0xff] %v1312_v14  }
 0x2a9 PF: > { %s15_s18 = sadd.s32 1, %s1484_s18  }
 0x2aa   : > { %p12_p4 = scmp.ge.s32.totalorder %s15_s18, 10  }
 0x2ac   :  { %14 = sbr.rel (!%p12_p4) target bundleno = 1 (0x1), region = 70 }

// kernel: _lambda_.5
= control target key start
LH: loop header
LB: loop body
LE: loop exit
PB: predicated region body
PF: predicated region fallthrough
CT: control target
= control target key end

     0   :  { %s7511_s21 = smov 0   ;;  %s10436_s0 = inlined_call_operand.vmem [shape: bf16[16,64,64], index: 0, kind: input, shape index: {}]   ;;  %s10437_s1 = inlined_call_operand.vmem [shape: bf16[16,2,8,64], index: 1, kind: input, shape index: {}]   ;;  %s10438_s2 = inlined_call_operand.vmem [shape: f32[4,64,8], index: 2, kind: input, shape index: {}]   ;;  %s10439_s3 = inlined_call_operand.vmem [shape: bf16[64,64], index: 3, kind: input, shape index: {}]   ;;  %s10440_s4 = inlined_call_operand.vmem [shape: f32[1,64], index: 4, kind: input, shape index: {}]   ;;  %s10441_s5 = inlined_call_operand.vmem [shape: f32[16,64,64], index: 5, kind: input, shape index: {}]   ;;  %s10442_s6 = inlined_call_operand.vmem [shape: f32[16,64,64], index: 6, kind: output, shape index: {}]  }
   0x1 LB: > { %s5848_s22 = sadd.s32 4294967295, %s7468_s21   ;;  %p5852_p0 = scmp.ge.s32.totalorder %s7468_s21, 1  ;;  %s7468_s21 = sphi %s7511_s21, %s16_s21  }
   0x2   : > { %p238_p1 = scmp.lt.s32.totalorder %s7468_s21, 5 }
   0x4   : > { %p239_p2 = pnand %p5852_p0, %p238_p1 }
   0x6   : > { %242 = sbr.rel (%p239_p2) target bundleno = 3386 (0xd3a), region = 44 }
   0xd   : > { %s5853_s23 = sshll.u32 %s5848_s22, 2  ;;  %vm404_vm0 = vcmask 130048   ;;  %s7470_s8 = smov 112   ;;  %v7619_v27 = vld [vmem:[%s10438_s2 + $0x10] sm:$0xff]  ;;  %vm849_vm1 = vcmask 64512   ;;  %v7624_v35 = vld [vmem:[%s10438_s2] sm:$0xff] }
   0xe   : > { %p283_p3 = scmp.lt.s32.totalorder %s5853_s23, 15  ;;  %v7629_v36 = vld [vmem:[%s10438_s2 + $0x18] sm:$0xff]  ;;  %v7660_v59 = vld [vmem:[%s10438_s2 + $0x8] sm:$0xff]  ;;  %vm1230_vm2 = vcmask 1043456   ;;  %s7473_s14 = smov 32   ;;  %vm5339_vm3 = vcmask 261120  }
   0xf   : > { %s7474_s15 = smov 16   ;;  %vm5372_vm4 = vcmask 392192   ;;  %vm5460_vm5 = vcmask 523264  }
  0x10   : > { %s10708_s23 = smov (!%p283_p3, %s5853_s23), 15 }
  0x11   : > { %s6044_s24 = sshll.u32 %s10708_s23, 5  ;;  %s6045_s25 = sshll.u32 %s10708_s23, 3 }
  0x12   : > { %s7526_s28 = scalar_lea.vmem %s10436_s0, %s6044_s24  ;;  %s7531_s7 = scalar_lea.vmem %s10437_s1, %s6045_s25 }
  0x13   : > { %v343_v0 = vld [vmem:[%s7531_s7] sm:$0xf]  ;;  %v7535_v1 = vld [vmem:[%s7531_s7 + $0x8] sm:$0xf]  ;;  %v6886_v9 = vld [vmem:[%s7526_s28 + $0x10] sm:$0xff]   ;;  %s7471_s24 = smov 96  }
  0x14   : > { %v6882_v2 = vld [vmem:[%s7526_s28] sm:$0xff]   ;;  %6596 = vmatprep.subr.msk.bf16.mxu0 %vm404_vm0, %v343_v0  ;;  %6597 = vmatprep.subr.msk.bf16.mxu1 %vm404_vm0, %v7535_v1  ;;  %v418_v3 = vsel %vm404_vm0, %v343_v0, 0  ;;  %v518_v4 = vsel %vm404_vm0, %v7535_v1, 0  ;;  %v7544_v5 = vcombine.low %v343_v0, %v343_v0  ;;  %v6884_v7 = vld [vmem:[%s7526_s28 + $0x8] sm:$0xff]   ;;  %v6888_v10 = vld [vmem:[%s7526_s28 + $0x30] sm:$0xff]  }
  0x15   : > { %6229 = vmatpush3.bf16.xpose.msra.mxu0 %v418_v3  ;;  %6239 = vmatpush3.bf16.xpose.msra.mxu1 %v518_v4  ;;  %v7547_v6 = vld [vmem:[%s7526_s28 + $0x20] sm:$0xff]   ;;  %v6885_v8 = vld [vmem:[%s7526_s28 + $0x28] sm:$0xff]   ;;  %v7563_v11 = vld [vmem:[%s7531_s7 + $0x10] sm:$0xf] }
  0x16   : > { %6230 = vmatprep.mubr.msk.bf16.mxu0 %vm404_vm0, %v6882_v2  ;;  %1539 = vrot.lane.b32.xlu1 %v6882_v2, %s7470_s8  ;;  %v346_v12 = vld [vmem:[%s7531_s7 + $0x18] sm:$0xf]  ;;  %v618_v13 = vsel %vm404_vm0, %v7563_v11, 0  ;;  %v7579_v17 = vld [vmem:[%s7526_s28 + $0x40] sm:$0xff]   ;;  %v7593_v19 = vld [vmem:[%s7526_s28 + $0x48] sm:$0xff]  }
  0x17   : > { %6240 = vmatprep.mubr.msk.bf16.mxu1 %vm404_vm0, %v7547_v6  ;;  %1550 = vrot.lane.b32.xlu0 %v7544_v5, %s7470_s8  ;;  %v718_v14 = vsel %vm404_vm0, %v346_v12, 0  ;;  %v7572_v15 = vld [vmem:[%s7526_s28 + $0x18] sm:$0xff]   ;;  %v7583_v18 = vld [vmem:[%s7526_s28 + $0x60] sm:$0xff]   ;;  %v6893_v20 = vld [vmem:[%s7526_s28 + $0x68] sm:$0xff]  }
  0x18   : > { %6598 = vmatprep.subr.msk.bf16.mxu0 %vm404_vm0, %v7563_v11  ;;  %6599 = vmatprep.subr.msk.bf16.mxu1 %vm404_vm0, %v346_v12  ;;  %v6889_v16 = vld [vmem:[%s7526_s28 + $0x38] sm:$0xff]   ;;  %v7597_v21 = vld [vmem:[%s7526_s28 + $0x50] sm:$0xff]  }
  0x19   : > { %v7600_v22 = vld [vmem:[%s7526_s28 + $0x70] sm:$0xff]   ;;  %v7610_v23 = vld [vmem:[%s7526_s28 + $0x58] sm:$0xff]  }
  0x1a   : > { %1541 = vrot.lane.b32.xlu1 %v6884_v7, %s7470_s8  ;;  %v6897_v24 = vld [vmem:[%s7526_s28 + $0x78] sm:$0xff]   ;;  %v7665_v2 = vld [vmem:[%s10438_s2 + $0x30] sm:$0xff] }
  0x1b   : > { %v7670_v3 = vld [vmem:[%s10438_s2 + $0x38] sm:$0xff] }
  0x1c   : > { %6231 = vmatmul.mubr.msk.bf16.vlgmr.msra.gmra.mrb[0].mxu0 %vm404_vm0, %v6884_v7  ;;  %6241 = vmatmul.mubr.msk.bf16.vlgmr.msra.gmra.mrb[0].mxu1 %vm404_vm0, %v6885_v8 }
  0x1d   : > { %6234 = vmatprep.mubr.msk.bf16.mxu0 %vm404_vm0, %v6886_v9  ;;  %6244 = vmatprep.mubr.msk.bf16.mxu1 %vm404_vm0, %v6888_v10 }
  0x1e   : > { %6249 = vmatpush3.bf16.xpose.msra.mxu0 %v618_v13  ;;  %6259 = vmatpush3.bf16.xpose.msra.mxu1 %v718_v14 }
  0x1f   : > { %1543 = vrot.lane.b32.xlu1 %v6886_v9, %s7470_s8 }
  0x24   : > { %6235 = vmatmul.mubr.msk.bf16.gmra.mrb[4].mxu0 %vm404_vm0, %v7572_v15  ;;  %6245 = vmatmul.mubr.msk.bf16.gmra.mrb[4].mxu1 %vm404_vm0, %v6889_v16 }
  0x25   : > { %6250 = vmatprep.mubr.msk.bf16.mxu0 %vm404_vm0, %v7579_v17  ;;  %6260 = vmatprep.mubr.msk.bf16.mxu1 %vm404_vm0, %v7583_v18 }
  0x2c   : > { %6251 = vmatmul.mubr.msk.bf16.vlgmr.msra.gmra.mrb[8].mxu0 %vm404_vm0, %v7593_v19  ;;  %6261 = vmatmul.mubr.msk.bf16.vlgmr.msra.gmra.mrb[8].mxu1 %vm404_vm0, %v6893_v20 }
  0x2d   : > { %6254 = vmatprep.mubr.msk.bf16.mxu0 %vm404_vm0, %v7597_v21  ;;  %6264 = vmatprep.mubr.msk.bf16.mxu1 %vm404_vm0, %v7600_v22 }
  0x34   : > { %6255 = vmatmul.mubr.msk.bf16.gmra.mrb[12].mxu0 %vm404_vm0, %v7610_v23  ;;  %6265 = vmatmul.mubr.msk.bf16.gmra.mrb[12].mxu1 %vm404_vm0, %v6897_v24 }
  0xef   : > { %v6232_v25 = vpop.f32.mrb[0].mxu0  ;;  %v6242_v26 = vpop.f32.mrb[0].mxu1 }
  0xf0   : > { %v787_v28 = vmul.f32 0.25, %v6232_v25  ;;  %v795_v29 = vmul.f32 0.25, %v6242_v26  ;;  %v454_v30 = vpop.f32.mrb[1].mxu0  ;;  %v554_v31 = vpop.f32.mrb[1].mxu1 }
  0xf1   : > { %v785_v32 = vmul.f32 0.25, %v454_v30  ;;  %v6233_v33 = vpop.f32.mrb[2].mxu0  ;;  %v6243_v34 = vpop.f32.mrb[2].mxu1  ;;  %v793_v42 = vmul.f32 0.25, %v554_v31 }
  0xf2   : > { %v788_v37 = vmul.f32 0.25, %v6233_v33  ;;  %v457_v38 = vpop.f32.mrb[3].mxu0  ;;  %v557_v39 = vpop.f32.mrb[3].mxu1  ;;  %v7632_v40 = vadd.f32 %v795_v29, %v7619_v27  ;;  %v7635_v41 = vadd.f32 %v787_v28, %v7619_v27  ;;  %v796_v43 = vmul.f32 0.25, %v6243_v34 }
  0xf3   : > { %v7642_v46 = vadd.f32 %v785_v32, %v7624_v35  ;;  %v786_v48 = vmul.f32 0.25, %v457_v38  ;;  %v794_v49 = vmul.f32 0.25, %v557_v39  ;;  %v7652_v54 = vadd.f32 %v793_v42, %v7624_v35 }
  0xf4   : > { %v880_v44 = vsel %vm849_vm1, %v7632_v40, -inf  ;;  %v856_v45 = vsel %vm849_vm1, %v7635_v41, -inf  ;;  %v7645_v47 = vadd.f32 %v788_v37, %v7629_v36  ;;  %v7655_v55 = vadd.f32 %v796_v43, %v7629_v36  ;;  %v7705_v43 = vld [vmem:[%s10438_s2 + $0x20] sm:$0xff] }
  0xf5   : > { %881 = vmax.xlane.f32.xlu0 %v880_v44  ;;  %857 = vmax.xlane.f32.xlu1 %v856_v45  ;;  %v850_v52 = vsel %vm849_vm1, %v7642_v46, -inf  ;;  %v874_v4 = vsel %vm849_vm1, %v7652_v54, -inf  ;;  %v7677_v8 = vadd.f32 %v794_v49, %v7660_v59  ;;  %v7680_v9 = vadd.f32 %v786_v48, %v7660_v59  ;;  %v7710_v44 = vld [vmem:[%s10438_s2 + $0x28] sm:$0xff] }
  0xf6   : > { %v859_v53 = vsel %vm849_vm1, %v7645_v47, -inf  ;;  %v883_v7 = vsel %vm849_vm1, %v7655_v55, -inf }
  0xf7   : > { %v6236_v50 = vpop.f32.mrb[4].mxu0  ;;  %v6246_v51 = vpop.f32.mrb[4].mxu1  ;;  %v877_v24 = vsel %vm849_vm1, %v7677_v8, -inf  ;;  %v853_v25 = vsel %vm849_vm1, %v7680_v9, -inf }
  0xf8   : > { %v470_v56 = vpop.f32.mrb[5].mxu0  ;;  %v570_v57 = vpop.f32.mrb[5].mxu1  ;;  %v791_v61 = vmul.f32 0.25, %v6236_v50  ;;  %v799_v10 = vmul.f32 0.25, %v6246_v51 }
  0xf9   : > { %851 = vmax.xlane.f32.xlu0 %v850_v52  ;;  %860 = vmax.xlane.f32.xlu1 %v859_v53  ;;  %v6237_v58 = vpop.f32.mrb[6].mxu0  ;;  %v6247_v60 = vpop.f32.mrb[6].mxu1  ;;  %v789_v39 = vmul.f32 0.25, %v470_v56  ;;  %v797_v51 = vmul.f32 0.25, %v570_v57 }
  0xfa   : > { %v792_v62 = vmul.f32 0.25, %v6237_v58  ;;  %v473_v63 = vpop.f32.mrb[7].mxu0  ;;  %v573_v0 = vpop.f32.mrb[7].mxu1  ;;  %v800_v12 = vmul.f32 0.25, %v6247_v60  ;;  %v7683_v13 = vadd.f32 %v791_v61, %v7665_v2  ;;  %v7697_v33 = vadd.f32 %v799_v10, %v7665_v2 }
  0xfb   : > { %v790_v42 = vmul.f32 0.25, %v473_v63  ;;  %v798_v52 = vmul.f32 0.25, %v573_v0  ;;  %v7717_v53 = vadd.f32 %v789_v39, %v7705_v43 }
  0xfc   : > { %v7686_v14 = vadd.f32 %v792_v62, %v7670_v3  ;;  %v868_v31 = vsel %vm849_vm1, %v7683_v13, -inf  ;;  %v7700_v34 = vadd.f32 %v800_v12, %v7670_v3  ;;  %v892_v45 = vsel %vm849_vm1, %v7697_v33, -inf }
  0xfd   : > { %875 = vmax.xlane.f32.xlu0 %v874_v4  ;;  %884 = vmax.xlane.f32.xlu1 %v883_v7  ;;  %v7720_v56 = vadd.f32 %v790_v42, %v7710_v44  ;;  %v862_v57 = vsel %vm849_vm1, %v7717_v53, -inf  ;;  %v7727_v12 = vadd.f32 %v797_v51, %v7705_v43 }
  0xfe   : > { %v871_v32 = vsel %vm849_vm1, %v7686_v14, -inf  ;;  %v895_v48 = vsel %vm849_vm1, %v7700_v34, -inf }
  0xff   : > { %v6252_v16 = vpop.f32.mrb[8].mxu0  ;;  %v6262_v20 = vpop.f32.mrb[8].mxu1  ;;  %v865_v0 = vsel %vm849_vm1, %v7720_v56, -inf }
 0x100   : > { %v654_v26 = vpop.f32.mrb[9].mxu0  ;;  %v754_v28 = vpop.f32.mrb[9].mxu1  ;;  %v803_v63 = vmul.f32 0.25, %v6252_v16 }
 0x101   : > { %878 = vmax.xlane.f32.xlu1 %v877_v24  ;;  %854 = vmax.xlane.f32.xlu0 %v853_v25  ;;  %v6253_v29 = vpop.f32.mrb[10].mxu0  ;;  %v6263_v30 = vpop.f32.mrb[10].mxu1  ;;  %v7730_v24 = vadd.f32 %v798_v52, %v7710_v44  ;;  %v811_v25 = vmul.f32 0.25, %v6262_v20 }
 0x102   : > { %v657_v37 = vpop.f32.mrb[11].mxu0  ;;  %v757_v38 = vpop.f32.mrb[11].mxu1  ;;  %v804_v4 = vmul.f32 0.25, %v6253_v29  ;;  %v7733_v16 = vadd.f32 %v803_v63, %v7619_v27 }
 0x103   : > { %v889_v39 = vsel %vm849_vm1, %v7730_v24, -inf  ;;  %v802_v51 = vmul.f32 0.25, %v657_v37 }
 0x104   : > { %v7736_v29 = vadd.f32 %v804_v4, %v7629_v36  ;;  %v904_v42 = vsel %vm849_vm1, %v7733_v16, -inf  ;;  %v809_v4 = vmul.f32 0.25, %v754_v28 }
 0x105   : > { %869 = vmax.xlane.f32.xlu0 %v868_v31  ;;  %872 = vmax.xlane.f32.xlu1 %v871_v32  ;;  %v812_v31 = vmul.f32 0.25, %v6263_v30  ;;  %v886_v32 = vsel %vm849_vm1, %v7727_v12, -inf  ;;  %v7747_v30 = vadd.f32 %v811_v25, %v7619_v27  ;;  %v7760_v27 = vadd.f32 %v802_v51, %v7660_v59 }
 0x106   : > { %v907_v20 = vsel %vm849_vm1, %v7736_v29, -inf }
 0x107   : > { %v6256_v49 = vpop.f32.mrb[12].mxu0  ;;  %v6266_v50 = vpop.f32.mrb[12].mxu1  ;;  %v928_v52 = vsel %vm849_vm1, %v7747_v30, -inf  ;;  %v901_v25 = vsel %vm849_vm1, %v7760_v27, -inf }
 0x108   : > { %v670_v58 = vpop.f32.mrb[13].mxu0  ;;  %v770_v60 = vpop.f32.mrb[13].mxu1 }
 0x109   : > { %893 = vmax.xlane.f32.xlu0 %v892_v45  ;;  %896 = vmax.xlane.f32.xlu1 %v895_v48  ;;  %v6257_v61 = vpop.f32.mrb[14].mxu0  ;;  %v6267_v62 = vpop.f32.mrb[14].mxu1  ;;  %v7750_v45 = vadd.f32 %v812_v31, %v7629_v36  ;;  %v801_v48 = vmul.f32 0.25, %v654_v26  ;;  %v807_v36 = vmul.f32 0.25, %v6256_v49  ;;  %v7767_v31 = vadd.f32 %v809_v4, %v7624_v35 }
 0x10a   : > { %v673_v7 = vpop.f32.mrb[15].mxu0  ;;  %v773_v10 = vpop.f32.mrb[15].mxu1  ;;  %v808_v26 = vmul.f32 0.25, %v6257_v61  ;;  %v813_v51 = vmul.f32 0.25, %v770_v60 }
 0x10b   : > { %v931_v63 = vsel %vm849_vm1, %v7750_v45, -inf  ;;  %v922_v61 = vsel %vm849_vm1, %v7767_v31, -inf }
 0x10c   : > { %v7776_v49 = vadd.f32 %v808_v26, %v7670_v3  ;;  %v7816_v26 = vpop.permute.xlu1 %1539 }
 0x10d   : > { %863 = vmax.xlane.f32.xlu0 %v862_v57  ;;  %866 = vmax.xlane.f32.xlu1 %v865_v0  ;;  %v810_v57 = vmul.f32 0.25, %v757_v38  ;;  %v7757_v0 = vadd.f32 %v801_v48, %v7624_v35  ;;  %v815_v38 = vmul.f32 0.25, %v6266_v50 }
 0x10f   : > { %v898_v37 = vsel %vm849_vm1, %v7757_v0, -inf  ;;  %v7770_v28 = vadd.f32 %v810_v57, %v7660_v59  ;;  %v7783_v59 = vadd.f32 %v815_v38, %v7665_v2 }
 0x111   : > { %887 = vmax.xlane.f32.xlu0 %v886_v32  ;;  %890 = vmax.xlane.f32.xlu1 %v889_v39  ;;  %v816_v32 = vmul.f32 0.25, %v6267_v62  ;;  %v7773_v39 = vadd.f32 %v807_v36, %v7665_v2  ;;  %v925_v35 = vsel %vm849_vm1, %v7770_v28, -inf  ;;  %v919_v62 = vsel %vm849_vm1, %v7776_v49, -inf }
 0x113   : > { %v916_v50 = vsel %vm849_vm1, %v7773_v39, -inf  ;;  %v7790_v48 = vadd.f32 %v816_v32, %v7670_v3 }
 0x115   : > { %905 = vmax.xlane.f32.xlu0 %v904_v42  ;;  %908 = vmax.xlane.f32.xlu1 %v907_v20  ;;  %v805_v42 = vmul.f32 0.25, %v670_v58  ;;  %v806_v20 = vmul.f32 0.25, %v673_v7  ;;  %v940_v58 = vsel %vm849_vm1, %v7783_v59, -inf  ;;  %v943_v2 = vsel %vm849_vm1, %v7790_v48, -inf }
 0x116   : > { %v7807_v7 = vadd.f32 %v813_v51, %v7705_v43 }
 0x117   : > { %v7800_v4 = vadd.f32 %v806_v20, %v7710_v44 }
 0x118   : > { %v934_v57 = vsel %vm849_vm1, %v7807_v7, -inf }
 0x119   : > { %929 = vmax.xlane.f32.xlu0 %v928_v52  ;;  %932 = vmax.xlane.f32.xlu1 %v931_v63  ;;  %v814_v52 = vmul.f32 0.25, %v773_v10  ;;  %v7797_v63 = vadd.f32 %v805_v42, %v7705_v43  ;;  %v913_v60 = vsel %vm849_vm1, %v7800_v4, -inf  ;;  %v7822_v43 = vpop.permute.xlu0 %1550 }
 0x11b   : > { %v910_v3 = vsel %vm849_vm1, %v7797_v63, -inf  ;;  %v7810_v10 = vadd.f32 %v814_v52, %v7710_v44 }
 0x11d   : > { %899 = vmax.xlane.f32.xlu0 %v898_v37  ;;  %902 = vmax.xlane.f32.xlu1 %v901_v25  ;;  %v937_v36 = vsel %vm849_vm1, %v7810_v10, -inf  ;;  %v7818_v37 = vpop.permute.xlu1 %1541 }
 0x121   : > { %923 = vmax.xlane.f32.xlu0 %v922_v61  ;;  %926 = vmax.xlane.f32.xlu1 %v925_v35  ;;  %v7820_v25 = vpop.permute.xlu1 %1543 }
 0x125   : > { %917 = vmax.xlane.f32.xlu0 %v916_v50  ;;  %920 = vmax.xlane.f32.xlu1 %v919_v62 }
 0x129   : > { %941 = vmax.xlane.f32.xlu0 %v940_v58  ;;  %944 = vmax.xlane.f32.xlu1 %v943_v2 }
 0x12d   : > { %911 = vmax.xlane.f32.xlu0 %v910_v3  ;;  %914 = vmax.xlane.f32.xlu1 %v913_v60 }
 0x131   : > { %935 = vmax.xlane.f32.xlu0 %v934_v57  ;;  %938 = vmax.xlane.f32.xlu1 %v937_v36 }
 0x182   : > { %v882_v44 = vpop.xlane.xlu0 %881  ;;  %v858_v38 = vpop.xlane.xlu1 %857 }
 0x183   : > { %v956_v32 = vsub.f32 %v7632_v40, %v882_v44  ;;  %v948_v61 = vsub.f32 %v7635_v41, %v858_v38 }
 0x185   : > { %v998_v35 = vmul.f32 1.442695, %v956_v32  ;;  %v982_v42 = vmul.f32 1.442695, %v948_v61 }
 0x186   : > { %v852_v50 = vpop.xlane.xlu0 %851  ;;  %v861_v62 = vpop.xlane.xlu1 %860 }
 0x187   : > { %v946_v20 = vsub.f32 %v7642_v46, %v852_v50  ;;  %v949_v51 = vsub.f32 %v7645_v47, %v861_v62  ;;  %6910 = vpow2.f32 %v982_v42 }
 0x188   : > { %6912 = vpow2.f32 %v998_v35 }
 0x189   : > { %v978_v52 = vmul.f32 1.442695, %v946_v20  ;;  %v984_v58 = vmul.f32 1.442695, %v949_v51 }
 0x18a   : > { %v876_v2 = vpop.xlane.xlu0 %875  ;;  %v885_v3 = vpop.xlane.xlu1 %884 }
 0x18b   : > { %v954_v60 = vsub.f32 %v7652_v54, %v876_v2  ;;  %v957_v40 = vsub.f32 %v7655_v55, %v885_v3  ;;  %6914 = vpow2.f32 %v984_v58 }
 0x18c   : > { %6916 = vpow2.f32 %v978_v52 }
 0x18d   : > { %v994_v41 = vmul.f32 1.442695, %v954_v60  ;;  %v1000_v57 = vmul.f32 1.442695, %v957_v40 }
 0x18e   : > { %v879_v36 = vpop.xlane.xlu1 %878  ;;  %v855_v44 = vpop.xlane.xlu0 %854 }
 0x18f   : > { %v955_v46 = vsub.f32 %v7677_v8, %v879_v36  ;;  %v947_v47 = vsub.f32 %v7680_v9, %v855_v44  ;;  %6918 = vpow2.f32 %v1000_v57 }
 0x190   : > { %6920 = vpow2.f32 %v994_v41 }
 0x191   : > { %v980_v38 = vmul.f32 1.442695, %v947_v47  ;;  %v7832_v32 = vpop.eup %6910  ;;  %v996_v61 = vmul.f32 1.442695, %v955_v46 }
 0x192   : > { %v870_v35 = vpop.xlane.xlu0 %869  ;;  %v873_v54 = vpop.xlane.xlu1 %872  ;;  %v1048_v62 = vsel %vm849_vm1, %v7832_v32, 0.0 }
 0x193   : > { %v7834_v42 = vpop.eup %6912  ;;  %v952_v55 = vsub.f32 %v7683_v13, %v870_v35  ;;  %v953_v50 = vsub.f32 %v7686_v14, %v873_v54  ;;  %6922 = vpow2.f32 %v980_v38  ;;  %1049 = vadd.xlane.f32.xlu0 %v1048_v62 }
 0x194   : > { %6924 = vpow2.f32 %v996_v61  ;;  %v1072_v58 = vsel %vm849_vm1, %v7834_v42, 0.0 }
 0x195   : > { %v990_v8 = vmul.f32 1.442695, %v952_v55  ;;  %v7840_v9 = vpop.eup %6914  ;;  %v992_v20 = vmul.f32 1.442695, %v953_v50 }
 0x196   : > { %v894_v51 = vpop.xlane.xlu0 %893  ;;  %v897_v52 = vpop.xlane.xlu1 %896  ;;  %v1051_v3 = vsel %vm849_vm1, %v7840_v9, 0.0 }
 0x197   : > { %v7844_v2 = vpop.eup %6916  ;;  %6926 = vpow2.f32 %v990_v8  ;;  %v960_v13 = vsub.f32 %v7697_v33, %v894_v51  ;;  %v961_v14 = vsub.f32 %v7700_v34, %v897_v52  ;;  %1073 = vadd.xlane.f32.xlu0 %v1072_v58  ;;  %1052 = vadd.xlane.f32.xlu1 %v1051_v3 }
 0x198   : > { %6928 = vpow2.f32 %v992_v20  ;;  %v1042_v44 = vsel %vm849_vm1, %v7844_v2, 0.0 }
 0x199   : > { %v1006_v60 = vmul.f32 1.442695, %v960_v13  ;;  %v7850_v40 = vpop.eup %6918  ;;  %v1008_v41 = vmul.f32 1.442695, %v961_v14 }
 0x19a   : > { %v864_v57 = vpop.xlane.xlu0 %863  ;;  %v867_v36 = vpop.xlane.xlu1 %866  ;;  %v1075_v47 = vsel %vm849_vm1, %v7850_v40, 0.0 }
 0x19b   : > { %v7854_v46 = vpop.eup %6920  ;;  %6930 = vpow2.f32 %v1006_v60  ;;  %v950_v33 = vsub.f32 %v7717_v53, %v864_v57  ;;  %v951_v34 = vsub.f32 %v7720_v56, %v867_v36  ;;  %1043 = vadd.xlane.f32.xlu0 %v1042_v44  ;;  %1076 = vadd.xlane.f32.xlu1 %v1075_v47 }
 0x19c   : > { %6932 = vpow2.f32 %v1008_v41  ;;  %v1066_v50 = vsel %vm849_vm1, %v7854_v46, 0.0 }
 0x19d   : > { %v986_v38 = vmul.f32 1.442695, %v950_v33  ;;  %v7860_v61 = vpop.eup %6922  ;;  %v988_v35 = vmul.f32 1.442695, %v951_v34 }
 0x19e   : > { %v888_v54 = vpop.xlane.xlu0 %887  ;;  %v891_v55 = vpop.xlane.xlu1 %890  ;;  %v1045_v62 = vsel %vm849_vm1, %v7860_v61, 0.0 }
 0x19f   : > { %6934 = vpow2.f32 %v986_v38  ;;  %v958_v53 = vsub.f32 %v7727_v12, %v888_v54  ;;  %v959_v56 = vsub.f32 %v7730_v24, %v891_v55  ;;  %v7868_v8 = vpop.eup %6924  ;;  %1067 = vadd.xlane.f32.xlu0 %v1066_v50  ;;  %1046 = vadd.xlane.f32.xlu1 %v1045_v62 }
 0x1a0   : > { %6936 = vpow2.f32 %v988_v35  ;;  %v1069_v3 = vsel %vm849_vm1, %v7868_v8, 0.0 }
 0x1a1   : > { %v7870_v20 = vpop.eup %6926  ;;  %v1002_v51 = vmul.f32 1.442695, %v958_v53  ;;  %v1004_v52 = vmul.f32 1.442695, %v959_v56 }
 0x1a2   : > { %v906_v58 = vpop.xlane.xlu0 %905  ;;  %v909_v13 = vpop.xlane.xlu1 %908  ;;  %v1060_v14 = vsel %vm849_vm1, %v7870_v20, 0.0 }
 0x1a3   : > { %6938 = vpow2.f32 %v1002_v51  ;;  %v964_v12 = vsub.f32 %v7733_v16, %v906_v58  ;;  %v965_v24 = vsub.f32 %v7736_v29, %v909_v13  ;;  %v7878_v60 = vpop.eup %6928  ;;  %1061 = vadd.xlane.f32.xlu0 %v1060_v14  ;;  %1070 = vadd.xlane.f32.xlu1 %v1069_v3 }
 0x1a4   : > { %6940 = vpow2.f32 %v1004_v52  ;;  %v1063_v47 = vsel %vm849_vm1, %v7878_v60, 0.0 }
 0x1a5   : > { %v7880_v41 = vpop.eup %6930  ;;  %v1014_v57 = vmul.f32 1.442695, %v964_v12  ;;  %v1016_v36 = vmul.f32 1.442695, %v965_v24 }
 0x1a6   : > { %v930_v44 = vpop.xlane.xlu0 %929  ;;  %v933_v33 = vpop.xlane.xlu1 %932  ;;  %v1084_v34 = vsel %vm849_vm1, %v7880_v41, 0.0 }
 0x1a7   : > { %6942 = vpow2.f32 %v1014_v57  ;;  %v972_v16 = vsub.f32 %v7747_v30, %v930_v44  ;;  %v973_v29 = vsub.f32 %v7750_v45, %v933_v33  ;;  %v7888_v38 = vpop.eup %6932  ;;  %1085 = vadd.xlane.f32.xlu0 %v1084_v34  ;;  %1064 = vadd.xlane.f32.xlu1 %v1063_v47 }
 0x1a8   : > { %6944 = vpow2.f32 %v1016_v36  ;;  %v1087_v62 = vsel %vm849_vm1, %v7888_v38, 0.0 }
 0x1a9   : > { %v7890_v35 = vpop.eup %6934  ;;  %v1030_v54 = vmul.f32 1.442695, %v972_v16  ;;  %v1032_v55 = vmul.f32 1.442695, %v973_v29 }
 0x1aa   : > { %v900_v50 = vpop.xlane.xlu0 %899  ;;  %v903_v53 = vpop.xlane.xlu1 %902  ;;  %v1054_v56 = vsel %vm849_vm1, %v7890_v35, 0.0 }
 0x1ab   : > { %6946 = vpow2.f32 %v1030_v54  ;;  %v962_v30 = vsub.f32 %v7757_v0, %v900_v50  ;;  %v963_v45 = vsub.f32 %v7760_v27, %v903_v53  ;;  %v7898_v51 = vpop.eup %6936  ;;  %1055 = vadd.xlane.f32.xlu0 %v1054_v56  ;;  %1088 = vadd.xlane.f32.xlu1 %v1087_v62 }
 0x1ac   : > { %6948 = vpow2.f32 %v1032_v55  ;;  %v1057_v3 = vsel %vm849_vm1, %v7898_v51, 0.0 }
 0x1ad   : > { %v7900_v52 = vpop.eup %6938  ;;  %v1010_v58 = vmul.f32 1.442695, %v962_v30  ;;  %v1012_v13 = vmul.f32 1.442695, %v963_v45  ;;  %v7929_v30 = vld [vmem:[%s7531_s7 + $0x4] sm:$0xf] }
 0x1ae   : > { %v924_v14 = vpop.xlane.xlu0 %923  ;;  %v927_v12 = vpop.xlane.xlu1 %926  ;;  %v1078_v24 = vsel %vm849_vm1, %v7900_v52, 0.0  ;;  %6600 = vmatprep.subr.msk.bf16.mxu0 %vm1230_vm2, %v7929_v30 }
 0x1af   : > { %6950 = vpow2.f32 %v1010_v58  ;;  %v970_v0 = vsub.f32 %v7767_v31, %v924_v14  ;;  %v971_v27 = vsub.f32 %v7770_v28, %v927_v12  ;;  %v7908_v57 = vpop.eup %6940  ;;  %1079 = vadd.xlane.f32.xlu0 %v1078_v24  ;;  %1058 = vadd.xlane.f32.xlu1 %v1057_v3  ;;  %v7943_v24 = vld [vmem:[%s7531_s7 + $0x14] sm:$0xf] }
 0x1b0   : > { %6952 = vpow2.f32 %v1012_v13  ;;  %v1081_v28 = vsel %vm849_vm1, %v7908_v57, 0.0  ;;  %v1232_v13 = vsel %vm1230_vm2, %v7929_v30, 0 }
 0x1b1   : > { %v7910_v36 = vpop.eup %6942  ;;  %v1026_v44 = vmul.f32 1.442695, %v970_v0  ;;  %v1028_v33 = vmul.f32 1.442695, %v971_v27  ;;  %6269 = vmatpush3.bf16.msra.mxu0 %v1232_v13 }
 0x1b2   : > { %v918_v34 = vpop.xlane.xlu0 %917  ;;  %v1096_v16 = vsel %vm849_vm1, %v7910_v36, 0.0  ;;  %v7917_v29 = vpop.eup %6944  ;;  %6602 = vmatprep.subr.msk.bf16.mxu0 %vm1230_vm2, %v7943_v24 }
 0x1b3   : > { %6954 = vpow2.f32 %v1026_v44  ;;  %v968_v31 = vsub.f32 %v7773_v39, %v918_v34  ;;  %1097 = vadd.xlane.f32.xlu0 %v1096_v16  ;;  %1082 = vadd.xlane.f32.xlu1 %v1081_v28  ;;  %v1099_v39 = vsel %vm849_vm1, %v7917_v29, 0.0 }
 0x1b4   : > { %6956 = vpow2.f32 %v1028_v33 }
 0x1b5   : > { %v7919_v47 = vpop.eup %6946  ;;  %v1022_v54 = vmul.f32 1.442695, %v968_v31 }
 0x1b6   : > { %v942_v55 = vpop.xlane.xlu0 %941  ;;  %v1120_v50 = vsel %vm849_vm1, %v7919_v47, 0.0  ;;  %v7926_v56 = vpop.eup %6948 }
 0x1b7   : > { %6958 = vpow2.f32 %v1022_v54  ;;  %v976_v53 = vsub.f32 %v7783_v59, %v942_v55  ;;  %1121 = vadd.xlane.f32.xlu0 %v1120_v50  ;;  %1100 = vadd.xlane.f32.xlu1 %v1099_v39  ;;  %v1123_v12 = vsel %vm849_vm1, %v7926_v56, 0.0 }
 0x1b9   : > { %v7931_v45 = vpop.eup %6950  ;;  %v1038_v62 = vmul.f32 1.442695, %v976_v53 }
 0x1ba   : > { %v912_v58 = vpop.xlane.xlu0 %911  ;;  %v1090_v59 = vsel %vm849_vm1, %v7931_v45, 0.0  ;;  %v7945_v0 = vpop.eup %6952 }
 0x1bb   : > { %6960 = vpow2.f32 %v1038_v62  ;;  %v966_v14 = vsub.f32 %v7797_v63, %v912_v58  ;;  %1091 = vadd.xlane.f32.xlu0 %v1090_v59  ;;  %1124 = vadd.xlane.f32.xlu1 %v1123_v12  ;;  %v5866_v63 = vld [vmem:[%s7531_s7 + $0xc] sm:$0xf]  ;;  %v1093_v33 = vsel %vm849_vm1, %v7945_v0, 0.0  ;;  %v7976_v62 = vcombine.low %v7535_v1, %v7535_v1  ;;  %v7981_v58 = vld [vmem:[%s7531_s7 + $0x1c] sm:$0xf]  ;;  %v921_v59 = vpop.xlane.xlu1 %920 }
 0x1bc   : > { %6601 = vmatprep.subr.msk.bf16.mxu1 %vm1230_vm2, %v5866_v63  ;;  %v1312_v16 = vsel %vm1230_vm2, %v5866_v63, 0 }
 0x1bd   : > { %v7947_v27 = vpop.eup %6954  ;;  %v1018_v3 = vmul.f32 1.442695, %v966_v14  ;;  %6279 = vmatpush3.bf16.msra.mxu1 %v1312_v16  ;;  %v969_v14 = vsub.f32 %v7776_v49, %v921_v59 }
 0x1be   : > { %v1114_v44 = vsel %vm849_vm1, %v7947_v27, 0.0  ;;  %v7957_v34 = vpop.eup %6956  ;;  %6603 = vmatprep.subr.msk.bf16.mxu1 %vm1230_vm2, %v7981_v58 }
 0x1bf   : > { %6962 = vpow2.f32 %v1018_v3  ;;  %1115 = vadd.xlane.f32.xlu0 %v1114_v44  ;;  %1094 = vadd.xlane.f32.xlu1 %v1093_v33  ;;  %v1117_v54 = vsel %vm849_vm1, %v7957_v34, 0.0  ;;  %v945_v13 = vpop.xlane.xlu1 %944  ;;  %v1024_v12 = vmul.f32 1.442695, %v969_v14  ;;  %v936_v44 = vpop.xlane.xlu0 %935 }
 0x1c0   : > { %v977_v3 = vsub.f32 %v7790_v48, %v945_v13  ;;  %v974_v16 = vsub.f32 %v7807_v7, %v936_v44  ;;  %v8011_v13 = vcombine.low %v7563_v11, %v7563_v11 }
 0x1c1   : > { %v7960_v31 = vpop.eup %6958  ;;  %6964 = vpow2.f32 %v1024_v12 }
 0x1c2   : > { %v1108_v28 = vsel %vm849_vm1, %v7960_v31, 0.0  ;;  %v1040_v33 = vmul.f32 1.442695, %v977_v3 }
 0x1c3   : > { %1109 = vadd.xlane.f32.xlu0 %v1108_v28  ;;  %1118 = vadd.xlane.f32.xlu1 %v1117_v54  ;;  %v915_v1 = vpop.xlane.xlu1 %914  ;;  %v1034_v54 = vmul.f32 1.442695, %v974_v16 }
 0x1c4   : > { %v967_v63 = vsub.f32 %v7800_v4, %v915_v1  ;;  %6966 = vpow2.f32 %v1040_v33 }
 0x1c5   : > { %v7966_v55 = vpop.eup %6960 }
 0x1c6   : > { %v1132_v50 = vsel %vm849_vm1, %v7966_v55, 0.0  ;;  %v1020_v28 = vmul.f32 1.442695, %v967_v63 }
 0x1c7   : > { %1133 = vadd.xlane.f32.xlu0 %v1132_v50  ;;  %v939_v14 = vpop.xlane.xlu1 %938 }
 0x1c8   : > { %6968 = vpow2.f32 %v1020_v28  ;;  %v975_v12 = vsub.f32 %v7810_v10, %v939_v14 }
 0x1c9   : > { %v7970_v53 = vpop.eup %6962  ;;  %6970 = vpow2.f32 %v1034_v54 }
 0x1ca   : > { %v1102_v39 = vsel %vm849_vm1, %v7970_v53, 0.0 }
 0x1cb   : > { %1103 = vadd.xlane.f32.xlu0 %v1102_v39  ;;  %v7991_v50 = vpop.eup %6964 }
 0x1ce   : > { %v7995_v49 = vpop.eup %6966 }
 0x1cf   : > { %v1135_v4 = vsel %vm849_vm1, %v7995_v49, 0.0 }
 0x1d2   : > { %v7997_v48 = vpop.eup %6968 }
 0x1d3   : > { %v8001_v39 = vpop.eup %6970  ;;  %v1105_v59 = vsel %vm849_vm1, %v7997_v48, 0.0 }
 0x1d4   : > { %1643 = vrot.lane.b32.xlu1 %v7976_v62, %s7470_s8  ;;  %v1126_v7 = vsel %vm849_vm1, %v8001_v39, 0.0 }
 0x1e1   : > { %1545 = vrot.lane.b32.xlu0 %v7572_v15, %s7470_s8  ;;  %v1111_v15 = vsel %vm849_vm1, %v7991_v50, 0.0 }
 0x1f8   : > { %1112 = vadd.xlane.f32.xlu1 %v1111_v15 }
 0x1fc   : > { %1136 = vadd.xlane.f32.xlu1 %v1135_v4 }
 0x200   : > { %1127 = vadd.xlane.f32.xlu0 %v1126_v7  ;;  %1106 = vadd.xlane.f32.xlu1 %v1105_v59 }
 0x211   : > { %1632 = vrot.lane.b32.xlu1 %v7547_v6, %s7470_s8  ;;  %v1036_v6 = vmul.f32 1.442695, %v975_v12 }
 0x213   : > { %6972 = vpow2.f32 %v1036_v6 }
 0x216   : > { %1736 = vrot.lane.b32.xlu0 %v8011_v13, %s7470_s8 }
 0x21a   : > { %1725 = vrot.lane.b32.xlu0 %v7579_v17, %s7470_s8 }
 0x21e   : > { %1727 = vrot.lane.b32.xlu0 %v7593_v19, %s7470_s8 }
 0x220   : > { %v1050_v3 = vpop.xlane.xlu0 %1049 }
 0x222   : > { %1729 = vrot.lane.b32.xlu0 %v7597_v21, %s7470_s8 }
 0x224   : > { %v1074_v1 = vpop.xlane.xlu0 %1073  ;;  %v1053_v11 = vpop.xlane.xlu1 %1052 }
 0x225   : > { %6974 = vrcp.f32 %v1053_v11 }
 0x226   : > { %1731 = vrot.lane.b32.xlu0 %v7610_v23, %s7470_s8  ;;  %v8028_v23 = vpop.eup %6972 }
 0x228   : > { %v1044_v44 = vpop.xlane.xlu0 %1043  ;;  %v1077_v63 = vpop.xlane.xlu1 %1076 }
 0x229   : > { %6976 = vrcp.f32 %v1044_v44 }
 0x22a   : > { %1818 = vrot.lane.b32.xlu0 %v7583_v18, %s7470_s8  ;;  %6978 = vrcp.f32 %v1050_v3  ;;  %v1129_v18 = vsel %vm849_vm1, %v8028_v23, 0.0 }
 0x22c   : > { %v1068_v17 = vpop.xlane.xlu0 %1067  ;;  %v1047_v19 = vpop.xlane.xlu1 %1046 }
 0x22d   : > { %6980 = vrcp.f32 %v1047_v19 }
 0x22e   : > { %1822 = vrot.lane.b32.xlu0 %v7600_v22, %s7470_s8  ;;  %6982 = vrcp.f32 %v1077_v63 }
 0x22f   : > { %6984 = vrcp.f32 %v1068_v17  ;;  %v6975_v28 = vpop.eup %6974 }
 0x230   : > { %v1062_v21 = vpop.xlane.xlu0 %1061  ;;  %v1071_v10 = vpop.xlane.xlu1 %1070  ;;  %6986 = vrcp.f32 %v1074_v1  ;;  %v1173_v22 = vmul.f32 %v6975_v28, %v7840_v9 }
 0x231   : > { %6988 = vrcp.f32 %v1071_v10 }
 0x233   : > { %v6977_v54 = vpop.eup %6976 }
 0x234   : > { %v1086_v33 = vpop.xlane.xlu0 %1085  ;;  %v1065_v16 = vpop.xlane.xlu1 %1064  ;;  %v1170_v12 = vmul.f32 %v6977_v54, %v7844_v2 }
 0x235   : > { %1130 = vadd.xlane.f32.xlu1 %v1129_v18  ;;  %v6979_v15 = vpop.eup %6978  ;;  %6990 = vrcp.f32 %v1065_v16  ;;  %v1392_v18 = vsel %vm1230_vm2, %v7943_v24, 0 }
 0x236   : > { %v1172_v1 = vmul.f32 %v6979_v15, %v7832_v32  ;;  %v7422_v15 = vld [vmem:[%s7526_s28 + $0x28] sm:$0xff]  }
 0x237   : > { %v6981_v4 = vpop.eup %6980 }
 0x238   : > { %v1056_v7 = vpop.xlane.xlu0 %1055  ;;  %v1089_v59 = vpop.xlane.xlu1 %1088  ;;  %v1171_v3 = vmul.f32 %v6981_v4, %v7860_v61  ;;  %v1203_v17 = vpack.c.bf16 %v1173_v22, %v1172_v1  ;;  %v7423_v1 = vld [vmem:[%s7526_s28 + $0x30] sm:$0xff]  }
 0x239   : > { %v6983_v14 = vpop.eup %6982  ;;  %6992 = vrcp.f32 %v1056_v7 }
 0x23a   : > { %v6985_v6 = vpop.eup %6984  ;;  %v1202_v44 = vpack.c.bf16 %v1171_v3, %v1170_v12  ;;  %v1181_v19 = vmul.f32 %v6983_v14, %v7850_v40  ;;  %6994 = vrcp.f32 %v1062_v21 }
 0x23b   : > { %v6987_v11 = vpop.eup %6986  ;;  %v1178_v2 = vmul.f32 %v6985_v6, %v7854_v46  ;;  %v1472_v46 = vsel %vm1230_vm2, %v7981_v58, 0 }
 0x23c   : > { %v6989_v63 = vpop.eup %6988  ;;  %v1080_v10 = vpop.xlane.xlu0 %1079  ;;  %6270 = vmatprep.mubr.msk.bf16.mxu0 %vm849_vm1, %v1202_v44  ;;  %v1180_v61 = vmul.f32 %v6987_v11, %v7834_v42 }
 0x23d   : > { %v1059_v9 = vpop.xlane.xlu1 %1058  ;;  %v1179_v32 = vmul.f32 %v6989_v63, %v7868_v8  ;;  %6271 = vmatmul.mubr.msk.bf16.vlgmr.msra.gmra.mrb[16].mxu0 %vm849_vm1, %v1203_v17 }
 0x23e   : > { %6996 = vrcp.f32 %v1059_v9  ;;  %6289 = vmatpush3.bf16.msra.mxu0 %v1392_v18  ;;  %v1207_v16 = vpack.c.bf16 %v1181_v19, %v1180_v61  ;;  %v7424_v9 = vld [vmem:[%s7526_s28 + $0x38] sm:$0xff]  }
 0x23f   : > { %6998 = vrcp.f32 %v1089_v59  ;;  %v1206_v40 = vpack.c.bf16 %v1179_v32, %v1178_v2  ;;  %6604 = vmatprep.subr.msk.bf16.mxu0 %vm404_vm0, %v7822_v43  ;;  %v6991_v28 = vpop.eup %6990  ;;  %v7425_v18 = vld [vmem:[%s7531_s7 + $0x18] sm:$0xf] }
 0x240   : > { %7000 = vrcp.f32 %v1080_v10  ;;  %v1098_v24 = vpop.xlane.xlu0 %1097  ;;  %v1177_v58 = vmul.f32 %v6991_v28, %v7878_v60  ;;  %v8067_v2 = vcombine.low %v7425_v18, %v7425_v18 }
 0x241   : > { %v1083_v21 = vpop.xlane.xlu1 %1082  ;;  %7002 = vrcp.f32 %v1086_v33  ;;  %6280 = vmatprep.mubr.msk.bf16.mxu1 %vm849_vm1, %v1206_v40  ;;  %v7426_v40 = vld [vmem:[%s7526_s28 + $0x68] sm:$0xff]  }
 0x242   : > { %7004 = vrcp.f32 %v1083_v21  ;;  %6281 = vmatmul.mubr.msk.bf16.vlgmr.msra.gmra.mrb[16].mxu1 %vm849_vm1, %v1207_v16 }
 0x243   : > { %6299 = vmatpush3.bf16.msra.mxu1 %v1472_v46  ;;  %v6993_v54 = vpop.eup %6992 }
 0x244   : > { %v1122_v42 = vpop.xlane.xlu0 %1121  ;;  %v6995_v4 = vpop.eup %6994  ;;  %v1174_v14 = vmul.f32 %v6993_v54, %v7890_v35 }
 0x245   : > { %v1101_v8 = vpop.xlane.xlu1 %1100  ;;  %v1176_v6 = vmul.f32 %v6995_v4, %v7870_v20 }
 0x246   : > { %1634 = vrot.lane.b32.xlu1 %v7422_v15, %s7470_s8  ;;  %7006 = vrcp.f32 %v1101_v8  ;;  %v8081_v15 = vld [vmem:[%s7526_s28 + $0x78] sm:$0xff]  }
 0x247   : > { %v1205_v60 = vpack.c.bf16 %v1177_v58, %v1176_v6 }
 0x248   : > { %v6997_v22 = vpop.eup %6996  ;;  %v1092_v7 = vpop.xlane.xlu0 %1091 }
 0x249   : > { %v1125_v59 = vpop.xlane.xlu1 %1124  ;;  %v6999_v33 = vpop.eup %6998  ;;  %v1175_v12 = vmul.f32 %v6997_v22, %v7898_v51  ;;  %7008 = vrcp.f32 %v1092_v7 }
 0x24a   : > { %v7001_v3 = vpop.eup %7000  ;;  %1636 = vrot.lane.b32.xlu1 %v7423_v1, %s7470_s8  ;;  %v1185_v19 = vmul.f32 %v6999_v33, %v7888_v38  ;;  %7010 = vrcp.f32 %v1098_v24 }
 0x24b   : > { %v7003_v11 = vpop.eup %7002  ;;  %v1204_v44 = vpack.c.bf16 %v1175_v12, %v1174_v14  ;;  %v1182_v20 = vmul.f32 %v7001_v3, %v7900_v52 }
 0x24c   : > { %v7005_v63 = vpop.eup %7004  ;;  %v1116_v35 = vpop.xlane.xlu0 %1115  ;;  %v1184_v10 = vmul.f32 %v7003_v11, %v7880_v41 }
 0x24d   : > { %v1095_v17 = vpop.xlane.xlu1 %1094  ;;  %6274 = vmatprep.mubr.msk.bf16.mxu0 %vm849_vm1, %v1204_v44  ;;  %v1183_v51 = vmul.f32 %v7005_v63, %v7908_v57 }
 0x24e   : > { %7012 = vrcp.f32 %v1095_v17  ;;  %6275 = vmatmul.mubr.msk.bf16.gmra.mrb[20].mxu0 %vm849_vm1, %v1205_v60  ;;  %1638 = vrot.lane.b32.xlu1 %v7424_v9, %s7470_s8  ;;  %v1209_v61 = vpack.c.bf16 %v1185_v19, %v1184_v10 }
 0x24f   : > { %7014 = vrcp.f32 %v1125_v59  ;;  %v1208_v38 = vpack.c.bf16 %v1183_v51, %v1182_v20 }
 0x250   : > { %7016 = vrcp.f32 %v1116_v35  ;;  %v7007_v52 = vpop.eup %7006 }
 0x251   : > { %v1119_v32 = vpop.xlane.xlu1 %1118  ;;  %7018 = vrcp.f32 %v1122_v42  ;;  %6284 = vmatprep.mubr.msk.bf16.mxu1 %vm849_vm1, %v1208_v38  ;;  %v1189_v21 = vmul.f32 %v7007_v52, %v7917_v29 }
 0x252   : > { %7020 = vrcp.f32 %v1119_v32  ;;  %6285 = vmatmul.mubr.msk.bf16.gmra.mrb[20].mxu1 %vm849_vm1, %v1209_v61  ;;  %1829 = vrot.lane.b32.xlu1 %v8067_v2, %s7470_s8 }
 0x253   : > { %v7009_v57 = vpop.eup %7008 }
 0x254   : > { %v7011_v16 = vpop.eup %7010  ;;  %v1186_v42 = vmul.f32 %v7009_v57, %v7931_v45 }
 0x255   : > { %v1644_v41 = vpop.permute.xlu1 %1643  ;;  %v1188_v54 = vmul.f32 %v7011_v16, %v7910_v36  ;;  %v1565_v36 = vsel %vm404_vm0, %v7822_v43, 0 }
 0x256   : > { %6605 = vmatprep.subr.msk.bf16.mxu1 %vm404_vm0, %v1644_v41  ;;  %1820 = vrot.lane.b32.xlu1 %v7426_v40, %s7470_s8 }
 0x257   : > { %v1211_v59 = vpack.c.bf16 %v1189_v21, %v1188_v54 }
 0x258   : > { %v7013_v24 = vpop.eup %7012 }
 0x259   : > { %v7015_v46 = vpop.eup %7014  ;;  %v1187_v8 = vmul.f32 %v7013_v24, %v7945_v0 }
 0x25a   : > { %v7017_v28 = vpop.eup %7016  ;;  %1824 = vrot.lane.b32.xlu1 %v8081_v15, %s7470_s8  ;;  %v1197_v58 = vmul.f32 %v7015_v46, %v7926_v56  ;;  %v1658_v56 = vsel %vm404_vm0, %v1644_v41, 0 }
 0x25b   : > { %v7019_v4 = vpop.eup %7018  ;;  %v1210_v22 = vpack.c.bf16 %v1187_v8, %v1186_v42  ;;  %v1194_v29 = vmul.f32 %v7017_v28, %v7947_v27  ;;  %v1110_v27 = vpop.xlane.xlu0 %1109 }
 0x25c   : > { %v7021_v7 = vpop.eup %7020  ;;  %v1196_v0 = vmul.f32 %v7019_v4, %v7919_v47 }
 0x25d   : > { %6290 = vmatprep.mubr.msk.bf16.mxu0 %vm849_vm1, %v1210_v22  ;;  %v1195_v45 = vmul.f32 %v7021_v7, %v7957_v34 }
 0x25e   : > { %6291 = vmatmul.mubr.msk.bf16.vlgmr.msra.gmra.mrb[24].mxu0 %vm849_vm1, %v1211_v59  ;;  %v1215_v14 = vpack.c.bf16 %v1197_v58, %v1196_v0 }
 0x25f   : > { %6309 = vmatpush3.bf16.xpose.msra.mxu0 %v1565_v36  ;;  %v1214_v33 = vpack.c.bf16 %v1195_v45, %v1194_v29  ;;  %v1134_v12 = vpop.xlane.xlu0 %1133 }
 0x261   : > { %6300 = vmatprep.mubr.msk.bf16.mxu1 %vm849_vm1, %v1214_v33 }
 0x262   : > { %6301 = vmatmul.mubr.msk.bf16.vlgmr.msra.gmra.mrb[24].mxu1 %vm849_vm1, %v1215_v14 }
 0x263   : > { %6319 = vmatpush3.bf16.xpose.msra.mxu1 %v1658_v56  ;;  %v1104_v34 = vpop.xlane.xlu0 %1103 }
 0x267   : > { %v1546_v47 = vpop.permute.xlu0 %1545 }
 0x285   : > { %v1113_v3 = vpop.xlane.xlu1 %1112 }
 0x286   : > { %7022 = vrcp.f32 %v1113_v3 }
 0x287   : > { %7024 = vrcp.f32 %v1104_v34 }
 0x288   : > { %7026 = vrcp.f32 %v1110_v27 }
 0x289   : > { %v1137_v6 = vpop.xlane.xlu1 %1136 }
 0x28d   : > { %v1128_v1 = vpop.xlane.xlu0 %1127  ;;  %v1107_v43 = vpop.xlane.xlu1 %1106 }
 0x28e   : > { %7028 = vrcp.f32 %v1107_v43 }
 0x28f   : > { %7030 = vrcp.f32 %v1137_v6 }
 0x290   : > { %v7023_v44 = vpop.eup %7022  ;;  %7032 = vrcp.f32 %v1128_v1 }
 0x291   : > { %v1737_v11 = vpop.permute.xlu0 %1736  ;;  %v7025_v63 = vpop.eup %7024  ;;  %v1193_v19 = vmul.f32 %v7023_v44, %v7991_v50  ;;  %7034 = vrcp.f32 %v1134_v12 }
 0x292   : > { %6606 = vmatprep.subr.msk.bf16.mxu0 %vm404_vm0, %v1737_v11  ;;  %v7027_v17 = vpop.eup %7026  ;;  %v1190_v35 = vmul.f32 %v7025_v63, %v7970_v53  ;;  %v1751_v18 = vsel %vm404_vm0, %v1737_v11, 0 }
 0x293   : > { %v1192_v51 = vmul.f32 %v7027_v17, %v7960_v31 }
 0x295   : > { %v1213_v9 = vpack.c.bf16 %v1193_v19, %v1192_v51  ;;  %v1726_v53 = vpop.permute.xlu0 %1725  ;;  %v8190_v51 = vld [vmem:[%s10438_s2 + $0x50] sm:$0xff] }
 0x298   : > { %v7029_v60 = vpop.eup %7028 }
 0x299   : > { %v1191_v20 = vmul.f32 %v7029_v60, %v7997_v48  ;;  %v1728_v31 = vpop.permute.xlu0 %1727  ;;  %v7031_v38 = vpop.eup %7030 }
 0x29a   : > { %v7033_v61 = vpop.eup %7032  ;;  %v1201_v57 = vmul.f32 %v7031_v38, %v7995_v49 }
 0x29b   : > { %v1212_v10 = vpack.c.bf16 %v1191_v20, %v1190_v35  ;;  %v7035_v41 = vpop.eup %7034  ;;  %v1198_v40 = vmul.f32 %v7033_v61, %v8001_v39 }
 0x29c   : > { %v1200_v21 = vmul.f32 %v7035_v41, %v7966_v55 }
 0x29d   : > { %6294 = vmatprep.mubr.msk.bf16.mxu0 %vm849_vm1, %v1212_v10  ;;  %v1730_v50 = vpop.permute.xlu0 %1729 }
 0x29e   : > { %6295 = vmatmul.mubr.msk.bf16.gmra.mrb[28].mxu0 %vm849_vm1, %v1213_v9  ;;  %v1217_v42 = vpack.c.bf16 %v1201_v57, %v1200_v21 }
 0x29f   : > { %6310 = vmatprep.mubr.msk.bf16.mxu0 %vm404_vm0, %v7816_v26  ;;  %v1633_v26 = vpop.permute.xlu1 %1632 }
 0x2a1   : > { %v1732_v48 = vpop.permute.xlu0 %1731 }
 0x2a5   : > { %v1819_v39 = vpop.permute.xlu0 %1818 }
 0x2a6   : > { %6311 = vmatmul.mubr.msk.bf16.vlgmr.msra.gmra.mrb[32].mxu0 %vm404_vm0, %v7818_v37 }
 0x2a7   : > { %6314 = vmatprep.mubr.msk.bf16.mxu0 %vm404_vm0, %v7820_v25  ;;  %6329 = vmatpush3.bf16.xpose.msra.mxu0 %v1751_v18 }
 0x2ae   : > { %6315 = vmatmul.mubr.msk.bf16.gmra.mrb[36].mxu0 %vm404_vm0, %v1546_v47 }
 0x2af   : > { %6330 = vmatprep.mubr.msk.bf16.mxu0 %vm404_vm0, %v1726_v53 }
 0x2b6   : > { %6331 = vmatmul.mubr.msk.bf16.vlgmr.msra.gmra.mrb[40].mxu0 %vm404_vm0, %v1728_v31 }
 0x2b7   : > { %6334 = vmatprep.mubr.msk.bf16.mxu0 %vm404_vm0, %v1730_v50 }
 0x2be   : > { %6335 = vmatmul.mubr.msk.bf16.gmra.mrb[44].mxu0 %vm404_vm0, %v1732_v48 }
 0x2c2   : > { %v1131_v37 = vpop.xlane.xlu1 %1130 }
 0x2c3   : > { %7036 = vrcp.f32 %v1131_v37 }
 0x2c6   : > { %v1635_v25 = vpop.permute.xlu1 %1634 }
 0x2ca   : > { %v1637_v32 = vpop.permute.xlu1 %1636 }
 0x2cd   : > { %v7037_v52 = vpop.eup %7036 }
 0x2ce   : > { %v1199_v16 = vmul.f32 %v7037_v52, %v8028_v23  ;;  %v1639_v24 = vpop.permute.xlu1 %1638  ;;  %v1823_v23 = vpop.permute.xlu0 %1822 }
 0x2d0   : > { %v1216_v46 = vpack.c.bf16 %v1199_v16, %v1198_v40 }
 0x2d2   : > { %6304 = vmatprep.mubr.msk.bf16.mxu1 %vm849_vm1, %v1216_v46  ;;  %v1830_v8 = vpop.permute.xlu1 %1829 }
 0x2d3   : > { %6305 = vmatmul.mubr.msk.bf16.gmra.mrb[28].mxu1 %vm849_vm1, %v1217_v42  ;;  %6607 = vmatprep.subr.msk.bf16.mxu1 %vm404_vm0, %v1830_v8  ;;  %v1844_v49 = vsel %vm404_vm0, %v1830_v8, 0 }
 0x2d4   : > { %6320 = vmatprep.mubr.msk.bf16.mxu1 %vm404_vm0, %v1633_v26 }
 0x2d6   : > { %v1821_v55 = vpop.permute.xlu1 %1820 }
 0x2da   : > { %v1825_v28 = vpop.permute.xlu1 %1824 }
 0x2db   : > { %6321 = vmatmul.mubr.msk.bf16.vlgmr.msra.gmra.mrb[32].mxu1 %vm404_vm0, %v1635_v25 }
 0x2dc   : > { %6324 = vmatprep.mubr.msk.bf16.mxu1 %vm404_vm0, %v1637_v32  ;;  %6339 = vmatpush3.bf16.xpose.msra.mxu1 %v1844_v49 }
 0x2e3   : > { %6325 = vmatmul.mubr.msk.bf16.gmra.mrb[36].mxu1 %vm404_vm0, %v1639_v24 }
 0x2e4   : > { %6340 = vmatprep.mubr.msk.bf16.mxu1 %vm404_vm0, %v1819_v39 }
 0x2eb   : > { %6341 = vmatmul.mubr.msk.bf16.vlgmr.msra.gmra.mrb[40].mxu1 %vm404_vm0, %v1821_v55 }
 0x2ec   : > { %6344 = vmatprep.mubr.msk.bf16.mxu1 %vm404_vm0, %v1823_v23 }
 0x2f3   : > { %6345 = vmatmul.mubr.msk.bf16.gmra.mrb[44].mxu1 %vm404_vm0, %v1825_v28  ;;  %v8228_v28 = vld [vmem:[%s10438_s2 + $0x40] sm:$0xff] }
 0x310   : > { %v8131_v54 = vpop.f32.mrb[16].mxu0 }
 0x311   : > { %10499 = vst [vmem:[#allocation2_spill] sm:$0xff] %v8131_v54  ;;  %v8133_v4 = vpop.f32.mrb[17].mxu0 }
 0x312   : > { %10500 = vst [vmem:[#allocation3_spill] sm:$0xff] %v8133_v4  ;;  %v8135_v22 = vpop.f32.mrb[18].mxu0 }
 0x313   : > { %10501 = vst [vmem:[#allocation4_spill] sm:$0xff] %v8135_v22  ;;  %v8137_v7 = vpop.f32.mrb[19].mxu0 }
 0x314   : > { %10502 = vst [vmem:[#allocation5_spill] sm:$0xff] %v8137_v7 }
 0x315   : > { %v8139_v59 = vpop.f32.mrb[16].mxu1 }
 0x316   : > { %10503 = vst [vmem:[#allocation6_spill] sm:$0xff] %v8139_v59  ;;  %v8141_v58 = vpop.f32.mrb[17].mxu1 }
 0x317   : > { %10504 = vst [vmem:[#allocation7_spill] sm:$0xff] %v8141_v58  ;;  %v8143_v29 = vpop.f32.mrb[18].mxu1 }
 0x318   : > { %10505 = vst [vmem:[#allocation8_spill] sm:$0xff] %v8143_v29  ;;  %v8145_v45 = vpop.f32.mrb[19].mxu1 }
 0x319   : > { %10506 = vst [vmem:[#allocation9_spill] sm:$0xff] %v8145_v45 }
 0x321   : > { %v8147_v0 = vpop.f32.mrb[20].mxu0 }
 0x322   : > { %10507 = vst [vmem:[#allocation10_spill] sm:$0xff] %v8147_v0  ;;  %v8149_v36 = vpop.f32.mrb[21].mxu0 }
 0x323   : > { %10508 = vst [vmem:[#allocation11_spill] sm:$0xff] %v8149_v36  ;;  %v8151_v33 = vpop.f32.mrb[22].mxu0 }
 0x324   : > { %10509 = vst [vmem:[#allocation12_spill] sm:$0xff] %v8151_v33  ;;  %v8153_v14 = vpop.f32.mrb[23].mxu0 }
 0x325   : > { %10510 = vst [vmem:[#allocation13_spill] sm:$0xff] %v8153_v14  ;;  %v8155_v56 = vpop.f32.mrb[20].mxu1 }
 0x326   : > { %10511 = vst [vmem:[#allocation14_spill] sm:$0xff] %v8155_v56  ;;  %v8157_v27 = vpop.f32.mrb[21].mxu1 }
 0x327   : > { %10512 = vst [vmem:[#allocation15_spill] sm:$0xff] %v8157_v27  ;;  %v8159_v12 = vpop.f32.mrb[22].mxu1 }
 0x328   : > { %10513 = vst [vmem:[#allocation16_spill] sm:$0xff] %v8159_v12  ;;  %v8161_v34 = vpop.f32.mrb[23].mxu1 }
 0x329   : > { %10514 = vst [vmem:[#allocation17_spill] sm:$0xff] %v8161_v34 }
 0x331   : > { %v8163_v3 = vpop.f32.mrb[24].mxu0 }
 0x332   : > { %10515 = vst [vmem:[#allocation18_spill] sm:$0xff] %v8163_v3  ;;  %v8165_v47 = vpop.f32.mrb[25].mxu0 }
 0x333   : > { %10516 = vst [vmem:[#allocation19_spill] sm:$0xff] %v8165_v47  ;;  %v8167_v6 = vpop.f32.mrb[26].mxu0 }
 0x334   : > { %10517 = vst [vmem:[#allocation20_spill] sm:$0xff] %v8167_v6  ;;  %v8169_v1 = vpop.f32.mrb[27].mxu0 }
 0x335   : > { %10518 = vst [vmem:[#allocation21_spill] sm:$0xff] %v8169_v1  ;;  %v8171_v43 = vpop.f32.mrb[24].mxu1 }
 0x336   : > { %10519 = vst [vmem:[#allocation22_spill] sm:$0xff] %v8171_v43  ;;  %v8173_v11 = vpop.f32.mrb[25].mxu1 }
 0x337   : > { %10520 = vst [vmem:[#allocation23_spill] sm:$0xff] %v8173_v11  ;;  %v8175_v44 = vpop.f32.mrb[26].mxu1 }
 0x338   : > { %10521 = vst [vmem:[#allocation24_spill] sm:$0xff] %v8175_v44  ;;  %v8177_v63 = vpop.f32.mrb[27].mxu1 }
 0x339   : > { %10522 = vst [vmem:[#allocation25_spill] sm:$0xff] %v8177_v63 }
 0x371   : > { %v8179_v17 = vpop.f32.mrb[28].mxu0 }
 0x372   : > { %10523 = vst [vmem:[#allocation26_spill] sm:$0xff] %v8179_v17  ;;  %v8181_v60 = vpop.f32.mrb[29].mxu0 }
 0x373   : > { %10524 = vst [vmem:[#allocation27_spill] sm:$0xff] %v8181_v60  ;;  %v8183_v19 = vpop.f32.mrb[30].mxu0 }
 0x374   : > { %10525 = vst [vmem:[#allocation28_spill] sm:$0xff] %v8183_v19  ;;  %v8185_v35 = vpop.f32.mrb[31].mxu0 }
 0x375   : > { %10526 = vst [vmem:[#allocation29_spill] sm:$0xff] %v8185_v35 }
 0x379   : > { %v6312_v20 = vpop.f32.mrb[32].mxu0 }
 0x37a   : > { %v1913_v10 = vmul.f32 0.25, %v6312_v20  ;;  %v1601_v9 = vpop.f32.mrb[33].mxu0 }
 0x37b   : > { %v6313_v18 = vpop.f32.mrb[34].mxu0  ;;  %v1911_v49 = vmul.f32 0.25, %v1601_v9  ;;  %v8241_v9 = vld [vmem:[%s10438_s2 + $0x48] sm:$0xff] }
 0x37c   : > { %v1604_v53 = vpop.f32.mrb[35].mxu0  ;;  %v8193_v31 = vadd.f32 %v1913_v10, %v8190_v51 }
 0x37d   : > { %v1912_v20 = vmul.f32 0.25, %v1604_v53 }
 0x37e   : > { %v1981_v50 = vsel %vm849_vm1, %v8193_v31, -inf }
 0x37f   : > { %1982 = vmax.xlane.f32.xlu0 %v1981_v50  ;;  %v8254_v60 = vadd.f32 %v1912_v20, %v8241_v9 }
 0x381   : > { %v6316_v26 = vpop.f32.mrb[36].mxu0 }
 0x382   : > { %v8197_v48 = vpop.f32.mrb[37].mxu0 }
 0x383   : > { %v6317_v37 = vpop.f32.mrb[38].mxu0 }
 0x384   : > { %v8199_v25 = vpop.f32.mrb[39].mxu0 }
 0x385   : > { %v1916_v6 = vmul.f32 0.25, %v8199_v25 }
 0x389   : > { %v8201_v38 = vpop.f32.mrb[40].mxu0 }
 0x38a   : > { %v8203_v32 = vpop.f32.mrb[41].mxu0 }
 0x38b   : > { %v8205_v61 = vpop.f32.mrb[42].mxu0 }
 0x38c   : > { %v8207_v41 = vpop.f32.mrb[43].mxu0 }
 0x391   : > { %v8209_v52 = vpop.f32.mrb[44].mxu0 }
 0x392   : > { %v8211_v57 = vpop.f32.mrb[45].mxu0 }
 0x393   : > { %v8213_v40 = vpop.f32.mrb[46].mxu0 }
 0x394   : > { %v8215_v16 = vpop.f32.mrb[47].mxu0 }
 0x3a6   : > { %v8217_v24 = vpop.f32.mrb[28].mxu1 }
 0x3a7   : > { %10527 = vst [vmem:[#allocation30_spill] sm:$0xff] %v8217_v24  ;;  %v8219_v21 = vpop.f32.mrb[29].mxu1 }
 0x3a8   : > { %10528 = vst [vmem:[#allocation31_spill] sm:$0xff] %v8219_v21  ;;  %v8221_v46 = vpop.f32.mrb[30].mxu1 }
 0x3a9   : > { %10529 = vst [vmem:[#allocation32_spill] sm:$0xff] %v8221_v46  ;;  %v8223_v42 = vpop.f32.mrb[31].mxu1  ;;  %v8236_v46 = vld [vmem:[%s10438_s2 + $0x58] sm:$0xff] }
 0x3aa   : > { %10530 = vst [vmem:[#allocation33_spill] sm:$0xff] %v8223_v42 }
 0x3ae   : > { %v6322_v8 = vpop.f32.mrb[32].mxu1 }
 0x3af   : > { %v1921_v39 = vmul.f32 0.25, %v6322_v8  ;;  %v1694_v55 = vpop.f32.mrb[33].mxu1 }
 0x3b0   : > { %v6323_v23 = vpop.f32.mrb[34].mxu1  ;;  %v1919_v8 = vmul.f32 0.25, %v1694_v55  ;;  %v1914_v55 = vmul.f32 0.25, %v6313_v18  ;;  %v8269_v18 = vld [vmem:[%s10438_s2 + $0x78] sm:$0xff] }
 0x3b1   : > { %v1922_v10 = vmul.f32 0.25, %v6323_v23  ;;  %v1697_v50 = vpop.f32.mrb[35].mxu1  ;;  %v8231_v24 = vadd.f32 %v1921_v39, %v8190_v51  ;;  %v8249_v39 = vadd.f32 %v1911_v49, %v8228_v28 }
 0x3b2   : > { %v1920_v23 = vmul.f32 0.25, %v1697_v50  ;;  %v1978_v50 = vsel %vm849_vm1, %v8254_v60, -inf }
 0x3b3   : > { %v2005_v21 = vsel %vm849_vm1, %v8231_v24, -inf  ;;  %v8246_v53 = vadd.f32 %v1922_v10, %v8236_v46  ;;  %v1975_v17 = vsel %vm849_vm1, %v8249_v39, -inf  ;;  %v8259_v10 = vadd.f32 %v1919_v8, %v8228_v28 }
 0x3b4   : > { %2006 = vmax.xlane.f32.xlu0 %v2005_v21  ;;  %v1918_v21 = vmul.f32 0.25, %v6317_v37  ;;  %v8264_v11 = vadd.f32 %v1920_v23, %v8241_v9  ;;  %v8279_v23 = vld [vmem:[%s10438_s2 + $0x70] sm:$0xff] }
 0x3b5   : > { %v2008_v42 = vsel %vm849_vm1, %v8246_v53, -inf  ;;  %v1999_v8 = vsel %vm849_vm1, %v8259_v10, -inf }
 0x3b6   : > { %2009 = vmax.xlane.f32.xlu1 %v2008_v42  ;;  %v6326_v35 = vpop.f32.mrb[36].mxu1  ;;  %v1917_v42 = vmul.f32 0.25, %v6316_v26  ;;  %v8284_v43 = vadd.f32 %v1918_v21, %v8269_v18 }
 0x3b7   : > { %v1710_v19 = vpop.f32.mrb[37].mxu1  ;;  %v1925_v63 = vmul.f32 0.25, %v6326_v35 }
 0x3b8   : > { %1976 = vmax.xlane.f32.xlu0 %v1975_v17  ;;  %v6327_v49 = vpop.f32.mrb[38].mxu1  ;;  %v8274_v17 = vadd.f32 %v1914_v55, %v8236_v46  ;;  %v1996_v35 = vsel %vm849_vm1, %v8284_v43, -inf  ;;  %v1923_v27 = vmul.f32 0.25, %v1710_v19  ;;  %v1929_v19 = vmul.f32 0.25, %v8201_v38 }
 0x3b9   : > { %v1713_v20 = vpop.f32.mrb[39].mxu1  ;;  %v1926_v37 = vmul.f32 0.25, %v6327_v49  ;;  %v8289_v49 = vadd.f32 %v1917_v42, %v8279_v23  ;;  %v8298_v21 = vadd.f32 %v1925_v63, %v8279_v23  ;;  %v8303_v42 = vld [vmem:[%s10438_s2 + $0x68] sm:$0xff]  ;;  %v8313_v63 = vld [vmem:[%s10438_s2 + $0x60] sm:$0xff] }
 0x3ba   : > { %1979 = vmax.xlane.f32.xlu1 %v1978_v50  ;;  %v2002_v50 = vsel %vm849_vm1, %v8264_v11, -inf  ;;  %v1984_v55 = vsel %vm849_vm1, %v8274_v17, -inf  ;;  %v8318_v12 = vadd.f32 %v1916_v6, %v8303_v42 }
 0x3bb   : > { %v2017_v56 = vsel %vm849_vm1, %v8298_v21, -inf }
 0x3bc   : > { %2000 = vmax.xlane.f32.xlu0 %v1999_v8  ;;  %v8292_v8 = vadd.f32 %v1926_v37, %v8269_v18  ;;  %v1915_v37 = vmul.f32 0.25, %v8197_v48 }
 0x3be   : > { %2003 = vmax.xlane.f32.xlu1 %v2002_v50  ;;  %v6342_v26 = vpop.f32.mrb[40].mxu1  ;;  %v2020_v25 = vsel %vm849_vm1, %v8292_v8, -inf  ;;  %v8321_v34 = vadd.f32 %v1915_v37, %v8313_v63 }
 0x3bf   : > { %v1880_v44 = vpop.f32.mrb[41].mxu1  ;;  %v1937_v33 = vmul.f32 0.25, %v6342_v26  ;;  %v1927_v26 = vmul.f32 0.25, %v8203_v32  ;;  %v1934_v32 = vmul.f32 0.25, %v8213_v40 }
 0x3c0   : > { %1985 = vmax.xlane.f32.xlu0 %v1984_v55  ;;  %v6343_v3 = vpop.f32.mrb[42].mxu1  ;;  %v1993_v55 = vsel %vm849_vm1, %v8289_v49, -inf  ;;  %v1987_v37 = vsel %vm849_vm1, %v8321_v34, -inf }
 0x3c1   : > { %v1883_v50 = vpop.f32.mrb[43].mxu1 }
 0x3c2   : > { %1997 = vmax.xlane.f32.xlu1 %v1996_v35  ;;  %v1924_v35 = vmul.f32 0.25, %v1713_v20  ;;  %v1930_v20 = vmul.f32 0.25, %v8205_v61 }
 0x3c4   : > { %1994 = vmax.xlane.f32.xlu0 %v1993_v55  ;;  %v8326_v0 = vadd.f32 %v1924_v35, %v8303_v42  ;;  %v1990_v55 = vsel %vm849_vm1, %v8318_v12, -inf  ;;  %v8338_v35 = vadd.f32 %v1930_v20, %v8236_v46  ;;  %v8352_v20 = vadd.f32 %v1937_v33, %v8190_v51 }
 0x3c6   : > { %2021 = vmax.xlane.f32.xlu1 %v2020_v25  ;;  %v6346_v48 = vpop.f32.mrb[44].mxu1  ;;  %v8332_v25 = vadd.f32 %v1923_v27, %v8313_v63  ;;  %v2014_v61 = vsel %vm849_vm1, %v8326_v0, -inf  ;;  %v2053_v33 = vsel %vm849_vm1, %v8352_v20, -inf }
 0x3c7   : > { %v8323_v36 = vpop.f32.mrb[45].mxu1 }
 0x3c8   : > { %2018 = vmax.xlane.f32.xlu0 %v2017_v56  ;;  %v6347_v14 = vpop.f32.mrb[46].mxu1  ;;  %v1938_v56 = vmul.f32 0.25, %v6343_v3  ;;  %v2011_v27 = vsel %vm849_vm1, %v8332_v25, -inf  ;;  %v1928_v3 = vmul.f32 0.25, %v8207_v41  ;;  %v1936_v41 = vmul.f32 0.25, %v1883_v50 }
 0x3c9   : > { %v1899_v6 = vpop.f32.mrb[47].mxu1  ;;  %v1933_v50 = vmul.f32 0.25, %v8209_v52 }
 0x3ca   : > { %1991 = vmax.xlane.f32.xlu1 %v1990_v55  ;;  %v8343_v55 = vadd.f32 %v1929_v19, %v8190_v51  ;;  %v8348_v38 = vadd.f32 %v1938_v56, %v8236_v46  ;;  %v8362_v46 = vadd.f32 %v1928_v3, %v8241_v9  ;;  %v8367_v51 = vadd.f32 %v1927_v26, %v8228_v28 }
 0x3cb   : > { %v1935_v56 = vmul.f32 0.25, %v1880_v44  ;;  %v8382_v44 = vadd.f32 %v1934_v32, %v8269_v18 }
 0x3cc   : > { %1988 = vmax.xlane.f32.xlu0 %v1987_v37  ;;  %v2032_v37 = vsel %vm849_vm1, %v8338_v35, -inf  ;;  %v2029_v19 = vsel %vm849_vm1, %v8343_v55, -inf  ;;  %v2023_v26 = vsel %vm849_vm1, %v8367_v51, -inf }
 0x3cd   : > { %v8377_v3 = vadd.f32 %v1935_v56, %v8228_v28 }
 0x3ce   : > { %2015 = vmax.xlane.f32.xlu1 %v2014_v61  ;;  %v2056_v61 = vsel %vm849_vm1, %v8348_v38, -inf }
 0x3cf   : > { %v2047_v52 = vsel %vm849_vm1, %v8377_v3, -inf }
 0x3d0   : > { %2012 = vmax.xlane.f32.xlu0 %v2011_v27  ;;  %v8371_v27 = vadd.f32 %v1936_v41, %v8241_v9  ;;  %v1941_v9 = vmul.f32 0.25, %v6346_v48  ;;  %v1931_v48 = vmul.f32 0.25, %v8211_v57 }
 0x3d2   : > { %2033 = vmax.xlane.f32.xlu1 %v2032_v37  ;;  %v2026_v37 = vsel %vm849_vm1, %v8362_v46, -inf  ;;  %v2050_v40 = vsel %vm849_vm1, %v8371_v27, -inf  ;;  %v8396_v41 = vadd.f32 %v1941_v9, %v8279_v23 }
 0x3d4   : > { %2030 = vmax.xlane.f32.xlu0 %v2029_v19  ;;  %v1942_v19 = vmul.f32 0.25, %v6347_v14  ;;  %v1932_v14 = vmul.f32 0.25, %v8215_v16  ;;  %v1939_v16 = vmul.f32 0.25, %v8323_v36 }
 0x3d6   : > { %2057 = vmax.xlane.f32.xlu1 %v2056_v61  ;;  %v8387_v61 = vadd.f32 %v1933_v50, %v8279_v23  ;;  %v8392_v28 = vadd.f32 %v1942_v19, %v8269_v18  ;;  %v1940_v18 = vmul.f32 0.25, %v1899_v6  ;;  %v2065_v23 = vsel %vm849_vm1, %v8396_v41, -inf }
 0x3d7   : > { %v8412_v50 = vadd.f32 %v1931_v48, %v8313_v63 }
 0x3d8   : > { %2054 = vmax.xlane.f32.xlu0 %v2053_v33  ;;  %v2044_v33 = vsel %vm849_vm1, %v8382_v44, -inf  ;;  %v2041_v56 = vsel %vm849_vm1, %v8387_v61, -inf  ;;  %v2068_v32 = vsel %vm849_vm1, %v8392_v28, -inf  ;;  %v8415_v57 = vadd.f32 %v1940_v18, %v8303_v42 }
 0x3d9   : > { %v2035_v36 = vsel %vm849_vm1, %v8412_v50, -inf }
 0x3da   : > { %2027 = vmax.xlane.f32.xlu1 %v2026_v37  ;;  %v8406_v37 = vadd.f32 %v1932_v14, %v8303_v42  ;;  %v2062_v19 = vsel %vm849_vm1, %v8415_v57, -inf  ;;  %v8430_v42 = vcombine.low %v7929_v30, %v7929_v30 }
 0x3dc   : > { %2024 = vmax.xlane.f32.xlu0 %v2023_v26  ;;  %v8418_v26 = vadd.f32 %v1939_v16, %v8313_v63  ;;  %v2038_v6 = vsel %vm849_vm1, %v8406_v37, -inf }
 0x3de   : > { %2051 = vmax.xlane.f32.xlu1 %v2050_v40  ;;  %v2059_v40 = vsel %vm849_vm1, %v8418_v26, -inf }
 0x3e0   : > { %2048 = vmax.xlane.f32.xlu0 %v2047_v52 }
 0x3e2   : > { %2045 = vmax.xlane.f32.xlu1 %v2044_v33 }
 0x3e4   : > { %2042 = vmax.xlane.f32.xlu0 %v2041_v56 }
 0x3e6   : > { %2069 = vmax.xlane.f32.xlu1 %v2068_v32 }
 0x3e8   : > { %2066 = vmax.xlane.f32.xlu0 %v2065_v23 }
 0x3ea   : > { %2039 = vmax.xlane.f32.xlu1 %v2038_v6 }
 0x3ec   : > { %2036 = vmax.xlane.f32.xlu0 %v2035_v36 }
 0x3ee   : > { %2063 = vmax.xlane.f32.xlu1 %v2062_v19 }
 0x3f0   : > { %2060 = vmax.xlane.f32.xlu0 %v2059_v40 }
 0x406   : > { %2346 = vrot.lane.b32.xlu0 %v8430_v42, %s7470_s8 }
 0x40c   : > { %v1983_v63 = vpop.xlane.xlu0 %1982 }
 0x40d   : > { %v2073_v9 = vsub.f32 %v8193_v31, %v1983_v63 }
 0x40f   : > { %v2107_v52 = vmul.f32 1.442695, %v2073_v9 }
 0x411   : > { %7038 = vpow2.f32 %v2107_v52 }
 0x41b   : > { %v8435_v14 = vpop.eup %7038 }
 0x41c   : > { %v2173_v33 = vsel %vm849_vm1, %v8435_v14, 0.0 }
 0x425   : > { %2174 = vadd.xlane.f32.xlu0 %v2173_v33 }
 0x441   : > { %v2007_v48 = vpop.xlane.xlu0 %2006 }
 0x442   : > { %v2081_v56 = vsub.f32 %v8231_v24, %v2007_v48 }
 0x443   : > { %v2010_v32 = vpop.xlane.xlu1 %2009 }
 0x444   : > { %v2123_v30 = vmul.f32 1.442695, %v2081_v56  ;;  %v2082_v40 = vsub.f32 %v8246_v53, %v2010_v32 }
 0x445   : > { %v1977_v18 = vpop.xlane.xlu0 %1976 }
 0x446   : > { %7040 = vpow2.f32 %v2123_v30  ;;  %v2071_v16 = vsub.f32 %v8249_v39, %v1977_v18  ;;  %v2125_v48 = vmul.f32 1.442695, %v2082_v40 }
 0x447   : > { %v1980_v23 = vpop.xlane.xlu1 %1979 }
 0x448   : > { %v2103_v6 = vmul.f32 1.442695, %v2071_v16  ;;  %v2072_v39 = vsub.f32 %v8254_v60, %v1980_v23 }
 0x449   : > { %v2001_v31 = vpop.xlane.xlu0 %2000 }
 0x44a   : > { %7042 = vpow2.f32 %v2103_v6  ;;  %v2079_v36 = vsub.f32 %v8259_v10, %v2001_v31  ;;  %v2105_v32 = vmul.f32 1.442695, %v2072_v39 }
 0x44b   : > { %v2004_v19 = vpop.xlane.xlu1 %2003 }
 0x44c   : > { %v2119_v63 = vmul.f32 1.442695, %v2079_v36 }
 0x44d   : > { %v1986_v9 = vpop.xlane.xlu0 %1985 }
 0x44e   : > { %7044 = vpow2.f32 %v2119_v63  ;;  %v2074_v24 = vsub.f32 %v8274_v17, %v1986_v9  ;;  %v2080_v17 = vsub.f32 %v8264_v11, %v2004_v19 }
 0x44f   : > { %v1998_v52 = vpop.xlane.xlu1 %1997 }
 0x450   : > { %v8444_v33 = vpop.eup %7040  ;;  %v2109_v56 = vmul.f32 1.442695, %v2074_v24  ;;  %v2078_v40 = vsub.f32 %v8284_v43, %v1998_v52 }
 0x451   : > { %v1995_v30 = vpop.xlane.xlu0 %1994  ;;  %v2197_v18 = vsel %vm849_vm1, %v8444_v33, 0.0 }
 0x452   : > { %7046 = vpow2.f32 %v2109_v56  ;;  %v2077_v10 = vsub.f32 %v8289_v49, %v1995_v30  ;;  %2198 = vadd.xlane.f32.xlu0 %v2197_v18  ;;  %v2121_v49 = vmul.f32 1.442695, %v2080_v17 }
 0x453   : > { %7048 = vpow2.f32 %v2125_v48  ;;  %v2022_v6 = vpop.xlane.xlu1 %2021 }
 0x454   : > { %v8450_v53 = vpop.eup %7042  ;;  %v2115_v16 = vmul.f32 1.442695, %v2077_v10  ;;  %v2086_v39 = vsub.f32 %v8292_v8, %v2022_v6 }
 0x455   : > { %v2019_v31 = vpop.xlane.xlu0 %2018  ;;  %v2167_v60 = vsel %vm849_vm1, %v8450_v53, 0.0 }
 0x456   : > { %7050 = vpow2.f32 %v2115_v16  ;;  %v2085_v23 = vsub.f32 %v8298_v21, %v2019_v31  ;;  %2168 = vadd.xlane.f32.xlu0 %v2167_v60  ;;  %v2117_v21 = vmul.f32 1.442695, %v2078_v40  ;;  %v2133_v10 = vmul.f32 1.442695, %v2086_v39 }
 0x457   : > { %7052 = vpow2.f32 %v2105_v32  ;;  %v1992_v24 = vpop.xlane.xlu1 %1991 }
 0x458   : > { %v8456_v36 = vpop.eup %7044  ;;  %v2131_v63 = vmul.f32 1.442695, %v2085_v23  ;;  %v2076_v32 = vsub.f32 %v8318_v12, %v1992_v24 }
 0x459   : > { %v1989_v9 = vpop.xlane.xlu0 %1988  ;;  %v2191_v11 = vsel %vm849_vm1, %v8456_v36, 0.0 }
 0x45a   : > { %7054 = vpow2.f32 %v2131_v63  ;;  %v2075_v19 = vsub.f32 %v8321_v34, %v1989_v9  ;;  %2192 = vadd.xlane.f32.xlu0 %v2191_v11  ;;  %v2113_v12 = vmul.f32 1.442695, %v2076_v32 }
 0x45b   : > { %7056 = vpow2.f32 %v2121_v49  ;;  %v2016_v16 = vpop.xlane.xlu1 %2015 }
 0x45c   : > { %v8462_v48 = vpop.eup %7046  ;;  %v2111_v56 = vmul.f32 1.442695, %v2075_v19  ;;  %v2084_v49 = vsub.f32 %v8326_v0, %v2016_v16 }
 0x45d   : > { %v2013_v30 = vpop.xlane.xlu0 %2012  ;;  %v2176_v43 = vsel %vm849_vm1, %v8462_v48, 0.0  ;;  %v8467_v52 = vpop.eup %7048 }
 0x45e   : > { %7058 = vpow2.f32 %v2111_v56  ;;  %v2083_v18 = vsub.f32 %v8332_v25, %v2013_v30  ;;  %2177 = vadd.xlane.f32.xlu1 %v2176_v43  ;;  %v2200_v31 = vsel %vm849_vm1, %v8467_v52, 0.0 }
 0x45f   : > { %7060 = vpow2.f32 %v2117_v21  ;;  %v2129_v21 = vmul.f32 1.442695, %v2084_v49 }
 0x460   : > { %v8470_v34 = vpop.eup %7050  ;;  %v2127_v17 = vmul.f32 1.442695, %v2083_v18 }
 0x461   : > { %v2031_v8 = vpop.xlane.xlu0 %2030  ;;  %v2185_v6 = vsel %vm849_vm1, %v8470_v34, 0.0  ;;  %v8477_v60 = vpop.eup %7052 }
 0x462   : > { %7062 = vpow2.f32 %v2127_v17  ;;  %v2089_v25 = vsub.f32 %v8343_v55, %v2031_v8  ;;  %2186 = vadd.xlane.f32.xlu0 %v2185_v6  ;;  %2201 = vadd.xlane.f32.xlu1 %v2200_v31  ;;  %v2170_v11 = vsel %vm849_vm1, %v8477_v60, 0.0  ;;  %v2034_v55 = vpop.xlane.xlu1 %2033 }
 0x463   : > { %7064 = vpow2.f32 %v2133_v10 }
 0x464   : > { %v8480_v23 = vpop.eup %7054  ;;  %v2139_v40 = vmul.f32 1.442695, %v2089_v25 }
 0x465   : > { %v2055_v63 = vpop.xlane.xlu0 %2054  ;;  %v2209_v9 = vsel %vm849_vm1, %v8480_v23, 0.0  ;;  %v8487_v19 = vpop.eup %7056 }
 0x466   : > { %7066 = vpow2.f32 %v2139_v40  ;;  %2210 = vadd.xlane.f32.xlu0 %v2209_v9  ;;  %2171 = vadd.xlane.f32.xlu1 %v2170_v11  ;;  %v2097_v0 = vsub.f32 %v8352_v20, %v2055_v63  ;;  %v2194_v30 = vsel %vm849_vm1, %v8487_v19, 0.0  ;;  %v2058_v16 = vpop.xlane.xlu1 %2057 }
 0x467   : > { %7068 = vpow2.f32 %v2113_v12  ;;  %v2090_v12 = vsub.f32 %v8338_v35, %v2034_v55 }
 0x468   : > { %v8489_v24 = vpop.eup %7058  ;;  %7070 = vpow2.f32 %v2129_v21  ;;  %v2155_v32 = vmul.f32 1.442695, %v2097_v0 }
 0x469   : > { %v2025_v39 = vpop.xlane.xlu0 %2024  ;;  %v2179_v56 = vsel %vm849_vm1, %v8489_v24, 0.0  ;;  %v8496_v43 = vpop.eup %7060  ;;  %v2141_v0 = vmul.f32 1.442695, %v2090_v12 }
 0x46a   : > { %v2087_v18 = vsub.f32 %v8367_v51, %v2025_v39  ;;  %2180 = vadd.xlane.f32.xlu0 %v2179_v56  ;;  %2195 = vadd.xlane.f32.xlu1 %v2194_v30  ;;  %v2188_v6 = vsel %vm849_vm1, %v8496_v43, 0.0  ;;  %v2098_v39 = vsub.f32 %v8348_v38, %v2058_v16 }
 0x46c   : > { %v8499_v10 = vpop.eup %7062  ;;  %v2135_v17 = vmul.f32 1.442695, %v2087_v18 }
 0x46d   : > { %v2049_v20 = vpop.xlane.xlu0 %2048  ;;  %v2203_v8 = vsel %vm849_vm1, %v8499_v10, 0.0  ;;  %v8505_v31 = vpop.eup %7064 }
 0x46e   : > { %7072 = vpow2.f32 %v2135_v17  ;;  %v2095_v51 = vsub.f32 %v8377_v3, %v2049_v20  ;;  %2204 = vadd.xlane.f32.xlu0 %v2203_v8  ;;  %2189 = vadd.xlane.f32.xlu1 %v2188_v6  ;;  %v2212_v9 = vsel %vm849_vm1, %v8505_v31, 0.0  ;;  %v2028_v3 = vpop.xlane.xlu1 %2027 }
 0x46f   : > { %7074 = vpow2.f32 %v2155_v32  ;;  %v2088_v18 = vsub.f32 %v8362_v46, %v2028_v3 }
 0x470   : > { %v8508_v25 = vpop.eup %7066  ;;  %v2151_v49 = vmul.f32 1.442695, %v2095_v51 }
 0x471   : > { %v2043_v40 = vpop.xlane.xlu0 %2042  ;;  %v2221_v63 = vsel %vm849_vm1, %v8508_v25, 0.0  ;;  %v8515_v11 = vpop.eup %7068  ;;  %v2137_v46 = vmul.f32 1.442695, %v2088_v18 }
 0x472   : > { %v2093_v21 = vsub.f32 %v8387_v61, %v2043_v40  ;;  %2222 = vadd.xlane.f32.xlu0 %v2221_v63  ;;  %2213 = vadd.xlane.f32.xlu1 %v2212_v9  ;;  %7076 = vpow2.f32 %v2151_v49  ;;  %v2182_v56 = vsel %vm849_vm1, %v8515_v11, 0.0  ;;  %v8521_v30 = vpop.eup %7070  ;;  %v2157_v61 = vmul.f32 1.442695, %v2098_v39  ;;  %v2052_v20 = vpop.xlane.xlu1 %2051 }
 0x473   : > { %v2206_v8 = vsel %vm849_vm1, %v8521_v30, 0.0  ;;  %v2096_v12 = vsub.f32 %v8371_v27, %v2052_v20 }
 0x474   : > { %v2147_v35 = vmul.f32 1.442695, %v2093_v21 }
 0x475   : > { %v2067_v55 = vpop.xlane.xlu0 %2066 }
 0x476   : > { %7078 = vpow2.f32 %v2147_v35  ;;  %2183 = vadd.xlane.f32.xlu1 %v2182_v56  ;;  %v2101_v17 = vsub.f32 %v8396_v41, %v2067_v55 }
 0x477   : > { %7080 = vpow2.f32 %v2141_v0 }
 0x478   : > { %v8524_v32 = vpop.eup %7072  ;;  %7082 = vpow2.f32 %v2157_v61  ;;  %v2163_v49 = vmul.f32 1.442695, %v2101_v17 }
 0x479   : > { %v2037_v38 = vpop.xlane.xlu0 %2036  ;;  %v2215_v16 = vsel %vm849_vm1, %v8524_v32, 0.0  ;;  %v8531_v6 = vpop.eup %7074 }
 0x47a   : > { %v2091_v51 = vsub.f32 %v8412_v50, %v2037_v38  ;;  %2216 = vadd.xlane.f32.xlu0 %v2215_v16  ;;  %2207 = vadd.xlane.f32.xlu1 %v2206_v8  ;;  %v2245_v63 = vsel %vm849_vm1, %v8531_v6, 0.0  ;;  %v2153_v50 = vmul.f32 1.442695, %v2096_v12  ;;  %v7428_v12 = vld [vmem:[%s7531_s7 + $0xc] sm:$0xf] }
 0x47c   : > { %v2143_v41 = vmul.f32 1.442695, %v2091_v51  ;;  %v8539_v9 = vpop.eup %7076 }
 0x47d   : > { %v8535_v40 = vpop.xlane.xlu0 %2060  ;;  %v2239_v27 = vsel %vm849_vm1, %v8539_v9, 0.0 }
 0x47e   : > { %7084 = vpow2.f32 %v2143_v41  ;;  %2246 = vadd.xlane.f32.xlu1 %v2245_v63  ;;  %v7429_v41 = vld [vmem:[%s7531_s7 + $0x1c] sm:$0xf] }
 0x47f   : > { %7086 = vpow2.f32 %v2137_v46  ;;  %v8577_v63 = vcombine.low %v7429_v41, %v7429_v41  ;;  %v2099_v41 = vsub.f32 %v8418_v26, %v8535_v40 }
 0x480   : > { %v8541_v21 = vpop.eup %7078  ;;  %7088 = vpow2.f32 %v2163_v49  ;;  %v8574_v49 = vcombine.low %v7428_v12, %v7428_v12  ;;  %v2046_v12 = vpop.xlane.xlu1 %2045 }
 0x481   : > { %v2233_v3 = vsel %vm849_vm1, %v8541_v21, 0.0  ;;  %v2347_v0 = vpop.permute.xlu0 %2346  ;;  %v8547_v39 = vpop.eup %7080  ;;  %7090 = vpow2.f32 %v2153_v50  ;;  %v7430_v50 = vld [vmem:[%s7531_s7 + $0x14] sm:$0xf]  ;;  %s7472_s7 = smov 80  }
 0x482   : > { %2234 = vadd.xlane.f32.xlu0 %v2233_v3  ;;  %2240 = vadd.xlane.f32.xlu1 %v2239_v27  ;;  %v2361_v35 = vsel %vm1230_vm2, %v2347_v0, 0  ;;  %v2224_v55 = vsel %vm849_vm1, %v8547_v39, 0.0  ;;  %v8553_v56 = vpop.eup %7082  ;;  %v8580_v3 = vcombine.low %v7430_v50, %v7430_v50  ;;  %v7431_v27 = vld [vmem:[%s7526_s28 + $0x20] sm:$0xff]  }
 0x483   : > { %6608 = vmatprep.subr.msk.bf16.mxu0 %vm1230_vm2, %v2347_v0  ;;  %v2248_v20 = vsel %vm849_vm1, %v8553_v56, 0.0  ;;  %v7432_v0 = vld [vmem:[%s7526_s28 + $0x28] sm:$0xff]  }
 0x484   : > { %6349 = vmatpush3.bf16.msra.mxu0 %v2361_v35  ;;  %10531 = vst [vmem:[#allocation34_spill] sm:$0xff] %v8580_v3  ;;  %v7433_v35 = vld [vmem:[%s7526_s28] sm:$0xff]   ;;  %v2070_v50 = vpop.xlane.xlu1 %2069 }
 0x486   : > { %2225 = vadd.xlane.f32.xlu1 %v2224_v55  ;;  %v7434_v55 = vld [vmem:[%s7526_s28 + $0x30] sm:$0xff]  }
 0x488   : > { %v8555_v18 = vpop.eup %7084 }
 0x489   : > { %v8557_v61 = vpop.eup %7086  ;;  %v2227_v17 = vsel %vm849_vm1, %v8555_v18, 0.0 }
 0x48a   : > { %v8563_v38 = vpop.eup %7088  ;;  %2228 = vadd.xlane.f32.xlu0 %v2227_v17  ;;  %2249 = vadd.xlane.f32.xlu1 %v2248_v20  ;;  %v2218_v8 = vsel %vm849_vm1, %v8557_v61, 0.0  ;;  %v7435_v17 = vld [vmem:[%s7526_s28 + $0x8] sm:$0xff]   ;;  %v7436_v20 = vld [vmem:[%s7526_s28 + $0x38] sm:$0xff]  }
 0x48b   : > { %v2257_v16 = vsel %vm849_vm1, %v8563_v38, 0.0  ;;  %v8569_v51 = vpop.eup %7090 }
 0x48c   : > { %v2242_v46 = vsel %vm849_vm1, %v8569_v51, 0.0 }
 0x48e   : > { %2258 = vadd.xlane.f32.xlu0 %v2257_v16  ;;  %2219 = vadd.xlane.f32.xlu1 %v2218_v8  ;;  %v7437_v16 = vld [vmem:[%s7526_s28 + $0x10] sm:$0xff]   ;;  %v7438_v8 = vld [vmem:[%s7526_s28 + $0x18] sm:$0xff]  }
 0x492   : > { %2243 = vadd.xlane.f32.xlu1 %v2242_v46  ;;  %v7439_v46 = vld [vmem:[%s7526_s28 + $0x68] sm:$0xff]  }
 0x4a3   : > { %2431 = vrot.lane.b32.xlu1 %v8574_v49, %s7470_s8 }
 0x4a4   : > { %2601 = vrot.lane.b32.xlu0 %v8577_v63, %s7470_s8 }
 0x4a7   : > { %2516 = vrot.lane.b32.xlu1 %v8580_v3, %s7470_s8  ;;  %s6046_s8 = sshll.u32 %s10708_s23, 6 }
 0x4a8   : > { %2773 = vrot.lane.b32.xlu0 %v7431_v27, %s7471_s24  ;;  %v2094_v27 = vsub.f32 %v8382_v44, %v2046_v12  ;;  %s10293_s27 = scalar_lea.vmem %s10441_s5, %s6046_s8  ;;  %s10306_s10 = scalar_lea.vmem %s10442_s6, %s6046_s8 }
 0x4ab   : > { %2691 = vrot.lane.b32.xlu1 %v7544_v5, %s7471_s24 }
 0x4ac   : > { %2775 = vrot.lane.b32.xlu0 %v7432_v0, %s7471_s24  ;;  %v2159_v0 = vmul.f32 1.442695, %v2099_v41 }
 0x4ae   : > { %7092 = vpow2.f32 %v2159_v0 }
 0x4af   : > { %2683 = vrot.lane.b32.xlu1 %v7433_v35, %s7471_s24  ;;  %v2149_v35 = vmul.f32 1.442695, %v2094_v27 }
 0x4b0   : > { %2777 = vrot.lane.b32.xlu0 %v7434_v55, %s7471_s24  ;;  %v2102_v55 = vsub.f32 %v8392_v28, %v2070_v50 }
 0x4b1   : > { %7094 = vpow2.f32 %v2149_v35 }
 0x4b3   : > { %2685 = vrot.lane.b32.xlu1 %v7435_v17, %s7471_s24  ;;  %v2040_v17 = vpop.xlane.xlu1 %2039 }
 0x4b4   : > { %2779 = vrot.lane.b32.xlu0 %v7436_v20, %s7471_s24  ;;  %v2165_v20 = vmul.f32 1.442695, %v2102_v55 }
 0x4b6   : > { %7096 = vpow2.f32 %v2165_v20 }
 0x4b7   : > { %2687 = vrot.lane.b32.xlu1 %v7437_v16, %s7471_s24 }
 0x4b8   : > { %2961 = vrot.lane.b32.xlu0 %v8067_v2, %s7471_s24 }
 0x4bb   : > { %2689 = vrot.lane.b32.xlu1 %v7438_v8, %s7471_s24  ;;  %v8621_v8 = vpop.eup %7092 }
 0x4bc   : > { %2955 = vrot.lane.b32.xlu0 %v7439_v46, %s7471_s24  ;;  %v2175_v46 = vpop.xlane.xlu0 %2174  ;;  %v2251_v26 = vsel %vm849_vm1, %v8621_v8, 0.0  ;;  %v8625_v44 = vpop.eup %7094 }
 0x4bd   : > { %v2236_v28 = vsel %vm849_vm1, %v8625_v44, 0.0 }
 0x4bf   : > { %2781 = vrot.lane.b32.xlu1 %v7976_v62, %s7471_s24 }
 0x4c0   : > { %2959 = vrot.lane.b32.xlu0 %v8081_v15, %s7471_s24  ;;  %v2092_v15 = vsub.f32 %v8406_v37, %v2040_v17  ;;  %v8631_v12 = vpop.eup %7096  ;;  %v2064_v37 = vpop.xlane.xlu1 %2063 }
 0x4c1   : > { %v2260_v50 = vsel %vm849_vm1, %v8631_v12, 0.0 }
 0x4c2   : > { %v2145_v16 = vmul.f32 1.442695, %v2092_v15 }
 0x4c4   : > { %3475 = vrot.lane.b32.xlu0 %v8430_v42, %s7471_s24  ;;  %7098 = vpow2.f32 %v2145_v16 }
 0x4ce   : > { %v8635_v27 = vpop.eup %7098 }
 0x4cf   : > { %v2230_v35 = vsel %vm849_vm1, %v8635_v27, 0.0 }
 0x4df   : > { %v8627_v40 = vpop.xlane.xlu0 %2198 }
 0x4e3   : > { %2252 = vadd.xlane.f32.xlu1 %v2251_v26  ;;  %v2169_v41 = vpop.xlane.xlu0 %2168 }
 0x4e7   : > { %2237 = vadd.xlane.f32.xlu1 %v2236_v28  ;;  %v2193_v55 = vpop.xlane.xlu0 %2192 }
 0x4eb   : > { %2261 = vadd.xlane.f32.xlu1 %v2260_v50  ;;  %v2178_v0 = vpop.xlane.xlu1 %2177 }
 0x4ec   : > { %7100 = vrcp.f32 %v2178_v0 }
 0x4ed   : > { %7102 = vrcp.f32 %v2169_v41 }
 0x4ee   : > { %7104 = vrcp.f32 %v2175_v46 }
 0x4ef   : > { %2231 = vadd.xlane.f32.xlu1 %v2230_v35  ;;  %v2202_v17 = vpop.xlane.xlu1 %2201  ;;  %v2187_v20 = vpop.xlane.xlu0 %2186 }
 0x4f3   : > { %v2172_v15 = vpop.xlane.xlu1 %2171  ;;  %v8639_v26 = vpop.xlane.xlu0 %2210 }
 0x4f4   : > { %7106 = vrcp.f32 %v2172_v15 }
 0x4f5   : > { %7108 = vrcp.f32 %v2193_v55 }
 0x4f6   : > { %v7101_v50 = vpop.eup %7100 }
 0x4f7   : > { %v2196_v16 = vpop.xlane.xlu1 %2195  ;;  %v7103_v58 = vpop.eup %7102  ;;  %v2298_v7 = vmul.f32 %v7101_v50, %v8462_v48 }
 0x4f8   : > { %7110 = vrcp.f32 %v2196_v16  ;;  %v7105_v45 = vpop.eup %7104  ;;  %v2181_v35 = vpop.xlane.xlu0 %2180  ;;  %v2295_v46 = vmul.f32 %v7103_v58, %v8450_v53 }
 0x4f9   : > { %v2297_v55 = vmul.f32 %v7105_v45, %v8435_v14 }
 0x4fb   : > { %v2190_v28 = vpop.xlane.xlu1 %2189  ;;  %v2328_v29 = vpack.c.bf16 %v2298_v7, %v2297_v55  ;;  %v2100_v7 = vsub.f32 %v8415_v57, %v2064_v37 }
 0x4fc   : > { %7112 = vrcp.f32 %v2190_v28  ;;  %v2205_v58 = vpop.xlane.xlu0 %2204 }
 0x4fd   : > { %7114 = vrcp.f32 %v2181_v35 }
 0x4fe   : > { %v7107_v4 = vpop.eup %7106  ;;  %7116 = vrcp.f32 %v2187_v20 }
 0x4ff   : > { %v2214_v59 = vpop.xlane.xlu1 %2213  ;;  %v2296_v41 = vmul.f32 %v7107_v4, %v8477_v60  ;;  %v7109_v0 = vpop.eup %7108 }
 0x500   : > { %2871 = vrot.lane.b32.xlu1 %v8011_v13, %s7471_s24  ;;  %v2303_v48 = vmul.f32 %v7109_v0, %v8456_v36  ;;  %v2223_v28 = vpop.xlane.xlu0 %2222 }
 0x501   : > { %v2327_v15 = vpack.c.bf16 %v2296_v41, %v2295_v46  ;;  %v2161_v46 = vmul.f32 1.442695, %v2100_v7 }
 0x502   : > { %v7111_v16 = vpop.eup %7110 }
 0x503   : > { %v2184_v54 = vpop.xlane.xlu1 %2183  ;;  %6350 = vmatprep.mubr.msk.bf16.mxu0 %vm849_vm1, %v2327_v15  ;;  %v2304_v50 = vmul.f32 %v7111_v16, %v8487_v19 }
 0x504   : > { %7118 = vrcp.f32 %v2184_v54  ;;  %6351 = vmatmul.mubr.msk.bf16.vlgmr.msra.gmra.mrb[48].mxu0 %vm849_vm1, %v2328_v29 }
 0x505   : > { %v2331_v4 = vpack.c.bf16 %v2304_v50, %v2303_v48  ;;  %7120 = vpow2.f32 %v2161_v46 }
 0x506   : > { %v7113_v45 = vpop.eup %7112  ;;  %7122 = vrcp.f32 %v2202_v17 }
 0x507   : > { %v2208_v53 = vpop.xlane.xlu1 %2207  ;;  %6360 = vmatprep.mubr.msk.bf16.mxu1 %vm849_vm1, %v2331_v4  ;;  %v7115_v60 = vpop.eup %7114  ;;  %v2302_v54 = vmul.f32 %v7113_v45, %v8496_v43 }
 0x508   : > { %v7117_v20 = vpop.eup %7116  ;;  %v2299_v19 = vmul.f32 %v7115_v60, %v8489_v24  ;;  %v2217_v0 = vpop.xlane.xlu0 %2216  ;;  %7124 = vrcp.f32 %v2208_v53 }
 0x509   : > { %v2301_v41 = vmul.f32 %v7117_v20, %v8470_v34  ;;  %7126 = vrcp.f32 %v8627_v40 }
 0x50a   : > { %7128 = vrcp.f32 %v2205_v58 }
 0x50b   : > { %v2247_v14 = vpop.xlane.xlu1 %2246  ;;  %v2330_v15 = vpack.c.bf16 %v2302_v54, %v2301_v41  ;;  %7130 = vrcp.f32 %v2223_v28 }
 0x50e   : > { %v7119_v35 = vpop.eup %7118 }
 0x50f   : > { %v2241_v36 = vpop.xlane.xlu1 %2240  ;;  %v2300_v29 = vmul.f32 %v7119_v35, %v8515_v11  ;;  %v8659_v57 = vpop.xlane.xlu0 %2234 }
 0x510   : > { %v8664_v11 = vpop.eup %7120 }
 0x511   : > { %v2329_v55 = vpack.c.bf16 %v2300_v29, %v2299_v19  ;;  %v7123_v37 = vpop.eup %7122 }
 0x512   : > { %v7125_v40 = vpop.eup %7124  ;;  %v2306_v58 = vmul.f32 %v7123_v37, %v8467_v52 }
 0x513   : > { %6354 = vmatprep.mubr.msk.bf16.mxu0 %vm849_vm1, %v2329_v55  ;;  %v2226_v16 = vpop.xlane.xlu1 %2225  ;;  %v7127_v50 = vpop.eup %7126  ;;  %v2308_v60 = vmul.f32 %v7125_v40, %v8521_v30 }
 0x514   : > { %6355 = vmatmul.mubr.msk.bf16.gmra.mrb[52].mxu0 %vm849_vm1, %v2330_v15  ;;  %7132 = vrcp.f32 %v2226_v16  ;;  %v7129_v4 = vpop.eup %7128  ;;  %v2305_v20 = vmul.f32 %v7127_v50, %v8444_v33 }
 0x515   : > { %7134 = vrcp.f32 %v2217_v0  ;;  %v7131_v53 = vpop.eup %7130  ;;  %v2307_v52 = vmul.f32 %v7129_v4, %v8499_v10 }
 0x516   : > { %7136 = vrcp.f32 %v2214_v59  ;;  %v2254_v59 = vsel %vm849_vm1, %v8664_v11, 0.0 }
 0x517   : > { %v2250_v24 = vpop.xlane.xlu1 %2249  ;;  %v8662_v43 = vpop.xlane.xlu0 %2228  ;;  %v2333_v33 = vpack.c.bf16 %v2308_v60, %v2307_v52  ;;  %v7441_v60 = vld [vmem:[%s7526_s28 + $0x48] sm:$0xff]   ;;  %v7445_v52 = vld [vmem:[%s7526_s28 + $0x70] sm:$0xff]  }
 0x51b   : > { %v2220_v34 = vpop.xlane.xlu1 %2219  ;;  %v8667_v17 = vpop.xlane.xlu0 %2258 }
 0x51c   : > { %7138 = vrcp.f32 %v2220_v34 }
 0x51d   : > { %7140 = vrcp.f32 %v8639_v26 }
 0x51e   : > { %7142 = vrcp.f32 %v2241_v36  ;;  %v7133_v26 = vpop.eup %7132  ;;  %v2332_v36 = vpack.c.bf16 %v2306_v58, %v2305_v20  ;;  %v7443_v20 = vld [vmem:[%s7526_s28 + $0x58] sm:$0xff]  }
 0x51f   : > { %v2244_v48 = vpop.xlane.xlu1 %2243  ;;  %v2602_v7 = vpop.permute.xlu0 %2601  ;;  %v2314_v30 = vmul.f32 %v7133_v26, %v8547_v39  ;;  %v7442_v26 = vld [vmem:[%s7526_s28 + $0x50] sm:$0xff]  }
 0x520   : > { %7144 = vrcp.f32 %v2244_v48  ;;  %v7135_v35 = vpop.eup %7134  ;;  %v2616_v46 = vsel %vm1230_vm2, %v2602_v7, 0 }
 0x521   : > { %7146 = vrcp.f32 %v2250_v24  ;;  %v7137_v54 = vpop.eup %7136  ;;  %v2311_v10 = vmul.f32 %v7135_v35, %v8524_v32 }
 0x522   : > { %7148 = vrcp.f32 %v2247_v14  ;;  %v2313_v14 = vmul.f32 %v7131_v53, %v8508_v25  ;;  %v2310_v24 = vmul.f32 %v7137_v54, %v8505_v31  ;;  %v7440_v53 = vld [vmem:[%s7526_s28 + $0x40] sm:$0xff]  }
 0x523   : > { %v2432_v45 = vpop.permute.xlu1 %2431  ;;  %v8712_v35 = vpop.permute.xlu0 %2773 }
 0x524   : > { %2255 = vadd.xlane.f32.xlu1 %v2254_v59  ;;  %6609 = vmatprep.subr.msk.bf16.mxu1 %vm1230_vm2, %v2432_v45  ;;  %v2446_v28 = vsel %vm1230_vm2, %v2432_v45, 0  ;;  %v2336_v34 = vpack.c.bf16 %v2314_v30, %v2313_v14 }
 0x525   : > { %6359 = vmatpush3.bf16.msra.mxu1 %v2446_v28  ;;  %v7444_v28 = vld [vmem:[%s7526_s28 + $0x60] sm:$0xff]  }
 0x526   : > { %6611 = vmatprep.subr.msk.bf16.mxu1 %vm1230_vm2, %v2602_v7  ;;  %v7139_v19 = vpop.eup %7138 }
 0x527   : > { %v2517_v29 = vpop.permute.xlu1 %2516  ;;  %v7141_v41 = vpop.eup %7140  ;;  %v2312_v55 = vmul.f32 %v7139_v19, %v8557_v61 }
 0x528   : > { %6361 = vmatmul.mubr.msk.bf16.vlgmr.msra.gmra.mrb[48].mxu1 %vm849_vm1, %v2332_v36  ;;  %6610 = vmatprep.subr.msk.bf16.mxu0 %vm1230_vm2, %v2517_v29  ;;  %v2531_v0 = vsel %vm1230_vm2, %v2517_v29, 0  ;;  %v7143_v15 = vpop.eup %7142  ;;  %v2309_v32 = vmul.f32 %v7141_v41, %v8480_v23  ;;  %v8718_v54 = vpop.permute.xlu0 %2775 }
 0x529   : > { %6364 = vmatprep.mubr.msk.bf16.mxu1 %vm849_vm1, %v2333_v33  ;;  %6369 = vmatpush3.bf16.msra.mxu0 %v2531_v0  ;;  %v2335_v16 = vpack.c.bf16 %v2312_v55, %v2311_v10  ;;  %v2319_v25 = vmul.f32 %v7143_v15, %v8539_v9 }
 0x52a   : > { %v7145_v39 = vpop.eup %7144  ;;  %6379 = vmatpush3.bf16.msra.mxu1 %v2616_v46  ;;  %v2334_v61 = vpack.c.bf16 %v2310_v24, %v2309_v32 }
 0x52b   : > { %v2692_v37 = vpop.permute.xlu1 %2691  ;;  %v2320_v48 = vmul.f32 %v7145_v39, %v8569_v51  ;;  %6370 = vmatprep.mubr.msk.bf16.mxu0 %vm849_vm1, %v2335_v16  ;;  %v7147_v40 = vpop.eup %7146 }
 0x52c   : > { %6612 = vmatprep.subr.msk.bf16.mxu0 %vm404_vm0, %v2692_v37  ;;  %6371 = vmatmul.mubr.msk.bf16.vlgmr.msra.gmra.mrb[56].mxu0 %vm849_vm1, %v2336_v34  ;;  %v7149_v51 = vpop.eup %7148  ;;  %v2706_v4 = vsel %vm404_vm0, %v2692_v37, 0  ;;  %v2322_v58 = vmul.f32 %v7147_v40, %v8553_v56  ;;  %v2778_v36 = vpop.permute.xlu0 %2777 }
 0x52d   : > { %v2339_v50 = vpack.c.bf16 %v2320_v48, %v2319_v25  ;;  %v2321_v9 = vmul.f32 %v7149_v51, %v8531_v6 }
 0x52f   : > { %v2684_v31 = vpop.permute.xlu1 %2683  ;;  %v2340_v45 = vpack.c.bf16 %v2322_v58, %v2321_v9 }
 0x530   : > { %6365 = vmatmul.mubr.msk.bf16.gmra.mrb[52].mxu1 %vm849_vm1, %v2334_v61  ;;  %v8722_v19 = vpop.permute.xlu0 %2779 }
 0x531   : > { %6380 = vmatprep.mubr.msk.bf16.mxu1 %vm849_vm1, %v2339_v50 }
 0x532   : > { %6389 = vmatpush3.bf16.xpose.msra.mxu0 %v2706_v4 }
 0x533   : > { %v2686_v23 = vpop.permute.xlu1 %2685 }
 0x534   : > { %v2962_v30 = vpop.permute.xlu0 %2961 }
 0x535   : > { %2863 = vrot.lane.b32.xlu1 %v7440_v53, %s7471_s24 }
 0x537   : > { %v2688_v59 = vpop.permute.xlu1 %2687 }
 0x538   : > { %6381 = vmatmul.mubr.msk.bf16.vlgmr.msra.gmra.mrb[56].mxu1 %vm849_vm1, %v2340_v45 }
 0x539   : > { %2865 = vrot.lane.b32.xlu1 %v7441_v60, %s7471_s24 }
 0x53b   : > { %v2690_v7 = vpop.permute.xlu1 %2689 }
 0x53d   : > { %2867 = vrot.lane.b32.xlu1 %v7442_v26, %s7471_s24 }
 0x53f   : > { %v2782_v56 = vpop.permute.xlu1 %2781 }
 0x540   : > { %6613 = vmatprep.subr.msk.bf16.mxu1 %vm404_vm0, %v2782_v56  ;;  %v2796_v6 = vsel %vm404_vm0, %v2782_v56, 0 }
 0x541   : > { %6399 = vmatpush3.bf16.xpose.msra.mxu1 %v2796_v6  ;;  %2869 = vrot.lane.b32.xlu1 %v7443_v20, %s7471_s24 }
 0x542   : > { %6615 = vmatprep.subr.msk.bf16.mxu1 %vm404_vm0, %v2962_v30 }
 0x545   : > { %2953 = vrot.lane.b32.xlu1 %v7444_v28, %s7471_s24 }
 0x549   : > { %2957 = vrot.lane.b32.xlu1 %v7445_v52, %s7471_s24 }
 0x54d   : > { %3557 = vrot.lane.b32.xlu1 %v8574_v49, %s7471_s24 }
 0x551   : > { %3639 = vrot.lane.b32.xlu1 %v8580_v3, %s7471_s24 }
 0x555   : > { %3811 = vrot.lane.b32.xlu1 %v7544_v5, %s7472_s7 }
 0x570   : > { %v2253_v29 = vpop.xlane.xlu1 %2252 }
 0x574   : > { %v2238_v33 = vpop.xlane.xlu1 %2237 }
 0x575   : > { %7150 = vrcp.f32 %v2238_v33 }
 0x576   : > { %7152 = vrcp.f32 %v8662_v43 }
 0x577   : > { %7154 = vrcp.f32 %v8659_v57 }
 0x578   : > { %v2262_v46 = vpop.xlane.xlu1 %2261 }
 0x57c   : > { %v2232_v41 = vpop.xlane.xlu1 %2231 }
 0x57d   : > { %7156 = vrcp.f32 %v2232_v41 }
 0x57e   : > { %7158 = vrcp.f32 %v2262_v46 }
 0x57f   : > { %v7151_v10 = vpop.eup %7150  ;;  %7160 = vrcp.f32 %v2253_v29 }
 0x580   : > { %v2872_v0 = vpop.permute.xlu1 %2871  ;;  %v7153_v55 = vpop.eup %7152  ;;  %v2318_v39 = vmul.f32 %v7151_v10, %v8625_v44  ;;  %7162 = vrcp.f32 %v8667_v17 }
 0x581   : > { %6614 = vmatprep.subr.msk.bf16.mxu0 %vm404_vm0, %v2872_v0  ;;  %v7155_v15 = vpop.eup %7154  ;;  %v2315_v16 = vmul.f32 %v7153_v55, %v8555_v18  ;;  %v2886_v18 = vsel %vm404_vm0, %v2872_v0, 0 }
 0x582   : > { %v2317_v34 = vmul.f32 %v7155_v15, %v8541_v21 }
 0x584   : > { %v2338_v37 = vpack.c.bf16 %v2318_v39, %v2317_v34 }
 0x587   : > { %v7157_v14 = vpop.eup %7156 }
 0x588   : > { %v2316_v24 = vmul.f32 %v7157_v14, %v8635_v27  ;;  %v7159_v27 = vpop.eup %7158 }
 0x589   : > { %v7161_v57 = vpop.eup %7160  ;;  %v2326_v25 = vmul.f32 %v7159_v27, %v8631_v12  ;;  %v2956_v12 = vpop.permute.xlu0 %2955 }
 0x58a   : > { %v2337_v43 = vpack.c.bf16 %v2316_v24, %v2315_v16  ;;  %v7163_v48 = vpop.eup %7162  ;;  %v2323_v61 = vmul.f32 %v7161_v57, %v8621_v8  ;;  %v2976_v8 = vsel %vm404_vm0, %v2962_v30, 0 }
 0x58b   : > { %v2325_v17 = vmul.f32 %v7163_v48, %v8563_v38 }
 0x58c   : > { %6374 = vmatprep.mubr.msk.bf16.mxu0 %vm849_vm1, %v2337_v43 }
 0x58d   : > { %6375 = vmatmul.mubr.msk.bf16.gmra.mrb[60].mxu0 %vm849_vm1, %v2338_v37  ;;  %v2342_v51 = vpack.c.bf16 %v2326_v25, %v2325_v17  ;;  %v2960_v60 = vpop.permute.xlu0 %2959 }
 0x58e   : > { %6390 = vmatprep.mubr.msk.bf16.mxu0 %vm404_vm0, %v2684_v31 }
 0x595   : > { %6391 = vmatmul.mubr.msk.bf16.vlgmr.msra.gmra.mrb[64].mxu0 %vm404_vm0, %v2686_v23 }
 0x596   : > { %6409 = vmatpush3.bf16.xpose.msra.mxu0 %v2886_v18  ;;  %6394 = vmatprep.mubr.msk.bf16.mxu0 %vm404_vm0, %v2688_v59 }
 0x59d   : > { %6395 = vmatmul.mubr.msk.bf16.gmra.mrb[68].mxu0 %vm404_vm0, %v2690_v7 }
 0x5b1   : > { %v2256_v21 = vpop.xlane.xlu1 %2255 }
 0x5b2   : > { %7164 = vrcp.f32 %v2256_v21 }
 0x5b5   : > { %v2864_v44 = vpop.permute.xlu1 %2863 }
 0x5b6   : > { %6410 = vmatprep.mubr.msk.bf16.mxu0 %vm404_vm0, %v2864_v44 }
 0x5b9   : > { %v2866_v5 = vpop.permute.xlu1 %2865 }
 0x5ba   : > { %6411 = vmatmul.mubr.msk.bf16.vlgmr.msra.gmra.mrb[72].mxu0 %vm404_vm0, %v2866_v5  ;;  %v3476_v5 = vpop.permute.xlu0 %3475 }
 0x5bb   : > { %6616 = vmatprep.subr.msk.bf16.mxu0 %vm1230_vm2, %v3476_v5  ;;  %v3490_v48 = vsel %vm1230_vm2, %v3476_v5, 0  ;;  %v8872_v5 = vld [vmem:[%s10438_s2 + $0x98] sm:$0xff] }
 0x5bc   : > { %v7165_v32 = vpop.eup %7164  ;;  %6429 = vmatpush3.bf16.msra.mxu0 %v3490_v48 }
 0x5bd   : > { %v2324_v40 = vmul.f32 %v7165_v32, %v8664_v11  ;;  %v2868_v31 = vpop.permute.xlu1 %2867 }
 0x5be   : > { %6414 = vmatprep.mubr.msk.bf16.mxu0 %vm404_vm0, %v2868_v31 }
 0x5bf   : > { %v2341_v50 = vpack.c.bf16 %v2324_v40, %v2323_v61 }
 0x5c1   : > { %6384 = vmatprep.mubr.msk.bf16.mxu1 %vm849_vm1, %v2341_v50  ;;  %v2870_v4 = vpop.permute.xlu1 %2869 }
 0x5c2   : > { %6385 = vmatmul.mubr.msk.bf16.gmra.mrb[60].mxu1 %vm849_vm1, %v2342_v51  ;;  %6415 = vmatmul.mubr.msk.bf16.gmra.mrb[76].mxu0 %vm404_vm0, %v2870_v4  ;;  %v8859_v51 = vld [vmem:[%s10438_s2 + $0x90] sm:$0xff] }
 0x5c3   : > { %6400 = vmatprep.mubr.msk.bf16.mxu1 %vm404_vm0, %v8712_v35 }
 0x5c5   : > { %v2954_v38 = vpop.permute.xlu1 %2953 }
 0x5c9   : > { %v2958_v58 = vpop.permute.xlu1 %2957 }
 0x5ca   : > { %6401 = vmatmul.mubr.msk.bf16.vlgmr.msra.gmra.mrb[64].mxu1 %vm404_vm0, %v8718_v54 }
 0x5cb   : > { %6404 = vmatprep.mubr.msk.bf16.mxu1 %vm404_vm0, %v2778_v36  ;;  %6419 = vmatpush3.bf16.xpose.msra.mxu1 %v2976_v8 }
 0x5cd   : > { %v3558_v27 = vpop.permute.xlu1 %3557 }
 0x5ce   : > { %6617 = vmatprep.subr.msk.bf16.mxu1 %vm1230_vm2, %v3558_v27  ;;  %v3572_v57 = vsel %vm1230_vm2, %v3558_v27, 0 }
 0x5d1   : > { %v8840_v32 = vpop.permute.xlu1 %3639 }
 0x5d2   : > { %6405 = vmatmul.mubr.msk.bf16.gmra.mrb[68].mxu1 %vm404_vm0, %v8722_v19  ;;  %6618 = vmatprep.subr.msk.bf16.mxu0 %vm1230_vm2, %v8840_v32 }
 0x5d3   : > { %6420 = vmatprep.mubr.msk.bf16.mxu1 %vm404_vm0, %v2954_v38  ;;  %v8864_v38 = vld [vmem:[%s10438_s2 + $0x80] sm:$0xff] }
 0x5d7   : > { %v8761_v11 = vpop.f32.mrb[48].mxu0 }
 0x5d8   : > { %10532 = vst [vmem:[#allocation35_spill] sm:$0xff] %v8761_v11  ;;  %v8763_v23 = vpop.f32.mrb[49].mxu0 }
 0x5d9   : > { %10533 = vst [vmem:[#allocation36_spill] sm:$0xff] %v8763_v23  ;;  %v8765_v9 = vpop.f32.mrb[50].mxu0 }
 0x5da   : > { %10534 = vst [vmem:[#allocation37_spill] sm:$0xff] %v8765_v9  ;;  %6421 = vmatmul.mubr.msk.bf16.vlgmr.msra.gmra.mrb[72].mxu1 %vm404_vm0, %v2956_v12  ;;  %v8770_v45 = vpop.f32.mrb[51].mxu0 }
 0x5db   : > { %10535 = vst [vmem:[#allocation38_spill] sm:$0xff] %v8770_v45  ;;  %6424 = vmatprep.mubr.msk.bf16.mxu1 %vm404_vm0, %v2958_v58  ;;  %6439 = vmatpush3.bf16.msra.mxu1 %v3572_v57 }
 0x5e2   : > { %6425 = vmatmul.mubr.msk.bf16.gmra.mrb[76].mxu1 %vm404_vm0, %v2960_v60 }
 0x5e7   : > { %v8776_v7 = vpop.f32.mrb[52].mxu0 }
 0x5e8   : > { %v8778_v26 = vpop.f32.mrb[53].mxu0 }
 0x5e9   : > { %v8780_v56 = vpop.f32.mrb[54].mxu0 }
 0x5ea   : > { %v8784_v20 = vpop.f32.mrb[55].mxu0 }
 0x5fb   : > { %v8788_v35 = vpop.f32.mrb[48].mxu1 }
 0x5fc   : > { %10536 = vst [vmem:[#allocation39_spill] sm:$0xff] %v8788_v35  ;;  %v8790_v52 = vpop.f32.mrb[49].mxu1 }
 0x5fd   : > { %10537 = vst [vmem:[#allocation40_spill] sm:$0xff] %v8790_v52  ;;  %v8792_v54 = vpop.f32.mrb[50].mxu1 }
 0x5fe   : > { %10538 = vst [vmem:[#allocation41_spill] sm:$0xff] %v8792_v54  ;;  %v8796_v19 = vpop.f32.mrb[51].mxu1 }
 0x5ff   : > { %10539 = vst [vmem:[#allocation42_spill] sm:$0xff] %v8796_v19  ;;  %v8800_v29 = vpop.f32.mrb[56].mxu0 }
 0x600   : > { %10540 = vst [vmem:[#allocation43_spill] sm:$0xff] %v8800_v29  ;;  %v8802_v33 = vpop.f32.mrb[57].mxu0 }
 0x601   : > { %10541 = vst [vmem:[#allocation44_spill] sm:$0xff] %v8802_v33  ;;  %v8804_v46 = vpop.f32.mrb[58].mxu0 }
 0x602   : > { %10542 = vst [vmem:[#allocation45_spill] sm:$0xff] %v8804_v46  ;;  %v8808_v0 = vpop.f32.mrb[59].mxu0 }
 0x603   : > { %10543 = vst [vmem:[#allocation46_spill] sm:$0xff] %v8808_v0  ;;  %v8810_v10 = vpop.f32.mrb[52].mxu1 }
 0x604   : > { %10544 = vst [vmem:[#allocation47_spill] sm:$0xff] %v8810_v10  ;;  %v8814_v15 = vpop.f32.mrb[53].mxu1 }
 0x605   : > { %10545 = vst [vmem:[#allocation48_spill] sm:$0xff] %v8814_v15  ;;  %v8816_v14 = vpop.f32.mrb[54].mxu1 }
 0x606   : > { %10546 = vst [vmem:[#allocation49_spill] sm:$0xff] %v8816_v14  ;;  %v8820_v16 = vpop.f32.mrb[55].mxu1 }
 0x607   : > { %10547 = vst [vmem:[#allocation50_spill] sm:$0xff] %v8820_v16 }
 0x60b   : > { %v8824_v34 = vpop.f32.mrb[56].mxu1 }
 0x60c   : > { %10548 = vst [vmem:[#allocation51_spill] sm:$0xff] %v8824_v34  ;;  %v8826_v43 = vpop.f32.mrb[57].mxu1 }
 0x60d   : > { %10549 = vst [vmem:[#allocation52_spill] sm:$0xff] %v8826_v43  ;;  %v8828_v37 = vpop.f32.mrb[58].mxu1 }
 0x60e   : > { %10550 = vst [vmem:[#allocation53_spill] sm:$0xff] %v8828_v37  ;;  %v8832_v21 = vpop.f32.mrb[59].mxu1 }
 0x60f   : > { %10551 = vst [vmem:[#allocation54_spill] sm:$0xff] %v8832_v21 }
 0x660   : > { %v8842_v25 = vpop.f32.mrb[60].mxu0 }
 0x661   : > { %10552 = vst [vmem:[#allocation55_spill] sm:$0xff] %v8842_v25  ;;  %v8846_v61 = vpop.f32.mrb[61].mxu0 }
 0x662   : > { %10553 = vst [vmem:[#allocation56_spill] sm:$0xff] %v8846_v61  ;;  %v8848_v40 = vpop.f32.mrb[62].mxu0 }
 0x663   : > { %10554 = vst [vmem:[#allocation57_spill] sm:$0xff] %v8848_v40  ;;  %v8852_v17 = vpop.f32.mrb[63].mxu0 }
 0x664   : > { %10555 = vst [vmem:[#allocation58_spill] sm:$0xff] %v8852_v17 }
 0x668   : > { %v6392_v4 = vpop.f32.mrb[64].mxu0 }
 0x669   : > { %v3045_v8 = vmul.f32 0.25, %v6392_v4  ;;  %v2742_v12 = vpop.f32.mrb[65].mxu0 }
 0x66a   : > { %v3043_v58 = vmul.f32 0.25, %v2742_v12  ;;  %v6393_v60 = vpop.f32.mrb[66].mxu0 }
 0x66b   : > { %v8867_v27 = vadd.f32 %v3045_v8, %v8859_v51  ;;  %v3046_v57 = vmul.f32 0.25, %v6393_v60  ;;  %v2745_v48 = vpop.f32.mrb[67].mxu0 }
 0x66c   : > { %v8875_v4 = vadd.f32 %v3043_v58, %v8864_v38  ;;  %v3044_v25 = vmul.f32 0.25, %v2745_v48 }
 0x66d   : > { %v3113_v39 = vsel %vm849_vm1, %v8867_v27, -inf  ;;  %v8880_v18 = vadd.f32 %v3046_v57, %v8872_v5 }
 0x66e   : > { %3114 = vmax.xlane.f32.xlu0 %v3113_v39  ;;  %v3107_v8 = vsel %vm849_vm1, %v8875_v4, -inf }
 0x66f   : > { %3108 = vmax.xlane.f32.xlu1 %v3107_v8  ;;  %v3116_v60 = vsel %vm849_vm1, %v8880_v18, -inf }
 0x670   : > { %v6396_v12 = vpop.f32.mrb[68].mxu0 }
 0x671   : > { %v2758_v44 = vpop.f32.mrb[69].mxu0  ;;  %v3049_v48 = vmul.f32 0.25, %v6396_v12 }
 0x672   : > { %v6397_v31 = vpop.f32.mrb[70].mxu0 }
 0x673   : > { %3117 = vmax.xlane.f32.xlu1 %v3116_v60  ;;  %v2761_v58 = vpop.f32.mrb[71].mxu0 }
 0x68d   : > { %v8886_v50 = vpop.f32.mrb[72].mxu0 }
 0x68e   : > { %v8888_v41 = vpop.f32.mrb[73].mxu0 }
 0x68f   : > { %v8890_v53 = vpop.f32.mrb[74].mxu0 }
 0x690   : > { %v8892_v57 = vpop.f32.mrb[75].mxu0 }
 0x695   : > { %v8894_v39 = vpop.f32.mrb[60].mxu1  ;;  %v8896_v55 = vpop.f32.mrb[76].mxu0 }
 0x696   : > { %10556 = vst [vmem:[#allocation59_spill] sm:$0xff] %v8894_v39  ;;  %v8898_v8 = vpop.f32.mrb[61].mxu1  ;;  %v8900_v59 = vpop.f32.mrb[77].mxu0 }
 0x697   : > { %10557 = vst [vmem:[#allocation60_spill] sm:$0xff] %v8898_v8  ;;  %v8902_v24 = vpop.f32.mrb[62].mxu1  ;;  %v8904_v60 = vpop.f32.mrb[78].mxu0 }
 0x698   : > { %10558 = vst [vmem:[#allocation61_spill] sm:$0xff] %v8902_v24  ;;  %v8908_v30 = vpop.f32.mrb[63].mxu1  ;;  %v8910_v6 = vpop.f32.mrb[79].mxu0 }
 0x699   : > { %10559 = vst [vmem:[#allocation62_spill] sm:$0xff] %v8908_v30 }
 0x69d   : > { %v6402_v22 = vpop.f32.mrb[64].mxu1 }
 0x69e   : > { %v3053_v10 = vmul.f32 0.25, %v6402_v22  ;;  %v2832_v14 = vpop.f32.mrb[65].mxu1  ;;  %v8928_v22 = vld [vmem:[%s10438_s2 + $0x88] sm:$0xff] }
 0x69f   : > { %v3051_v47 = vmul.f32 0.25, %v2832_v14  ;;  %v6403_v1 = vpop.f32.mrb[66].mxu1  ;;  %v8938_v14 = vld [vmem:[%s10438_s2 + $0xb8] sm:$0xff] }
 0x6a0   : > { %v8915_v34 = vadd.f32 %v3053_v10, %v8859_v51  ;;  %v3054_v37 = vmul.f32 0.25, %v6403_v1  ;;  %v2835_v43 = vpop.f32.mrb[67].mxu1  ;;  %v3050_v10 = vmul.f32 0.25, %v6397_v31 }
 0x6a1   : > { %v3052_v21 = vmul.f32 0.25, %v2835_v43  ;;  %v8918_v36 = vadd.f32 %v3051_v47, %v8864_v38 }
 0x6a2   : > { %v8921_v39 = vadd.f32 %v3054_v37, %v8872_v5  ;;  %v3137_v28 = vsel %vm849_vm1, %v8915_v34, -inf  ;;  %v8941_v37 = vadd.f32 %v3044_v25, %v8928_v22  ;;  %v8951_v8 = vadd.f32 %v3050_v10, %v8938_v14 }
 0x6a3   : > { %3138 = vmax.xlane.f32.xlu0 %v3137_v28  ;;  %v8931_v1 = vadd.f32 %v3052_v21, %v8928_v22  ;;  %v3131_v28 = vsel %vm849_vm1, %v8918_v36, -inf  ;;  %v8948_v21 = vld [vmem:[%s10438_s2 + $0xb0] sm:$0xff] }
 0x6a4   : > { %v3140_v47 = vsel %vm849_vm1, %v8921_v39, -inf  ;;  %v8956_v40 = vadd.f32 %v3049_v48, %v8948_v21  ;;  %v3110_v61 = vsel %vm849_vm1, %v8941_v37, -inf }
 0x6a5   : > { %3141 = vmax.xlane.f32.xlu1 %v3140_v47  ;;  %v6406_v43 = vpop.f32.mrb[68].mxu1  ;;  %v3134_v47 = vsel %vm849_vm1, %v8931_v1, -inf }
 0x6a6   : > { %v2848_v31 = vpop.f32.mrb[69].mxu1  ;;  %v3057_v25 = vmul.f32 0.25, %v6406_v43  ;;  %v3128_v43 = vsel %vm849_vm1, %v8951_v8, -inf }
 0x6a7   : > { %3132 = vmax.xlane.f32.xlu0 %v3131_v28  ;;  %v6407_v24 = vpop.f32.mrb[70].mxu1  ;;  %v3048_v28 = vmul.f32 0.25, %v2761_v58  ;;  %v3055_v33 = vmul.f32 0.25, %v2848_v31 }
 0x6a8   : > { %v3058_v30 = vmul.f32 0.25, %v6407_v24  ;;  %v2851_v12 = vpop.f32.mrb[71].mxu1  ;;  %v8964_v10 = vadd.f32 %v3057_v25, %v8948_v21  ;;  %v8971_v24 = vld [vmem:[%s10438_s2 + $0xa8] sm:$0xff]  ;;  %v8980_v25 = vld [vmem:[%s10438_s2 + $0xa0] sm:$0xff] }
 0x6a9   : > { %3135 = vmax.xlane.f32.xlu1 %v3134_v47  ;;  %v3047_v47 = vmul.f32 0.25, %v2758_v44  ;;  %v8983_v46 = vadd.f32 %v3048_v28, %v8971_v24  ;;  %v8997_v23 = vadd.f32 %v3055_v33, %v8980_v25 }
 0x6aa   : > { %v8961_v17 = vadd.f32 %v3058_v30, %v8938_v14  ;;  %v3125_v30 = vsel %vm849_vm1, %v8956_v40, -inf  ;;  %v3149_v44 = vsel %vm849_vm1, %v8964_v10, -inf }
 0x6ab   : > { %3111 = vmax.xlane.f32.xlu0 %v3110_v61  ;;  %v8988_v9 = vadd.f32 %v3047_v47, %v8980_v25  ;;  %v3122_v28 = vsel %vm849_vm1, %v8983_v46, -inf }
 0x6ac   : > { %v3152_v61 = vsel %vm849_vm1, %v8961_v17, -inf }
 0x6ad   : > { %3129 = vmax.xlane.f32.xlu1 %v3128_v43  ;;  %v6422_v48 = vpop.f32.mrb[72].mxu1  ;;  %v3056_v43 = vmul.f32 0.25, %v2851_v12  ;;  %v3119_v47 = vsel %vm849_vm1, %v8988_v9, -inf }
 0x6ae   : > { %v3012_v58 = vpop.f32.mrb[73].mxu1 }
 0x6af   : > { %3126 = vmax.xlane.f32.xlu0 %v3125_v30  ;;  %v6423_v29 = vpop.f32.mrb[74].mxu1  ;;  %v8991_v0 = vadd.f32 %v3056_v43, %v8971_v24  ;;  %v3062_v30 = vmul.f32 0.25, %v8890_v53 }
 0x6b0   : > { %v3015_v11 = vpop.f32.mrb[75].mxu1  ;;  %v3070_v31 = vmul.f32 0.25, %v6423_v29 }
 0x6b1   : > { %3153 = vmax.xlane.f32.xlu1 %v3152_v61  ;;  %v3061_v61 = vmul.f32 0.25, %v8886_v50  ;;  %v9003_v45 = vadd.f32 %v3062_v30, %v8872_v5  ;;  %v3146_v53 = vsel %vm849_vm1, %v8991_v0, -inf  ;;  %v3143_v50 = vsel %vm849_vm1, %v8997_v23, -inf }
 0x6b2   : > { %v9013_v29 = vadd.f32 %v3070_v31, %v8872_v5 }
 0x6b3   : > { %3150 = vmax.xlane.f32.xlu0 %v3149_v44  ;;  %v9008_v33 = vadd.f32 %v3061_v61, %v8859_v51 }
 0x6b4   : > { %v3188_v15 = vsel %vm849_vm1, %v9013_v29, -inf }
 0x6b5   : > { %3123 = vmax.xlane.f32.xlu1 %v3122_v28  ;;  %v6426_v12 = vpop.f32.mrb[76].mxu1  ;;  %v3069_v28 = vmul.f32 0.25, %v6422_v48  ;;  %v3164_v48 = vsel %vm849_vm1, %v9003_v45, -inf  ;;  %v3161_v61 = vsel %vm849_vm1, %v9008_v33, -inf }
 0x6b6   : > { %v3028_v44 = vpop.f32.mrb[77].mxu1 }
 0x6b7   : > { %3120 = vmax.xlane.f32.xlu0 %v3119_v47  ;;  %v6427_v43 = vpop.f32.mrb[78].mxu1  ;;  %v3060_v47 = vmul.f32 0.25, %v8892_v57  ;;  %v9017_v30 = vadd.f32 %v3069_v28, %v8859_v51  ;;  %v3068_v57 = vmul.f32 0.25, %v3015_v11  ;;  %v3067_v28 = vmul.f32 0.25, %v3012_v58 }
 0x6b8   : > { %v3031_v3 = vpop.f32.mrb[79].mxu1  ;;  %v3065_v11 = vmul.f32 0.25, %v8896_v55 }
 0x6b9   : > { %3147 = vmax.xlane.f32.xlu1 %v3146_v53  ;;  %v3059_v53 = vmul.f32 0.25, %v8888_v41  ;;  %v9027_v5 = vadd.f32 %v3060_v47, %v8928_v22  ;;  %v3185_v51 = vsel %vm849_vm1, %v9017_v30, -inf  ;;  %v3066_v41 = vmul.f32 0.25, %v8904_v60 }
 0x6ba   : > { %v9042_v47 = vadd.f32 %v3067_v28, %v8864_v38 }
 0x6bb   : > { %3144 = vmax.xlane.f32.xlu0 %v3143_v50  ;;  %v9032_v31 = vadd.f32 %v3059_v53, %v8864_v38  ;;  %v9036_v50 = vadd.f32 %v3068_v57, %v8928_v22  ;;  %v3074_v53 = vmul.f32 0.25, %v6427_v43  ;;  %v9047_v58 = vadd.f32 %v3066_v41, %v8938_v14 }
 0x6bc   : > { %v3073_v22 = vmul.f32 0.25, %v6426_v12  ;;  %v3179_v55 = vsel %vm849_vm1, %v9042_v47, -inf  ;;  %v3064_v43 = vmul.f32 0.25, %v8910_v6  ;;  %v3063_v12 = vmul.f32 0.25, %v8900_v59 }
 0x6bd   : > { %3165 = vmax.xlane.f32.xlu1 %v3164_v48  ;;  %v3158_v48 = vsel %vm849_vm1, %v9027_v5, -inf  ;;  %v3182_v60 = vsel %vm849_vm1, %v9036_v50, -inf  ;;  %v9057_v38 = vadd.f32 %v3074_v53, %v8938_v14  ;;  %v3072_v14 = vmul.f32 0.25, %v3031_v3 }
 0x6be   : > { %v9061_v57 = vadd.f32 %v3073_v22, %v8948_v21  ;;  %v3071_v6 = vmul.f32 0.25, %v3028_v44 }
 0x6bf   : > { %3162 = vmax.xlane.f32.xlu0 %v3161_v61  ;;  %v9052_v61 = vadd.f32 %v3065_v11, %v8948_v21  ;;  %v3200_v41 = vsel %vm849_vm1, %v9057_v38, -inf  ;;  %v9076_v11 = vadd.f32 %v3063_v12, %v8980_v25  ;;  %v9079_v59 = vadd.f32 %v3072_v14, %v8971_v24 }
 0x6c0   : > { %v3197_v21 = vsel %vm849_vm1, %v9061_v57, -inf }
 0x6c1   : > { %3189 = vmax.xlane.f32.xlu1 %v3188_v15  ;;  %v3155_v15 = vsel %vm849_vm1, %v9032_v31, -inf  ;;  %v3173_v28 = vsel %vm849_vm1, %v9052_v61, -inf  ;;  %v3167_v44 = vsel %vm849_vm1, %v9076_v11, -inf  ;;  %v3194_v53 = vsel %vm849_vm1, %v9079_v59, -inf }
 0x6c3   : > { %3186 = vmax.xlane.f32.xlu0 %v3185_v51  ;;  %v3176_v51 = vsel %vm849_vm1, %v9047_v58, -inf }
 0x6c5   : > { %3159 = vmax.xlane.f32.xlu1 %v3158_v48  ;;  %v9071_v48 = vadd.f32 %v3064_v43, %v8971_v24  ;;  %v9092_v24 = vpop.permute.xlu1 %3811 }
 0x6c7   : > { %3156 = vmax.xlane.f32.xlu0 %v3155_v15  ;;  %v9082_v15 = vadd.f32 %v3071_v6, %v8980_v25  ;;  %v3170_v3 = vsel %vm849_vm1, %v9071_v48, -inf }
 0x6c9   : > { %3183 = vmax.xlane.f32.xlu1 %v3182_v60  ;;  %v3191_v60 = vsel %vm849_vm1, %v9082_v15, -inf }
 0x6cb   : > { %3180 = vmax.xlane.f32.xlu0 %v3179_v55 }
 0x6cd   : > { %3177 = vmax.xlane.f32.xlu1 %v3176_v51 }
 0x6cf   : > { %3174 = vmax.xlane.f32.xlu0 %v3173_v28 }
 0x6d1   : > { %3201 = vmax.xlane.f32.xlu1 %v3200_v41 }
 0x6d3   : > { %3198 = vmax.xlane.f32.xlu0 %v3197_v21 }
 0x6d5   : > { %3171 = vmax.xlane.f32.xlu1 %v3170_v3 }
 0x6d7   : > { %3168 = vmax.xlane.f32.xlu0 %v3167_v44 }
 0x6d9   : > { %3195 = vmax.xlane.f32.xlu1 %v3194_v53 }
 0x6db   : > { %3192 = vmax.xlane.f32.xlu0 %v3191_v60 }
 0x6fb   : > { %v3115_v25 = vpop.xlane.xlu0 %3114 }
 0x6fc   : > { %v3205_v22 = vsub.f32 %v8867_v27, %v3115_v25  ;;  %v3109_v55 = vpop.xlane.xlu1 %3108 }
 0x6fd   : > { %v3203_v27 = vsub.f32 %v8875_v4, %v3109_v55 }
 0x6fe   : > { %v3239_v43 = vmul.f32 1.442695, %v3205_v22 }
 0x700   : > { %7166 = vpow2.f32 %v3239_v43  ;;  %v3118_v51 = vpop.xlane.xlu1 %3117 }
 0x701   : > { %v3206_v12 = vsub.f32 %v8880_v18, %v3118_v51  ;;  %v3235_v18 = vmul.f32 1.442695, %v3203_v27 }
 0x703   : > { %v3241_v28 = vmul.f32 1.442695, %v3206_v12 }
 0x705   : > { %7168 = vpow2.f32 %v3241_v28 }
 0x70a   : > { %v9096_v41 = vpop.eup %7166 }
 0x70b   : > { %v3305_v14 = vsel %vm849_vm1, %v9096_v41, 0.0 }
 0x70c   : > { %3306 = vadd.xlane.f32.xlu0 %v3305_v14 }
 0x70f   : > { %v9100_v6 = vpop.eup %7168 }
 0x710   : > { %v3308_v21 = vsel %vm849_vm1, %v9100_v6, 0.0 }
 0x711   : > { %3309 = vadd.xlane.f32.xlu1 %v3308_v21 }
 0x730   : > { %v3139_v3 = vpop.xlane.xlu0 %3138 }
 0x731   : > { %v3213_v44 = vsub.f32 %v8915_v34, %v3139_v3 }
 0x732   : > { %v3142_v53 = vpop.xlane.xlu1 %3141 }
 0x733   : > { %v3255_v60 = vmul.f32 1.442695, %v3213_v44  ;;  %v3214_v25 = vsub.f32 %v8921_v39, %v3142_v53 }
 0x734   : > { %v3133_v22 = vpop.xlane.xlu0 %3132 }
 0x735   : > { %7170 = vpow2.f32 %v3255_v60  ;;  %v3257_v43 = vmul.f32 1.442695, %v3214_v25  ;;  %v3211_v51 = vsub.f32 %v8918_v36, %v3133_v22 }
 0x736   : > { %7172 = vpow2.f32 %v3235_v18  ;;  %v3136_v12 = vpop.xlane.xlu1 %3135 }
 0x737   : > { %7174 = vpow2.f32 %v3257_v43  ;;  %v3251_v28 = vmul.f32 1.442695, %v3211_v51  ;;  %v3212_v14 = vsub.f32 %v8931_v1, %v3136_v12 }
 0x738   : > { %v3112_v4 = vpop.xlane.xlu0 %3111 }
 0x739   : > { %v3204_v55 = vsub.f32 %v8941_v37, %v3112_v4  ;;  %7176 = vpow2.f32 %v3251_v28  ;;  %v3253_v21 = vmul.f32 1.442695, %v3212_v14 }
 0x73a   : > { %v3130_v34 = vpop.xlane.xlu1 %3129 }
 0x73b   : > { %v3237_v27 = vmul.f32 1.442695, %v3204_v55  ;;  %v3210_v39 = vsub.f32 %v8951_v8, %v3130_v34 }
 0x73c   : > { %v3127_v3 = vpop.xlane.xlu0 %3126 }
 0x73d   : > { %7178 = vpow2.f32 %v3237_v27  ;;  %v3209_v44 = vsub.f32 %v8956_v40, %v3127_v3  ;;  %v3249_v53 = vmul.f32 1.442695, %v3210_v39 }
 0x73e   : > { %v3154_v36 = vpop.xlane.xlu1 %3153  ;;  %7180 = vpow2.f32 %v3253_v21 }
 0x73f   : > { %v9112_v18 = vpop.eup %7170  ;;  %v3247_v60 = vmul.f32 1.442695, %v3209_v44  ;;  %v3218_v1 = vsub.f32 %v8961_v17, %v3154_v36 }
 0x740   : > { %v9115_v25 = vpop.eup %7172  ;;  %v3151_v37 = vpop.xlane.xlu0 %3150  ;;  %v3329_v22 = vsel %vm849_vm1, %v9112_v18, 0.0 }
 0x741   : > { %v9119_v43 = vpop.eup %7174  ;;  %7182 = vpow2.f32 %v3247_v60  ;;  %v3217_v8 = vsub.f32 %v8964_v10, %v3151_v37  ;;  %3330 = vadd.xlane.f32.xlu0 %v3329_v22  ;;  %v3265_v12 = vmul.f32 1.442695, %v3218_v1  ;;  %v3299_v4 = vsel %vm849_vm1, %v9115_v25, 0.0 }
 0x742   : > { %v3124_v40 = vpop.xlane.xlu1 %3123  ;;  %v3332_v51 = vsel %vm849_vm1, %v9119_v43, 0.0  ;;  %7184 = vpow2.f32 %v3249_v53 }
 0x743   : > { %v3263_v28 = vmul.f32 1.442695, %v3217_v8  ;;  %v3208_v17 = vsub.f32 %v8983_v46, %v3124_v40  ;;  %3333 = vadd.xlane.f32.xlu1 %v3332_v51  ;;  %v9127_v55 = vpop.eup %7176 }
 0x744   : > { %v3121_v14 = vpop.xlane.xlu0 %3120  ;;  %v3323_v44 = vsel %vm849_vm1, %v9127_v55, 0.0 }
 0x745   : > { %7186 = vpow2.f32 %v3263_v28  ;;  %v3207_v10 = vsub.f32 %v8988_v9, %v3121_v14  ;;  %3300 = vadd.xlane.f32.xlu0 %v3299_v4  ;;  %v3245_v27 = vmul.f32 1.442695, %v3208_v17 }
 0x746   : > { %v3148_v34 = vpop.xlane.xlu1 %3147  ;;  %7188 = vpow2.f32 %v3265_v12 }
 0x747   : > { %v9130_v21 = vpop.eup %7178  ;;  %v3243_v39 = vmul.f32 1.442695, %v3207_v10  ;;  %v3216_v3 = vsub.f32 %v8991_v0, %v3148_v34 }
 0x748   : > { %v3145_v46 = vpop.xlane.xlu0 %3144  ;;  %v3302_v36 = vsel %vm849_vm1, %v9130_v21, 0.0  ;;  %v9137_v53 = vpop.eup %7180 }
 0x749   : > { %7190 = vpow2.f32 %v3243_v39  ;;  %v3215_v9 = vsub.f32 %v8997_v23, %v3145_v46  ;;  %3324 = vadd.xlane.f32.xlu0 %v3323_v44  ;;  %3303 = vadd.xlane.f32.xlu1 %v3302_v36  ;;  %v3261_v1 = vmul.f32 1.442695, %v3216_v3  ;;  %v3326_v8 = vsel %vm849_vm1, %v9137_v53, 0.0 }
 0x74a   : > { %7192 = vpow2.f32 %v3245_v27  ;;  %v3166_v23 = vpop.xlane.xlu1 %3165 }
 0x74b   : > { %v9140_v60 = vpop.eup %7182  ;;  %v3259_v37 = vmul.f32 1.442695, %v3215_v9 }
 0x74c   : > { %v3163_v0 = vpop.xlane.xlu0 %3162  ;;  %v3317_v22 = vsel %vm849_vm1, %v9140_v60, 0.0  ;;  %v9146_v40 = vpop.eup %7184 }
 0x74d   : > { %7194 = vpow2.f32 %v3259_v37  ;;  %v3221_v51 = vsub.f32 %v9008_v33, %v3163_v0  ;;  %3318 = vadd.xlane.f32.xlu0 %v3317_v22  ;;  %3327 = vadd.xlane.f32.xlu1 %v3326_v8  ;;  %v3320_v4 = vsel %vm849_vm1, %v9146_v40, 0.0 }
 0x74e   : > { %7196 = vpow2.f32 %v3261_v1  ;;  %v3190_v39 = vpop.xlane.xlu1 %3189  ;;  %v3222_v1 = vsub.f32 %v9003_v45, %v3166_v23 }
 0x74f   : > { %v9149_v12 = vpop.eup %7186  ;;  %v3271_v28 = vmul.f32 1.442695, %v3221_v51  ;;  %v3230_v45 = vsub.f32 %v9013_v29, %v3190_v39 }
 0x750   : > { %v3187_v17 = vpop.xlane.xlu0 %3186  ;;  %v3341_v14 = vsel %vm849_vm1, %v9149_v12, 0.0  ;;  %v9155_v10 = vpop.eup %7188 }
 0x751   : > { %7198 = vpow2.f32 %v3271_v28  ;;  %v3229_v34 = vsub.f32 %v9017_v30, %v3187_v17  ;;  %3342 = vadd.xlane.f32.xlu0 %v3341_v14  ;;  %3321 = vadd.xlane.f32.xlu1 %v3320_v4  ;;  %v3344_v44 = vsel %vm849_vm1, %v9155_v10, 0.0  ;;  %v3273_v14 = vmul.f32 1.442695, %v3222_v1 }
 0x753   : > { %v9158_v33 = vpop.eup %7190  ;;  %v3287_v27 = vmul.f32 1.442695, %v3229_v34 }
 0x754   : > { %v3157_v3 = vpop.xlane.xlu0 %3156  ;;  %v3311_v46 = vsel %vm849_vm1, %v9158_v33, 0.0  ;;  %v9164_v36 = vpop.eup %7192 }
 0x755   : > { %7200 = vpow2.f32 %v3287_v27  ;;  %v3219_v9 = vsub.f32 %v9032_v31, %v3157_v3  ;;  %3312 = vadd.xlane.f32.xlu0 %v3311_v46  ;;  %3345 = vadd.xlane.f32.xlu1 %v3344_v44  ;;  %v3314_v8 = vsel %vm849_vm1, %v9164_v36, 0.0  ;;  %v3160_v31 = vpop.xlane.xlu1 %3159  ;;  %v3289_v46 = vmul.f32 1.442695, %v3230_v45 }
 0x756   : > { %v3220_v44 = vsub.f32 %v9027_v5, %v3160_v31 }
 0x757   : > { %v9167_v30 = vpop.eup %7194  ;;  %v3267_v37 = vmul.f32 1.442695, %v3219_v9 }
 0x758   : > { %v3181_v0 = vpop.xlane.xlu0 %3180  ;;  %v3335_v22 = vsel %vm849_vm1, %v9167_v30, 0.0  ;;  %v9174_v51 = vpop.eup %7196 }
 0x759   : > { %7202 = vpow2.f32 %v3267_v37  ;;  %v3227_v28 = vsub.f32 %v9042_v47, %v3181_v0  ;;  %3336 = vadd.xlane.f32.xlu0 %v3335_v22  ;;  %3315 = vadd.xlane.f32.xlu1 %v3314_v8  ;;  %v3338_v27 = vsel %vm849_vm1, %v9174_v51, 0.0  ;;  %v3184_v39 = vpop.xlane.xlu1 %3183 }
 0x75a   : > { %v3228_v0 = vsub.f32 %v9036_v50, %v3184_v39 }
 0x75b   : > { %v9177_v17 = vpop.eup %7198  ;;  %v3283_v23 = vmul.f32 1.442695, %v3227_v28 }
 0x75c   : > { %v3175_v4 = vpop.xlane.xlu0 %3174  ;;  %v3353_v34 = vsel %vm849_vm1, %v9177_v17, 0.0  ;;  %v3285_v31 = vmul.f32 1.442695, %v3228_v0 }
 0x75d   : > { %7204 = vpow2.f32 %v3283_v23  ;;  %v3225_v3 = vsub.f32 %v9052_v61, %v3175_v4  ;;  %3354 = vadd.xlane.f32.xlu0 %v3353_v34  ;;  %3339 = vadd.xlane.f32.xlu1 %v3338_v27  ;;  %v3269_v61 = vmul.f32 1.442695, %v3220_v44 }
 0x75e   : > { %7206 = vpow2.f32 %v3273_v14 }
 0x75f   : > { %v9185_v47 = vpop.eup %7200  ;;  %v3279_v29 = vmul.f32 1.442695, %v3225_v3 }
 0x760   : > { %v3199_v9 = vpop.xlane.xlu0 %3198  ;;  %v3377_v1 = vsel %vm849_vm1, %v9185_v47, 0.0 }
 0x761   : > { %7208 = vpow2.f32 %v3279_v29  ;;  %3378 = vadd.xlane.f32.xlu1 %v3377_v1  ;;  %v3233_v14 = vsub.f32 %v9061_v57, %v3199_v9 }
 0x762   : > { %7210 = vpow2.f32 %v3289_v46 }
 0x763   : > { %v9190_v37 = vpop.eup %7202  ;;  %7212 = vpow2.f32 %v3269_v61  ;;  %v3295_v34 = vmul.f32 1.442695, %v3233_v14 }
 0x764   : > { %v3169_v22 = vpop.xlane.xlu0 %3168  ;;  %v3347_v8 = vsel %vm849_vm1, %v9190_v37, 0.0 }
 0x765   : > { %v3223_v5 = vsub.f32 %v9076_v11, %v3169_v22  ;;  %3348 = vadd.xlane.f32.xlu0 %v3347_v8  ;;  %v3178_v22 = vpop.xlane.xlu1 %3177 }
 0x767   : > { %v9196_v28 = vpop.eup %7204  ;;  %v3275_v45 = vmul.f32 1.442695, %v3223_v5 }
 0x768   : > { %v3371_v23 = vsel %vm849_vm1, %v9196_v28, 0.0  ;;  %v9201_v4 = vpop.eup %7206 }
 0x769   : > { %7214 = vpow2.f32 %v3275_v45  ;;  %3372 = vadd.xlane.f32.xlu1 %v3371_v23  ;;  %v3356_v27 = vsel %vm849_vm1, %v9201_v4, 0.0  ;;  %v3202_v8 = vpop.xlane.xlu1 %3201  ;;  %v7447_v45 = vld [vmem:[%s7526_s28 + $0x8] sm:$0xff]  }
 0x76a   : > { %7216 = vpow2.f32 %v3285_v31  ;;  %v7446_v31 = vld [vmem:[%s7526_s28] sm:$0xff]  }
 0x76b   : > { %v9203_v50 = vpop.eup %7208  ;;  %7218 = vpow2.f32 %v3295_v34 }
 0x76c   : > { %v3365_v11 = vsel %vm849_vm1, %v9203_v50, 0.0  ;;  %v9209_v3 = vpop.eup %7210 }
 0x76d   : > { %3366 = vadd.xlane.f32.xlu0 %v3365_v11  ;;  %3357 = vadd.xlane.f32.xlu1 %v3356_v27  ;;  %v3380_v57 = vsel %vm849_vm1, %v9209_v3, 0.0  ;;  %v9213_v46 = vpop.eup %7212  ;;  %v3172_v5 = vpop.xlane.xlu1 %3171 }
 0x76e   : > { %v3350_v39 = vsel %vm849_vm1, %v9213_v46, 0.0  ;;  %v3193_v11 = vpop.xlane.xlu0 %3192 }
 0x76f   : > { %v3231_v27 = vsub.f32 %v9082_v15, %v3193_v11  ;;  %v7449_v11 = vld [vmem:[%s7526_s28 + $0x48] sm:$0xff]  }
 0x771   : > { %3381 = vadd.xlane.f32.xlu1 %v3380_v57  ;;  %v3196_v14 = vpop.xlane.xlu1 %3195  ;;  %v3226_v57 = vsub.f32 %v9047_v58, %v3178_v22 }
 0x772   : > { %v3232_v23 = vsub.f32 %v9079_v59, %v3196_v14  ;;  %v3224_v14 = vsub.f32 %v9071_v48, %v3172_v5 }
 0x773   : > { %v9215_v44 = vpop.eup %7214 }
 0x774   : > { %v3359_v29 = vsel %vm849_vm1, %v9215_v44, 0.0  ;;  %v9221_v9 = vpop.eup %7216  ;;  %v3293_v34 = vmul.f32 1.442695, %v3232_v23  ;;  %v3277_v15 = vmul.f32 1.442695, %v3224_v14  ;;  %v7453_v14 = vld [vmem:[%s7526_s28 + $0x60] sm:$0xff]  }
 0x775   : > { %3360 = vadd.xlane.f32.xlu0 %v3359_v29  ;;  %3351 = vadd.xlane.f32.xlu1 %v3350_v39  ;;  %v3374_v1 = vsel %vm849_vm1, %v9221_v9, 0.0  ;;  %v9225_v61 = vpop.eup %7218  ;;  %v3291_v29 = vmul.f32 1.442695, %v3231_v27 }
 0x776   : > { %v3389_v0 = vsel %vm849_vm1, %v9225_v61, 0.0  ;;  %7220 = vpow2.f32 %v3293_v34  ;;  %v7448_v34 = vld [vmem:[%s7526_s28 + $0x40] sm:$0xff]  }
 0x777   : > { %7222 = vpow2.f32 %v3291_v29 }
 0x779   : > { %3375 = vadd.xlane.f32.xlu1 %v3374_v1  ;;  %v3281_v1 = vmul.f32 1.442695, %v3226_v57  ;;  %v7450_v57 = vld [vmem:[%s7526_s28 + $0x50] sm:$0xff]  }
 0x77b   : > { %7224 = vpow2.f32 %v3281_v1 }
 0x77d   : > { %3390 = vadd.xlane.f32.xlu1 %v3389_v0  ;;  %v3234_v0 = vsub.f32 %v9057_v38, %v3202_v8 }
 0x77f   : > { %v3297_v59 = vmul.f32 1.442695, %v3234_v0 }
 0x780   : > { %v9238_v39 = vpop.eup %7220 }
 0x781   : > { %7226 = vpow2.f32 %v3297_v59  ;;  %v7452_v59 = vld [vmem:[%s7526_s28 + $0x10] sm:$0xff]  }
 0x782   : > { %7228 = vpow2.f32 %v3277_v15 }
 0x78b   : > { %3721 = vrot.lane.b32.xlu0 %v8577_v63, %s7471_s24  ;;  %s7475_s24 = smov 48  }
 0x78e   : > { %3803 = vrot.lane.b32.xlu1 %v7446_v31, %s7472_s7  ;;  %v3386_v31 = vsel %vm849_vm1, %v9238_v39, 0.0 }
 0x792   : > { %3805 = vrot.lane.b32.xlu1 %v7447_v45, %s7472_s7  ;;  %v9244_v45 = vpop.eup %7222 }
 0x793   : > { %v3383_v58 = vsel %vm849_vm1, %v9244_v45, 0.0  ;;  %v9248_v38 = vpop.eup %7224 }
 0x794   : > { %v3368_v22 = vsel %vm849_vm1, %v9248_v38, 0.0  ;;  %v9252_v8 = vpop.eup %7226 }
 0x795   : > { %v3392_v48 = vsel %vm849_vm1, %v9252_v8, 0.0  ;;  %v9256_v5 = vpop.eup %7228 }
 0x796   : > { %v3362_v23 = vsel %vm849_vm1, %v9256_v5, 0.0 }
 0x799   : > { %v3307_v27 = vpop.xlane.xlu0 %3306 }
 0x79e   : > { %v3310_v29 = vpop.xlane.xlu1 %3309 }
 0x79f   : > { %7230 = vrcp.f32 %v3310_v29  ;;  %v7456_v29 = vld [vmem:[%s7526_s28 + $0x20] sm:$0xff]  }
 0x7aa   : > { %3387 = vadd.xlane.f32.xlu0 %v3386_v31 }
 0x7b6   : > { %3384 = vadd.xlane.f32.xlu1 %v3383_v58 }
 0x7ba   : > { %3369 = vadd.xlane.f32.xlu1 %v3368_v22  ;;  %v7454_v22 = vld [vmem:[%s7526_s28 + $0x18] sm:$0xff]  }
 0x7be   : > { %3393 = vadd.xlane.f32.xlu1 %v3392_v48  ;;  %v7455_v48 = vld [vmem:[%s7526_s28 + $0x70] sm:$0xff]  }
 0x7c0   : > { %3991 = vrot.lane.b32.xlu0 %v8011_v13, %s7472_s7  ;;  %v7451_v13 = vld [vmem:[%s7526_s28 + $0x58] sm:$0xff]  }
 0x7c2   : > { %3363 = vadd.xlane.f32.xlu1 %v3362_v23 }
 0x7c4   : > { %3983 = vrot.lane.b32.xlu0 %v7448_v34, %s7472_s7 }
 0x7c8   : > { %3985 = vrot.lane.b32.xlu0 %v7449_v11, %s7472_s7 }
 0x7cc   : > { %3987 = vrot.lane.b32.xlu0 %v7450_v57, %s7472_s7  ;;  %v7231_v57 = vpop.eup %7230 }
 0x7ce   : > { %v3331_v1 = vpop.xlane.xlu0 %3330 }
 0x7d0   : > { %3989 = vrot.lane.b32.xlu0 %v7451_v13, %s7472_s7  ;;  %v3334_v0 = vpop.xlane.xlu1 %3333 }
 0x7d2   : > { %v3301_v31 = vpop.xlane.xlu0 %3300 }
 0x7d3   : > { %3807 = vrot.lane.b32.xlu1 %v7452_v59, %s7472_s7  ;;  %7232 = vrcp.f32 %v3301_v31 }
 0x7d4   : > { %4073 = vrot.lane.b32.xlu0 %v7453_v14, %s7472_s7  ;;  %7234 = vrcp.f32 %v3307_v27 }
 0x7d6   : > { %v3325_v15 = vpop.xlane.xlu0 %3324  ;;  %v3304_v58 = vpop.xlane.xlu1 %3303 }
 0x7d7   : > { %3809 = vrot.lane.b32.xlu1 %v7454_v22, %s7472_s7  ;;  %7236 = vrcp.f32 %v3304_v58  ;;  %v7457_v22 = vld [vmem:[%s7526_s28 + $0x28] sm:$0xff]  }
 0x7d8   : > { %4077 = vrot.lane.b32.xlu0 %v7455_v48, %s7472_s7  ;;  %7238 = vrcp.f32 %v3334_v0  ;;  %v3430_v0 = vmul.f32 %v7231_v57, %v9100_v6 }
 0x7d9   : > { %7240 = vrcp.f32 %v3325_v15 }
 0x7da   : > { %v3319_v23 = vpop.xlane.xlu0 %3318  ;;  %v3328_v34 = vpop.xlane.xlu1 %3327  ;;  %7242 = vrcp.f32 %v3331_v1 }
 0x7db   : > { %3901 = vrot.lane.b32.xlu1 %v7976_v62, %s7472_s7  ;;  %7244 = vrcp.f32 %v3328_v34 }
 0x7dd   : > { %v7233_v13 = vpop.eup %7232 }
 0x7de   : > { %v3343_v11 = vpop.xlane.xlu0 %3342  ;;  %v3322_v27 = vpop.xlane.xlu1 %3321  ;;  %v3427_v1 = vmul.f32 %v7233_v13, %v9115_v25 }
 0x7df   : > { %3893 = vrot.lane.b32.xlu1 %v7456_v29, %s7472_s7  ;;  %v7235_v31 = vpop.eup %7234  ;;  %7246 = vrcp.f32 %v3322_v27 }
 0x7e0   : > { %v3429_v34 = vmul.f32 %v7235_v31, %v9096_v41 }
 0x7e1   : > { %v7237_v59 = vpop.eup %7236 }
 0x7e2   : > { %v3313_v14 = vpop.xlane.xlu0 %3312  ;;  %v3346_v15 = vpop.xlane.xlu1 %3345  ;;  %v3428_v62 = vmul.f32 %v7237_v59, %v9130_v21  ;;  %v3460_v54 = vpack.c.bf16 %v3430_v0, %v3429_v34  ;;  %v7458_v59 = vld [vmem:[%s7526_s28 + $0x30] sm:$0xff]  }
 0x7e3   : > { %v7239_v58 = vpop.eup %7238  ;;  %3895 = vrot.lane.b32.xlu1 %v7457_v22, %s7472_s7  ;;  %7248 = vrcp.f32 %v3313_v14 }
 0x7e4   : > { %v7241_v48 = vpop.eup %7240  ;;  %v3459_v16 = vpack.c.bf16 %v3428_v62, %v3427_v1  ;;  %v3438_v6 = vmul.f32 %v7239_v58, %v9119_v43  ;;  %7250 = vrcp.f32 %v3319_v23  ;;  %v3654_v43 = vsel %vm1230_vm2, %v8840_v32, 0 }
 0x7e5   : > { %v7243_v29 = vpop.eup %7242  ;;  %v3435_v21 = vmul.f32 %v7241_v48, %v9127_v55 }
 0x7e6   : > { %v7245_v35 = vpop.eup %7244  ;;  %v3316_v57 = vpop.xlane.xlu1 %3315  ;;  %6430 = vmatprep.mubr.msk.bf16.mxu0 %vm849_vm1, %v3459_v16  ;;  %v3437_v41 = vmul.f32 %v7243_v29, %v9112_v18  ;;  %v7459_v18 = vld [vmem:[%s7526_s28 + $0x38] sm:$0xff]  }
 0x7e7   : > { %v3337_v25 = vpop.xlane.xlu0 %3336  ;;  %v3436_v13 = vmul.f32 %v7245_v35, %v9137_v53  ;;  %3897 = vrot.lane.b32.xlu1 %v7458_v59, %s7472_s7  ;;  %7252 = vrcp.f32 %v3316_v57  ;;  %6431 = vmatmul.mubr.msk.bf16.vlgmr.msra.gmra.mrb[80].mxu0 %vm849_vm1, %v3460_v54 }
 0x7e8   : > { %7254 = vrcp.f32 %v3346_v15  ;;  %6449 = vmatpush3.bf16.msra.mxu0 %v3654_v43  ;;  %v3464_v16 = vpack.c.bf16 %v3438_v6, %v3437_v41  ;;  %v7460_v15 = vld [vmem:[%s7526_s28 + $0x68] sm:$0xff]   ;;  %v7461_v6 = vld [vmem:[%s7526_s28 + $0x78] sm:$0xff]  }
 0x7e9   : > { %v3463_v23 = vpack.c.bf16 %v3436_v13, %v3435_v21  ;;  %7256 = vrcp.f32 %v3337_v25  ;;  %6620 = vmatprep.subr.msk.bf16.mxu0 %vm404_vm0, %v9092_v24  ;;  %v7247_v54 = vpop.eup %7246 }
 0x7ea   : > { %v3340_v35 = vpop.xlane.xlu1 %3339  ;;  %7258 = vrcp.f32 %v3343_v11  ;;  %v3434_v31 = vmul.f32 %v7247_v54, %v9146_v40 }
 0x7eb   : > { %6440 = vmatprep.mubr.msk.bf16.mxu1 %vm849_vm1, %v3463_v23  ;;  %3899 = vrot.lane.b32.xlu1 %v7459_v18, %s7472_s7  ;;  %7260 = vrcp.f32 %v3340_v35  ;;  %v3355_v48 = vpop.xlane.xlu0 %3354 }
 0x7ec   : > { %6441 = vmatmul.mubr.msk.bf16.vlgmr.msra.gmra.mrb[80].mxu1 %vm849_vm1, %v3464_v16  ;;  %7262 = vrcp.f32 %v3355_v48 }
 0x7ed   : > { %v7249_v32 = vpop.eup %7248 }
 0x7ee   : > { %v7251_v55 = vpop.eup %7250  ;;  %v3379_v27 = vpop.xlane.xlu1 %3378  ;;  %v3431_v0 = vmul.f32 %v7249_v32, %v9158_v33 }
 0x7ef   : > { %4081 = vrot.lane.b32.xlu1 %v8067_v2, %s7472_s7  ;;  %v3433_v1 = vmul.f32 %v7251_v55, %v9140_v60 }
 0x7f1   : > { %v7253_v53 = vpop.eup %7252  ;;  %v3462_v29 = vpack.c.bf16 %v3434_v31, %v3433_v1 }
 0x7f2   : > { %v7255_v11 = vpop.eup %7254  ;;  %v3432_v14 = vmul.f32 %v7253_v53, %v9164_v36  ;;  %v3349_v25 = vpop.xlane.xlu0 %3348 }
 0x7f3   : > { %4075 = vrot.lane.b32.xlu1 %v7460_v15, %s7472_s7  ;;  %v7257_v58 = vpop.eup %7256  ;;  %v3442_v40 = vmul.f32 %v7255_v11, %v9155_v10 }
 0x7f4   : > { %v7259_v62 = vpop.eup %7258  ;;  %v3461_v2 = vpack.c.bf16 %v3432_v14, %v3431_v0  ;;  %v3439_v33 = vmul.f32 %v7257_v58, %v9167_v30 }
 0x7f5   : > { %v7261_v22 = vpop.eup %7260  ;;  %v3441_v60 = vmul.f32 %v7259_v62, %v9149_v12 }
 0x7f6   : > { %v3373_v34 = vpop.xlane.xlu1 %3372  ;;  %6434 = vmatprep.mubr.msk.bf16.mxu0 %vm849_vm1, %v3461_v2  ;;  %v3440_v36 = vmul.f32 %v7261_v22, %v9174_v51  ;;  %v7263_v23 = vpop.eup %7262 }
 0x7f7   : > { %4079 = vrot.lane.b32.xlu1 %v7461_v6, %s7472_s7  ;;  %6435 = vmatmul.mubr.msk.bf16.gmra.mrb[84].mxu0 %vm849_vm1, %v3462_v29  ;;  %v3466_v13 = vpack.c.bf16 %v3442_v40, %v3441_v60  ;;  %v3445_v11 = vmul.f32 %v7263_v23, %v9177_v17 }
 0x7f8   : > { %v3465_v57 = vpack.c.bf16 %v3440_v36, %v3439_v33 }
 0x7fa   : > { %v3358_v21 = vpop.xlane.xlu1 %3357  ;;  %6444 = vmatprep.mubr.msk.bf16.mxu1 %vm849_vm1, %v3465_v57  ;;  %v3367_v10 = vpop.xlane.xlu0 %3366 }
 0x7fb   : > { %6445 = vmatmul.mubr.msk.bf16.gmra.mrb[84].mxu1 %vm849_vm1, %v3466_v13  ;;  %7264 = vrcp.f32 %v3358_v21 }
 0x7fc   : > { %7266 = vrcp.f32 %v3349_v25 }
 0x7fe   : > { %v3382_v59 = vpop.xlane.xlu1 %3381 }
 0x7ff   : > { %7268 = vrcp.f32 %v3382_v59 }
 0x802   : > { %v3361_v30 = vpop.xlane.xlu0 %3360  ;;  %v3352_v51 = vpop.xlane.xlu1 %3351 }
 0x803   : > { %7270 = vrcp.f32 %v3352_v51 }
 0x804   : > { %7272 = vrcp.f32 %v3373_v34 }
 0x805   : > { %7274 = vrcp.f32 %v3379_v27  ;;  %v7265_v16 = vpop.eup %7264 }
 0x806   : > { %v3376_v12 = vpop.xlane.xlu1 %3375  ;;  %v3722_v41 = vpop.permute.xlu0 %3721  ;;  %v3446_v32 = vmul.f32 %v7265_v16, %v9201_v4 }
 0x807   : > { %7276 = vrcp.f32 %v3376_v12  ;;  %6619 = vmatprep.subr.msk.bf16.mxu1 %vm1230_vm2, %v3722_v41  ;;  %v3736_v43 = vsel %vm1230_vm2, %v3722_v41, 0  ;;  %v7267_v35 = vpop.eup %7266 }
 0x808   : > { %6459 = vmatpush3.bf16.msra.mxu1 %v3736_v43  ;;  %v3443_v53 = vmul.f32 %v7267_v35, %v9190_v37  ;;  %v3468_v58 = vpack.c.bf16 %v3446_v32, %v3445_v11  ;;  %v3826_v37 = vsel %vm404_vm0, %v9092_v24, 0 }
 0x809   : > { %v7269_v18 = vpop.eup %7268 }
 0x80a   : > { %v3454_v14 = vmul.f32 %v7269_v18, %v9209_v3  ;;  %v3391_v3 = vpop.xlane.xlu1 %3390 }
 0x80d   : > { %v7271_v54 = vpop.eup %7270 }
 0x80e   : > { %v7273_v55 = vpop.eup %7272  ;;  %v3444_v27 = vmul.f32 %v7271_v54, %v9213_v46  ;;  %v3804_v46 = vpop.permute.xlu1 %3803 }
 0x80f   : > { %v7275_v31 = vpop.eup %7274  ;;  %v3451_v1 = vmul.f32 %v7273_v55, %v9196_v28 }
 0x810   : > { %v3467_v15 = vpack.c.bf16 %v3444_v27, %v3443_v53  ;;  %v3453_v2 = vmul.f32 %v7275_v31, %v9185_v47 }
 0x811   : > { %v7277_v0 = vpop.eup %7276 }
 0x812   : > { %v3452_v62 = vmul.f32 %v7277_v0, %v9221_v9  ;;  %6450 = vmatprep.mubr.msk.bf16.mxu0 %vm849_vm1, %v3467_v15  ;;  %v3472_v17 = vpack.c.bf16 %v3454_v14, %v3453_v2  ;;  %v3806_v47 = vpop.permute.xlu1 %3805 }
 0x813   : > { %6451 = vmatmul.mubr.msk.bf16.vlgmr.msra.gmra.mrb[88].mxu0 %vm849_vm1, %v3468_v58 }
 0x814   : > { %v3471_v4 = vpack.c.bf16 %v3452_v62, %v3451_v1  ;;  %6469 = vmatpush3.bf16.xpose.msra.mxu0 %v3826_v37 }
 0x816   : > { %6460 = vmatprep.mubr.msk.bf16.mxu1 %vm849_vm1, %v3471_v4 }
 0x817   : > { %6461 = vmatmul.mubr.msk.bf16.vlgmr.msra.gmra.mrb[88].mxu1 %vm849_vm1, %v3472_v17 }
 0x837   : > { %v3388_v28 = vpop.xlane.xlu0 %3387 }
 0x838   : > { %7278 = vrcp.f32 %v3388_v28 }
 0x83b   : > { %v3992_v9 = vpop.permute.xlu0 %3991 }
 0x83c   : > { %6622 = vmatprep.subr.msk.bf16.mxu0 %vm404_vm0, %v3992_v9  ;;  %v4006_v55 = vsel %vm404_vm0, %v3992_v9, 0 }
 0x83f   : > { %v3984_v60 = vpop.permute.xlu0 %3983 }
 0x842   : > { %v7279_v34 = vpop.eup %7278 }
 0x843   : > { %v3385_v22 = vpop.xlane.xlu1 %3384  ;;  %v3456_v36 = vmul.f32 %v7279_v34, %v9238_v39  ;;  %v3986_v12 = vpop.permute.xlu0 %3985 }
 0x844   : > { %7280 = vrcp.f32 %v3385_v22 }
 0x845   : > { %7282 = vrcp.f32 %v3391_v3 }
 0x847   : > { %v3370_v48 = vpop.xlane.xlu1 %3369  ;;  %v3988_v32 = vpop.permute.xlu0 %3987 }
 0x84b   : > { %v3394_v24 = vpop.xlane.xlu1 %3393 }
 0x84c   : > { %7284 = vrcp.f32 %v3394_v24 }
 0x84d   : > { %7286 = vrcp.f32 %v3370_v48 }
 0x84e   : > { %v7281_v29 = vpop.eup %7280  ;;  %7288 = vrcp.f32 %v3361_v30 }
 0x84f   : > { %7290 = vrcp.f32 %v3367_v10  ;;  %v3364_v40 = vpop.xlane.xlu1 %3363  ;;  %v3455_v33 = vmul.f32 %v7281_v29, %v9244_v45  ;;  %v7283_v25 = vpop.eup %7282 }
 0x850   : > { %7292 = vrcp.f32 %v3364_v40  ;;  %v3457_v51 = vmul.f32 %v7283_v25, %v9225_v61 }
 0x851   : > { %v3473_v6 = vpack.c.bf16 %v3456_v36, %v3455_v33 }
 0x853   : > { %6464 = vmatprep.mubr.msk.bf16.mxu1 %vm849_vm1, %v3473_v6  ;;  %v3808_v57 = vpop.permute.xlu1 %3807 }
 0x856   : > { %v7285_v21 = vpop.eup %7284 }
 0x857   : > { %v7287_v13 = vpop.eup %7286  ;;  %v3810_v59 = vpop.permute.xlu1 %3809  ;;  %v3458_v30 = vmul.f32 %v7285_v21, %v9252_v8 }
 0x858   : > { %v7289_v10 = vpop.eup %7288  ;;  %v3450_v39 = vmul.f32 %v7287_v13, %v9248_v38 }
 0x859   : > { %v7291_v41 = vpop.eup %7290  ;;  %v3474_v45 = vpack.c.bf16 %v3458_v30, %v3457_v51  ;;  %v3447_v16 = vmul.f32 %v7289_v10, %v9215_v44 }
 0x85a   : > { %v7293_v43 = vpop.eup %7292  ;;  %v3449_v8 = vmul.f32 %v7291_v41, %v9203_v50 }
 0x85b   : > { %6465 = vmatmul.mubr.msk.bf16.gmra.mrb[92].mxu1 %vm849_vm1, %v3474_v45  ;;  %v3902_v23 = vpop.permute.xlu1 %3901  ;;  %v3448_v35 = vmul.f32 %v7293_v43, %v9256_v5  ;;  %v3990_v5 = vpop.permute.xlu0 %3989 }
 0x85c   : > { %6621 = vmatprep.subr.msk.bf16.mxu1 %vm404_vm0, %v3902_v23  ;;  %v3916_v61 = vsel %vm404_vm0, %v3902_v23, 0  ;;  %v3470_v54 = vpack.c.bf16 %v3450_v39, %v3449_v8 }
 0x85d   : > { %6479 = vmatpush3.bf16.xpose.msra.mxu1 %v3916_v61  ;;  %v3469_v18 = vpack.c.bf16 %v3448_v35, %v3447_v16 }
 0x85f   : > { %6454 = vmatprep.mubr.msk.bf16.mxu0 %vm849_vm1, %v3469_v18  ;;  %v3894_v38 = vpop.permute.xlu1 %3893  ;;  %v4074_v53 = vpop.permute.xlu0 %4073 }
 0x860   : > { %6455 = vmatmul.mubr.msk.bf16.gmra.mrb[92].mxu0 %vm849_vm1, %v3470_v54  ;;  %6480 = vmatprep.mubr.msk.bf16.mxu1 %vm404_vm0, %v3894_v38 }
 0x861   : > { %6470 = vmatprep.mubr.msk.bf16.mxu0 %vm404_vm0, %v3804_v46 }
 0x863   : > { %v3896_v44 = vpop.permute.xlu1 %3895  ;;  %v4078_v14 = vpop.permute.xlu0 %4077 }
 0x864   : > { %6481 = vmatmul.mubr.msk.bf16.vlgmr.msra.gmra.mrb[96].mxu1 %vm404_vm0, %v3896_v44 }
 0x867   : > { %v3898_v50 = vpop.permute.xlu1 %3897 }
 0x868   : > { %6471 = vmatmul.mubr.msk.bf16.vlgmr.msra.gmra.mrb[96].mxu0 %vm404_vm0, %v3806_v47  ;;  %6484 = vmatprep.mubr.msk.bf16.mxu1 %vm404_vm0, %v3898_v50  ;;  %v9504_v47 = vld [vmem:[%s10438_s2 + $0xd8] sm:$0xff] }
 0x869   : > { %6474 = vmatprep.mubr.msk.bf16.mxu0 %vm404_vm0, %v3808_v57  ;;  %6489 = vmatpush3.bf16.xpose.msra.mxu0 %v4006_v55 }
 0x86b   : > { %v3900_v27 = vpop.permute.xlu1 %3899 }
 0x86c   : > { %6485 = vmatmul.mubr.msk.bf16.gmra.mrb[100].mxu1 %vm404_vm0, %v3900_v27 }
 0x86d   : > { %6500 = vmatprep.mubr.msk.bf16.mxu1 %vm404_vm0, %v4074_v53  ;;  %v9471_v53 = vld [vmem:[%s10438_s2 + $0xd0] sm:$0xff] }
 0x86f   : > { %v4082_v31 = vpop.permute.xlu1 %4081 }
 0x870   : > { %6475 = vmatmul.mubr.msk.bf16.gmra.mrb[100].mxu0 %vm404_vm0, %v3810_v59  ;;  %6623 = vmatprep.subr.msk.bf16.mxu1 %vm404_vm0, %v4082_v31  ;;  %v4096_v11 = vsel %vm404_vm0, %v4082_v31, 0 }
 0x871   : > { %6490 = vmatprep.mubr.msk.bf16.mxu0 %vm404_vm0, %v3984_v60  ;;  %6499 = vmatpush3.bf16.xpose.msra.mxu1 %v4096_v11  ;;  %v9476_v11 = vld [vmem:[%s10438_s2 + $0xc0] sm:$0xff] }
 0x873   : > { %v4076_v0 = vpop.permute.xlu1 %4075 }
 0x877   : > { %v4080_v15 = vpop.permute.xlu1 %4079 }
 0x878   : > { %6491 = vmatmul.mubr.msk.bf16.vlgmr.msra.gmra.mrb[104].mxu0 %vm404_vm0, %v3986_v12  ;;  %6501 = vmatmul.mubr.msk.bf16.vlgmr.msra.gmra.mrb[104].mxu1 %vm404_vm0, %v4076_v0 }
 0x879   : > { %6494 = vmatprep.mubr.msk.bf16.mxu0 %vm404_vm0, %v3988_v32  ;;  %6504 = vmatprep.mubr.msk.bf16.mxu1 %vm404_vm0, %v4078_v14 }
 0x880   : > { %6495 = vmatmul.mubr.msk.bf16.gmra.mrb[108].mxu0 %vm404_vm0, %v3990_v5  ;;  %6505 = vmatmul.mubr.msk.bf16.gmra.mrb[108].mxu1 %vm404_vm0, %v4080_v15 }
 0x8ba   : > { %v9372_v58 = vpop.f32.mrb[80].mxu0 }
 0x8bb   : > { %v9374_v1 = vpop.f32.mrb[81].mxu0 }
 0x8bc   : > { %v9376_v62 = vpop.f32.mrb[82].mxu0 }
 0x8bd   : > { %v9380_v37 = vpop.f32.mrb[83].mxu0 }
 0x8bf   : > { %v9384_v17 = vpop.f32.mrb[80].mxu1 }
 0x8c0   : > { %10560 = vst [vmem:[#allocation63_spill] sm:$0xff] %v9384_v17  ;;  %v9386_v3 = vpop.f32.mrb[81].mxu1 }
 0x8c1   : > { %10561 = vst [vmem:[#allocation64_spill] sm:$0xff] %v9386_v3  ;;  %v9388_v28 = vpop.f32.mrb[82].mxu1 }
 0x8c2   : > { %10562 = vst [vmem:[#allocation65_spill] sm:$0xff] %v9388_v28  ;;  %v9392_v9 = vpop.f32.mrb[83].mxu1 }
 0x8c3   : > { %10563 = vst [vmem:[#allocation66_spill] sm:$0xff] %v9392_v9 }
 0x8ca   : > { %v9396_v22 = vpop.f32.mrb[84].mxu0 }
 0x8cb   : > { %10564 = vst [vmem:[#allocation67_spill] sm:$0xff] %v9396_v22  ;;  %v9398_v48 = vpop.f32.mrb[85].mxu0 }
 0x8cc   : > { %10565 = vst [vmem:[#allocation68_spill] sm:$0xff] %v9398_v48  ;;  %v9400_v24 = vpop.f32.mrb[86].mxu0 }
 0x8cd   : > { %10566 = vst [vmem:[#allocation69_spill] sm:$0xff] %v9400_v24  ;;  %v9404_v29 = vpop.f32.mrb[87].mxu0 }
 0x8ce   : > { %v9408_v33 = vpop.f32.mrb[84].mxu1 }
 0x8cf   : > { %10567 = vst [vmem:[#allocation70_spill] sm:$0xff] %v9408_v33  ;;  %v9410_v36 = vpop.f32.mrb[85].mxu1 }
 0x8d0   : > { %10568 = vst [vmem:[#allocation71_spill] sm:$0xff] %v9410_v36  ;;  %v9412_v6 = vpop.f32.mrb[86].mxu1 }
 0x8d1   : > { %10569 = vst [vmem:[#allocation72_spill] sm:$0xff] %v9412_v6  ;;  %v9416_v57 = vpop.f32.mrb[87].mxu1 }
 0x8d2   : > { %10570 = vst [vmem:[#allocation73_spill] sm:$0xff] %v9416_v57 }
 0x8e6   : > { %v9420_v21 = vpop.f32.mrb[88].mxu0 }
 0x8e7   : > { %10571 = vst [vmem:[#allocation74_spill] sm:$0xff] %v9420_v21  ;;  %v9422_v13 = vpop.f32.mrb[89].mxu0 }
 0x8e8   : > { %10572 = vst [vmem:[#allocation75_spill] sm:$0xff] %v9422_v13  ;;  %v9424_v59 = vpop.f32.mrb[90].mxu0 }
 0x8e9   : > { %10573 = vst [vmem:[#allocation76_spill] sm:$0xff] %v9424_v59  ;;  %v9428_v30 = vpop.f32.mrb[91].mxu0 }
 0x8ea   : > { %10574 = vst [vmem:[#allocation77_spill] sm:$0xff] %v9428_v30  ;;  %v9430_v10 = vpop.f32.mrb[88].mxu1 }
 0x8eb   : > { %10575 = vst [vmem:[#allocation78_spill] sm:$0xff] %v9430_v10  ;;  %v9434_v41 = vpop.f32.mrb[89].mxu1 }
 0x8ec   : > { %10576 = vst [vmem:[#allocation79_spill] sm:$0xff] %v9434_v41  ;;  %v9436_v45 = vpop.f32.mrb[90].mxu1 }
 0x8ed   : > { %10577 = vst [vmem:[#allocation80_spill] sm:$0xff] %v9436_v45  ;;  %v9440_v39 = vpop.f32.mrb[91].mxu1 }
 0x8ee   : > { %10578 = vst [vmem:[#allocation81_spill] sm:$0xff] %v9440_v39 }
 0x92e   : > { %v9444_v16 = vpop.f32.mrb[92].mxu1 }
 0x92f   : > { %10579 = vst [vmem:[#allocation82_spill] sm:$0xff] %v9444_v16  ;;  %v9446_v35 = vpop.f32.mrb[93].mxu1 }
 0x930   : > { %10580 = vst [vmem:[#allocation83_spill] sm:$0xff] %v9446_v35  ;;  %v9448_v61 = vpop.f32.mrb[94].mxu1 }
 0x931   : > { %10581 = vst [vmem:[#allocation84_spill] sm:$0xff] %v9448_v61  ;;  %v9452_v18 = vpop.f32.mrb[95].mxu1 }
 0x932   : > { %10582 = vst [vmem:[#allocation85_spill] sm:$0xff] %v9452_v18 }
 0x933   : > { %v9456_v32 = vpop.f32.mrb[92].mxu0 }
 0x934   : > { %10583 = vst [vmem:[#allocation86_spill] sm:$0xff] %v9456_v32  ;;  %v9458_v38 = vpop.f32.mrb[93].mxu0 }
 0x935   : > { %10584 = vst [vmem:[#allocation87_spill] sm:$0xff] %v9458_v38  ;;  %v9460_v44 = vpop.f32.mrb[94].mxu0 }
 0x936   : > { %10585 = vst [vmem:[#allocation88_spill] sm:$0xff] %v9460_v44  ;;  %v9464_v55 = vpop.f32.mrb[95].mxu0 }
 0x937   : > { %10586 = vst [vmem:[#allocation89_spill] sm:$0xff] %v9464_v55  ;;  %v6482_v27 = vpop.f32.mrb[96].mxu1 }
 0x938   : > { %v4173_v31 = vmul.f32 0.25, %v6482_v27  ;;  %v3952_v0 = vpop.f32.mrb[97].mxu1 }
 0x939   : > { %v4171_v14 = vmul.f32 0.25, %v3952_v0  ;;  %v6483_v15 = vpop.f32.mrb[98].mxu1 }
 0x93a   : > { %v9479_v8 = vadd.f32 %v4173_v31, %v9471_v53  ;;  %v3955_v54 = vpop.f32.mrb[99].mxu1  ;;  %v9492_v31 = vld [vmem:[%s10438_s2 + $0xc8] sm:$0xff] }
 0x93b   : > { %v6472_v60 = vpop.f32.mrb[96].mxu0  ;;  %v9482_v25 = vadd.f32 %v4171_v14, %v9476_v11  ;;  %v4172_v6 = vmul.f32 0.25, %v3955_v54 }
 0x93c   : > { %v4165_v43 = vmul.f32 0.25, %v6472_v60  ;;  %v3862_v23 = vpop.f32.mrb[97].mxu0  ;;  %v4257_v27 = vsel %vm849_vm1, %v9479_v8, -inf }
 0x93d   : > { %v4163_v5 = vmul.f32 0.25, %v3862_v23  ;;  %v6473_v50 = vpop.f32.mrb[98].mxu0  ;;  %4258 = vmax.xlane.f32.xlu1 %v4257_v27  ;;  %v4251_v14 = vsel %vm849_vm1, %v9482_v25, -inf  ;;  %v9547_v57 = vadd.f32 %v4172_v6, %v9492_v31 }
 0x93e   : > { %v9487_v51 = vadd.f32 %v4165_v43, %v9471_v53  ;;  %v3865_v0 = vpop.f32.mrb[99].mxu0  ;;  %v4166_v23 = vmul.f32 0.25, %v6473_v50 }
 0x93f   : > { %v4164_v60 = vmul.f32 0.25, %v3865_v0  ;;  %v6486_v12 = vpop.f32.mrb[100].mxu1  ;;  %v9497_v46 = vadd.f32 %v4163_v5, %v9476_v11  ;;  %v9514_v5 = vld [vmem:[%s10438_s2 + $0xf0] sm:$0xff]  ;;  %v4254_v38 = vsel %vm849_vm1, %v9547_v57, -inf }
 0x940   : > { %v4233_v27 = vsel %vm849_vm1, %v9487_v51, -inf  ;;  %v3968_v43 = vpop.f32.mrb[101].mxu1  ;;  %v4177_v40 = vmul.f32 0.25, %v6486_v12  ;;  %v9519_v16 = vadd.f32 %v4166_v23, %v9504_v47 }
 0x941   : > { %v9507_v34 = vadd.f32 %v4164_v60, %v9492_v31  ;;  %4234 = vmax.xlane.f32.xlu0 %v4233_v27  ;;  %4252 = vmax.xlane.f32.xlu1 %v4251_v14  ;;  %v6487_v0 = vpop.f32.mrb[102].mxu1  ;;  %v4174_v27 = vmul.f32 0.25, %v6483_v15  ;;  %v4227_v12 = vsel %vm849_vm1, %v9497_v46, -inf }
 0x942   : > { %v9509_v2 = vpop.f32.mrb[103].mxu1  ;;  %v9527_v33 = vadd.f32 %v4177_v40, %v9514_v5  ;;  %v4236_v15 = vsel %vm849_vm1, %v9519_v16, -inf  ;;  %v4178_v32 = vmul.f32 0.25, %v6487_v0 }
 0x943   : > { %v6476_v50 = vpop.f32.mrb[100].mxu0  ;;  %v4230_v4 = vsel %vm849_vm1, %v9507_v34, -inf  ;;  %v9530_v23 = vadd.f32 %v4174_v27, %v9504_v47  ;;  %v4176_v9 = vmul.f32 0.25, %v9509_v2 }
 0x944   : > { %v4169_v60 = vmul.f32 0.25, %v6476_v50  ;;  %v3878_v61 = vpop.f32.mrb[101].mxu0  ;;  %v4269_v40 = vsel %vm849_vm1, %v9527_v33, -inf }
 0x945   : > { %4228 = vmax.xlane.f32.xlu0 %v4227_v12  ;;  %v6477_v14 = vpop.f32.mrb[102].mxu0  ;;  %4231 = vmax.xlane.f32.xlu1 %v4230_v4  ;;  %v4167_v36 = vmul.f32 0.25, %v3878_v61  ;;  %v9539_v4 = vld [vmem:[%s10438_s2 + $0xe0] sm:$0xff]  ;;  %v4175_v61 = vmul.f32 0.25, %v3968_v43  ;;  %v4260_v10 = vsel %vm849_vm1, %v9530_v23, -inf }
 0x946   : > { %v9524_v35 = vadd.f32 %v4169_v60, %v9514_v5  ;;  %v3881_v18 = vpop.f32.mrb[103].mxu0  ;;  %v4170_v12 = vmul.f32 0.25, %v6477_v14 }
 0x947   : > { %v9544_v27 = vadd.f32 %v4167_v36, %v9539_v4  ;;  %v9555_v36 = vadd.f32 %v4175_v61, %v9539_v4  ;;  %v4168_v21 = vmul.f32 0.25, %v3881_v18 }
 0x948   : > { %v4245_v50 = vsel %vm849_vm1, %v9524_v35, -inf }
 0x949   : > { %4237 = vmax.xlane.f32.xlu0 %v4236_v15  ;;  %4246 = vmax.xlane.f32.xlu1 %v4245_v50  ;;  %v383_v15 = vld [vmem:[%s10438_s2 + $0xf8] sm:$0xff]  ;;  %v4239_v55 = vsel %vm849_vm1, %v9544_v27, -inf }
 0x94a   : > { %v9559_v44 = vadd.f32 %v4170_v12, %v383_v15 }
 0x94b   : > { %v6492_v54 = vpop.f32.mrb[104].mxu0  ;;  %v6502_v60 = vpop.f32.mrb[104].mxu1 }
 0x94c   : > { %v4042_v45 = vpop.f32.mrb[105].mxu0  ;;  %v4132_v41 = vpop.f32.mrb[105].mxu1  ;;  %v4181_v14 = vmul.f32 0.25, %v6492_v54  ;;  %v4189_v61 = vmul.f32 0.25, %v6502_v60  ;;  %v9570_v54 = vadd.f32 %v4178_v32, %v383_v15  ;;  %v4248_v59 = vsel %vm849_vm1, %v9559_v44, -inf }
 0x94d   : > { %4261 = vmax.xlane.f32.xlu0 %v4260_v10  ;;  %4270 = vmax.xlane.f32.xlu1 %v4269_v40  ;;  %v6493_v43 = vpop.f32.mrb[106].mxu0  ;;  %v6503_v50 = vpop.f32.mrb[106].mxu1  ;;  %v4263_v40 = vsel %vm849_vm1, %v9555_v36, -inf  ;;  %v4179_v22 = vmul.f32 0.25, %v4042_v45 }
 0x94e   : > { %v4045_v39 = vpop.f32.mrb[107].mxu0  ;;  %v9557_v6 = vpop.f32.mrb[107].mxu1  ;;  %v9566_v10 = vadd.f32 %v4181_v14, %v9471_v53  ;;  %v9578_v60 = vadd.f32 %v4189_v61, %v9471_v53  ;;  %v4272_v52 = vsel %vm849_vm1, %v9570_v54, -inf }
 0x950   : > { %v4281_v32 = vsel %vm849_vm1, %v9566_v10, -inf  ;;  %v4305_v2 = vsel %vm849_vm1, %v9578_v60, -inf }
 0x951   : > { %4255 = vmax.xlane.f32.xlu0 %v4254_v38  ;;  %4240 = vmax.xlane.f32.xlu1 %v4239_v55  ;;  %v381_v38 = vld [vmem:[%s10438_s2 + $0xe8] sm:$0xff] }
 0x952   : > { %v9597_v48 = vadd.f32 %v4176_v9, %v381_v38 }
 0x953   : > { %v6496_v0 = vpop.f32.mrb[108].mxu0  ;;  %v6506_v12 = vpop.f32.mrb[108].mxu1 }
 0x954   : > { %v4058_v13 = vpop.f32.mrb[109].mxu0  ;;  %v4148_v30 = vpop.f32.mrb[109].mxu1  ;;  %v4185_v9 = vmul.f32 0.25, %v6496_v0 }
 0x955   : > { %4249 = vmax.xlane.f32.xlu0 %v4248_v59  ;;  %4264 = vmax.xlane.f32.xlu1 %v4263_v40  ;;  %v6497_v55 = vpop.f32.mrb[110].mxu0  ;;  %v6507_v14 = vpop.f32.mrb[110].mxu1  ;;  %v9585_v40 = vadd.f32 %v4168_v21, %v381_v38 }
 0x956   : > { %v4186_v18 = vmul.f32 0.25, %v6497_v55  ;;  %v4061_v17 = vpop.f32.mrb[111].mxu0  ;;  %v4194_v28 = vmul.f32 0.25, %v6507_v14  ;;  %v4151_v3 = vpop.f32.mrb[111].mxu1  ;;  %v4187_v14 = vmul.f32 0.25, %v4132_v41  ;;  %v4190_v41 = vmul.f32 0.25, %v6503_v50 }
 0x957   : > { %v4184_v19 = vmul.f32 0.25, %v4061_v17  ;;  %v4192_v59 = vmul.f32 0.25, %v4151_v3  ;;  %v9600_v17 = vadd.f32 %v4179_v22, %v9476_v11  ;;  %v4182_v3 = vmul.f32 0.25, %v6493_v43 }
 0x958   : > { %v9587_v24 = vadd.f32 %v4186_v18, %v383_v15  ;;  %v9589_v53 = vadd.f32 %v4194_v28, %v383_v15  ;;  %v4242_v28 = vsel %vm849_vm1, %v9585_v40, -inf  ;;  %v4193_v15 = vmul.f32 0.25, %v6506_v12 }
 0x959   : > { %4282 = vmax.xlane.f32.xlu1 %v4281_v32  ;;  %4273 = vmax.xlane.f32.xlu0 %v4272_v52  ;;  %v9591_v61 = vadd.f32 %v4184_v19, %v381_v38  ;;  %v9593_v55 = vadd.f32 %v4192_v59, %v381_v38  ;;  %v9605_v52 = vadd.f32 %v4187_v14, %v9476_v11  ;;  %v4266_v19 = vsel %vm849_vm1, %v9597_v48, -inf }
 0x95a   : > { %v9610_v21 = vadd.f32 %v4182_v3, %v9504_v47  ;;  %v4275_v22 = vsel %vm849_vm1, %v9600_v17, -inf  ;;  %v4180_v43 = vmul.f32 0.25, %v4045_v39  ;;  %v9617_v11 = vadd.f32 %v4185_v9, %v9514_v5 }
 0x95b   : > { %v4299_v45 = vsel %vm849_vm1, %v9605_v52, -inf  ;;  %v9620_v38 = vadd.f32 %v4190_v41, %v9504_v47  ;;  %v9625_v50 = vadd.f32 %v4193_v15, %v9514_v5  ;;  %v4188_v32 = vmul.f32 0.25, %v9557_v6 }
 0x95c   : > { %v4284_v0 = vsel %vm849_vm1, %v9610_v21, -inf  ;;  %v9629_v18 = vadd.f32 %v4180_v43, %v9492_v31  ;;  %v4183_v39 = vmul.f32 0.25, %v4058_v13  ;;  %v4293_v12 = vsel %vm849_vm1, %v9617_v11, -inf }
 0x95d   : > { %4243 = vmax.xlane.f32.xlu0 %v4242_v28  ;;  %4306 = vmax.xlane.f32.xlu1 %v4305_v2  ;;  %v4308_v47 = vsel %vm849_vm1, %v9620_v38, -inf  ;;  %v4317_v59 = vsel %vm849_vm1, %v9625_v50, -inf  ;;  %v4191_v2 = vmul.f32 0.25, %v4148_v30  ;;  %v9641_v6 = vadd.f32 %v4188_v32, %v9492_v31 }
 0x95e   : > { %v9638_v5 = vadd.f32 %v4183_v39, %v9539_v4  ;;  %v4278_v13 = vsel %vm849_vm1, %v9629_v18, -inf  ;;  %v4320_v28 = vsel %vm849_vm1, %v9589_v53, -inf  ;;  %v4314_v9 = vsel %vm849_vm1, %v9593_v55, -inf }
 0x95f   : > { %v9646_v14 = vadd.f32 %v4191_v2, %v9539_v4  ;;  %v4302_v3 = vsel %vm849_vm1, %v9641_v6, -inf  ;;  %v4296_v4 = vsel %vm849_vm1, %v9587_v24, -inf }
 0x960   : > { %v4287_v30 = vsel %vm849_vm1, %v9638_v5, -inf }
 0x961   : > { %4267 = vmax.xlane.f32.xlu0 %v4266_v19  ;;  %4276 = vmax.xlane.f32.xlu1 %v4275_v22  ;;  %v4311_v31 = vsel %vm849_vm1, %v9646_v14, -inf  ;;  %v4290_v19 = vsel %vm849_vm1, %v9591_v61, -inf }
 0x965   : > { %4285 = vmax.xlane.f32.xlu0 %v4284_v0  ;;  %4300 = vmax.xlane.f32.xlu1 %v4299_v45 }
 0x969   : > { %4294 = vmax.xlane.f32.xlu1 %v4293_v12  ;;  %4309 = vmax.xlane.f32.xlu0 %v4308_v47 }
 0x96d   : > { %4279 = vmax.xlane.f32.xlu0 %v4278_v13  ;;  %4318 = vmax.xlane.f32.xlu1 %v4317_v59 }
 0x971   : > { %4303 = vmax.xlane.f32.xlu0 %v4302_v3  ;;  %4288 = vmax.xlane.f32.xlu1 %v4287_v30 }
 0x975   : > { %4312 = vmax.xlane.f32.xlu1 %v4311_v31 }
 0x986   : > { %4595 = vrot.lane.b32.xlu1 %v8430_v42, %s7472_s7 }
 0x987   : > { %4677 = vrot.lane.b32.xlu0 %v8574_v49, %s7472_s7 }
 0x9a6   : > { %4297 = vmax.xlane.f32.xlu0 %v4296_v4 }
 0x9aa   : > { %4321 = vmax.xlane.f32.xlu0 %v4320_v28 }
 0x9ae   : > { %4291 = vmax.xlane.f32.xlu0 %v4290_v19 }
 0x9b2   : > { %4315 = vmax.xlane.f32.xlu0 %v4314_v9 }
 0x9ca   : > { %v4259_v42 = vpop.xlane.xlu1 %4258 }
 0x9cb   : > { %v4333_v41 = vsub.f32 %v9479_v8, %v4259_v42 }
 0x9cd   : > { %v4375_v15 = vmul.f32 1.442695, %v4333_v41 }
 0x9ce   : > { %v4235_v49 = vpop.xlane.xlu0 %4234  ;;  %v4253_v22 = vpop.xlane.xlu1 %4252 }
 0x9cf   : > { %v4325_v45 = vsub.f32 %v9487_v51, %v4235_v49  ;;  %v4331_v12 = vsub.f32 %v9482_v25, %v4253_v22 }
 0x9d1   : > { %v4359_v43 = vmul.f32 1.442695, %v4325_v45  ;;  %v4371_v3 = vmul.f32 1.442695, %v4331_v12 }
 0x9d2   : > { %v4229_v0 = vpop.xlane.xlu0 %4228  ;;  %v4232_v32 = vpop.xlane.xlu1 %4231 }
 0x9d3   : > { %7294 = vpow2.f32 %v4359_v43  ;;  %v4323_v39 = vsub.f32 %v9497_v46, %v4229_v0  ;;  %v4324_v8 = vsub.f32 %v9507_v34, %v4232_v32 }
 0x9d4   : > { %7296 = vpow2.f32 %v4375_v15 }
 0x9d5   : > { %v4355_v47 = vmul.f32 1.442695, %v4323_v39  ;;  %v4357_v28 = vmul.f32 1.442695, %v4324_v8 }
 0x9d6   : > { %v4238_v59 = vpop.xlane.xlu0 %4237  ;;  %v4247_v2 = vpop.xlane.xlu1 %4246 }
 0x9d7   : > { %v4326_v13 = vsub.f32 %v9519_v16, %v4238_v59  ;;  %7298 = vpow2.f32 %v4355_v47  ;;  %v4329_v30 = vsub.f32 %v9524_v35, %v4247_v2 }
 0x9d9   : > { %v4361_v51 = vmul.f32 1.442695, %v4326_v13  ;;  %v4367_v9 = vmul.f32 1.442695, %v4329_v30 }
 0x9da   : > { %v4262_v31 = vpop.xlane.xlu0 %4261  ;;  %v4271_v4 = vpop.xlane.xlu1 %4270 }
 0x9db   : > { %7300 = vpow2.f32 %v4361_v51  ;;  %v4334_v46 = vsub.f32 %v9530_v23, %v4262_v31  ;;  %v4337_v25 = vsub.f32 %v9527_v33, %v4271_v4 }
 0x9dc   : > { %7302 = vpow2.f32 %v4371_v3 }
 0x9dd   : > { %v9675_v19 = vpop.eup %7294  ;;  %v4377_v16 = vmul.f32 1.442695, %v4334_v46  ;;  %v4383_v23 = vmul.f32 1.442695, %v4337_v25 }
 0x9de   : > { %v4256_v42 = vpop.xlane.xlu0 %4255  ;;  %v4241_v34 = vpop.xlane.xlu1 %4240  ;;  %v4425_v41 = vsel %vm849_vm1, %v9675_v19, 0.0 }
 0x9df   : > { %v9679_v49 = vpop.eup %7296  ;;  %7304 = vpow2.f32 %v4377_v16  ;;  %v4332_v35 = vsub.f32 %v9547_v57, %v4256_v42  ;;  %4426 = vadd.xlane.f32.xlu1 %v4425_v41  ;;  %v4327_v33 = vsub.f32 %v9544_v27, %v4241_v34 }
 0x9e0   : > { %7306 = vpow2.f32 %v4357_v28  ;;  %v4449_v43 = vsel %vm849_vm1, %v9679_v49, 0.0 }
 0x9e1   : > { %7308 = vpow2.f32 %v4367_v9  ;;  %v4373_v22 = vmul.f32 1.442695, %v4332_v35  ;;  %v9685_v0 = vpop.eup %7298  ;;  %v4363_v39 = vmul.f32 1.442695, %v4327_v33 }
 0x9e2   : > { %v4250_v45 = vpop.xlane.xlu0 %4249  ;;  %v4265_v15 = vpop.xlane.xlu1 %4264  ;;  %7310 = vpow2.f32 %v4383_v23  ;;  %v4419_v13 = vsel %vm849_vm1, %v9685_v0, 0.0 }
 0x9e3   : > { %v4330_v32 = vsub.f32 %v9559_v44, %v4250_v45  ;;  %4450 = vadd.xlane.f32.xlu1 %v4449_v43  ;;  %v4335_v57 = vsub.f32 %v9555_v36, %v4265_v15  ;;  %7312 = vpow2.f32 %v4373_v22 }
 0x9e4   : > { %7314 = vpow2.f32 %v4363_v39 }
 0x9e5   : > { %v9689_v12 = vpop.eup %7300  ;;  %v4369_v27 = vmul.f32 1.442695, %v4330_v32  ;;  %v4379_v36 = vmul.f32 1.442695, %v4335_v57 }
 0x9e6   : > { %v4274_v47 = vpop.xlane.xlu0 %4273  ;;  %v4283_v59 = vpop.xlane.xlu1 %4282  ;;  %v4428_v2 = vsel %vm849_vm1, %v9689_v12, 0.0 }
 0x9e7   : > { %v9695_v8 = vpop.eup %7302  ;;  %v4338_v44 = vsub.f32 %v9570_v54, %v4274_v47  ;;  %4429 = vadd.xlane.f32.xlu0 %v4428_v2  ;;  %4420 = vadd.xlane.f32.xlu1 %v4419_v13  ;;  %v4341_v3 = vsub.f32 %v9566_v10, %v4283_v59  ;;  %7316 = vpow2.f32 %v4369_v27 }
 0x9e8   : > { %v4443_v54 = vsel %vm849_vm1, %v9695_v8, 0.0  ;;  %7318 = vpow2.f32 %v4379_v36 }
 0x9e9   : > { %v9699_v51 = vpop.eup %7304  ;;  %v4385_v30 = vmul.f32 1.442695, %v4338_v44  ;;  %v4391_v10 = vmul.f32 1.442695, %v4341_v3 }
 0x9ea   : > { %v9701_v31 = vpop.eup %7306  ;;  %v4244_v4 = vpop.xlane.xlu0 %4243  ;;  %v4452_v28 = vsel %vm849_vm1, %v9699_v51, 0.0 }
 0x9eb   : > { %v4307_v46 = vpop.xlane.xlu1 %4306  ;;  %v9707_v25 = vpop.eup %7308  ;;  %v4328_v9 = vsub.f32 %v9585_v40, %v4244_v4  ;;  %4453 = vadd.xlane.f32.xlu0 %v4452_v28  ;;  %4444 = vadd.xlane.f32.xlu1 %v4443_v54  ;;  %7320 = vpow2.f32 %v4385_v30  ;;  %v4422_v35 = vsel %vm849_vm1, %v9701_v31, 0.0 }
 0x9ec   : > { %v9710_v42 = vpop.eup %7310  ;;  %v4437_v23 = vsel %vm849_vm1, %v9707_v25, 0.0  ;;  %7322 = vpow2.f32 %v4391_v10  ;;  %v4349_v45 = vsub.f32 %v9578_v60, %v4307_v46 }
 0x9ed   : > { %v4365_v16 = vmul.f32 1.442695, %v4328_v9  ;;  %v9716_v33 = vpop.eup %7312 }
 0x9ee   : > { %v4268_v34 = vpop.xlane.xlu0 %4267  ;;  %v9721_v43 = vpop.eup %7314  ;;  %v4446_v27 = vsel %vm849_vm1, %v9716_v33, 0.0 }
 0x9ef   : > { %v4277_v41 = vpop.xlane.xlu1 %4276  ;;  %v4336_v40 = vsub.f32 %v9597_v48, %v4268_v34  ;;  %4423 = vadd.xlane.f32.xlu0 %v4422_v35  ;;  %4438 = vadd.xlane.f32.xlu1 %v4437_v23  ;;  %7324 = vpow2.f32 %v4365_v16  ;;  %v4461_v48 = vsel %vm849_vm1, %v9710_v42, 0.0  ;;  %v4431_v36 = vsel %vm849_vm1, %v9721_v43, 0.0 }
 0x9f0   : > { %v4339_v22 = vsub.f32 %v9600_v17, %v4277_v41  ;;  %v4407_v17 = vmul.f32 1.442695, %v4349_v45 }
 0x9f1   : > { %v4381_v15 = vmul.f32 1.442695, %v4336_v40  ;;  %v9727_v47 = vpop.eup %7316 }
 0x9f2   : > { %v4387_v32 = vmul.f32 1.442695, %v4339_v22  ;;  %v4286_v39 = vpop.xlane.xlu0 %4285  ;;  %v9730_v59 = vpop.eup %7318  ;;  %v4440_v44 = vsel %vm849_vm1, %v9727_v47, 0.0 }
 0x9f3   : > { %v4301_v57 = vpop.xlane.xlu1 %4300  ;;  %4447 = vadd.xlane.f32.xlu0 %v4446_v27  ;;  %4462 = vadd.xlane.f32.xlu1 %v4461_v48  ;;  %7326 = vpow2.f32 %v4381_v15  ;;  %v4455_v16 = vsel %vm849_vm1, %v9730_v59, 0.0 }
 0x9f4   : > { %v4347_v60 = vsub.f32 %v9605_v52, %v4301_v57  ;;  %7328 = vpow2.f32 %v4387_v32  ;;  %v4342_v52 = vsub.f32 %v9610_v21, %v4286_v39 }
 0x9f5   : > { %v9736_v3 = vpop.eup %7320  ;;  %7330 = vpow2.f32 %v4407_v17 }
 0x9f6   : > { %v4310_v2 = vpop.xlane.xlu0 %4309  ;;  %v4403_v4 = vmul.f32 1.442695, %v4347_v60  ;;  %v9740_v28 = vpop.eup %7322  ;;  %v4464_v10 = vsel %vm849_vm1, %v9736_v3, 0.0 }
 0x9f7   : > { %v4295_v13 = vpop.xlane.xlu1 %4294  ;;  %4441 = vadd.xlane.f32.xlu0 %v4440_v44  ;;  %4432 = vadd.xlane.f32.xlu1 %v4431_v36  ;;  %v4350_v21 = vsub.f32 %v9620_v38, %v4310_v2  ;;  %v4473_v40 = vsel %vm849_vm1, %v9740_v28, 0.0 }
 0x9f8   : > { %v4345_v30 = vsub.f32 %v9617_v11, %v4295_v13  ;;  %v4393_v11 = vmul.f32 1.442695, %v4342_v52 }
 0x9f9   : > { %v9746_v34 = vpop.eup %7324  ;;  %v4409_v32 = vmul.f32 1.442695, %v4350_v21 }
 0x9fa   : > { %v4399_v46 = vmul.f32 1.442695, %v4345_v30  ;;  %v4280_v54 = vpop.xlane.xlu0 %4279  ;;  %v4434_v23 = vsel %vm849_vm1, %v9746_v34, 0.0 }
 0x9fb   : > { %v4319_v9 = vpop.xlane.xlu1 %4318  ;;  %4465 = vadd.xlane.f32.xlu0 %v4464_v10  ;;  %4456 = vadd.xlane.f32.xlu1 %v4455_v16  ;;  %v4340_v38 = vsub.f32 %v9629_v18, %v4280_v54 }
 0x9fc   : > { %7332 = vpow2.f32 %v4399_v46 }
 0x9fd   : > { %7334 = vpow2.f32 %v4403_v4  ;;  %v9753_v22 = vpop.eup %7326  ;;  %v4389_v18 = vmul.f32 1.442695, %v4340_v38 }
 0x9fe   : > { %v4304_v41 = vpop.xlane.xlu0 %4303  ;;  %v9756_v15 = vpop.eup %7328  ;;  %7336 = vpow2.f32 %v4393_v11  ;;  %v4458_v48 = vsel %vm849_vm1, %v9753_v22, 0.0 }
 0x9ff   : > { %v4289_v35 = vpop.xlane.xlu1 %4288  ;;  %4435 = vadd.xlane.f32.xlu0 %v4434_v23  ;;  %4474 = vadd.xlane.f32.xlu1 %v4473_v40  ;;  %v9761_v17 = vpop.eup %7330  ;;  %v4348_v13 = vsub.f32 %v9641_v6, %v4304_v41  ;;  %v4353_v6 = vsub.f32 %v9625_v50, %v4319_v9 }
 0xa00   : > { %v4343_v45 = vsub.f32 %v9638_v5, %v4289_v35  ;;  %v4467_v5 = vsel %vm849_vm1, %v9756_v15, 0.0 }
 0xa01   : > { %v4405_v54 = vmul.f32 1.442695, %v4348_v13  ;;  %v4415_v11 = vmul.f32 1.442695, %v4353_v6 }
 0xa02   : > { %v4395_v39 = vmul.f32 1.442695, %v4343_v45  ;;  %v4678_v57 = vpop.permute.xlu0 %4677 }
 0xa03   : > { %v4313_v27 = vpop.xlane.xlu1 %4312  ;;  %6625 = vmatprep.subr.msk.bf16.mxu1 %vm1230_vm2, %v4678_v57  ;;  %4459 = vadd.xlane.f32.xlu0 %v4458_v48  ;;  %v4692_v2 = vsel %vm1230_vm2, %v4678_v57, 0  ;;  %v10587_v48 = vpack.i.bf16 %v9380_v37, %v9374_v1 }
 0xa04   : > { %v4351_v60 = vsub.f32 %v9646_v14, %v4313_v27  ;;  %7338 = vpow2.f32 %v4395_v39  ;;  %4468 = vadd.xlane.f32.xlu1 %v4467_v5  ;;  %6519 = vmatpush3.bf16.msra.mxu1 %v4692_v2  ;;  %v4497_v14 = vsel %vm849_vm1, %v9761_v17, 0.0  ;;  %v10589_v5 = vpack.i.bf16 %v8784_v20, %v8778_v26 }
 0xa05   : > { %7340 = vpow2.f32 %v4409_v32 }
 0xa06   : > { %v4411_v44 = vmul.f32 1.442695, %v4351_v60  ;;  %v9769_v36 = vpop.eup %7332  ;;  %v10588_v60 = vpack.i.bf16 %v9376_v62, %v9372_v58  ;;  %v10591_v62 = vld [vmem:[#allocation68_spill] sm:$0xff] }
 0xa07   : > { %v4596_v30 = vpop.permute.xlu1 %4595  ;;  %v9773_v52 = vpop.eup %7334  ;;  %4498 = vadd.xlane.f32.xlu0 %v4497_v14  ;;  %v4485_v4 = vsel %vm849_vm1, %v9769_v36, 0.0  ;;  %v10592_v13 = vpack.i.bf16 %v9404_v29, %v10591_v62  ;;  %v10594_v14 = vld [vmem:[#allocation67_spill] sm:$0xff]  ;;  %v10612_v62 = vld [vmem:[#allocation38_spill] sm:$0xff] }
 0xa08   : > { %7342 = vpow2.f32 %v4411_v44  ;;  %v4610_v46 = vsel %vm1230_vm2, %v4596_v30, 0  ;;  %6624 = vmatprep.subr.msk.bf16.mxu0 %vm1230_vm2, %v4596_v30  ;;  %4486 = vadd.xlane.f32.xlu1 %v4485_v4  ;;  %v4491_v10 = vsel %vm849_vm1, %v9773_v52, 0.0  ;;  %v9782_v16 = vpop.eup %7336  ;;  %v10593_v44 = vld [vmem:[#allocation69_spill] sm:$0xff]  ;;  %v10596_v4 = vld [vmem:[#allocation42_spill] sm:$0xff] }
 0xa09   : > { %6509 = vmatpush3.bf16.msra.mxu0 %v4610_v46  ;;  %7344 = vpow2.f32 %v4389_v18  ;;  %v4476_v41 = vsel %vm849_vm1, %v9782_v16, 0.0  ;;  %v10590_v18 = vpack.i.bf16 %v8780_v56, %v8776_v7  ;;  %v10595_v7 = vpack.i.bf16 %v10593_v44, %v10594_v14  ;;  %v10597_v46 = vld [vmem:[#allocation40_spill] sm:$0xff] }
 0xa0a   : > { %7346 = vpow2.f32 %v4405_v54  ;;  %v10598_v29 = vpack.i.bf16 %v10596_v4, %v10597_v46  ;;  %v10616_v44 = vld [vmem:[#allocation44_spill] sm:$0xff] }
 0xa0b   : > { %4492 = vadd.xlane.f32.xlu0 %v4491_v10  ;;  %7348 = vpow2.f32 %v4415_v11  ;;  %v10599_v10 = vld [vmem:[#allocation41_spill] sm:$0xff]  ;;  %v10600_v11 = vld [vmem:[#allocation39_spill] sm:$0xff] }
 0xa0e   : > { %v9784_v21 = vpop.eup %7338 }
 0xa0f   : > { %v9788_v35 = vpop.eup %7340  ;;  %4477 = vadd.xlane.f32.xlu0 %v4476_v41  ;;  %v4479_v50 = vsel %vm849_vm1, %v9784_v21, 0.0  ;;  %v10601_v41 = vpack.i.bf16 %v10599_v10, %v10600_v11 }
 0xa10   : > { %4480 = vadd.xlane.f32.xlu1 %v4479_v50  ;;  %v4500_v23 = vsel %vm849_vm1, %v9788_v35, 0.0 }
 0xa12   : > { %v9792_v9 = vpop.eup %7342 }
 0xa13   : > { %v4503_v40 = vsel %vm849_vm1, %v9792_v9, 0.0  ;;  %v9798_v45 = vpop.eup %7344  ;;  %4501 = vadd.xlane.f32.xlu0 %v4500_v23  ;;  %v10602_v23 = vld [vmem:[#allocation66_spill] sm:$0xff] }
 0xa14   : > { %4504 = vadd.xlane.f32.xlu1 %v4503_v40  ;;  %v4470_v32 = vsel %vm849_vm1, %v9798_v45, 0.0  ;;  %v9802_v38 = vpop.eup %7346  ;;  %v10603_v40 = vld [vmem:[#allocation64_spill] sm:$0xff] }
 0xa15   : > { %v4494_v39 = vsel %vm849_vm1, %v9802_v38, 0.0  ;;  %v9806_v57 = vpop.eup %7348 }
 0xa16   : > { %v4509_v27 = vsel %vm849_vm1, %v9806_v57, 0.0 }
 0xa17   : > { %4471 = vadd.xlane.f32.xlu0 %v4470_v32  ;;  %v10604_v32 = vpack.i.bf16 %v10602_v23, %v10603_v40 }
 0xa1b   : > { %4495 = vadd.xlane.f32.xlu0 %v4494_v39 }
 0xa1f   : > { %4510 = vadd.xlane.f32.xlu0 %v4509_v27 }
 0xa25   : > { %4841 = vrot.lane.b32.xlu1 %v8577_v63, %s7472_s7 }
 0xa29   : > { %6663 = vrot.lane.b32.xlu1 %v10587_v48, %s7473_s14  ;;  %v10605_v48 = vld [vmem:[#allocation65_spill] sm:$0xff] }
 0xa2d   : > { %6673 = vrot.lane.b32.xlu1 %v10588_v60, %s7473_s14  ;;  %v10606_v60 = vld [vmem:[#allocation63_spill] sm:$0xff] }
 0xa31   : > { %6683 = vrot.lane.b32.xlu1 %v10589_v5, %s7474_s15  ;;  %v10607_v5 = vpack.i.bf16 %v10605_v48, %v10606_v60  ;;  %v10628_v48 = vld [vmem:[#allocation74_spill] sm:$0xff] }
 0xa33   : > { %v4298_v2 = vpop.xlane.xlu0 %4297 }
 0xa34   : > { %v4346_v63 = vsub.f32 %v9587_v24, %v4298_v2 }
 0xa35   : > { %6693 = vrot.lane.b32.xlu1 %v10590_v18, %s7474_s15  ;;  %v10608_v18 = vld [vmem:[#allocation50_spill] sm:$0xff] }
 0xa36   : > { %v4401_v1 = vmul.f32 1.442695, %v4346_v63 }
 0xa37   : > { %v4322_v37 = vpop.xlane.xlu0 %4321 }
 0xa38   : > { %7350 = vpow2.f32 %v4401_v1  ;;  %v4354_v58 = vsub.f32 %v9589_v53, %v4322_v37  ;;  %v10609_v1 = vld [vmem:[#allocation48_spill] sm:$0xff] }
 0xa39   : > { %6703 = vrot.lane.b32.xlu1 %v10592_v13, %s7473_s14  ;;  %v10610_v37 = vpack.i.bf16 %v10608_v18, %v10609_v1  ;;  %v10613_v13 = vld [vmem:[#allocation36_spill] sm:$0xff]  ;;  %v10630_v18 = vld [vmem:[#allocation58_spill] sm:$0xff] }
 0xa3a   : > { %v4417_v26 = vmul.f32 1.442695, %v4354_v58  ;;  %v10611_v58 = vld [vmem:[#allocation34_spill] sm:$0xff]  ;;  %v10631_v1 = vld [vmem:[#allocation56_spill] sm:$0xff] }
 0xa3b   : > { %v4292_v20 = vpop.xlane.xlu0 %4291 }
 0xa3c   : > { %7352 = vpow2.f32 %v4417_v26  ;;  %v4344_v24 = vsub.f32 %v9591_v61, %v4292_v20  ;;  %v10614_v26 = vpack.i.bf16 %v10612_v62, %v10613_v13 }
 0xa3d   : > { %6713 = vrot.lane.b32.xlu1 %v10595_v7, %s7473_s14 }
 0xa3e   : > { %v4397_v56 = vmul.f32 1.442695, %v4344_v24  ;;  %v10615_v24 = vld [vmem:[#allocation46_spill] sm:$0xff] }
 0xa3f   : > { %v4316_v30 = vpop.xlane.xlu0 %4315  ;;  %v10617_v14 = vpack.i.bf16 %v10615_v24, %v10616_v44  ;;  %v10633_v24 = vld [vmem:[#allocation57_spill] sm:$0xff]  ;;  %v10634_v44 = vld [vmem:[#allocation55_spill] sm:$0xff] }
 0xa40   : > { %7354 = vpow2.f32 %v4397_v56  ;;  %v4352_v53 = vsub.f32 %v9593_v55, %v4316_v30  ;;  %v10618_v56 = vld [vmem:[#allocation37_spill] sm:$0xff]  ;;  %v10619_v30 = vld [vmem:[#allocation35_spill] sm:$0xff] }
 0xa41   : > { %6723 = vrot.lane.b32.xlu1 %v10598_v29, %s7474_s15  ;;  %v10621_v29 = vld [vmem:[#allocation45_spill] sm:$0xff] }
 0xa42   : > { %v9844_v6 = vpop.eup %7350  ;;  %v4413_v54 = vmul.f32 1.442695, %v4352_v53  ;;  %v10620_v53 = vpack.i.bf16 %v10618_v56, %v10619_v30 }
 0xa43   : > { %v4488_v61 = vsel %vm849_vm1, %v9844_v6, 0.0 }
 0xa44   : > { %7356 = vpow2.f32 %v4413_v54  ;;  %4489 = vadd.xlane.f32.xlu0 %v4488_v61  ;;  %v10622_v54 = vld [vmem:[#allocation43_spill] sm:$0xff] }
 0xa45   : > { %6733 = vrot.lane.b32.xlu1 %v10601_v41, %s7474_s15  ;;  %v10623_v61 = vpack.i.bf16 %v10621_v29, %v10622_v54  ;;  %v10624_v41 = vld [vmem:[#allocation77_spill] sm:$0xff] }
 0xa46   : > { %v9852_v50 = vpop.eup %7352 }
 0xa47   : > { %v4512_v55 = vsel %vm849_vm1, %v9852_v50, 0.0 }
 0xa48   : > { %4513 = vadd.xlane.f32.xlu0 %v4512_v55  ;;  %v10625_v55 = vld [vmem:[#allocation75_spill] sm:$0xff] }
 0xa49   : > { %6743 = vrot.lane.b32.xlu1 %v10604_v32, %s7473_s14  ;;  %v10626_v23 = vpack.i.bf16 %v10624_v41, %v10625_v55  ;;  %v10637_v41 = vld [vmem:[#allocation87_spill] sm:$0xff] }
 0xa4a   : > { %v9860_v39 = vpop.eup %7354 }
 0xa4b   : > { %v4482_v27 = vsel %vm849_vm1, %v9860_v39, 0.0 }
 0xa4c   : > { %4483 = vadd.xlane.f32.xlu0 %v4482_v27  ;;  %v10627_v27 = vld [vmem:[#allocation76_spill] sm:$0xff] }
 0xa4d   : > { %6753 = vrot.lane.b32.xlu1 %v10607_v5, %s7473_s14  ;;  %v10629_v60 = vpack.i.bf16 %v10627_v27, %v10628_v48 }
 0xa4e   : > { %v9868_v2 = vpop.eup %7356 }
 0xa4f   : > { %v4506_v63 = vsel %vm849_vm1, %v9868_v2, 0.0 }
 0xa50   : > { %4507 = vadd.xlane.f32.xlu0 %v4506_v63 }
 0xa51   : > { %6763 = vrot.lane.b32.xlu1 %v10610_v37, %s7474_s15  ;;  %v10632_v37 = vpack.i.bf16 %v10630_v18, %v10631_v1 }
 0xa66   : > { %4759 = vrot.lane.b32.xlu0 %v10611_v58, %s7472_s7 }
 0xa6a   : > { %6643 = vrot.lane.b32.xlu0 %v10614_v26, %s7474_s15 }
 0xa6c   : > { %v4427_v20 = vpop.xlane.xlu1 %4426 }
 0xa6e   : > { %6648 = vrot.lane.b32.xlu0 %v10617_v14, %s7474_s15  ;;  %v10635_v14 = vpack.i.bf16 %v10633_v24, %v10634_v44  ;;  %v10645_v24 = vld [vmem:[#allocation53_spill] sm:$0xff]  ;;  %v10646_v44 = vld [vmem:[#allocation51_spill] sm:$0xff] }
 0xa70   : > { %v4451_v7 = vpop.xlane.xlu1 %4450 }
 0xa72   : > { %6653 = vrot.lane.b32.xlu0 %v10620_v53, %s7474_s15 }
 0xa74   : > { %v4430_v4 = vpop.xlane.xlu0 %4429  ;;  %v4421_v46 = vpop.xlane.xlu1 %4420 }
 0xa75   : > { %7358 = vrcp.f32 %v4430_v4 }
 0xa76   : > { %6658 = vrot.lane.b32.xlu0 %v10623_v61, %s7474_s15  ;;  %7360 = vrcp.f32 %v4421_v46 }
 0xa77   : > { %7362 = vrcp.f32 %v4427_v20 }
 0xa78   : > { %v4454_v10 = vpop.xlane.xlu0 %4453  ;;  %v4445_v11 = vpop.xlane.xlu1 %4444 }
 0xa7a   : > { %6668 = vrot.lane.b32.xlu0 %v10626_v23, %s7473_s14 }
 0xa7c   : > { %v4424_v40 = vpop.xlane.xlu0 %4423  ;;  %v4439_v32 = vpop.xlane.xlu1 %4438 }
 0xa7d   : > { %7364 = vrcp.f32 %v4424_v40 }
 0xa7e   : > { %7366 = vrcp.f32 %v4454_v10  ;;  %6678 = vrot.lane.b32.xlu0 %v10629_v60, %s7473_s14 }
 0xa7f   : > { %7368 = vrcp.f32 %v4445_v11  ;;  %v7359_v58 = vpop.eup %7358  ;;  %v10636_v11 = vld [vmem:[#allocation89_spill] sm:$0xff] }
 0xa80   : > { %7370 = vrcp.f32 %v4451_v7  ;;  %v4448_v5 = vpop.xlane.xlu0 %4447  ;;  %v4463_v63 = vpop.xlane.xlu1 %4462  ;;  %v4550_v7 = vmul.f32 %v7359_v58, %v9689_v12  ;;  %v10638_v55 = vpack.i.bf16 %v10636_v11, %v10637_v41  ;;  %v10649_v11 = vld [vmem:[#allocation79_spill] sm:$0xff] }
 0xa81   : > { %7372 = vrcp.f32 %v4448_v5  ;;  %v7361_v26 = vpop.eup %7360  ;;  %v10639_v5 = vld [vmem:[#allocation88_spill] sm:$0xff] }
 0xa82   : > { %6688 = vrot.lane.b32.xlu0 %v10632_v37, %s7474_s15  ;;  %v7363_v20 = vpop.eup %7362  ;;  %v4547_v46 = vmul.f32 %v7361_v26, %v9685_v0 }
 0xa83   : > { %v4549_v61 = vmul.f32 %v7363_v20, %v9675_v19 }
 0xa84   : > { %v4442_v62 = vpop.xlane.xlu0 %4441  ;;  %v4433_v13 = vpop.xlane.xlu1 %4432 }
 0xa85   : > { %7374 = vrcp.f32 %v4442_v62  ;;  %v4580_v12 = vpack.c.bf16 %v4550_v7, %v4549_v61 }
 0xa86   : > { %6698 = vrot.lane.b32.xlu0 %v10635_v14, %s7474_s15  ;;  %7376 = vrcp.f32 %v4433_v13 }
 0xa87   : > { %v7365_v56 = vpop.eup %7364  ;;  %7378 = vrcp.f32 %v4439_v32 }
 0xa88   : > { %v7367_v30 = vpop.eup %7366  ;;  %v4466_v53 = vpop.xlane.xlu0 %4465  ;;  %v4548_v29 = vmul.f32 %v7365_v56, %v9701_v31 }
 0xa89   : > { %v4457_v4 = vpop.xlane.xlu1 %4456  ;;  %v7369_v54 = vpop.eup %7368  ;;  %v4558_v27 = vmul.f32 %v7367_v30, %v9699_v51  ;;  %v10640_v51 = vld [vmem:[#allocation86_spill] sm:$0xff] }
 0xa8a   : > { %v7371_v10 = vpop.eup %7370  ;;  %6708 = vrot.lane.b32.xlu0 %v10638_v55, %s7473_s14  ;;  %v4579_v23 = vpack.c.bf16 %v4548_v29, %v4547_v46  ;;  %v4555_v31 = vmul.f32 %v7369_v54, %v9695_v8  ;;  %v10641_v18 = vpack.i.bf16 %v10639_v5, %v10640_v51 }
 0xa8b   : > { %v7373_v40 = vpop.eup %7372  ;;  %v4557_v48 = vmul.f32 %v7371_v10, %v9679_v49  ;;  %v10642_v49 = vld [vmem:[#allocation54_spill] sm:$0xff]  ;;  %v10648_v10 = vld [vmem:[#allocation81_spill] sm:$0xff] }
 0xa8c   : > { %v4436_v0 = vpop.xlane.xlu0 %4435  ;;  %6510 = vmatprep.mubr.msk.bf16.mxu0 %vm849_vm1, %v4579_v23  ;;  %v4556_v19 = vmul.f32 %v7373_v40, %v9716_v33  ;;  %v10643_v33 = vld [vmem:[#allocation52_spill] sm:$0xff]  ;;  %v10650_v41 = vpack.i.bf16 %v10648_v10, %v10649_v11 }
 0xa8d   : > { %7380 = vrcp.f32 %v4436_v0  ;;  %v9923_v60 = vpop.xlane.xlu1 %4474  ;;  %6511 = vmatmul.mubr.msk.bf16.vlgmr.msra.gmra.mrb[112].mxu0 %vm849_vm1, %v4580_v12  ;;  %v4584_v1 = vpack.c.bf16 %v4558_v27, %v4557_v48  ;;  %v10644_v37 = vpack.i.bf16 %v10642_v49, %v10643_v33  ;;  %v10651_v0 = vld [vmem:[#allocation80_spill] sm:$0xff] }
 0xa8e   : > { %7382 = vrcp.f32 %v4466_v53  ;;  %6718 = vrot.lane.b32.xlu0 %v10641_v18, %s7473_s14  ;;  %v4583_v32 = vpack.c.bf16 %v4556_v19, %v4555_v31  ;;  %v10652_v31 = vld [vmem:[#allocation78_spill] sm:$0xff] }
 0xa8f   : > { %7384 = vrcp.f32 %v4457_v4  ;;  %v7375_v62 = vpop.eup %7374  ;;  %v10653_v19 = vpack.i.bf16 %v10651_v0, %v10652_v31 }
 0xa90   : > { %7386 = vrcp.f32 %v4463_v63  ;;  %v4460_v8 = vpop.xlane.xlu0 %4459  ;;  %6520 = vmatprep.mubr.msk.bf16.mxu1 %vm849_vm1, %v4583_v32  ;;  %v7377_v26 = vpop.eup %7376  ;;  %v10647_v63 = vpack.i.bf16 %v10645_v24, %v10646_v44  ;;  %v4554_v56 = vmul.f32 %v7375_v62, %v9727_v47 }
 0xa91   : > { %7388 = vrcp.f32 %v4460_v8  ;;  %6521 = vmatmul.mubr.msk.bf16.vlgmr.msra.gmra.mrb[112].mxu1 %vm849_vm1, %v4584_v1  ;;  %v4469_v58 = vpop.xlane.xlu1 %4468  ;;  %v7379_v20 = vpop.eup %7378  ;;  %v4551_v53 = vmul.f32 %v7377_v26, %v9721_v43 }
 0xa92   : > { %6728 = vrot.lane.b32.xlu0 %v10644_v37, %s7474_s15  ;;  %v4553_v54 = vmul.f32 %v7379_v20, %v9707_v25  ;;  %7390 = vrcp.f32 %v4469_v58 }
 0xa94   : > { %v4499_v13 = vpop.xlane.xlu0 %4498  ;;  %v4582_v40 = vpack.c.bf16 %v4554_v56, %v4553_v54 }
 0xa95   : > { %v4487_v29 = vpop.xlane.xlu1 %4486 }
 0xa96   : > { %6738 = vrot.lane.b32.xlu0 %v10647_v63, %s7474_s15 }
 0xa97   : > { %v7381_v14 = vpop.eup %7380 }
 0xa98   : > { %v7383_v7 = vpop.eup %7382  ;;  %v4493_v30 = vpop.xlane.xlu0 %4492  ;;  %v4552_v4 = vmul.f32 %v7381_v14, %v9746_v34 }
 0xa99   : > { %v7385_v46 = vpop.eup %7384  ;;  %v4562_v47 = vmul.f32 %v7383_v7, %v9736_v3 }
 0xa9a   : > { %v7387_v61 = vpop.eup %7386  ;;  %6748 = vrot.lane.b32.xlu0 %v10650_v41, %s7473_s14  ;;  %v4581_v55 = vpack.c.bf16 %v4552_v4, %v4551_v53  ;;  %v4559_v43 = vmul.f32 %v7385_v46, %v9730_v59  ;;  %v10654_v59 = vld [vmem:[#allocation62_spill] sm:$0xff] }
 0xa9b   : > { %v7389_v23 = vpop.eup %7388  ;;  %v4561_v25 = vmul.f32 %v7387_v61, %v9710_v42 }
 0xa9c   : > { %v4478_v12 = vpop.xlane.xlu0 %4477  ;;  %6514 = vmatprep.mubr.msk.bf16.mxu0 %vm849_vm1, %v4581_v55  ;;  %v4560_v34 = vmul.f32 %v7389_v23, %v9753_v22  ;;  %v10655_v22 = vld [vmem:[#allocation60_spill] sm:$0xff]  ;;  %v7391_v49 = vpop.eup %7390 }
 0xa9d   : > { %v4481_v27 = vpop.xlane.xlu1 %4480  ;;  %6515 = vmatmul.mubr.msk.bf16.gmra.mrb[116].mxu0 %vm849_vm1, %v4582_v40  ;;  %v4586_v5 = vpack.c.bf16 %v4562_v47, %v4561_v25  ;;  %v10656_v18 = vpack.i.bf16 %v10654_v59, %v10655_v22  ;;  %v4563_v62 = vmul.f32 %v7391_v49, %v9756_v15 }
 0xa9e   : > { %6758 = vrot.lane.b32.xlu0 %v10653_v19, %s7473_s14  ;;  %v4585_v48 = vpack.c.bf16 %v4560_v34, %v4559_v43 }
 0xaa0   : > { %v4502_v3 = vpop.xlane.xlu0 %4501  ;;  %6524 = vmatprep.mubr.msk.bf16.mxu1 %vm849_vm1, %v4585_v48 }
 0xaa1   : > { %v4505_v51 = vpop.xlane.xlu1 %4504  ;;  %6525 = vmatmul.mubr.msk.bf16.gmra.mrb[116].mxu1 %vm849_vm1, %v4586_v5 }
 0xaa2   : > { %6768 = vrot.lane.b32.xlu0 %v10656_v18, %s7474_s15 }
 0xaa4   : > { %v4472_v42 = vpop.xlane.xlu0 %4471 }
 0xaa5   : > { %7392 = vrcp.f32 %v4472_v42  ;;  %v4842_v32 = vpop.permute.xlu1 %4841 }
 0xaa6   : > { %7394 = vrcp.f32 %v4502_v3  ;;  %v4856_v1 = vsel %vm1230_vm2, %v4842_v32, 0  ;;  %6627 = vmatprep.subr.msk.bf16.mxu1 %vm1230_vm2, %v4842_v32  ;;  %v10657_v3 = vld [vmem:[#allocation21_spill] sm:$0xff] }
 0xaa7   : > { %7396 = vrcp.f32 %v4493_v30  ;;  %6539 = vmatpush3.bf16.msra.mxu1 %v4856_v1  ;;  %v6909_v32 = vld [vmem:[%s10439_s3 + $0x18] sm:$0xff]  }
 0xaa8   : > { %7398 = vrcp.f32 %v4499_v13  ;;  %v4496_v8 = vpop.xlane.xlu0 %4495 }
 0xaa9   : > { %7400 = vrcp.f32 %v4496_v8 }
 0xaaa   : > { %7402 = vrcp.f32 %v4478_v12 }
 0xaab   : > { %7404 = vrcp.f32 %v9923_v60 }
 0xaac   : > { %v4511_v15 = vpop.xlane.xlu0 %4510  ;;  %7406 = vrcp.f32 %v4487_v29 }
 0xaad   : > { %7408 = vrcp.f32 %v4481_v27 }
 0xaaf   : > { %v7393_v33 = vpop.eup %7392 }
 0xab0   : > { %v7395_v37 = vpop.eup %7394  ;;  %v4564_v58 = vmul.f32 %v7393_v33, %v9798_v45 }
 0xab1   : > { %v7397_v26 = vpop.eup %7396  ;;  %v4574_v63 = vmul.f32 %v7395_v37, %v9788_v35 }
 0xab2   : > { %v7399_v20 = vpop.eup %7398  ;;  %v4587_v24 = vpack.c.bf16 %v4564_v58, %v4563_v62  ;;  %v4571_v14 = vmul.f32 %v7397_v26, %v9773_v52 }
 0xab3   : > { %v7401_v44 = vpop.eup %7400  ;;  %v4573_v56 = vmul.f32 %v7399_v20, %v9761_v17 }
 0xab4   : > { %6530 = vmatprep.mubr.msk.bf16.mxu0 %vm849_vm1, %v4587_v24  ;;  %v4572_v13 = vmul.f32 %v7401_v44, %v9802_v38  ;;  %v7403_v17 = vpop.eup %7402 }
 0xab5   : > { %v4592_v30 = vpack.c.bf16 %v4574_v63, %v4573_v56  ;;  %v7405_v53 = vpop.eup %7404  ;;  %v4566_v4 = vmul.f32 %v7403_v17, %v9782_v16  ;;  %v10659_v17 = vld [vmem:[#allocation49_spill] sm:$0xff] }
 0xab6   : > { %v4591_v7 = vpack.c.bf16 %v4572_v13, %v4571_v14  ;;  %v7407_v46 = vpop.eup %7406  ;;  %v4565_v60 = vmul.f32 %v7405_v53, %v9740_v28 }
 0xab7   : > { %v7409_v61 = vpop.eup %7408 }
 0xab8   : > { %6540 = vmatprep.mubr.msk.bf16.mxu1 %vm849_vm1, %v4591_v7  ;;  %v4588_v41 = vpack.c.bf16 %v4566_v4, %v4565_v60  ;;  %v4567_v40 = vmul.f32 %v7409_v61, %v9784_v21  ;;  %v10662_v4 = vld [vmem:[#allocation73_spill] sm:$0xff]  ;;  %v10665_v61 = vld [vmem:[#allocation72_spill] sm:$0xff]  ;;  %v10666_v60 = vld [vmem:[#allocation70_spill] sm:$0xff] }
 0xab9   : > { %6541 = vmatmul.mubr.msk.bf16.vlgmr.msra.gmra.mrb[120].mxu1 %vm849_vm1, %v4592_v30 }
 0xad1   : > { %v4490_v45 = vpop.xlane.xlu0 %4489 }
 0xad2   : > { %7410 = vrcp.f32 %v4490_v45 }
 0xad5   : > { %v4514_v35 = vpop.xlane.xlu0 %4513 }
 0xad9   : > { %v4484_v52 = vpop.xlane.xlu0 %4483 }
 0xada   : > { %7412 = vrcp.f32 %v4484_v52 }
 0xadb   : > { %7414 = vrcp.f32 %v4514_v35 }
 0xadc   : > { %7416 = vrcp.f32 %v4505_v51  ;;  %v7411_v10 = vpop.eup %7410 }
 0xadd   : > { %7418 = vrcp.f32 %v4511_v15  ;;  %v4508_v38 = vpop.xlane.xlu0 %4507  ;;  %v4570_v34 = vmul.f32 %v7411_v10, %v9844_v6  ;;  %v10658_v6 = vld [vmem:[#allocation19_spill] sm:$0xff] }
 0xade   : > { %7420 = vrcp.f32 %v4508_v38  ;;  %v10660_v38 = vld [vmem:[#allocation47_spill] sm:$0xff] }
 0xadf   : > { %v10661_v53 = vpack.i.bf16 %v10659_v17, %v10660_v38 }
 0xae1   : > { %v4760_v54 = vpop.permute.xlu0 %4759 }
 0xae2   : > { %v4774_v29 = vsel %vm1230_vm2, %v4760_v54, 0  ;;  %6626 = vmatprep.subr.msk.bf16.mxu0 %vm1230_vm2, %v4760_v54 }
 0xae3   : > { %6529 = vmatpush3.bf16.msra.mxu0 %v4774_v29  ;;  %v10667_v29 = vpack.i.bf16 %v10665_v61, %v10666_v60 }
 0xae4   : > { %v7413_v11 = vpop.eup %7412 }
 0xae5   : > { %v7415_v55 = vpop.eup %7414  ;;  %v9980_v23 = vpop.permute.xlu0 %6643  ;;  %v4568_v16 = vmul.f32 %v7413_v11, %v9860_v39  ;;  %v4569_v39 = vmul.f32 %v7407_v46, %v9769_v36  ;;  %v6906_v36 = vld [vmem:[%s10439_s3] sm:$0xff]   ;;  %v10663_v46 = vld [vmem:[#allocation71_spill] sm:$0xff] }
 0xae6   : > { %v7417_v47 = vpop.eup %7416  ;;  %6531 = vmatmul.mubr.msk.bf16.vlgmr.msra.gmra.mrb[120].mxu0 %vm849_vm1, %v4588_v41  ;;  %v4578_v27 = vmul.f32 %v7415_v55, %v9852_v50  ;;  %6548 = vmatprep.subr.bf16.mxu0 %v6906_v36  ;;  %v10664_v54 = vpack.i.bf16 %v10662_v4, %v10663_v46  ;;  %v6646_v46 = vunpack.i.h.bf16 %v9980_v23 }
 0xae7   : > { %v7419_v12 = vpop.eup %7418  ;;  %v4589_v28 = vpack.c.bf16 %v4568_v16, %v4567_v40  ;;  %v4575_v0 = vmul.f32 %v7417_v47, %v9792_v9  ;;  %v4590_v59 = vpack.c.bf16 %v4570_v34, %v4569_v39  ;;  %6588 = vmatprep.subr.bf16.mxu1 %v6906_v36  ;;  %6549 = vmatpush3.bf16.msra.mxu0 %v6906_v36  ;;  %v6907_v9 = vld [vmem:[%s10439_s3 + $0x8] sm:$0xff]   ;;  %v10035_v47 = vpop.permute.xlu1 %6663 }
 0xae8   : > { %v7421_v43 = vpop.eup %7420  ;;  %v4577_v48 = vmul.f32 %v7419_v12, %v9806_v57  ;;  %6592 = vmatpush3.bf16.msra.mxu1 %v6906_v36  ;;  %6550 = vmatprep.subr.bf16.mxu0 %v6907_v9  ;;  %v6908_v57 = vld [vmem:[%s10439_s3 + $0x10] sm:$0xff]  }
 0xae9   : > { %v6649_v25 = vpop.permute.xlu0 %6648  ;;  %6534 = vmatprep.mubr.msk.bf16.mxu0 %vm849_vm1, %v4589_v28  ;;  %v4576_v31 = vmul.f32 %v7421_v43, %v9868_v2  ;;  %6589 = vmatprep.subr.bf16.mxu1 %v6907_v9 }
 0xaea   : > { %v6651_v21 = vunpack.i.h.bf16 %v6649_v25  ;;  %v6650_v19 = vunpack.i.l.bf16 %v6649_v25  ;;  %v4594_v22 = vpack.c.bf16 %v4578_v27, %v4577_v48 }
 0xaeb   : > { %v4593_v5 = vpack.c.bf16 %v4576_v31, %v4575_v0  ;;  %6551 = vmatpush3.bf16.msra.mxu0 %v6907_v9  ;;  %v6674_v12 = vpop.permute.xlu1 %6673 }
 0xaec   : > { %v9994_v51 = vsel %vm404_vm0, %v10657_v3, %v6651_v21  ;;  %v9998_v50 = vsel %vm404_vm0, %v10658_v6, %v6650_v19  ;;  %6593 = vmatpush3.bf16.msra.mxu1 %v6907_v9  ;;  %6552 = vmatprep.subr.bf16.mxu0 %v6908_v57 }
 0xaed   : > { %6544 = vmatprep.mubr.msk.bf16.mxu1 %vm849_vm1, %v4593_v5  ;;  %6590 = vmatprep.subr.bf16.mxu1 %v6908_v57 }
 0xaee   : > { %6535 = vmatmul.mubr.msk.bf16.gmra.mrb[124].mxu0 %vm849_vm1, %v4590_v59  ;;  %6545 = vmatmul.mubr.msk.bf16.gmra.mrb[124].mxu1 %vm849_vm1, %v4594_v22 }
 0xaef   : > { %6553 = vmatpush3.bf16.msra.mxu0 %v6908_v57  ;;  %v10037_v28 = vpop.permute.xlu1 %6683 }
 0xaf0   : > { %6594 = vmatpush3.bf16.msra.mxu1 %v6908_v57  ;;  %6554 = vmatprep.subr.bf16.mxu0 %v6909_v32 }
 0xaf1   : > { %6591 = vmatprep.subr.bf16.mxu1 %v6909_v32 }
 0xaf3   : > { %6555 = vmatpush3.bf16.msra.mxu0 %v6909_v32  ;;  %v10039_v43 = vpop.permute.xlu1 %6693 }
 0xaf4   : > { %6595 = vmatpush3.bf16.msra.mxu1 %v6909_v32 }
 0xaf7   : > { %v10041_v34 = vpop.permute.xlu1 %6703 }
 0xafb   : > { %v10043_v27 = vpop.permute.xlu1 %6713 }
 0xaff   : > { %v10045_v0 = vpop.permute.xlu1 %6723 }
 0xb03   : > { %v6734_v5 = vpop.permute.xlu1 %6733 }
 0xb60   : > { %v6512_v2 = vpop.f32.mrb[112].mxu0 }
 0xb61   : > { %v4646_v18 = vpop.f32.mrb[113].mxu0 }
 0xb62   : > { %v6513_v42 = vpop.f32.mrb[114].mxu0 }
 0xb63   : > { %v6772_v1 = vpack.i.bf16 %v6513_v42, %v6512_v2  ;;  %v4649_v8 = vpop.f32.mrb[115].mxu0 }
 0xb64   : > { %v6782_v49 = vpack.i.bf16 %v4649_v8, %v4646_v18  ;;  %v6522_v33 = vpop.f32.mrb[112].mxu1  ;;  %v10059_v8 = vpop.permute.xlu1 %6743 }
 0xb65   : > { %6773 = vrot.lane.b32.xlu1 %v6772_v1, %s7475_s24  ;;  %v4728_v37 = vpop.f32.mrb[113].mxu1 }
 0xb66   : > { %v6523_v62 = vpop.f32.mrb[114].mxu1 }
 0xb67   : > { %v6777_v58 = vpack.i.bf16 %v6523_v62, %v6522_v33  ;;  %v4731_v26 = vpop.f32.mrb[115].mxu1  ;;  %v6654_v33 = vpop.permute.xlu0 %6653 }
 0xb68   : > { %v6787_v20 = vpack.i.bf16 %v4731_v26, %v4728_v37  ;;  %v6656_v37 = vunpack.i.h.bf16 %v6654_v33  ;;  %v6655_v62 = vunpack.i.l.bf16 %v6654_v33  ;;  %v10668_v26 = vld [vmem:[#allocation4_spill] sm:$0xff] }
 0xb69   : > { %6778 = vrot.lane.b32.xlu1 %v6777_v58, %s7475_s24 }
 0xb6d   : > { %6783 = vrot.lane.b32.xlu1 %v6782_v49, %s7475_s24  ;;  %v6754_v49 = vpop.permute.xlu1 %6753 }
 0xb6e   : > { %v6756_v17 = vunpack.i.h.bf16 %v6754_v49  ;;  %v6755_v38 = vunpack.i.l.bf16 %v6754_v49 }
 0xb70   : > { %v6516_v24 = vpop.f32.mrb[116].mxu0 }
 0xb71   : > { %6788 = vrot.lane.b32.xlu1 %v6787_v20, %s7475_s24  ;;  %v4662_v44 = vpop.f32.mrb[117].mxu0  ;;  %v10064_v58 = vpop.permute.xlu1 %6763  ;;  %v5310_v20 = vsel %vm404_vm0, %v10668_v26, %v6656_v37  ;;  %v6726_v37 = vunpack.i.h.bf16 %v10045_v0 }
 0xb72   : > { %v6517_v63 = vpop.f32.mrb[118].mxu0 }
 0xb73   : > { %v6792_v14 = vpack.i.bf16 %v6517_v63, %v6516_v24  ;;  %v4665_v13 = vpop.f32.mrb[119].mxu0  ;;  %v10669_v24 = vld [vmem:[#allocation2_spill] sm:$0xff]  ;;  %v10670_v63 = vld [vmem:[#allocation61_spill] sm:$0xff] }
 0xb74   : > { %v6797_v56 = vpack.i.bf16 %v4665_v13, %v4662_v44  ;;  %v6526_v7 = vpop.f32.mrb[116].mxu1  ;;  %v5309_v44 = vsel %vm404_vm0, %v10669_v24, %v6655_v62  ;;  %v6725_v62 = vunpack.i.l.bf16 %v10045_v0  ;;  %v6746_v24 = vunpack.i.h.bf16 %v10059_v8 }
 0xb75   : > { %6793 = vrot.lane.b32.xlu1 %v6792_v14, %s7475_s24  ;;  %v4744_v30 = vpop.f32.mrb[117].mxu1  ;;  %v10671_v14 = vld [vmem:[#allocation59_spill] sm:$0xff]  ;;  %v6695_v0 = vunpack.i.l.bf16 %v10039_v43 }
 0xb76   : > { %v6527_v15 = vpop.f32.mrb[118].mxu1  ;;  %v10672_v13 = vpack.i.bf16 %v10670_v63, %v10671_v14 }
 0xb77   : > { %v6872_v45 = vpack.i.bf16 %v6527_v15, %v6526_v7  ;;  %v4747_v35 = vpop.f32.mrb[119].mxu1  ;;  %v6675_v7 = vunpack.i.l.bf16 %v6674_v12  ;;  %v6736_v15 = vunpack.i.h.bf16 %v6734_v5 }
 0xb78   : > { %v6862_v52 = vpack.i.bf16 %v4747_v35, %v4744_v30 }
 0xb79   : > { %6798 = vrot.lane.b32.xlu1 %v6797_v56, %s7475_s24  ;;  %v6676_v56 = vunpack.i.h.bf16 %v6674_v12  ;;  %v10677_v12 = vld [vmem:[#allocation6_spill] sm:$0xff] }
 0xb7b   : > { %v5343_v4 = vsel %vm5339_vm3, %v5310_v20, %v6676_v56  ;;  %v6696_v56 = vunpack.i.h.bf16 %v10039_v43 }
 0xb7d   : > { %6803 = vrot.lane.b32.xlu1 %v10661_v53, %s7474_s15  ;;  %v5342_v53 = vsel %vm5339_vm3, %v5309_v44, %v6675_v7  ;;  %v6745_v44 = vunpack.i.l.bf16 %v10059_v8 }
 0xb81   : > { %6843 = vrot.lane.b32.xlu1 %v10664_v54, %s7473_s14  ;;  %v6645_v54 = vunpack.i.l.bf16 %v9980_v23 }
 0xb85   : > { %6853 = vrot.lane.b32.xlu1 %v10667_v29, %s7473_s14  ;;  %v10673_v29 = vld [vmem:[#allocation85_spill] sm:$0xff] }
 0xb89   : > { %6863 = vrot.lane.b32.xlu1 %v6862_v52, %s7475_s24 }
 0xb8c   : > { %v6542_v10 = vpop.f32.mrb[120].mxu1 }
 0xb8d   : > { %6873 = vrot.lane.b32.xlu1 %v6872_v45, %s7475_s24  ;;  %v4892_v11 = vpop.f32.mrb[121].mxu1  ;;  %v6735_v45 = vunpack.i.l.bf16 %v6734_v5  ;;  %v10679_v5 = vld [vmem:[#allocation3_spill] sm:$0xff] }
 0xb8e   : > { %v6543_v41 = vpop.f32.mrb[122].mxu1 }
 0xb8f   : > { %v6812_v55 = vpack.i.bf16 %v6543_v41, %v6542_v10  ;;  %v4895_v40 = vpop.f32.mrb[123].mxu1  ;;  %v10674_v10 = vld [vmem:[#allocation83_spill] sm:$0xff] }
 0xb90   : > { %v6822_v16 = vpack.i.bf16 %v4895_v40, %v4892_v11  ;;  %v10675_v11 = vpack.i.bf16 %v10673_v29, %v10674_v10  ;;  %v10676_v40 = vld [vmem:[#allocation8_spill] sm:$0xff] }
 0xb91   : > { %v10685_v29 = vld [vmem:[#allocation12_spill] sm:$0xff] }
 0xb92   : > { %v5314_v10 = vsel %vm404_vm0, %v10685_v29, %v6696_v56 }
 0xbb9   : > { %v6532_v25 = vpop.f32.mrb[120].mxu0 }
 0xbba   : > { %v4810_v31 = vpop.f32.mrb[121].mxu0 }
 0xbbb   : > { %v6533_v21 = vpop.f32.mrb[122].mxu0 }
 0xbbc   : > { %v6807_v19 = vpack.i.bf16 %v6533_v21, %v6532_v25  ;;  %v4813_v39 = vpop.f32.mrb[123].mxu0  ;;  %v5317_v25 = vsel %vm404_vm0, %v10677_v12, %v6735_v45  ;;  %v10684_v45 = vld [vmem:[#allocation7_spill] sm:$0xff]  ;;  %v6706_v12 = vunpack.i.h.bf16 %v10041_v34 }
 0xbbd   : > { %v6817_v48 = vpack.i.bf16 %v4813_v39, %v4810_v31  ;;  %v5350_v23 = vsel %vm5339_vm3, %v5317_v25, %v6755_v38  ;;  %v10678_v39 = vld [vmem:[#allocation5_spill] sm:$0xff]  ;;  %v6716_v38 = vunpack.i.h.bf16 %v10043_v27 }
 0xbbe   : > { %6808 = vrot.lane.b32.xlu0 %v6807_v19, %s7475_s24 }
 0xbc1   : > { %v6536_v3 = vpop.f32.mrb[124].mxu0  ;;  %v10048_v6 = vpop.f32.mrb[124].mxu1 }
 0xbc2   : > { %v4826_v59 = vpop.f32.mrb[125].mxu0  ;;  %6813 = vrot.lane.b32.xlu0 %v6812_v55, %s7475_s24  ;;  %v10051_v22 = vpop.f32.mrb[125].mxu1 }
 0xbc3   : > { %v6537_v36 = vpop.f32.mrb[126].mxu0  ;;  %v10053_v9 = vpop.f32.mrb[126].mxu1 }
 0xbc4   : > { %v6827_v57 = vpack.i.bf16 %v6537_v36, %v6536_v3  ;;  %v6877_v2 = vpack.i.bf16 %v10053_v9, %v10048_v6  ;;  %v4829_v18 = vpop.f32.mrb[127].mxu0  ;;  %v4911_v42 = vpop.f32.mrb[127].mxu1  ;;  %v5307_v3 = vsel %vm404_vm0, %v10679_v5, %v6645_v54  ;;  %v10680_v36 = vld [vmem:[#allocation84_spill] sm:$0xff]  ;;  %v6686_v54 = vunpack.i.h.bf16 %v10037_v28 }
 0xbc5   : > { %v6832_v32 = vpack.i.bf16 %v4829_v18, %v4826_v59  ;;  %v6867_v1 = vpack.i.bf16 %v4911_v42, %v10051_v22  ;;  %v6666_v42 = vunpack.i.h.bf16 %v10035_v47  ;;  %v6705_v6 = vunpack.i.l.bf16 %v10041_v34 }
 0xbc6   : > { %6818 = vrot.lane.b32.xlu0 %v6817_v48, %s7475_s24  ;;  %v5308_v48 = vsel %vm404_vm0, %v10678_v39, %v6646_v46  ;;  %v10688_v39 = vld [vmem:[#allocation11_spill] sm:$0xff] }
 0xbc7   : > { %v5341_v14 = vsel %vm5339_vm3, %v5308_v48, %v6666_v42 }
 0xbca   : > { %6823 = vrot.lane.b32.xlu0 %v6822_v16, %s7475_s24  ;;  %v5318_v16 = vsel %vm404_vm0, %v10676_v40, %v6736_v15  ;;  %v10683_v15 = vld [vmem:[#allocation9_spill] sm:$0xff] }
 0xbcb   : > { %v5351_v19 = vsel %vm5339_vm3, %v5318_v16, %v6756_v17  ;;  %v5316_v8 = vsel %vm404_vm0, %v10683_v15, %v6726_v37 }
 0xbce   : > { %6828 = vrot.lane.b32.xlu0 %v6827_v57, %s7475_s24  ;;  %v10681_v57 = vld [vmem:[#allocation82_spill] sm:$0xff] }
 0xbcf   : > { %v10682_v18 = vpack.i.bf16 %v10680_v36, %v10681_v57 }
 0xbd2   : > { %6833 = vrot.lane.b32.xlu0 %v6832_v32, %s7475_s24  ;;  %v6665_v32 = vunpack.i.l.bf16 %v10035_v47 }
 0xbd4   : > { %v5340_v63 = vsel %vm5339_vm3, %v5307_v3, %v6665_v32 }
 0xbd6   : > { %6838 = vrot.lane.b32.xlu0 %v10672_v13, %s7474_s15 }
 0xbd7   : > { %v6774_v30 = vpop.permute.xlu1 %6773 }
 0xbd8   : > { %v6776_v35 = vunpack.i.h.bf16 %v6774_v30  ;;  %v6775_v52 = vunpack.i.l.bf16 %v6774_v30 }
 0xbda   : > { %v5375_v61 = vsel %vm5372_vm4, %v5342_v53, %v6775_v52  ;;  %v5376_v60 = vsel %vm5372_vm4, %v5343_v4, %v6776_v35  ;;  %6848 = vrot.lane.b32.xlu0 %v10675_v11, %s7473_s14  ;;  %v5315_v35 = vsel %vm404_vm0, %v10684_v45, %v6725_v62  ;;  %v6715_v53 = vunpack.i.l.bf16 %v10043_v27  ;;  %v10686_v11 = vld [vmem:[#allocation10_spill] sm:$0xff] }
 0xbdb   : > { %v5406_v41 = vpack.c.bf16 %v5376_v60, %v5375_v61  ;;  %v6779_v55 = vpop.permute.xlu1 %6778  ;;  %v5349_v4 = vsel %vm5339_vm3, %v5316_v8, %v6746_v24  ;;  %v6685_v27 = vunpack.i.l.bf16 %v10037_v28 }
 0xbdc   : > { %v6781_v31 = vunpack.i.h.bf16 %v6779_v55  ;;  %v6780_v21 = vunpack.i.l.bf16 %v6779_v55  ;;  %v5313_v55 = vsel %vm404_vm0, %v10686_v11, %v6695_v0 }
 0xbdd   : > { %v5346_v9 = vsel %vm5339_vm3, %v5313_v55, %v6715_v53  ;;  %v5311_v48 = vsel %vm404_vm0, %v10688_v39, %v6685_v27  ;;  %v10691_v53 = vld [vmem:[#allocation16_spill] sm:$0xff]  ;;  %v10694_v39 = vld [vmem:[#allocation18_spill] sm:$0xff] }
 0xbde   : > { %v10095_v59 = vsel %vm5372_vm4, %v5350_v23, %v6780_v21  ;;  %v10098_v22 = vsel %vm5372_vm4, %v5351_v19, %v6781_v31  ;;  %6858 = vrot.lane.b32.xlu0 %v10682_v18, %s7473_s14  ;;  %v10687_v23 = vld [vmem:[#allocation13_spill] sm:$0xff]  ;;  %v5344_v3 = vsel %vm5339_vm3, %v5311_v48, %v6705_v6 }
 0xbdf   : > { %v5410_v49 = vpack.c.bf16 %v10098_v22, %v10095_v59  ;;  %v6784_v33 = vpop.permute.xlu1 %6783  ;;  %v5312_v19 = vsel %vm404_vm0, %v10687_v23, %v6686_v54  ;;  %v10693_v23 = vld [vmem:[#allocation20_spill] sm:$0xff] }
 0xbe0   : > { %v6786_v26 = vunpack.i.h.bf16 %v6784_v33  ;;  %v6785_v20 = vunpack.i.l.bf16 %v6784_v33  ;;  %v5345_v36 = vsel %vm5339_vm3, %v5312_v19, %v6706_v12 }
 0xbe2   : > { %v5373_v47 = vsel %vm5372_vm4, %v5340_v63, %v6785_v20  ;;  %v5374_v13 = vsel %vm5372_vm4, %v5341_v14, %v6786_v26  ;;  %6868 = vrot.lane.b32.xlu0 %v6867_v1, %s7475_s24  ;;  %v5348_v1 = vsel %vm5339_vm3, %v5315_v35, %v6745_v44  ;;  %v6766_v26 = vunpack.i.h.bf16 %v10064_v58  ;;  %v10689_v14 = vld [vmem:[#allocation17_spill] sm:$0xff] }
 0xbe3   : > { %v5405_v7 = vpack.c.bf16 %v5374_v13, %v5373_v47  ;;  %v6789_v30 = vpop.permute.xlu1 %6788  ;;  %v6765_v20 = vunpack.i.l.bf16 %v10064_v58  ;;  %v10690_v13 = vld [vmem:[#allocation15_spill] sm:$0xff] }
 0xbe4   : > { %v6791_v52 = vunpack.i.h.bf16 %v6789_v30  ;;  %v6790_v17 = vunpack.i.l.bf16 %v6789_v30  ;;  %v5320_v47 = vsel %vm404_vm0, %v10689_v14, %v6766_v26 }
 0xbe5   : > { %6556 = vmatprep.mubr.msk.bf16.mxu0 %vm5460_vm5, %v5405_v7  ;;  %v5319_v56 = vsel %vm404_vm0, %v10690_v13, %v6765_v20 }
 0xbe6   : > { %v5381_v43 = vsel %vm5372_vm4, %v5348_v1, %v6790_v17  ;;  %v5382_v46 = vsel %vm5372_vm4, %v5349_v4, %v6791_v52  ;;  %6878 = vrot.lane.b32.xlu0 %v6877_v2, %s7475_s24  ;;  %6557 = vmatmul.mubr.msk.bf16.vlgmr.msra.gmra.mrb[128].mxu0 %vm5460_vm5, %v5406_v41  ;;  %v5347_v2 = vsel %vm5339_vm3, %v5314_v10, %v6716_v38  ;;  %v10145_v41 = vpop.permute.xlu0 %6658  ;;  %v10692_v4 = vld [vmem:[#allocation14_spill] sm:$0xff] }
 0xbe7   : > { %v5409_v61 = vpack.c.bf16 %v5382_v46, %v5381_v43  ;;  %v6794_v60 = vpop.permute.xlu1 %6793 }
 0xbe8   : > { %v6796_v40 = vunpack.i.h.bf16 %v6794_v60  ;;  %v6795_v16 = vunpack.i.l.bf16 %v6794_v60 }
 0xbea   : > { %v5379_v28 = vsel %vm5372_vm4, %v5346_v9, %v6795_v16  ;;  %v5380_v25 = vsel %vm5372_vm4, %v5347_v2, %v6796_v40  ;;  %v10157_v33 = vpop.permute.xlu0 %6668  ;;  %v6661_v2 = vunpack.i.h.bf16 %v10145_v41 }
 0xbeb   : > { %v5408_v31 = vpack.c.bf16 %v5380_v25, %v5379_v28  ;;  %v6799_v21 = vpop.permute.xlu1 %6798  ;;  %v6660_v28 = vunpack.i.l.bf16 %v10145_v41 }
 0xbec   : > { %v6801_v5 = vunpack.i.h.bf16 %v6799_v21  ;;  %v6800_v34 = vunpack.i.l.bf16 %v6799_v21  ;;  %v5326_v19 = vsel %vm404_vm0, %v10693_v23, %v6661_v2 }
 0xbed   : > { %v5325_v48 = vsel %vm404_vm0, %v10694_v39, %v6660_v28  ;;  %v10700_v39 = vld [vmem:[#allocation26_spill] sm:$0xff] }
 0xbee   : > { %v5377_v57 = vsel %vm5372_vm4, %v5344_v3, %v6800_v34  ;;  %v5378_v18 = vsel %vm5372_vm4, %v5345_v36, %v6801_v5  ;;  %v6679_v62 = vpop.permute.xlu0 %6678 }
 0xbef   : > { %v5407_v42 = vpack.c.bf16 %v5378_v18, %v5377_v57  ;;  %v6804_v32 = vpop.permute.xlu1 %6803  ;;  %v6680_v21 = vunpack.i.l.bf16 %v6679_v62 }
 0xbf0   : > { %v6806_v30 = vunpack.i.h.bf16 %v6804_v32  ;;  %v6805_v15 = vunpack.i.l.bf16 %v6804_v32 }
 0xbf1   : > { %6560 = vmatprep.mubr.msk.bf16.mxu0 %vm5460_vm5, %v5407_v42  ;;  %v5358_v18 = vsel %vm5339_vm3, %v5325_v48, %v6680_v21 }
 0xbf2   : > { %6561 = vmatmul.mubr.msk.bf16.gmra.mrb[132].mxu0 %vm5460_vm5, %v5408_v31  ;;  %v10172_v7 = vpop.permute.xlu0 %6688  ;;  %v5322_v1 = vsel %vm404_vm0, %v10691_v53, %v6806_v30  ;;  %v5321_v43 = vsel %vm404_vm0, %v10692_v4, %v6805_v15  ;;  %v6681_v31 = vunpack.i.h.bf16 %v6679_v62 }
 0xbf3   : > { %v6844_v37 = vpop.permute.xlu1 %6843  ;;  %6564 = vmatprep.mubr.msk.bf16.mxu0 %vm5460_vm5, %v5409_v61  ;;  %v6691_v28 = vunpack.i.h.bf16 %v10172_v7 }
 0xbf4   : > { %v6846_v44 = vunpack.i.h.bf16 %v6844_v37  ;;  %v6845_v63 = vunpack.i.l.bf16 %v6844_v37  ;;  %v5359_v42 = vsel %vm5339_vm3, %v5326_v19, %v6681_v31  ;;  %v6690_v31 = vunpack.i.l.bf16 %v10172_v7  ;;  %v10699_v19 = vld [vmem:[#allocation28_spill] sm:$0xff] }
 0xbf6   : > { %v5352_v45 = vsel %vm5339_vm3, %v5319_v56, %v6845_v63  ;;  %v5353_v35 = vsel %vm5339_vm3, %v5320_v47, %v6846_v44  ;;  %v10185_v60 = vpop.permute.xlu0 %6698  ;;  %v10696_v63 = vld [vmem:[#allocation22_spill] sm:$0xff]  ;;  %v6671_v56 = vunpack.i.h.bf16 %v10157_v33 }
 0xbf7   : > { %v6854_v24 = vpop.permute.xlu1 %6853 }
 0xbf8   : > { %v6856_v59 = vunpack.i.h.bf16 %v6854_v24  ;;  %v6855_v22 = vunpack.i.l.bf16 %v6854_v24  ;;  %v10695_v24 = vld [vmem:[#allocation24_spill] sm:$0xff] }
 0xbfa   : > { %6565 = vmatmul.mubr.msk.bf16.gmra.mrb[136].mxu0 %vm5460_vm5, %v5410_v49  ;;  %v5354_v27 = vsel %vm5339_vm3, %v5321_v43, %v6855_v22  ;;  %v5355_v61 = vsel %vm5339_vm3, %v5322_v1, %v6856_v59  ;;  %v10190_v55 = vpop.permute.xlu0 %6708  ;;  %v6701_v43 = vunpack.i.h.bf16 %v10185_v60 }
 0xbfb   : > { %v6864_v0 = vpop.permute.xlu1 %6863 }
 0xbfc   : > { %v6866_v58 = vunpack.i.h.bf16 %v6864_v0  ;;  %v6865_v8 = vunpack.i.l.bf16 %v6864_v0  ;;  %v6670_v0 = vunpack.i.l.bf16 %v10157_v33 }
 0xbfe   : > { %v5385_v49 = vsel %vm5372_vm4, %v5352_v45, %v6865_v8  ;;  %v5386_v52 = vsel %vm5372_vm4, %v5353_v35, %v6866_v58  ;;  %v10192_v40 = vpop.permute.xlu0 %6718  ;;  %v5356_v33 = vsel %vm5339_vm3, %v9998_v50, %v6670_v0 }
 0xbff   : > { %v5411_v17 = vpack.c.bf16 %v5386_v52, %v5385_v49  ;;  %v6874_v38 = vpop.permute.xlu1 %6873 }
 0xc00   : > { %v6876_v46 = vunpack.i.h.bf16 %v6874_v38  ;;  %v6875_v54 = vunpack.i.l.bf16 %v6874_v38 }
 0xc01   : > { %6568 = vmatprep.mubr.msk.bf16.mxu0 %vm5460_vm5, %v5411_v17  ;;  %v5357_v17 = vsel %vm5339_vm3, %v9994_v51, %v6671_v56 }
 0xc02   : > { %v5387_v29 = vsel %vm5372_vm4, %v5354_v27, %v6875_v54  ;;  %v5388_v10 = vsel %vm5372_vm4, %v5355_v61, %v6876_v46  ;;  %v6729_v16 = vpop.permute.xlu0 %6728  ;;  %v6700_v46 = vunpack.i.l.bf16 %v10185_v60  ;;  %v10697_v61 = vld [vmem:[#allocation25_spill] sm:$0xff] }
 0xc03   : > { %v5412_v11 = vpack.c.bf16 %v5388_v10, %v5387_v29  ;;  %v6731_v59 = vunpack.i.h.bf16 %v6729_v16  ;;  %v6730_v22 = vunpack.i.l.bf16 %v6729_v16  ;;  %v10698_v10 = vld [vmem:[#allocation23_spill] sm:$0xff]  ;;  %v6721_v16 = vunpack.i.h.bf16 %v10192_v40 }
 0xc04   : > { %v5329_v48 = vsel %vm404_vm0, %v10700_v39, %v6700_v46 }
 0xc05   : > { %6569 = vmatmul.mubr.msk.bf16.gmra.mrb[140].mxu0 %vm5460_vm5, %v5412_v11  ;;  %v5332_v29 = vsel %vm404_vm0, %v10697_v61, %v6731_v59  ;;  %v5331_v50 = vsel %vm404_vm0, %v10698_v10, %v6730_v22 }
 0xc06   : > { %v6739_v12 = vpop.permute.xlu0 %6738 }
 0xc07   : > { %v6741_v34 = vunpack.i.h.bf16 %v6739_v12  ;;  %v6740_v3 = vunpack.i.l.bf16 %v6739_v12  ;;  %v6720_v12 = vunpack.i.l.bf16 %v10192_v40  ;;  %v5330_v40 = vsel %vm404_vm0, %v10699_v19, %v6701_v43 }
 0xc09   : > { %v5334_v44 = vsel %vm404_vm0, %v10695_v24, %v6741_v34  ;;  %v5333_v14 = vsel %vm404_vm0, %v10696_v63, %v6740_v3  ;;  %v6711_v3 = vunpack.i.h.bf16 %v10190_v55 }
 0xc0a   : > { %v6749_v6 = vpop.permute.xlu0 %6748 }
 0xc0b   : > { %v6751_v38 = vunpack.i.h.bf16 %v6749_v6  ;;  %v6750_v53 = vunpack.i.l.bf16 %v6749_v6 }
 0xc0d   : > { %v5364_v6 = vsel %vm5339_vm3, %v5331_v50, %v6750_v53  ;;  %v10706_v50 = vld [vmem:[#allocation30_spill] sm:$0xff] }
 0xc0e   : > { %v6759_v9 = vpop.permute.xlu0 %6758 }
 0xc0f   : > { %v6761_v41 = vunpack.i.h.bf16 %v6759_v9  ;;  %v6760_v32 = vunpack.i.l.bf16 %v6759_v9  ;;  %v5365_v9 = vsel %vm5339_vm3, %v5332_v29, %v6751_v38  ;;  %v10705_v29 = vld [vmem:[#allocation32_spill] sm:$0xff] }
 0xc11   : > { %v5366_v30 = vsel %vm5339_vm3, %v5333_v14, %v6760_v32  ;;  %v5367_v15 = vsel %vm5339_vm3, %v5334_v44, %v6761_v41 }
 0xc12   : > { %v10196_v25 = vpop.permute.xlu0 %6768 }
 0xc30   : > { %v6809_v5 = vpop.permute.xlu0 %6808 }
 0xc31   : > { %v6811_v36 = vunpack.i.h.bf16 %v6809_v5  ;;  %v6810_v57 = vunpack.i.l.bf16 %v6809_v5 }
 0xc33   : > { %v5392_v37 = vsel %vm5372_vm4, %v5359_v42, %v6811_v36  ;;  %v5391_v62 = vsel %vm5372_vm4, %v5358_v18, %v6810_v57  ;;  %v6710_v36 = vunpack.i.l.bf16 %v10190_v55  ;;  %v5362_v57 = vsel %vm5339_vm3, %v5329_v48, %v6720_v12 }
 0xc34   : > { %v5414_v26 = vpack.c.bf16 %v5392_v37, %v5391_v62  ;;  %v6814_v20 = vpop.permute.xlu0 %6813  ;;  %v5363_v18 = vsel %vm5339_vm3, %v5330_v40, %v6721_v16  ;;  %v10701_v37 = vld [vmem:[#allocation29_spill] sm:$0xff]  ;;  %v5670_v40 = vld [vmem:[%s10293_s27] sm:$0xff] }
 0xc35   : > { %v6816_v47 = vunpack.i.h.bf16 %v6814_v20  ;;  %v6815_v13 = vunpack.i.l.bf16 %v6814_v20  ;;  %v5328_v62 = vsel %vm404_vm0, %v10701_v37, %v6691_v28  ;;  %v10298_v28 = vld [vmem:[%s10440_s4] ss:$0 sm:$0xff]  ;;  %v5676_v37 = vld [vmem:[%s10293_s27 + $0x30] sm:$0xff] }
 0xc36   : > { %v5361_v63 = vsel %vm5339_vm3, %v5328_v62, %v6711_v3 }
 0xc37   : > { %v10215_v58 = vsel %vm5372_vm4, %v5367_v15, %v6816_v47  ;;  %v10218_v8 = vsel %vm5372_vm4, %v5366_v30, %v6815_v13  ;;  %v6771_v30 = vunpack.i.h.bf16 %v10196_v25  ;;  %v6770_v15 = vunpack.i.l.bf16 %v10196_v25 }
 0xc38   : > { %v5418_v45 = vpack.c.bf16 %v10215_v58, %v10218_v8  ;;  %v6819_v35 = vpop.permute.xlu0 %6818 }
 0xc39   : > { %v6821_v49 = vunpack.i.h.bf16 %v6819_v35  ;;  %v6820_v52 = vunpack.i.l.bf16 %v6819_v35 }
 0xc3b   : > { %v5390_v1 = vsel %vm5372_vm4, %v5357_v17, %v6821_v49  ;;  %v5389_v4 = vsel %vm5372_vm4, %v5356_v33, %v6820_v52  ;;  %v10703_v49 = vld [vmem:[#allocation33_spill] sm:$0xff]  ;;  %v10704_v33 = vld [vmem:[#allocation31_spill] sm:$0xff] }
 0xc3c   : > { %v5413_v54 = vpack.c.bf16 %v5390_v1, %v5389_v4  ;;  %v6824_v27 = vpop.permute.xlu0 %6823  ;;  %v5336_v52 = vsel %vm404_vm0, %v10703_v49, %v6771_v30  ;;  %v5335_v17 = vsel %vm404_vm0, %v10704_v33, %v6770_v15 }
 0xc3d   : > { %v6826_v11 = vunpack.i.h.bf16 %v6824_v27  ;;  %v6825_v51 = vunpack.i.l.bf16 %v6824_v27 }
 0xc3e   : > { %6572 = vmatprep.mubr.msk.bf16.mxu1 %vm5460_vm5, %v5413_v54 }
 0xc3f   : > { %v5398_v60 = vsel %vm5372_vm4, %v5365_v9, %v6826_v11  ;;  %v5397_v2 = vsel %vm5372_vm4, %v5364_v6, %v6825_v51  ;;  %6573 = vmatmul.mubr.msk.bf16.vlgmr.msra.gmra.mrb[128].mxu1 %vm5460_vm5, %v5414_v26  ;;  %v10702_v26 = vld [vmem:[#allocation27_spill] sm:$0xff] }
 0xc40   : > { %v5417_v21 = vpack.c.bf16 %v5398_v60, %v5397_v2  ;;  %v6829_v23 = vpop.permute.xlu0 %6828  ;;  %v5327_v20 = vsel %vm404_vm0, %v10702_v26, %v6690_v31 }
 0xc41   : > { %v6831_v5 = vunpack.i.h.bf16 %v6829_v23  ;;  %v6830_v34 = vunpack.i.l.bf16 %v6829_v23  ;;  %v5360_v55 = vsel %vm5339_vm3, %v5327_v20, %v6710_v36  ;;  %v5674_v20 = vld [vmem:[%s10293_s27 + $0x20] sm:$0xff] }
 0xc43   : > { %v5396_v7 = vsel %vm5372_vm4, %v5363_v18, %v6831_v5  ;;  %v5395_v42 = vsel %vm5372_vm4, %v5362_v57, %v6830_v34  ;;  %v5673_v5 = vld [vmem:[%s10293_s27 + $0x18] sm:$0xff]  ;;  %v5671_v57 = vld [vmem:[%s10293_s27 + $0x8] sm:$0xff] }
 0xc44   : > { %v5416_v41 = vpack.c.bf16 %v5396_v7, %v5395_v42  ;;  %v6834_v32 = vpop.permute.xlu0 %6833 }
 0xc45   : > { %v6836_v24 = vunpack.i.h.bf16 %v6834_v32  ;;  %v6835_v44 = vunpack.i.l.bf16 %v6834_v32 }
 0xc47   : > { %v5394_v14 = vsel %vm5372_vm4, %v5361_v63, %v6836_v24  ;;  %v5393_v47 = vsel %vm5372_vm4, %v5360_v55, %v6835_v44  ;;  %v5677_v55 = vld [vmem:[%s10293_s27 + $0x38] sm:$0xff] }
 0xc48   : > { %v5415_v13 = vpack.c.bf16 %v5394_v14, %v5393_v47  ;;  %v6839_v56 = vpop.permute.xlu0 %6838 }
 0xc49   : > { %v6841_v53 = vunpack.i.h.bf16 %v6839_v56  ;;  %v6840_v1 = vunpack.i.l.bf16 %v6839_v56 }
 0xc4a   : > { %6576 = vmatprep.mubr.msk.bf16.mxu1 %vm5460_vm5, %v5415_v13  ;;  %v5675_v13 = vld [vmem:[%s10293_s27 + $0x28] sm:$0xff] }
 0xc4b   : > { %6577 = vmatmul.mubr.msk.bf16.gmra.mrb[132].mxu1 %vm5460_vm5, %v5416_v41  ;;  %v5338_v10 = vsel %vm404_vm0, %v10705_v29, %v6841_v53  ;;  %v5337_v11 = vsel %vm404_vm0, %v10706_v50, %v6840_v1  ;;  %v5682_v29 = vld [vmem:[%s10293_s27 + $0x60] sm:$0xff] }
 0xc4c   : > { %v6849_v0 = vpop.permute.xlu0 %6848  ;;  %6580 = vmatprep.mubr.msk.bf16.mxu1 %vm5460_vm5, %v5417_v21  ;;  %v5672_v21 = vld [vmem:[%s10293_s27 + $0x10] sm:$0xff] }
 0xc4d   : > { %v6851_v59 = vunpack.i.h.bf16 %v6849_v0  ;;  %v6850_v22 = vunpack.i.l.bf16 %v6849_v0 }
 0xc4f   : > { %v5369_v25 = vsel %vm5339_vm3, %v5336_v52, %v6851_v59  ;;  %v5368_v46 = vsel %vm5339_vm3, %v5335_v17, %v6850_v22  ;;  %v5680_v59 = vld [vmem:[%s10293_s27 + $0x50] sm:$0xff]  ;;  %v5678_v52 = vld [vmem:[%s10293_s27 + $0x40] sm:$0xff] }
 0xc50   : > { %v6859_v35 = vpop.permute.xlu0 %6858 }
 0xc51   : > { %v6861_v54 = vunpack.i.h.bf16 %v6859_v35  ;;  %v6860_v27 = vunpack.i.l.bf16 %v6859_v35 }
 0xc53   : > { %6581 = vmatmul.mubr.msk.bf16.gmra.mrb[136].mxu1 %vm5460_vm5, %v5418_v45  ;;  %v5370_v12 = vsel %vm5339_vm3, %v5337_v11, %v6860_v27  ;;  %v5371_v6 = vsel %vm5339_vm3, %v5338_v10, %v6861_v54  ;;  %v5685_v11 = vld [vmem:[%s10293_s27 + $0x78] sm:$0xff] }
 0xc54   : > { %v6869_v38 = vpop.permute.xlu0 %6868 }
 0xc55   : > { %v6871_v4 = vunpack.i.h.bf16 %v6869_v38  ;;  %v6870_v43 = vunpack.i.l.bf16 %v6869_v38  ;;  %v5681_v38 = vld [vmem:[%s10293_s27 + $0x58] sm:$0xff] }
 0xc57   : > { %v5402_v58 = vsel %vm5372_vm4, %v5369_v25, %v6871_v4  ;;  %v5401_v8 = vsel %vm5372_vm4, %v5368_v46, %v6870_v43  ;;  %v5679_v43 = vld [vmem:[%s10293_s27 + $0x48] sm:$0xff] }
 0xc58   : > { %v5419_v45 = vpack.c.bf16 %v5402_v58, %v5401_v8  ;;  %v6879_v61 = vpop.permute.xlu0 %6878  ;;  %v5684_v8 = vld [vmem:[%s10293_s27 + $0x70] sm:$0xff] }
 0xc59   : > { %v6881_v51 = vunpack.i.h.bf16 %v6879_v61  ;;  %v6880_v16 = vunpack.i.l.bf16 %v6879_v61 }
 0xc5a   : > { %6584 = vmatprep.mubr.msk.bf16.mxu1 %vm5460_vm5, %v5419_v45 }
 0xc5b   : > { %v5404_v9 = vsel %vm5372_vm4, %v5371_v6, %v6881_v51  ;;  %v5403_v60 = vsel %vm5372_vm4, %v5370_v12, %v6880_v16  ;;  %v5683_v6 = vld [vmem:[%s10293_s27 + $0x68] sm:$0xff] }
 0xc5c   : > { %v5420_v2 = vpack.c.bf16 %v5404_v9, %v5403_v60 }
 0xc5e   : > { %6585 = vmatmul.mubr.msk.bf16.gmra.mrb[140].mxu1 %vm5460_vm5, %v5420_v2 }
 0xcb9   : > { %v6558_v31 = vpop.f32.mrb[128].mxu0 }
 0xcba   : > { %v5552_v23 = vadd.f32 %v6558_v31, %v10298_v28  ;;  %v5543_v19 = vpop.f32.mrb[129].mxu0 }
 0xcbb   : > { %v5544_v39 = vadd.f32 %v10298_v28, %v5543_v19  ;;  %v6559_v48 = vpop.f32.mrb[130].mxu0 }
 0xcbc   : > { %v5704_v34 = vadd.f32 %v5672_v21, %v5552_v23  ;;  %v5555_v3 = vadd.f32 %v6559_v48, %v10298_v28  ;;  %v5546_v36 = vpop.f32.mrb[131].mxu0  ;;  %v5688_v23 = vld [vmem:[%s10293_s27 + $0x90] sm:$0xff] }
 0xcbd   : > { %v5702_v18 = vadd.f32 %v5670_v40, %v5544_v39  ;;  %v5547_v7 = vadd.f32 %v10298_v28, %v5546_v36  ;;  %v5686_v39 = vld [vmem:[%s10293_s27 + $0x80] sm:$0xff] }
 0xcbe   : > { %5736 = vst.msk [vmem:[%s10306_s10 + $0x10] sm:$0xff] %vm5460_vm5, %v5704_v34  ;;  %v5705_v42 = vadd.f32 %v5673_v5, %v5555_v3  ;;  %v5689_v34 = vld [vmem:[%s10293_s27 + $0x98] sm:$0xff] }
 0xcbf   : > { %5734 = vst.msk [vmem:[%s10306_s10] sm:$0xff] %vm5460_vm5, %v5702_v18  ;;  %v5703_v41 = vadd.f32 %v5671_v57, %v5547_v7  ;;  %v5687_v18 = vld [vmem:[%s10293_s27 + $0x88] sm:$0xff] }
 0xcc0   : > { %5737 = vst.msk [vmem:[%s10306_s10 + $0x18] sm:$0xff] %vm5460_vm5, %v5705_v42 }
 0xcc1   : > { %5735 = vst.msk [vmem:[%s10306_s10 + $0x8] sm:$0xff] %vm5460_vm5, %v5703_v41 }
 0xcc5   : > { %v6562_v32 = vpop.f32.mrb[132].mxu0 }
 0xcc6   : > { %v5568_v62 = vadd.f32 %v6562_v32, %v10298_v28  ;;  %v5559_v26 = vpop.f32.mrb[133].mxu0 }
 0xcc7   : > { %v5560_v24 = vadd.f32 %v10298_v28, %v5559_v26  ;;  %v6563_v44 = vpop.f32.mrb[134].mxu0 }
 0xcc8   : > { %v5708_v63 = vadd.f32 %v5676_v37, %v5568_v62  ;;  %v5571_v14 = vadd.f32 %v6563_v44, %v10298_v28  ;;  %v5562_v47 = vpop.f32.mrb[135].mxu0  ;;  %v5692_v62 = vld [vmem:[%s10293_s27 + $0xb0] sm:$0xff] }
 0xcc9   : > { %v5706_v56 = vadd.f32 %v5674_v20, %v5560_v24  ;;  %v5563_v0 = vadd.f32 %v10298_v28, %v5562_v47  ;;  %v5690_v24 = vld [vmem:[%s10293_s27 + $0xa0] sm:$0xff] }
 0xcca   : > { %5740 = vst.msk [vmem:[%s10306_s10 + $0x30] sm:$0xff] %vm5460_vm5, %v5708_v63  ;;  %v5709_v30 = vadd.f32 %v5677_v55, %v5571_v14  ;;  %v5693_v63 = vld [vmem:[%s10293_s27 + $0xb8] sm:$0xff] }
 0xccb   : > { %5738 = vst.msk [vmem:[%s10306_s10 + $0x20] sm:$0xff] %vm5460_vm5, %v5706_v56  ;;  %v5707_v15 = vadd.f32 %v5675_v13, %v5563_v0  ;;  %v5691_v56 = vld [vmem:[%s10293_s27 + $0xa8] sm:$0xff] }
 0xccc   : > { %5741 = vst.msk [vmem:[%s10306_s10 + $0x38] sm:$0xff] %vm5460_vm5, %v5709_v30 }
 0xccd   : > { %5739 = vst.msk [vmem:[%s10306_s10 + $0x28] sm:$0xff] %vm5460_vm5, %v5707_v15  ;;  %v6566_v35 = vpop.f32.mrb[136].mxu0 }
 0xcce   : > { %v5584_v22 = vadd.f32 %v6566_v35, %v10298_v28  ;;  %v5575_v49 = vpop.f32.mrb[137].mxu0 }
 0xccf   : > { %v5576_v33 = vadd.f32 %v10298_v28, %v5575_v49  ;;  %v6567_v17 = vpop.f32.mrb[138].mxu0 }
 0xcd0   : > { %v5712_v53 = vadd.f32 %v5680_v59, %v5584_v22  ;;  %v5587_v1 = vadd.f32 %v6567_v17, %v10298_v28  ;;  %v5578_v4 = vpop.f32.mrb[139].mxu0  ;;  %v5696_v22 = vld [vmem:[%s10293_s27 + $0xd0] sm:$0xff] }
 0xcd1   : > { %v5710_v25 = vadd.f32 %v5678_v52, %v5576_v33  ;;  %v5579_v46 = vadd.f32 %v10298_v28, %v5578_v4  ;;  %v5694_v33 = vld [vmem:[%s10293_s27 + $0xc0] sm:$0xff] }
 0xcd2   : > { %5744 = vst.msk [vmem:[%s10306_s10 + $0x50] sm:$0xff] %vm5460_vm5, %v5712_v53  ;;  %v5713_v54 = vadd.f32 %v5681_v38, %v5587_v1  ;;  %v5697_v53 = vld [vmem:[%s10293_s27 + $0xd8] sm:$0xff] }
 0xcd3   : > { %5742 = vst.msk [vmem:[%s10306_s10 + $0x40] sm:$0xff] %vm5460_vm5, %v5710_v25  ;;  %v5711_v27 = vadd.f32 %v5679_v43, %v5579_v46  ;;  %v5695_v25 = vld [vmem:[%s10293_s27 + $0xc8] sm:$0xff] }
 0xcd4   : > { %5745 = vst.msk [vmem:[%s10306_s10 + $0x58] sm:$0xff] %vm5460_vm5, %v5713_v54 }
 0xcd5   : > { %5743 = vst.msk [vmem:[%s10306_s10 + $0x48] sm:$0xff] %vm5460_vm5, %v5711_v27 }
 0xcd8   : > { %v6570_v58 = vpop.f32.mrb[140].mxu0 }
 0xcd9   : > { %v5600_v45 = vadd.f32 %v6570_v58, %v10298_v28  ;;  %v5591_v61 = vpop.f32.mrb[141].mxu0 }
 0xcda   : > { %v5592_v10 = vadd.f32 %v10298_v28, %v5591_v61  ;;  %v6571_v50 = vpop.f32.mrb[142].mxu0 }
 0xcdb   : > { %v5716_v51 = vadd.f32 %v5684_v8, %v5600_v45  ;;  %v5603_v16 = vadd.f32 %v6571_v50, %v10298_v28  ;;  %v5594_v12 = vpop.f32.mrb[143].mxu0  ;;  %v5700_v45 = vld [vmem:[%s10293_s27 + $0xf0] sm:$0xff] }
 0xcdc   : > { %v5714_v9 = vadd.f32 %v5682_v29, %v5592_v10  ;;  %v5595_v60 = vadd.f32 %v10298_v28, %v5594_v12  ;;  %v5698_v10 = vld [vmem:[%s10293_s27 + $0xe0] sm:$0xff] }
 0xcdd   : > { %5748 = vst.msk [vmem:[%s10306_s10 + $0x70] sm:$0xff] %vm5460_vm5, %v5716_v51  ;;  %v5717_v2 = vadd.f32 %v5685_v11, %v5603_v16  ;;  %v5701_v51 = vld [vmem:[%s10293_s27 + $0xf8] sm:$0xff] }
 0xcde   : > { %5746 = vst.msk [vmem:[%s10306_s10 + $0x60] sm:$0xff] %vm5460_vm5, %v5714_v9  ;;  %v5715_v31 = vadd.f32 %v5683_v6, %v5595_v60  ;;  %v5699_v9 = vld [vmem:[%s10293_s27 + $0xe8] sm:$0xff] }
 0xcdf   : > { %5749 = vst.msk [vmem:[%s10306_s10 + $0x78] sm:$0xff] %vm5460_vm5, %v5717_v2 }
 0xce0   : > { %5747 = vst.msk [vmem:[%s10306_s10 + $0x68] sm:$0xff] %vm5460_vm5, %v5715_v31 }
 0xd12   : > { %v6574_v21 = vpop.f32.mrb[128].mxu1 }
 0xd13   : > { %v5616_v19 = vadd.f32 %v6574_v21, %v10298_v28  ;;  %v5607_v40 = vpop.f32.mrb[129].mxu1 }
 0xd14   : > { %v5608_v48 = vadd.f32 %v10298_v28, %v5607_v40  ;;  %v6575_v5 = vpop.f32.mrb[130].mxu1 }
 0xd15   : > { %v5720_v3 = vadd.f32 %v5688_v23, %v5616_v19  ;;  %v5619_v36 = vadd.f32 %v6575_v5, %v10298_v28  ;;  %v5610_v57 = vpop.f32.mrb[131].mxu1 }
 0xd16   : > { %v5718_v7 = vadd.f32 %v5686_v39, %v5608_v48  ;;  %v5611_v42 = vadd.f32 %v10298_v28, %v5610_v57 }
 0xd17   : > { %5752 = vst.msk [vmem:[%s10306_s10 + $0x90] sm:$0xff] %vm5460_vm5, %v5720_v3  ;;  %v5721_v41 = vadd.f32 %v5689_v34, %v5619_v36 }
 0xd18   : > { %5750 = vst.msk [vmem:[%s10306_s10 + $0x80] sm:$0xff] %vm5460_vm5, %v5718_v7  ;;  %v5719_v32 = vadd.f32 %v5687_v18, %v5611_v42 }
 0xd19   : > { %5753 = vst.msk [vmem:[%s10306_s10 + $0x98] sm:$0xff] %vm5460_vm5, %v5721_v41 }
 0xd1a   : > { %5751 = vst.msk [vmem:[%s10306_s10 + $0x88] sm:$0xff] %vm5460_vm5, %v5719_v32 }
 0xd1e   : > { %v6578_v37 = vpop.f32.mrb[132].mxu1 }
 0xd1f   : > { %v5632_v26 = vadd.f32 %v6578_v37, %v10298_v28  ;;  %v5623_v20 = vpop.f32.mrb[133].mxu1 }
 0xd20   : > { %v5624_v44 = vadd.f32 %v10298_v28, %v5623_v20  ;;  %v6579_v55 = vpop.f32.mrb[134].mxu1 }
 0xd21   : > { %v5724_v14 = vadd.f32 %v5692_v62, %v5632_v26  ;;  %v5635_v47 = vadd.f32 %v6579_v55, %v10298_v28  ;;  %v5626_v13 = vpop.f32.mrb[135].mxu1 }
 0xd22   : > { %v5722_v0 = vadd.f32 %v5690_v24, %v5624_v44  ;;  %v5627_v30 = vadd.f32 %v10298_v28, %v5626_v13 }
 0xd23   : > { %5756 = vst.msk [vmem:[%s10306_s10 + $0xb0] sm:$0xff] %vm5460_vm5, %v5724_v14  ;;  %v5725_v15 = vadd.f32 %v5693_v63, %v5635_v47 }
 0xd24   : > { %5754 = vst.msk [vmem:[%s10306_s10 + $0xa0] sm:$0xff] %vm5460_vm5, %v5722_v0  ;;  %v5723_v35 = vadd.f32 %v5691_v56, %v5627_v30 }
 0xd25   : > { %5757 = vst.msk [vmem:[%s10306_s10 + $0xb8] sm:$0xff] %vm5460_vm5, %v5725_v15 }
 0xd26   : > { %5755 = vst.msk [vmem:[%s10306_s10 + $0xa8] sm:$0xff] %vm5460_vm5, %v5723_v35  ;;  %v6582_v59 = vpop.f32.mrb[136].mxu1 }
 0xd27   : > { %v5648_v49 = vadd.f32 %v6582_v59, %v10298_v28  ;;  %v5639_v52 = vpop.f32.mrb[137].mxu1 }
 0xd28   : > { %v5640_v17 = vadd.f32 %v10298_v28, %v5639_v52  ;;  %v6583_v38 = vpop.f32.mrb[138].mxu1 }
 0xd29   : > { %v5728_v1 = vadd.f32 %v5696_v22, %v5648_v49  ;;  %v5651_v4 = vadd.f32 %v6583_v38, %v10298_v28  ;;  %v5642_v43 = vpop.f32.mrb[139].mxu1 }
 0xd2a   : > { %v5726_v46 = vadd.f32 %v5694_v33, %v5640_v17  ;;  %v5643_v54 = vadd.f32 %v10298_v28, %v5642_v43 }
 0xd2b   : > { %5760 = vst.msk [vmem:[%s10306_s10 + $0xd0] sm:$0xff] %vm5460_vm5, %v5728_v1  ;;  %v5729_v27 = vadd.f32 %v5697_v53, %v5651_v4 }
 0xd2c   : > { %5758 = vst.msk [vmem:[%s10306_s10 + $0xc0] sm:$0xff] %vm5460_vm5, %v5726_v46  ;;  %v5727_v58 = vadd.f32 %v5695_v25, %v5643_v54 }
 0xd2d   : > { %5761 = vst.msk [vmem:[%s10306_s10 + $0xd8] sm:$0xff] %vm5460_vm5, %v5729_v27 }
 0xd2e   : > { %5759 = vst.msk [vmem:[%s10306_s10 + $0xc8] sm:$0xff] %vm5460_vm5, %v5727_v58 }
 0xd31   : > { %v6586_v8 = vpop.f32.mrb[140].mxu1 }
 0xd32   : > { %v5664_v61 = vadd.f32 %v6586_v8, %v10298_v28  ;;  %v5655_v29 = vpop.f32.mrb[141].mxu1 }
 0xd33   : > { %v5656_v50 = vadd.f32 %v10298_v28, %v5655_v29  ;;  %v6587_v11 = vpop.f32.mrb[142].mxu1 }
 0xd34   : > { %v5732_v16 = vadd.f32 %v5700_v45, %v5664_v61  ;;  %v5667_v12 = vadd.f32 %v6587_v11, %v10298_v28  ;;  %v5658_v6 = vpop.f32.mrb[143].mxu1 }
 0xd35   : > { %v5730_v60 = vadd.f32 %v5698_v10, %v5656_v50  ;;  %v5659_v2 = vadd.f32 %v10298_v28, %v5658_v6 }
 0xd36   : > { %5764 = vst.msk [vmem:[%s10306_s10 + $0xf0] sm:$0xff] %vm5460_vm5, %v5732_v16  ;;  %v5733_v31 = vadd.f32 %v5701_v51, %v5667_v12 }
 0xd37   : > { %5762 = vst.msk [vmem:[%s10306_s10 + $0xe0] sm:$0xff] %vm5460_vm5, %v5730_v60  ;;  %v5731_v21 = vadd.f32 %v5699_v9, %v5659_v2 }
 0xd38   : > { %5765 = vst.msk [vmem:[%s10306_s10 + $0xf8] sm:$0xff] %vm5460_vm5, %v5733_v31 }
 0xd39   : > { %5763 = vst.msk [vmem:[%s10306_s10 + $0xe8] sm:$0xff] %vm5460_vm5, %v5731_v21 }
 0xd3a PF: > { %s16_s21 = sadd.s32 1, %s7468_s21  }
 0xd3b   : > { %p13_p4 = scmp.ge.s32.totalorder %s16_s21, 6  }
 0xd3d   :  { %15 = sbr.rel (!%p13_p4) target bundleno = 1 (0x1), region = 81 }

// kernel: _lambda_.7
= control target key start
LH: loop header
LB: loop body
LE: loop exit
PB: predicated region body
PF: predicated region fallthrough
CT: control target
= control target key end

     0   :  { %s2112_s21 = smov 0   ;;  %s3194_s0 = inlined_call_operand.vmem [shape: bf16[2,8,8,8,128], index: 0, kind: input, shape index: {}]   ;;  %s3195_s1 = inlined_call_operand.vmem [shape: f32[2,8,64,64], index: 1, kind: input, shape index: {}]   ;;  %s3196_s2 = inlined_call_operand.vmem [shape: f32[27,128], index: 2, kind: input, shape index: {}]   ;;  %s3197_s3 = inlined_call_operand.vmem [shape: f32[1,128], index: 3, kind: input, shape index: {}]   ;;  %s3198_s4 = inlined_call_operand.vmem [shape: bf16[128,64], index: 4, kind: input, shape index: {}]   ;;  %s3199_s5 = inlined_call_operand.vmem [shape: f32[1,64], index: 5, kind: input, shape index: {}]   ;;  %s3200_s6 = inlined_call_operand.vmem [shape: f32[2,8,64,64], index: 6, kind: output, shape index: {}]  }
   0x1 LB: > { %s1704_s22 = sadd.s32 4294967295, %s2070_s21   ;;  %p1708_p0 = scmp.ge.s32.totalorder %s2070_s21, 1  ;;  %s2070_s21 = sphi %s2112_s21, %s16_s21  }
   0x2   : > { %p222_p1 = scmp.lt.s32.totalorder %s2070_s21, 3 }
   0x4   : > { %p223_p2 = pnand %p1708_p0, %p222_p1 }
   0x5   : > { %v2123_v0 = vld [vmem:[%s3196_s2] sm:$0xff] (!%p223_p2)  ;;  %v2128_v1 = vld [vmem:[%s3196_s2 + $0x8] sm:$0xff] (!%p223_p2)  ;;  %v2133_v2 = vld [vmem:[%s3196_s2 + $0x10] sm:$0xff] (!%p223_p2)  ;;  %p2137_p3 = scmp.lt.s32.totalorder (!%p223_p2), %s1704_s22, 1  ;;  %v2076_v3 = vmov (!%p223_p2), 0.0   ;;  %v527_v13 = vlaneseq (!%p223_p2)  ;;  %s2333_s11 = smov (!%p223_p2), 0  }
   0x6   : > { %226 = sbr.rel (%p223_p2) target bundleno = 514 (0x202), region = 44  ;;  %3245 = vst [vmem:[#allocation3_spill] sm:$0xff] (!%p223_p2), %v2123_v0  ;;  %3246 = vst [vmem:[#allocation4_spill] sm:$0xff] (!%p223_p2), %v2128_v1  ;;  %v2180_v4 = vld [vmem:[%s3196_s2 + $0x18] sm:$0x7] (!%p223_p2) }
   0x7   : > { %3247 = vst [vmem:[#allocation5_spill] sm:$0xff] (!%p223_p2), %v2133_v2  ;;  %273 = vst [vmem:[#allocation2] sm:$0xff] (!%p223_p2), %v2076_v3  ;;  %v2185_v5 = vld [vmem:[%s3197_s3] ss:$0 sm:$0xff] (!%p223_p2)  ;;  %v2195_v7 = vld [vmem:[%s3198_s4 + $0x4] sm:$0xf] (!%p223_p2) }
   0x8   : > { %274 = vst [vmem:[#allocation2 + $0x8] sm:$0xff] (!%p223_p2), %v2076_v3  ;;  %275 = vst [vmem:[#allocation2 + $0x10] sm:$0xff] (!%p223_p2), %v2076_v3  ;;  %v2190_v6 = vld [vmem:[%s3198_s4] sm:$0xf] (!%p223_p2)  ;;  %v2200_v8 = vld [vmem:[%s3198_s4 + $0x8] sm:$0xf] (!%p223_p2) }
   0x9   : > { %276 = vst [vmem:[#allocation2 + $0x18] sm:$0xff] (!%p223_p2), %v2076_v3  ;;  %277 = vst [vmem:[#allocation2 + $0x20] sm:$0xff] (!%p223_p2), %v2076_v3  ;;  %v2205_v9 = vld [vmem:[%s3198_s4 + $0xc] sm:$0xf] (!%p223_p2)  ;;  %v2210_v10 = vld [vmem:[%s3198_s4 + $0x10] sm:$0xf] (!%p223_p2) }
   0xa   : > { %278 = vst [vmem:[#allocation2 + $0x28] sm:$0xff] (!%p223_p2), %v2076_v3  ;;  %279 = vst [vmem:[#allocation2 + $0x30] sm:$0xff] (!%p223_p2), %v2076_v3  ;;  %v2215_v11 = vld [vmem:[%s3198_s4 + $0x14] sm:$0xf] (!%p223_p2)  ;;  %v2220_v12 = vld [vmem:[%s3198_s4 + $0x18] sm:$0xf] (!%p223_p2) }
   0xb   : > { %280 = vst [vmem:[#allocation2 + $0x38] sm:$0xff] (!%p223_p2), %v2076_v3  ;;  %281 = vst [vmem:[#allocation2 + $0x40] sm:$0xff] (!%p223_p2), %v2076_v3  ;;  %v2225_v14 = vld [vmem:[%s3198_s4 + $0x1c] sm:$0xf] (!%p223_p2)  ;;  %v2230_v15 = vld [vmem:[%s3198_s4 + $0x20] sm:$0xf] (!%p223_p2) }
   0xc   : > { %282 = vst [vmem:[#allocation2 + $0x48] sm:$0xff] (!%p223_p2), %v2076_v3  ;;  %284 = vst [vmem:[#allocation2 + $0x2d0] sm:$0xff] (!%p223_p2), %v2076_v3  ;;  %v2235_v16 = vld [vmem:[%s3198_s4 + $0x24] sm:$0xf] (!%p223_p2)  ;;  %v2240_v17 = vld [vmem:[%s3198_s4 + $0x28] sm:$0xf] (!%p223_p2) }
   0xd   : > { %285 = vst [vmem:[#allocation2 + $0x2d8] sm:$0xff] %v2076_v3  ;;  %286 = vst [vmem:[#allocation2 + $0x2e0] sm:$0xff] %v2076_v3  ;;  %v2245_v18 = vld [vmem:[%s3198_s4 + $0x2c] sm:$0xf]  ;;  %v2250_v19 = vld [vmem:[%s3198_s4 + $0x30] sm:$0xf] }
   0xe   : > { %287 = vst [vmem:[#allocation2 + $0x2e8] sm:$0xff] %v2076_v3  ;;  %288 = vst [vmem:[#allocation2 + $0x2f0] sm:$0xff] %v2076_v3  ;;  %v2255_v20 = vld [vmem:[%s3198_s4 + $0x34] sm:$0xf]  ;;  %v2260_v21 = vld [vmem:[%s3198_s4 + $0x38] sm:$0xf] }
   0xf   : > { %289 = vst [vmem:[#allocation2 + $0x2f8] sm:$0xff] %v2076_v3  ;;  %290 = vst [vmem:[#allocation2 + $0x300] sm:$0xff] %v2076_v3  ;;  %v2265_v22 = vld [vmem:[%s3198_s4 + $0x3c] sm:$0xf]  ;;  %v2270_v23 = vld [vmem:[%s3199_s5] ss:$0 sm:$0xff] }
  0x10   : > { %291 = vst [vmem:[#allocation2 + $0x308] sm:$0xff] %v2076_v3  ;;  %292 = vst [vmem:[#allocation2 + $0x310] sm:$0xff] %v2076_v3  ;;  %v2272_v24 = vshrl.u32 %v527_v13, 7  ;;  %s3329_s22 = smov (!%p2137_p3, %s1704_s22), 1 }
  0x11   : > { %293 = vst [vmem:[#allocation2 + $0x318] sm:$0xff] %v2076_v3  ;;  %295 = vst [vmem:[#allocation2 + $0x50] sm:$0xff] %v2076_v3  ;;  %s1794_s25 = sshll.u32 %s3329_s22, 8  ;;  %s1795_s26 = sshll.u32 %s3329_s22, 9 }
  0x12   : > { %296 = vst [vmem:[#allocation2 + $0xa0] sm:$0xff] %v2076_v3  ;;  %297 = vst [vmem:[#allocation2 + $0xf0] sm:$0xff] %v2076_v3  ;;  %vm529_vm0 = vcmp.gt.s32.totalorder %v2272_v24, 0  ;;  %vm532_vm1 = vcmp.lt.s32.totalorder %v2272_v24, 7  ;;  %s2289_s30 = scalar_lea.vmem %s3194_s0, %s1794_s25  ;;  %s2294_s22 = scalar_lea.vmem %s3195_s1, %s1795_s26 }
  0x13   : > { %298 = vst [vmem:[#allocation2 + $0x140] sm:$0xff] %v2076_v3  ;;  %299 = vst [vmem:[#allocation2 + $0x190] sm:$0xff] %v2076_v3  ;;  %v2281_v25 = vsel %vm529_vm0, 1.0, %v2076_v3  ;;  %v2284_v26 = vsel %vm532_vm1, 1.0, %v2076_v3  ;;  %s2299_s10 = scalar_lea.vmem %s3200_s6, %s1795_s26  ;;  %v1798_v27 = vld [vmem:[%s2289_s30] sm:$0xff]   ;;  %v1925_v28 = vld [vmem:[%s2289_s30 + $0x8] sm:$0xff]  }
  0x14   : > { %300 = vst [vmem:[#allocation2 + $0x1e0] sm:$0xff] %v2076_v3  ;;  %301 = vst [vmem:[#allocation2 + $0x230] sm:$0xff] %v2076_v3  ;;  %v1926_v29 = vld [vmem:[%s2289_s30 + $0x10] sm:$0xff]   ;;  %v1799_v30 = vunpack.c.l.bf16 %v1798_v27  ;;  %v1800_v31 = vunpack.c.h.bf16 %v1798_v27  ;;  %v1803_v32 = vunpack.c.l.bf16 %v1925_v28  ;;  %v1804_v33 = vunpack.c.h.bf16 %v1925_v28  ;;  %v1927_v34 = vld [vmem:[%s2289_s30 + $0x18] sm:$0xff]  }
  0x15   : > { %302 = vst [vmem:[#allocation2 + $0x280] sm:$0xff] %v2076_v3  ;;  %304 = vst [vmem:[#allocation2 + $0x98] sm:$0xff] %v2076_v3  ;;  %v1928_v35 = vld [vmem:[%s2289_s30 + $0x20] sm:$0xff]   ;;  %v1929_v36 = vld [vmem:[%s2289_s30 + $0x28] sm:$0xff]   ;;  %v1807_v37 = vunpack.c.l.bf16 %v1926_v29  ;;  %v1808_v38 = vunpack.c.h.bf16 %v1926_v29  ;;  %v1811_v39 = vunpack.c.l.bf16 %v1927_v34  ;;  %v1812_v40 = vunpack.c.h.bf16 %v1927_v34 }
  0x16   : > { %305 = vst [vmem:[#allocation2 + $0xe8] sm:$0xff] %v2076_v3  ;;  %306 = vst [vmem:[#allocation2 + $0x138] sm:$0xff] %v2076_v3  ;;  %v1930_v41 = vld [vmem:[%s2289_s30 + $0x30] sm:$0xff]   ;;  %v1931_v42 = vld [vmem:[%s2289_s30 + $0x38] sm:$0xff]   ;;  %v1815_v44 = vunpack.c.l.bf16 %v1928_v35  ;;  %v1816_v45 = vunpack.c.h.bf16 %v1928_v35  ;;  %v1819_v46 = vunpack.c.l.bf16 %v1929_v36  ;;  %v1820_v47 = vunpack.c.h.bf16 %v1929_v36 }
  0x17   : > { %307 = vst [vmem:[#allocation2 + $0x188] sm:$0xff] %v2076_v3  ;;  %308 = vst [vmem:[#allocation2 + $0x1d8] sm:$0xff] %v2076_v3  ;;  %v1932_v43 = vld [vmem:[%s2289_s30 + $0x40] sm:$0xff]   ;;  %v1933_v48 = vld [vmem:[%s2289_s30 + $0x48] sm:$0xff]   ;;  %v1823_v51 = vunpack.c.l.bf16 %v1930_v41  ;;  %v1824_v52 = vunpack.c.h.bf16 %v1930_v41  ;;  %v1827_v53 = vunpack.c.l.bf16 %v1931_v42  ;;  %v1828_v54 = vunpack.c.h.bf16 %v1931_v42 }
  0x18   : > { %309 = vst [vmem:[#allocation2 + $0x228] sm:$0xff] %v2076_v3  ;;  %310 = vst [vmem:[#allocation2 + $0x278] sm:$0xff] %v2076_v3  ;;  %v1934_v49 = vld [vmem:[%s2289_s30 + $0x50] sm:$0xff]   ;;  %v1935_v50 = vld [vmem:[%s2289_s30 + $0x58] sm:$0xff]   ;;  %v1831_v57 = vunpack.c.l.bf16 %v1932_v43  ;;  %v1832_v58 = vunpack.c.h.bf16 %v1932_v43  ;;  %v1835_v59 = vunpack.c.l.bf16 %v1933_v48  ;;  %v1836_v60 = vunpack.c.h.bf16 %v1933_v48 }
  0x19   : > { %311 = vst [vmem:[#allocation2 + $0x2c8] sm:$0xff] %v2076_v3  ;;  %3249 = vst [vmem:[#allocation6_spill] sm:$0xff] %v2180_v4  ;;  %v1936_v55 = vld [vmem:[%s2289_s30 + $0x60] sm:$0xff]   ;;  %v1937_v56 = vld [vmem:[%s2289_s30 + $0x68] sm:$0xff]   ;;  %v1839_v63 = vunpack.c.l.bf16 %v1934_v49  ;;  %v1840_v3 = vunpack.c.h.bf16 %v1934_v49  ;;  %v1843_v13 = vunpack.c.l.bf16 %v1935_v50  ;;  %v1844_v27 = vunpack.c.h.bf16 %v1935_v50 }
  0x1a   : > { %3250 = vst [vmem:[#allocation7_spill] sm:$0xff] %v2190_v6  ;;  %3251 = vst [vmem:[#allocation8_spill] sm:$0xff] %v2195_v7  ;;  %v1938_v61 = vld [vmem:[%s2289_s30 + $0x70] sm:$0xff]   ;;  %v1939_v62 = vld [vmem:[%s2289_s30 + $0x78] sm:$0xff]  }
  0x1b   : > { %3252 = vst [vmem:[#allocation9_spill] sm:$0xff] %v2200_v8  ;;  %3253 = vst [vmem:[#allocation10_spill] sm:$0xff] %v2205_v9  ;;  %v1940_v28 = vld [vmem:[%s2289_s30 + $0x80] sm:$0xff]   ;;  %v1941_v29 = vld [vmem:[%s2289_s30 + $0x88] sm:$0xff]   ;;  %v1855_v36 = vunpack.c.l.bf16 %v1938_v61 }
  0x1c   : > { %3254 = vst [vmem:[#allocation11_spill] sm:$0xff] %v2210_v10  ;;  %3255 = vst [vmem:[#allocation12_spill] sm:$0xff] %v2215_v11  ;;  %v1942_v34 = vld [vmem:[%s2289_s30 + $0x90] sm:$0xff]   ;;  %v1943_v35 = vld [vmem:[%s2289_s30 + $0x98] sm:$0xff]   ;;  %v1863_v42 = vunpack.c.l.bf16 %v1940_v28  ;;  %v1864_v43 = vunpack.c.h.bf16 %v1940_v28 }
  0x1d   : > { %3256 = vst [vmem:[#allocation13_spill] sm:$0xff] %v2220_v12  ;;  %3257 = vst [vmem:[#allocation14_spill] sm:$0xff] %v2225_v14  ;;  %v1945_v41 = vld [vmem:[%s2289_s30 + $0xa8] sm:$0xff]   ;;  %v1871_v48 = vunpack.c.l.bf16 %v1942_v34  ;;  %v1872_v49 = vunpack.c.h.bf16 %v1942_v34  ;;  %v1875_v50 = vunpack.c.l.bf16 %v1943_v35 }
  0x1e   : > { %3258 = vst [vmem:[#allocation15_spill] sm:$0xff] %v2230_v15  ;;  %3259 = vst [vmem:[#allocation16_spill] sm:$0xff] %v2235_v16 }
  0x1f   : > { %3260 = vst [vmem:[#allocation17_spill] sm:$0xff] %v2240_v17  ;;  %3261 = vst [vmem:[#allocation18_spill] sm:$0xff] %v2245_v18 }
  0x20   : > { %3262 = vst [vmem:[#allocation19_spill] sm:$0xff] %v2250_v19  ;;  %3263 = vst [vmem:[#allocation20_spill] sm:$0xff] %v2255_v20 }
  0x21   : > { %3264 = vst [vmem:[#allocation21_spill] sm:$0xff] %v2260_v21  ;;  %3265 = vst [vmem:[#allocation22_spill] sm:$0xff] %v2265_v22 }
  0x22   : > { %3266 = vst [vmem:[#allocation23_spill] sm:$0xff] %v2270_v23  ;;  %3267 = vst [vmem:[#allocation24_spill] sm:$0xff] %v2272_v24 }
  0x23   : > { %441 = vst [vmem:[#allocation2 + $0x58] sm:$0xff] %v1799_v30  ;;  %442 = vst [vmem:[#allocation2 + $0x60] sm:$0xff] %v1800_v31  ;;  %v1847_v30 = vunpack.c.l.bf16 %v1936_v55  ;;  %v1848_v31 = vunpack.c.h.bf16 %v1936_v55 }
  0x24   : > { %443 = vst [vmem:[#allocation2 + $0x68] sm:$0xff] %v1803_v32  ;;  %444 = vst [vmem:[#allocation2 + $0x70] sm:$0xff] %v1804_v33  ;;  %v1851_v32 = vunpack.c.l.bf16 %v1937_v56  ;;  %v1852_v33 = vunpack.c.h.bf16 %v1937_v56  ;;  %v1883_v56 = vunpack.c.l.bf16 %v1945_v41 }
  0x25   : > { %445 = vst [vmem:[#allocation2 + $0x78] sm:$0xff] %v1807_v37  ;;  %446 = vst [vmem:[#allocation2 + $0x80] sm:$0xff] %v1808_v38  ;;  %v1856_v37 = vunpack.c.h.bf16 %v1938_v61  ;;  %v1859_v38 = vunpack.c.l.bf16 %v1939_v62 }
  0x26   : > { %447 = vst [vmem:[#allocation2 + $0x88] sm:$0xff] %v1811_v39  ;;  %448 = vst [vmem:[#allocation2 + $0x90] sm:$0xff] %v1812_v40  ;;  %v1860_v39 = vunpack.c.h.bf16 %v1939_v62  ;;  %v1944_v40 = vld [vmem:[%s2289_s30 + $0xa0] sm:$0xff]  }
  0x27   : > { %449 = vst [vmem:[#allocation2 + $0xa8] sm:$0xff] %v1815_v44  ;;  %450 = vst [vmem:[#allocation2 + $0xb0] sm:$0xff] %v1816_v45  ;;  %v1867_v44 = vunpack.c.l.bf16 %v1941_v29  ;;  %v1868_v45 = vunpack.c.h.bf16 %v1941_v29  ;;  %v1880_v55 = vunpack.c.h.bf16 %v1944_v40 }
  0x28   : > { %451 = vst [vmem:[#allocation2 + $0xb8] sm:$0xff] %v1819_v46  ;;  %452 = vst [vmem:[#allocation2 + $0xc0] sm:$0xff] %v1820_v47  ;;  %v1946_v46 = vld [vmem:[%s2289_s30 + $0xb0] sm:$0xff]   ;;  %v1947_v47 = vld [vmem:[%s2289_s30 + $0xb8] sm:$0xff]  }
  0x29   : > { %453 = vst [vmem:[#allocation2 + $0xc8] sm:$0xff] %v1823_v51  ;;  %454 = vst [vmem:[#allocation2 + $0xd0] sm:$0xff] %v1824_v52  ;;  %v1876_v51 = vunpack.c.h.bf16 %v1943_v35  ;;  %v1948_v52 = vld [vmem:[%s2289_s30 + $0xc0] sm:$0xff]   ;;  %v1888_v61 = vunpack.c.h.bf16 %v1946_v46  ;;  %v1891_v62 = vunpack.c.l.bf16 %v1947_v47 }
  0x2a   : > { %455 = vst [vmem:[#allocation2 + $0xd8] sm:$0xff] %v1827_v53  ;;  %456 = vst [vmem:[#allocation2 + $0xe0] sm:$0xff] %v1828_v54  ;;  %v1949_v53 = vld [vmem:[%s2289_s30 + $0xc8] sm:$0xff]   ;;  %v1879_v54 = vunpack.c.l.bf16 %v1944_v40  ;;  %v1896_v28 = vunpack.c.h.bf16 %v1948_v52 }
  0x2b   : > { %457 = vst [vmem:[#allocation2 + $0xf8] sm:$0xff] %v1831_v57  ;;  %458 = vst [vmem:[#allocation2 + $0x100] sm:$0xff] %v1832_v58  ;;  %v1884_v57 = vunpack.c.h.bf16 %v1945_v41  ;;  %v1950_v58 = vld [vmem:[%s2289_s30 + $0xd0] sm:$0xff]   ;;  %v1899_v29 = vunpack.c.l.bf16 %v1949_v53 }
  0x2c   : > { %459 = vst [vmem:[#allocation2 + $0x108] sm:$0xff] %v1835_v59  ;;  %460 = vst [vmem:[#allocation2 + $0x110] sm:$0xff] %v1836_v60  ;;  %v1951_v59 = vld [vmem:[%s2289_s30 + $0xd8] sm:$0xff]   ;;  %v1887_v60 = vunpack.c.l.bf16 %v1946_v46  ;;  %v1904_v34 = vunpack.c.h.bf16 %v1950_v58 }
  0x2d   : > { %461 = vst [vmem:[#allocation2 + $0x118] sm:$0xff] %v1839_v63  ;;  %462 = vst [vmem:[#allocation2 + $0x120] sm:$0xff] %v1840_v3  ;;  %v1892_v63 = vunpack.c.h.bf16 %v1947_v47  ;;  %v1952_v3 = vld [vmem:[%s2289_s30 + $0xe0] sm:$0xff]   ;;  %v1907_v35 = vunpack.c.l.bf16 %v1951_v59 }
  0x2e   : > { %463 = vst [vmem:[#allocation2 + $0x128] sm:$0xff] %v1843_v13  ;;  %464 = vst [vmem:[#allocation2 + $0x130] sm:$0xff] %v1844_v27  ;;  %v1953_v13 = vld [vmem:[%s2289_s30 + $0xe8] sm:$0xff]   ;;  %v1895_v27 = vunpack.c.l.bf16 %v1948_v52 }
  0x2f   : > { %465 = vst [vmem:[#allocation2 + $0x148] sm:$0xff] %v1847_v30  ;;  %466 = vst [vmem:[#allocation2 + $0x150] sm:$0xff] %v1848_v31  ;;  %v1900_v30 = vunpack.c.h.bf16 %v1949_v53  ;;  %v1954_v31 = vld [vmem:[%s2289_s30 + $0xf0] sm:$0xff]   ;;  %v1916_v40 = vunpack.c.h.bf16 %v1953_v13 }
  0x30   : > { %467 = vst [vmem:[#allocation2 + $0x158] sm:$0xff] %v1851_v32  ;;  %468 = vst [vmem:[#allocation2 + $0x160] sm:$0xff] %v1852_v33  ;;  %v1955_v32 = vld [vmem:[%s2289_s30 + $0xf8] sm:$0xff]   ;;  %v1903_v33 = vunpack.c.l.bf16 %v1950_v58  ;;  %v1919_v41 = vunpack.c.l.bf16 %v1954_v31 }
  0x31   : > { %469 = vst [vmem:[#allocation2 + $0x168] sm:$0xff] %v1855_v36  ;;  %470 = vst [vmem:[#allocation2 + $0x170] sm:$0xff] %v1856_v37  ;;  %v1908_v36 = vunpack.c.h.bf16 %v1951_v59  ;;  %v1911_v37 = vunpack.c.l.bf16 %v1952_v3 }
  0x32   : > { %471 = vst [vmem:[#allocation2 + $0x178] sm:$0xff] %v1859_v38  ;;  %472 = vst [vmem:[#allocation2 + $0x180] sm:$0xff] %v1860_v39  ;;  %v1912_v38 = vunpack.c.h.bf16 %v1952_v3  ;;  %v1915_v39 = vunpack.c.l.bf16 %v1953_v13 }
  0x33   : > { %473 = vst [vmem:[#allocation2 + $0x198] sm:$0xff] %v1863_v42  ;;  %474 = vst [vmem:[#allocation2 + $0x1a0] sm:$0xff] %v1864_v43  ;;  %v1920_v42 = vunpack.c.h.bf16 %v1954_v31  ;;  %v1923_v43 = vunpack.c.l.bf16 %v1955_v32 }
  0x34   : > { %475 = vst [vmem:[#allocation2 + $0x1a8] sm:$0xff] %v1867_v44  ;;  %476 = vst [vmem:[#allocation2 + $0x1b0] sm:$0xff] %v1868_v45  ;;  %v1924_v44 = vunpack.c.h.bf16 %v1955_v32 }
  0x35   : > { %477 = vst [vmem:[#allocation2 + $0x1b8] sm:$0xff] %v1871_v48  ;;  %478 = vst [vmem:[#allocation2 + $0x1c0] sm:$0xff] %v1872_v49 }
  0x36   : > { %479 = vst [vmem:[#allocation2 + $0x1c8] sm:$0xff] %v1875_v50  ;;  %480 = vst [vmem:[#allocation2 + $0x1d0] sm:$0xff] %v1876_v51 }
  0x37   : > { %481 = vst [vmem:[#allocation2 + $0x1e8] sm:$0xff] %v1879_v54  ;;  %482 = vst [vmem:[#allocation2 + $0x1f0] sm:$0xff] %v1880_v55 }
  0x38   : > { %483 = vst [vmem:[#allocation2 + $0x1f8] sm:$0xff] %v1883_v56  ;;  %484 = vst [vmem:[#allocation2 + $0x200] sm:$0xff] %v1884_v57 }
  0x39   : > { %485 = vst [vmem:[#allocation2 + $0x208] sm:$0xff] %v1887_v60  ;;  %486 = vst [vmem:[#allocation2 + $0x210] sm:$0xff] %v1888_v61 }
  0x3a   : > { %487 = vst [vmem:[#allocation2 + $0x218] sm:$0xff] %v1891_v62  ;;  %488 = vst [vmem:[#allocation2 + $0x220] sm:$0xff] %v1892_v63 }
  0x3b   : > { %489 = vst [vmem:[#allocation2 + $0x238] sm:$0xff] %v1895_v27  ;;  %490 = vst [vmem:[#allocation2 + $0x240] sm:$0xff] %v1896_v28 }
  0x3c   : > { %491 = vst [vmem:[#allocation2 + $0x248] sm:$0xff] %v1899_v29  ;;  %492 = vst [vmem:[#allocation2 + $0x250] sm:$0xff] %v1900_v30 }
  0x3d   : > { %493 = vst [vmem:[#allocation2 + $0x258] sm:$0xff] %v1903_v33  ;;  %494 = vst [vmem:[#allocation2 + $0x260] sm:$0xff] %v1904_v34 }
  0x3e   : > { %495 = vst [vmem:[#allocation2 + $0x268] sm:$0xff] %v1907_v35  ;;  %496 = vst [vmem:[#allocation2 + $0x270] sm:$0xff] %v1908_v36 }
  0x3f   : > { %497 = vst [vmem:[#allocation2 + $0x288] sm:$0xff] %v1911_v37  ;;  %498 = vst [vmem:[#allocation2 + $0x290] sm:$0xff] %v1912_v38 }
  0x40   : > { %499 = vst [vmem:[#allocation2 + $0x298] sm:$0xff] %v1915_v39  ;;  %500 = vst [vmem:[#allocation2 + $0x2a0] sm:$0xff] %v1916_v40 }
  0x41   : > { %501 = vst [vmem:[#allocation2 + $0x2a8] sm:$0xff] %v1919_v41  ;;  %502 = vst [vmem:[#allocation2 + $0x2b0] sm:$0xff] %v1920_v42 }
  0x42   : > { %503 = vst [vmem:[#allocation2 + $0x2b8] sm:$0xff] %v1923_v43  ;;  %504 = vst [vmem:[#allocation2 + $0x2c0] sm:$0xff] %v1924_v44 }
  0x43 LB: >> { %v3268_v4 = vld [vmem:[#allocation6_spill] sm:$0xff]  ;;  %v3269_v24 = vld [vmem:[#allocation24_spill] sm:$0xff]  ;;  %v3270_v2 = vld [vmem:[#allocation5_spill] sm:$0xff]  ;;  %s541_s12 = smul.u32 80, %s2074_s11  ;;  %s1791_s14 = sshll.u32 %s2074_s11, 6  ;;  %vm1593_vm10 = vcmask 523264   ;;  %s2074_s11 = sphi %s2333_s11, %s540_s11  }
  0x44   : >> { %v3271_v1 = vld [vmem:[#allocation4_spill] sm:$0xff]  ;;  %v3272_v0 = vld [vmem:[#allocation3_spill] sm:$0xff]  ;;  %v3275_v9 = vld [vmem:[#allocation10_spill] sm:$0xff]  ;;  %v2362_v52 = vsub.s32 0, %v3269_v24  ;;  %v2365_v53 = vsub.s32 1, %v3269_v24  ;;  %v2368_v54 = vsub.s32 2, %v3269_v24  ;;  %s3151_s15 = scalar_lea.vmem %s2294_s22, %s1791_s14  ;;  %s3157_s16 = scalar_lea.vmem %s2299_s10, %s1791_s14 }
  0x45   : >> { %v3273_v7 = vld [vmem:[#allocation8_spill] sm:$0xff]  ;;  %v3274_v6 = vld [vmem:[#allocation7_spill] sm:$0xff]  ;;  %v3276_v8 = vld [vmem:[#allocation9_spill] sm:$0xff]  ;;  %v2371_v55 = vsub.s32 3, %v3269_v24  ;;  %v2378_v57 = vsub.s32 4, %v3269_v24  ;;  %v2381_v58 = vsub.s32 5, %v3269_v24 }
  0x46   : >> { %v1783_v45 = vcombine.low %v3274_v6, %v3273_v7  ;;  %v1784_v46 = vcombine.low %v3276_v8, %v3275_v9  ;;  %v3277_v11 = vld [vmem:[#allocation12_spill] sm:$0xff]  ;;  %v3278_v10 = vld [vmem:[#allocation11_spill] sm:$0xff]  ;;  %v3279_v14 = vld [vmem:[#allocation14_spill] sm:$0xff]  ;;  %v2384_v59 = vsub.s32 6, %v3269_v24  ;;  %v2388_v60 = vrot.slane %v3272_v0, %v2362_v52  ;;  %s2398_s13 = scalar_lea.vmem [#allocation2], %s541_s12  ;;  %s540_s11 = sadd.s32 1, %s2074_s11  }
  0x47   : >> { %v1785_v47 = vcombine.low %v3278_v10, %v3277_v11  ;;  %v3280_v12 = vld [vmem:[#allocation13_spill] sm:$0xff]  ;;  %v3281_v16 = vld [vmem:[#allocation16_spill] sm:$0xff]  ;;  %v3282_v15 = vld [vmem:[#allocation15_spill] sm:$0xff]  ;;  %v2392_v61 = vrot.slane %v3272_v0, %v2365_v53  ;;  %v2396_v62 = vrot.slane %v3272_v0, %v2368_v54  ;;  %v2407_v27 = vrot.slane %v3272_v0, %v2371_v55  ;;  %p537_p4 = scmp.ge.s32.totalorder %s540_s11, 8  }
  0x48   : >> { %v2346_v48 = vcombine.low %v3280_v12, %v3279_v14  ;;  %v2350_v49 = vcombine.low %v3282_v15, %v3281_v16  ;;  %v3283_v18 = vld [vmem:[#allocation18_spill] sm:$0xff]  ;;  %v3284_v17 = vld [vmem:[#allocation17_spill] sm:$0xff]  ;;  %v3285_v20 = vld [vmem:[#allocation20_spill] sm:$0xff]  ;;  %1968 = vmatprep.subr.bf16.mxu0 %v1783_v45  ;;  %1992 = vmatprep.subr.bf16.mxu1 %v1783_v45  ;;  %v2411_v28 = vrot.slane %v3272_v0, %v2378_v57  ;;  %v2437_v42 = vsub.s32 7, %v3269_v24 }
  0x49   : >> { %v2354_v50 = vcombine.low %v3284_v17, %v3283_v18  ;;  %v3286_v19 = vld [vmem:[#allocation19_spill] sm:$0xff]  ;;  %1969 = vmatpush3.bf16.msra.mxu0 %v1783_v45  ;;  %2000 = vmatpush3.bf16.msra.mxu1 %v1783_v45  ;;  %v3287_v22 = vld [vmem:[#allocation22_spill] sm:$0xff]  ;;  %v3288_v21 = vld [vmem:[#allocation21_spill] sm:$0xff]  ;;  %v2415_v29 = vrot.slane %v3272_v0, %v2381_v58  ;;  %v2419_v30 = vrot.slane %v3272_v0, %v2384_v59 }
  0x4a   : >> { %v2358_v51 = vcombine.low %v3286_v19, %v3285_v20  ;;  %v2375_v56 = vcombine.low %v3288_v21, %v3287_v22  ;;  %1970 = vmatprep.subr.bf16.mxu0 %v1784_v46  ;;  %1993 = vmatprep.subr.bf16.mxu1 %v1784_v46  ;;  %v543_v63 = vld [vmem:[%s2398_s13] sm:$0xff]  ;;  %v544_v3 = vld [vmem:[%s2398_s13 + $0x8] sm:$0xff]  ;;  %v2403_v13 = vld [vmem:[%s2398_s13 + $0x10] sm:$0xff]  ;;  %v2450_v10 = vrot.slane %v3272_v0, %v2437_v42 }
  0x4b   : >> { %v555_v31 = vmul.f32 %v2388_v60, %v543_v63  ;;  %v556_v32 = vmul.f32 %v2388_v60, %v544_v3  ;;  %v575_v33 = vmul.f32 %v2392_v61, %v543_v63  ;;  %v576_v34 = vmul.f32 %v2392_v61, %v544_v3  ;;  %v2429_v38 = vld [vmem:[%s2398_s13 + $0x18] sm:$0xff]  ;;  %v2493_v12 = vld [vmem:[%s2398_s13 + $0x60] sm:$0xff] }
  0x4c   : >> { %v595_v35 = vmul.f32 %v2396_v62, %v543_v63  ;;  %v596_v36 = vmul.f32 %v2396_v62, %v544_v3  ;;  %v625_v37 = vmul.f32 %v2407_v27, %v544_v3  ;;  %v626_v39 = vmul.f32 %v2403_v13, %v2407_v27  ;;  %3292 = vst [vmem:[#allocation28_spill] sm:$0xff] %v2493_v12  ;;  %v2610_v24 = vld [vmem:[%s2398_s13 + $0xb8] sm:$0xff] }
  0x4d   : >> { %1971 = vmatpush3.bf16.msra.mxu0 %v1784_v46  ;;  %2001 = vmatpush3.bf16.msra.mxu1 %v1784_v46  ;;  %v645_v40 = vmul.f32 %v2411_v28, %v544_v3  ;;  %v646_v41 = vmul.f32 %v2403_v13, %v2411_v28  ;;  %v665_v44 = vmul.f32 %v2415_v29, %v544_v3 }
  0x4e   : >> { %1972 = vmatprep.subr.bf16.mxu0 %v1785_v47  ;;  %1994 = vmatprep.subr.bf16.mxu1 %v1785_v47  ;;  %v633_v43 = vadd.f32 %v625_v37, %v555_v31  ;;  %v666_v45 = vmul.f32 %v2403_v13, %v2415_v29  ;;  %v695_v46 = vmul.f32 %v2403_v13, %v2419_v30 }
  0x4f   : >> { %v634_v63 = vadd.f32 %v626_v39, %v556_v32  ;;  %v653_v6 = vadd.f32 %v645_v40, %v575_v33  ;;  %v654_v7 = vadd.f32 %v646_v41, %v576_v34  ;;  %v696_v8 = vmul.f32 %v2429_v38, %v2419_v30  ;;  %v1733_v33 = vld [vmem:[%s2398_s13 + $0x50] sm:$0xff]  ;;  %v2458_v34 = vld [vmem:[%s2398_s13 + $0x58] sm:$0xff]  ;;  %3298 = vst [vmem:[#allocation34_spill] sm:$0xff] %v2610_v24 }
  0x50   : >> { %v673_v9 = vadd.f32 %v665_v44, %v595_v35  ;;  %v674_v31 = vadd.f32 %v666_v45, %v596_v36  ;;  %v703_v37 = vadd.f32 %v695_v46, %v633_v43  ;;  %v2454_v32 = vrot.slane %v3271_v1, %v2362_v52  ;;  %3289 = vst [vmem:[#allocation25_spill] sm:$0xff] %v2458_v34 }
  0x51   : >> { %1973 = vmatpush3.bf16.msra.mxu0 %v1785_v47  ;;  %2002 = vmatpush3.bf16.msra.mxu1 %v1785_v47  ;;  %v704_v3 = vadd.f32 %v696_v8, %v634_v63  ;;  %v2462_v47 = vrot.slane %v3271_v1, %v2365_v53  ;;  %v2466_v35 = vrot.slane %v3271_v1, %v2368_v54 }
  0x52   : >> { %1974 = vmatprep.subr.bf16.mxu0 %v2346_v48  ;;  %1995 = vmatprep.subr.bf16.mxu1 %v2346_v48  ;;  %v2470_v8 = vrot.slane %v3271_v1, %v2371_v55  ;;  %v2474_v36 = vrot.slane %v3271_v1, %v2378_v57  ;;  %v715_v39 = vmul.f32 %v2403_v13, %v2450_v10 }
  0x53   : >> { %3290 = vst [vmem:[#allocation26_spill] sm:$0xff] %v2462_v47  ;;  %3291 = vst [vmem:[#allocation27_spill] sm:$0xff] %v2466_v35  ;;  %v716_v40 = vmul.f32 %v2429_v38, %v2450_v10  ;;  %v735_v41 = vmul.f32 %v2403_v13, %v2454_v32  ;;  %v736_v43 = vmul.f32 %v2429_v38, %v2454_v32 }
  0x54   : >> { %v766_v44 = vmul.f32 %v1733_v33, %v2462_v47  ;;  %v767_v45 = vmul.f32 %v2458_v34, %v2462_v47  ;;  %v786_v46 = vmul.f32 %v1733_v33, %v2466_v35  ;;  %v723_v63 = vadd.f32 %v715_v39, %v653_v6 }
  0x55   : >> { %1975 = vmatpush3.bf16.msra.mxu0 %v2346_v48  ;;  %2003 = vmatpush3.bf16.msra.mxu1 %v2346_v48  ;;  %v724_v0 = vadd.f32 %v716_v40, %v654_v7  ;;  %v743_v11 = vadd.f32 %v735_v41, %v673_v9  ;;  %v744_v14 = vadd.f32 %v736_v43, %v674_v31 }
  0x56   : >> { %1976 = vmatprep.subr.bf16.mxu0 %v2350_v49  ;;  %1996 = vmatprep.subr.bf16.mxu1 %v2350_v49  ;;  %v774_v15 = vadd.f32 %v766_v44, %v703_v37  ;;  %v775_v16 = vadd.f32 %v767_v45, %v704_v3  ;;  %v787_v48 = vmul.f32 %v2458_v34, %v2466_v35 }
  0x57   : >> { %v794_v17 = vadd.f32 %v786_v46, %v723_v63  ;;  %v806_v18 = vmul.f32 %v1733_v33, %v2470_v8  ;;  %v807_v19 = vmul.f32 %v2458_v34, %v2470_v8  ;;  %v836_v20 = vmul.f32 %v2458_v34, %v2474_v36  ;;  %v1757_v63 = vld [vmem:[%s2398_s13 + $0xa0] sm:$0xff] }
  0x58   : >> { %v795_v6 = vadd.f32 %v787_v48, %v724_v0  ;;  %v837_v7 = vmul.f32 %v2493_v12, %v2474_v36  ;;  %v2508_v9 = vrot.slane %v3271_v1, %v2381_v58  ;;  %v2518_v39 = vrot.slane %v3271_v1, %v2384_v59  ;;  %v1758_v48 = vld [vmem:[%s2398_s13 + $0xa8] sm:$0xff] }
  0x59   : >> { %1977 = vmatpush3.bf16.msra.mxu0 %v2350_v49  ;;  %2004 = vmatpush3.bf16.msra.mxu1 %v2350_v49  ;;  %v814_v31 = vadd.f32 %v806_v18, %v743_v11  ;;  %v815_v37 = vadd.f32 %v807_v19, %v744_v14  ;;  %v844_v3 = vadd.f32 %v836_v20, %v774_v15  ;;  %v2541_v20 = vld [vmem:[%s2398_s13 + $0x68] sm:$0xff] }
  0x5a   : >> { %1978 = vmatprep.subr.bf16.mxu0 %v2354_v50  ;;  %1997 = vmatprep.subr.bf16.mxu1 %v2354_v50  ;;  %v845_v33 = vadd.f32 %v837_v7, %v775_v16  ;;  %v856_v49 = vmul.f32 %v2458_v34, %v2508_v9  ;;  %v857_v0 = vmul.f32 %v2493_v12, %v2508_v9 }
  0x5b   : >> { %v2522_v40 = vrot.slane %v3271_v1, %v2437_v42  ;;  %v2526_v11 = vrot.slane %v3270_v2, %v2362_v52  ;;  %v2530_v14 = vrot.slane %v3270_v2, %v2365_v53  ;;  %v2534_v15 = vrot.slane %v3270_v2, %v2368_v54  ;;  %3293 = vst [vmem:[#allocation29_spill] sm:$0xff] %v2541_v20 }
  0x5c   : >> { %v864_v16 = vadd.f32 %v856_v49, %v794_v17  ;;  %v865_v18 = vadd.f32 %v857_v0, %v795_v6  ;;  %v876_v19 = vmul.f32 %v2458_v34, %v2518_v39  ;;  %v877_v41 = vmul.f32 %v2493_v12, %v2518_v39 }
  0x5d   : >> { %1979 = vmatpush3.bf16.msra.mxu0 %v2354_v50  ;;  %2005 = vmatpush3.bf16.msra.mxu1 %v2354_v50  ;;  %v906_v43 = vmul.f32 %v2493_v12, %v2522_v40  ;;  %v907_v50 = vmul.f32 %v2541_v20, %v2522_v40  ;;  %v926_v44 = vmul.f32 %v2493_v12, %v2526_v11 }
  0x5e   : >> { %1980 = vmatprep.subr.bf16.mxu0 %v2358_v51  ;;  %1998 = vmatprep.subr.bf16.mxu1 %v2358_v51  ;;  %v884_v17 = vadd.f32 %v876_v19, %v814_v31  ;;  %v927_v45 = vmul.f32 %v2541_v20, %v2526_v11  ;;  %v946_v46 = vmul.f32 %v2493_v12, %v2530_v14 }
  0x5f   : >> { %v885_v6 = vadd.f32 %v877_v41, %v815_v37  ;;  %v914_v7 = vadd.f32 %v906_v43, %v844_v3  ;;  %v915_v49 = vadd.f32 %v907_v50, %v845_v33  ;;  %v947_v0 = vmul.f32 %v2541_v20, %v2530_v14 }
  0x60   : >> { %v934_v31 = vadd.f32 %v926_v44, %v864_v16  ;;  %v935_v19 = vadd.f32 %v927_v45, %v865_v18  ;;  %v954_v1 = vadd.f32 %v946_v46, %v884_v17  ;;  %v977_v37 = vmul.f32 %v1757_v63, %v2534_v15 }
  0x61   : >> { %1981 = vmatpush3.bf16.msra.mxu0 %v2358_v51  ;;  %2006 = vmatpush3.bf16.msra.mxu1 %v2358_v51  ;;  %v955_v21 = vadd.f32 %v947_v0, %v885_v6  ;;  %v978_v3 = vmul.f32 %v1758_v48, %v2534_v15  ;;  %v2569_v33 = vrot.slane %v3270_v2, %v2371_v55  ;;  %v2576_v51 = vld [vmem:[%s2398_s13 + $0xb0] sm:$0xff] }
  0x62   : >> { %1982 = vmatprep.subr.bf16.mxu0 %v2375_v56  ;;  %1999 = vmatprep.subr.bf16.mxu1 %v2375_v56  ;;  %v2573_v41 = vrot.slane %v3270_v2, %v2378_v57  ;;  %3294 = vst [vmem:[#allocation30_spill] sm:$0xff] %v2576_v51  ;;  %v2580_v16 = vrot.slane %v3270_v2, %v2381_v58 }
  0x63   : >> { %v2584_v18 = vrot.slane %v3270_v2, %v2384_v59  ;;  %v985_v43 = vadd.f32 %v977_v37, %v914_v7  ;;  %v986_v50 = vadd.f32 %v978_v3, %v915_v49  ;;  %v2588_v55 = vrot.slane %v3270_v2, %v2437_v42 }
  0x64   : >> { %v2592_v57 = vrot.slane %v3268_v4, %v2362_v52  ;;  %v997_v58 = vmul.f32 %v1757_v63, %v2569_v33  ;;  %v998_v17 = vmul.f32 %v1758_v48, %v2569_v33  ;;  %v1017_v59 = vmul.f32 %v1757_v63, %v2573_v41 }
  0x65   : >> { %3295 = vst [vmem:[#allocation31_spill] sm:$0xff] %v2584_v18  ;;  %3296 = vst [vmem:[#allocation32_spill] sm:$0xff] %v2588_v55  ;;  %1983 = vmatpush3.bf16.msra.mxu0 %v2375_v56  ;;  %2007 = vmatpush3.bf16.msra.mxu1 %v2375_v56  ;;  %v1018_v44 = vmul.f32 %v1758_v48, %v2573_v41  ;;  %v1047_v42 = vmul.f32 %v1758_v48, %v2580_v16 }
  0x66   : >> { %3297 = vst [vmem:[#allocation33_spill] sm:$0xff] %v2592_v57  ;;  %v1048_v45 = vmul.f32 %v2576_v51, %v2580_v16  ;;  %v1067_v52 = vmul.f32 %v1758_v48, %v2584_v18  ;;  %v1005_v46 = vadd.f32 %v997_v58, %v934_v31  ;;  %v1006_v6 = vadd.f32 %v998_v17, %v935_v19 }
  0x67   : >> { %v1025_v56 = vadd.f32 %v1017_v59, %v954_v1  ;;  %v1068_v7 = vmul.f32 %v2576_v51, %v2584_v18  ;;  %v1026_v49 = vadd.f32 %v1018_v44, %v955_v21  ;;  %v1055_v63 = vadd.f32 %v1047_v42, %v985_v43  ;;  %v2625_v43 = vld [vmem:[%s2398_s13 + $0x20] sm:$0xff] }
  0x68   : >> { %v1056_v0 = vadd.f32 %v1048_v45, %v986_v50  ;;  %v1087_v37 = vmul.f32 %v1758_v48, %v2588_v55  ;;  %v1075_v3 = vadd.f32 %v1067_v52, %v1005_v46  ;;  %v1088_v22 = vmul.f32 %v2576_v51, %v2588_v55  ;;  %v2628_v50 = vld [vmem:[%s2398_s13 + $0x28] sm:$0xff]  ;;  %v2643_v46 = vld [vmem:[%s2398_s13 + $0x30] sm:$0xff] }
  0x69   : >> { %v1076_v2 = vadd.f32 %v1068_v7, %v1006_v6  ;;  %v1117_v31 = vmul.f32 %v2576_v51, %v2592_v57  ;;  %v1118_v19 = vmul.f32 %v2610_v24, %v2592_v57  ;;  %v2618_v21 = vrot.slane %v3268_v4, %v2365_v53  ;;  %3299 = vst [vmem:[#allocation35_spill] sm:$0xff] %v2643_v46 }
  0x6a   : >> { %v1095_v1 = vadd.f32 %v1087_v37, %v1025_v56  ;;  %v2622_v48 = vrot.slane %v3268_v4, %v2368_v54  ;;  %v1096_v58 = vadd.f32 %v1088_v22, %v1026_v49  ;;  %v559_v52 = vmul.f32 %v2388_v60, %v2625_v43 }
  0x6b   : >> { %v1125_v17 = vadd.f32 %v1117_v31, %v1055_v63  ;;  %v1126_v59 = vadd.f32 %v1118_v19, %v1056_v0  ;;  %v1137_v44 = vmul.f32 %v2576_v51, %v2618_v21  ;;  %v1138_v42 = vmul.f32 %v2610_v24, %v2618_v21 }
  0x6c   : >> { %v1157_v53 = vmul.f32 %v2576_v51, %v2622_v48  ;;  %v1158_v54 = vmul.f32 %v2610_v24, %v2622_v48  ;;  %v560_v22 = vmul.f32 %v2388_v60, %v2628_v50  ;;  %v579_v37 = vmul.f32 %v2392_v61, %v2625_v43 }
  0x6d   : >> { %v1173_v45 = vrot.slane %v1125_v17, 7  ;;  %v1145_v6 = vadd.f32 %v1137_v44, %v1075_v3  ;;  %v1146_v56 = vadd.f32 %v1138_v42, %v1076_v2  ;;  %v1174_v49 = vrot.slane %v1126_v59, 7  ;;  %v2660_v44 = vld [vmem:[%s2398_s13 + $0x38] sm:$0xff] }
  0x6e   : >> { %v1165_v7 = vadd.f32 %v1157_v53, %v1095_v1  ;;  %v1166_v63 = vadd.f32 %v1158_v54, %v1096_v58  ;;  %v580_v31 = vmul.f32 %v2392_v61, %v2628_v50  ;;  %v629_v4 = vmul.f32 %v2407_v27, %v2628_v50  ;;  %3300 = vst [vmem:[#allocation36_spill] sm:$0xff] %v2660_v44 }
  0x6f   : >> { %v1181_v0 = vmul.f32 %v2281_v25, %v1173_v45  ;;  %v1182_v19 = vmul.f32 %v2281_v25, %v1174_v49  ;;  %v630_v2 = vmul.f32 %v2643_v46, %v2407_v27  ;;  %v649_v58 = vmul.f32 %v2411_v28, %v2628_v50 }
  0x70   : >> { %v1197_v17 = vrot.slane %v1165_v7, 1  ;;  %v1198_v1 = vrot.slane %v1166_v63, 1  ;;  %v650_v59 = vmul.f32 %v2643_v46, %v2411_v28  ;;  %v599_v54 = vmul.f32 %v2396_v62, %v2625_v43 }
  0x71   : >> { %v1189_v3 = vadd.f32 %v1181_v0, %v1145_v6  ;;  %v1190_v42 = vadd.f32 %v1182_v19, %v1146_v56  ;;  %v600_v45 = vmul.f32 %v2396_v62, %v2628_v50  ;;  %v637_v7 = vadd.f32 %v629_v4, %v559_v52  ;;  %v2679_v52 = vld [vmem:[%s2398_s13 + $0x70] sm:$0xff] }
  0x72   : >> { %v1205_v53 = vmul.f32 %v2284_v26, %v1197_v17  ;;  %v1206_v6 = vmul.f32 %v2284_v26, %v1198_v1  ;;  %v638_v49 = vadd.f32 %v630_v2, %v560_v22  ;;  %v669_v63 = vmul.f32 %v2415_v29, %v2628_v50  ;;  %3301 = vst [vmem:[#allocation37_spill] sm:$0xff] %v2679_v52 }
  0x73   : >> { %v670_v56 = vmul.f32 %v2643_v46, %v2415_v29  ;;  %v699_v19 = vmul.f32 %v2643_v46, %v2419_v30  ;;  %v700_v17 = vmul.f32 %v2660_v44, %v2419_v30  ;;  %v657_v24 = vadd.f32 %v649_v58, %v579_v37 }
  0x74   : >> { %v1213_v0 = vadd.f32 %v1205_v53, %v1189_v3  ;;  %v1214_v23 = vadd.f32 %v1206_v6, %v1190_v42  ;;  %v658_v51 = vadd.f32 %v650_v59, %v580_v31  ;;  %v719_v4 = vmul.f32 %v2643_v46, %v2450_v10  ;;  %v2687_v53 = vld [vmem:[%s2398_s13 + $0x78] sm:$0xff] }
  0x75   : >> { %v677_v2 = vadd.f32 %v669_v63, %v599_v54  ;;  %v678_v3 = vadd.f32 %v670_v56, %v600_v45  ;;  %v720_v1 = vmul.f32 %v2660_v44, %v2450_v10  ;;  %v707_v37 = vadd.f32 %v699_v19, %v637_v7 }
  0x76   : >> { %v2682_v22 = vadd.f32 %v2185_v5, %v1213_v0  ;;  %v2690_v20 = vadd.f32 %v2185_v5, %v1214_v23  ;;  %v708_v31 = vadd.f32 %v700_v17, %v638_v49  ;;  %v739_v58 = vmul.f32 %v2643_v46, %v2454_v32 }
  0x77   : >> { %v740_v42 = vmul.f32 %v2660_v44, %v2454_v32  ;;  %v770_v54 = vmul.f32 %v2679_v52, %v2462_v47  ;;  %v727_v6 = vadd.f32 %v719_v4, %v657_v24  ;;  %v771_v23 = vmul.f32 %v2687_v53, %v2462_v47 }
  0x78   : >> { %v2695_v59 = vmul.f32 0.70710677, %v2682_v22  ;;  %v2702_v45 = vmul.f32 0.70710677, %v2690_v20  ;;  %v728_v49 = vadd.f32 %v720_v1, %v658_v51  ;;  %v747_v63 = vadd.f32 %v739_v58, %v677_v2 }
  0x79   : >> { %v748_v0 = vadd.f32 %v740_v42, %v678_v3  ;;  %v778_v19 = vadd.f32 %v770_v54, %v707_v37  ;;  %v779_v17 = vadd.f32 %v771_v23, %v708_v31  ;;  %v790_v44 = vmul.f32 %v2679_v52, %v2466_v35  ;;  %v2717_v3 = vld [vmem:[%s2398_s13 + $0x80] sm:$0xff] }
  0x7a   : >> { %v1251_v7 = vand.u32 2147483647, %v2695_v59  ;;  %v1252_v56 = vand.u32 2147483647, %v2702_v45  ;;  %v791_v24 = vmul.f32 %v2687_v53, %v2466_v35  ;;  %v810_v4 = vmul.f32 %v2679_v52, %v2470_v8  ;;  %3302 = vst [vmem:[#allocation38_spill] sm:$0xff] %v2717_v3 }
  0x7b   : >> { %v798_v51 = vadd.f32 %v790_v44, %v727_v6  ;;  %v811_v2 = vmul.f32 %v2687_v53, %v2470_v8  ;;  %v840_v35 = vmul.f32 %v2687_v53, %v2474_v36  ;;  %v841_v44 = vmul.f32 %v2717_v3, %v2474_v36 }
  0x7c   : >> { %v1259_v46 = vmul.f32 0.3275911, %v1251_v7  ;;  %v1355_v34 = vsub.f32 0.0, %v1251_v7  ;;  %v1260_v12 = vmul.f32 0.3275911, %v1252_v56  ;;  %v1356_v47 = vsub.f32 0.0, %v1252_v56 }
  0x7d   : >> { %v799_v31 = vadd.f32 %v791_v24, %v728_v49  ;;  %v818_v58 = vadd.f32 %v810_v4, %v747_v63  ;;  %v819_v23 = vadd.f32 %v811_v2, %v748_v0  ;;  %v860_v6 = vmul.f32 %v2687_v53, %v2508_v9 }
  0x7e   : >> { %v1267_v1 = vadd.f32 1.0, %v1259_v46  ;;  %v1363_v37 = vmul.f32 %v1355_v34, %v1251_v7  ;;  %v1268_v42 = vadd.f32 1.0, %v1260_v12  ;;  %v1364_v54 = vmul.f32 %v1356_v47, %v1252_v56  ;;  %v2732_v56 = vld [vmem:[%s2398_s13 + $0x88] sm:$0xff] }
  0x7f   : >> { %v848_v46 = vadd.f32 %v840_v35, %v778_v19  ;;  %v861_v12 = vmul.f32 %v2717_v3, %v2508_v9  ;;  %v849_v47 = vadd.f32 %v841_v44, %v779_v17  ;;  %v868_v7 = vadd.f32 %v860_v6, %v798_v51  ;;  %3303 = vst [vmem:[#allocation39_spill] sm:$0xff] %v2732_v56  ;;  %v2737_v19 = vld [vmem:[%s2398_s13 + $0xc0] sm:$0xff]  ;;  %v2746_v51 = vld [vmem:[%s2398_s13 + $0xc8] sm:$0xff]  ;;  %v2755_v6 = vld [vmem:[%s2398_s13 + $0xd0] sm:$0xff] }
  0x80   : >> { %2025 = vrcp.f32 %v1267_v1  ;;  %v1371_v52 = vmul.f32 1.442695, %v1363_v37  ;;  %v1373_v34 = vmul.f32 1.442695, %v1364_v54  ;;  %v880_v49 = vmul.f32 %v2687_v53, %v2518_v39  ;;  %3304 = vst [vmem:[#allocation40_spill] sm:$0xff] %v2737_v19  ;;  %3305 = vst [vmem:[#allocation41_spill] sm:$0xff] %v2746_v51 }
  0x81   : >> { %2027 = vrcp.f32 %v1268_v42  ;;  %v869_v63 = vadd.f32 %v861_v12, %v799_v31  ;;  %v881_v0 = vmul.f32 %v2717_v3, %v2518_v39  ;;  %v910_v35 = vmul.f32 %v2717_v3, %v2522_v40 }
  0x82   : >> { %2029 = vpow2.f32 %v1371_v52  ;;  %v888_v24 = vadd.f32 %v880_v49, %v818_v58  ;;  %v911_v52 = vmul.f32 %v2732_v56, %v2522_v40  ;;  %v930_v17 = vmul.f32 %v2717_v3, %v2526_v11 }
  0x83   : >> { %2031 = vpow2.f32 %v1373_v34  ;;  %v931_v4 = vmul.f32 %v2732_v56, %v2526_v11  ;;  %v889_v2 = vadd.f32 %v881_v0, %v819_v23  ;;  %v918_v1 = vadd.f32 %v910_v35, %v848_v46 }
  0x84   : >> { %v950_v37 = vmul.f32 %v2717_v3, %v2530_v14  ;;  %v951_v31 = vmul.f32 %v2732_v56, %v2530_v14  ;;  %v919_v58 = vadd.f32 %v911_v52, %v849_v47  ;;  %v938_v42 = vadd.f32 %v930_v17, %v868_v7 }
  0x85   : >> { %v939_v54 = vadd.f32 %v931_v4, %v869_v63  ;;  %v981_v44 = vmul.f32 %v2737_v19, %v2534_v15  ;;  %v982_v23 = vmul.f32 %v2746_v51, %v2534_v15  ;;  %v1001_v46 = vmul.f32 %v2737_v19, %v2569_v33 }
  0x86   : >> { %v958_v34 = vadd.f32 %v950_v37, %v888_v24  ;;  %v959_v12 = vadd.f32 %v951_v31, %v889_v2  ;;  %v1002_v0 = vmul.f32 %v2746_v51, %v2569_v33  ;;  %v1021_v47 = vmul.f32 %v2737_v19, %v2573_v41 }
  0x87   : >> { %v989_v49 = vadd.f32 %v981_v44, %v918_v1  ;;  %v1022_v7 = vmul.f32 %v2746_v51, %v2573_v41  ;;  %v990_v63 = vadd.f32 %v982_v23, %v919_v58  ;;  %v1009_v35 = vadd.f32 %v1001_v46, %v938_v42 }
  0x88   : >> { %v1051_v24 = vmul.f32 %v2746_v51, %v2580_v16  ;;  %v1052_v52 = vmul.f32 %v2755_v6, %v2580_v16  ;;  %v1010_v4 = vadd.f32 %v1002_v0, %v939_v54  ;;  %v1029_v2 = vadd.f32 %v1021_v47, %v958_v34 }
  0x89   : >> { %v1030_v1 = vadd.f32 %v1022_v7, %v959_v12  ;;  %v1071_v37 = vmul.f32 %v2746_v51, %v2584_v18  ;;  %v1072_v23 = vmul.f32 %v2755_v6, %v2584_v18  ;;  %v1091_v54 = vmul.f32 %v2746_v51, %v2588_v55  ;;  %v2788_v12 = vld [vmem:[%s2398_s13 + $0xd8] sm:$0xff] }
  0x8a   : >> { %v2771_v17 = vpop.eup %2025  ;;  %v1059_v42 = vadd.f32 %v1051_v24, %v989_v49  ;;  %v1060_v44 = vadd.f32 %v1052_v52, %v990_v63  ;;  %v1092_v34 = vmul.f32 %v2755_v6, %v2588_v55  ;;  %3306 = vst [vmem:[#allocation42_spill] sm:$0xff] %v2788_v12  ;;  %v1121_v7 = vmul.f32 %v2755_v6, %v2592_v57 }
  0x8b   : >> { %v2775_v31 = vpop.eup %2027  ;;  %v1283_v58 = vmul.f32 1.0614054, %v2771_v17  ;;  %v1079_v3 = vadd.f32 %v1071_v37, %v1009_v35  ;;  %v1080_v47 = vadd.f32 %v1072_v23, %v1010_v4  ;;  %v1122_v63 = vmul.f32 %v2788_v12, %v2592_v57 }
  0x8c   : >> { %v2780_v46 = vpop.eup %2029  ;;  %v1284_v56 = vmul.f32 1.0614054, %v2775_v31  ;;  %v1099_v35 = vadd.f32 %v1091_v54, %v1029_v2  ;;  %v1100_v52 = vadd.f32 %v1092_v34, %v1030_v1  ;;  %v1141_v37 = vmul.f32 %v2755_v6, %v2618_v21 }
  0x8d   : >> { %v2790_v0 = vpop.eup %2031  ;;  %v1291_v49 = vadd.f32 -1.4531521, %v1283_v58  ;;  %v1129_v55 = vadd.f32 %v1121_v7, %v1059_v42  ;;  %v1130_v18 = vadd.f32 %v1122_v63, %v1060_v44  ;;  %v1142_v58 = vmul.f32 %v2788_v12, %v2618_v21 }
  0x8e   : >> { %v1292_v24 = vadd.f32 -1.4531521, %v1284_v56  ;;  %v1149_v23 = vadd.f32 %v1141_v37, %v1079_v3  ;;  %v1161_v19 = vmul.f32 %v2755_v6, %v2622_v48  ;;  %v1162_v56 = vmul.f32 %v2788_v12, %v2622_v48 }
  0x8f   : >> { %v1299_v51 = vmul.f32 %v2771_v17, %v1291_v49  ;;  %v1150_v1 = vadd.f32 %v1142_v58, %v1080_v47  ;;  %v1177_v54 = vrot.slane %v1129_v55, 7  ;;  %v1178_v34 = vrot.slane %v1130_v18, 7 }
  0x90   : >> { %v1300_v4 = vmul.f32 %v2775_v31, %v1292_v24  ;;  %v1169_v49 = vadd.f32 %v1161_v19, %v1099_v35  ;;  %v1170_v42 = vadd.f32 %v1162_v56, %v1100_v52  ;;  %v2810_v3 = vmul.f32 0.5, %v2682_v22 }
  0x91   : >> { %v1307_v2 = vadd.f32 1.4214138, %v1299_v51  ;;  %v1185_v7 = vmul.f32 %v2281_v25, %v1177_v54  ;;  %v1186_v63 = vmul.f32 %v2281_v25, %v1178_v34  ;;  %v2814_v51 = vmul.f32 0.5, %v2690_v20 }
  0x92   : >> { %v1308_v57 = vadd.f32 1.4214138, %v1300_v4  ;;  %v1201_v37 = vrot.slane %v1169_v49, 1  ;;  %v1202_v12 = vrot.slane %v1170_v42, 1  ;;  %v557_v58 = vmul.f32 %v2403_v13, %v2388_v60 }
  0x93   : >> { %v1315_v44 = vmul.f32 %v2771_v17, %v1307_v2  ;;  %v1193_v55 = vadd.f32 %v1185_v7, %v1149_v23  ;;  %v1194_v19 = vadd.f32 %v1186_v63, %v1150_v1  ;;  %v577_v20 = vmul.f32 %v2403_v13, %v2392_v61 }
  0x94   : >> { %v1316_v24 = vmul.f32 %v2775_v31, %v1308_v57  ;;  %v1209_v35 = vmul.f32 %v2284_v26, %v1201_v37  ;;  %v1210_v52 = vmul.f32 %v2284_v26, %v1202_v12  ;;  %v558_v57 = vmul.f32 %v2429_v38, %v2388_v60 }
  0x95   : >> { %v1323_v18 = vadd.f32 -0.28449672, %v1315_v44  ;;  %v627_v4 = vmul.f32 %v2429_v38, %v2407_v27  ;;  %vm1403_vm2 = vcmp.ge.f32.partialorder %v2695_v59, 0.0  ;;  %v628_v2 = vmul.f32 %v2407_v27, %v2625_v43 }
  0x96   : >> { %v1324_v47 = vadd.f32 -0.28449672, %v1316_v24  ;;  %v1217_v56 = vadd.f32 %v1209_v35, %v1193_v55  ;;  %v1218_v12 = vadd.f32 %v1210_v52, %v1194_v19  ;;  %vm1404_vm3 = vcmp.ge.f32.partialorder %v2702_v45, 0.0 }
  0x97   : >> { %v1331_v22 = vmul.f32 %v2771_v17, %v1323_v18  ;;  %v578_v54 = vmul.f32 %v2429_v38, %v2392_v61  ;;  %v647_v34 = vmul.f32 %v2429_v38, %v2411_v28  ;;  %v648_v49 = vmul.f32 %v2411_v28, %v2625_v43 }
  0x98   : >> { %v1332_v23 = vmul.f32 %v2775_v31, %v1324_v47  ;;  %v2839_v44 = vadd.f32 %v2185_v5, %v1217_v56  ;;  %v2842_v7 = vadd.f32 %v2185_v5, %v1218_v12  ;;  %v597_v63 = vmul.f32 %v2403_v13, %v2396_v62 }
  0x99   : >> { %v1339_v1 = vadd.f32 0.2548296, %v1331_v22  ;;  %v598_v37 = vmul.f32 %v2429_v38, %v2396_v62  ;;  %v667_v18 = vmul.f32 %v2429_v38, %v2415_v29  ;;  %v668_v55 = vmul.f32 %v2415_v29, %v2625_v43 }
  0x9a   : >> { %v1340_v42 = vadd.f32 0.2548296, %v1332_v23  ;;  %v2855_v47 = vmul.f32 0.70710677, %v2839_v44  ;;  %v635_v35 = vadd.f32 %v627_v4, %v557_v58  ;;  %v636_v52 = vadd.f32 %v628_v2, %v558_v57 }
  0x9b   : >> { %v1347_v24 = vmul.f32 %v2771_v17, %v1339_v1  ;;  %v2859_v17 = vmul.f32 0.70710677, %v2842_v7  ;;  %v655_v22 = vadd.f32 %v647_v34, %v577_v20  ;;  %v656_v23 = vadd.f32 %v648_v49, %v578_v54 }
  0x9c   : >> { %v1348_v19 = vmul.f32 %v2775_v31, %v1340_v42  ;;  %v1255_v38 = vand.u32 2147483647, %v2855_v47  ;;  %v675_v12 = vadd.f32 %v667_v18, %v597_v63  ;;  %v697_v31 = vmul.f32 %v2419_v30, %v2625_v43 }
  0x9d   : >> { %v1387_v13 = vmul.f32 %v2780_v46, %v1347_v24  ;;  %v1256_v42 = vand.u32 2147483647, %v2859_v17  ;;  %v676_v58 = vadd.f32 %v668_v55, %v598_v37  ;;  %v698_v46 = vmul.f32 %v2419_v30, %v2628_v50 }
  0x9e   : >> { %v1388_v56 = vmul.f32 %v2790_v0, %v1348_v19  ;;  %v1263_v4 = vmul.f32 0.3275911, %v1255_v38  ;;  %v1359_v2 = vsub.f32 0.0, %v1255_v38  ;;  %v705_v20 = vadd.f32 %v697_v31, %v635_v35 }
  0x9f   : >> { %v1395_v1 = vsub.f32 1.0, %v1387_v13  ;;  %v1264_v34 = vmul.f32 0.3275911, %v1256_v42  ;;  %v1360_v0 = vsub.f32 0.0, %v1256_v42  ;;  %v706_v49 = vadd.f32 %v698_v46, %v636_v52 }
  0xa0   : >> { %v1396_v57 = vsub.f32 1.0, %v1388_v56  ;;  %v1271_v63 = vadd.f32 1.0, %v1263_v4  ;;  %v1367_v18 = vmul.f32 %v1359_v2, %v1255_v38  ;;  %v717_v19 = vmul.f32 %v2450_v10, %v2625_v43 }
  0xa1   : >> { %v1411_v54 = vsub.f32 0.0, %v1395_v1  ;;  %v1272_v55 = vadd.f32 1.0, %v1264_v34  ;;  %v1368_v13 = vmul.f32 %v1360_v0, %v1256_v42  ;;  %v718_v56 = vmul.f32 %v2450_v10, %v2628_v50  ;;  %v3309_v0 = vld [vmem:[#allocation25_spill] sm:$0xff] }
  0xa2   : >> { %v1412_v24 = vsub.f32 0.0, %v1396_v57  ;;  %2033 = vrcp.f32 %v1271_v63  ;;  %v1379_v52 = vmul.f32 1.442695, %v1367_v18  ;;  %v725_v4 = vadd.f32 %v717_v19, %v655_v22  ;;  %v3310_v22 = vld [vmem:[#allocation29_spill] sm:$0xff]  ;;  %v3311_v18 = vld [vmem:[#allocation27_spill] sm:$0xff] }
  0xa3   : >> { %v1419_v37 = vsel %vm1403_vm2, %v1395_v1, %v1411_v54  ;;  %2035 = vrcp.f32 %v1272_v55  ;;  %v1381_v38 = vmul.f32 1.442695, %v1368_v13  ;;  %v726_v59 = vadd.f32 %v718_v56, %v656_v23  ;;  %v3308_v54 = vld [vmem:[#allocation28_spill] sm:$0xff] }
  0xa4   : >> { %v1420_v35 = vsel %vm1404_vm3, %v1396_v57, %v1412_v24  ;;  %v1427_v31 = vadd.f32 1.0, %v1419_v37  ;;  %2037 = vpow2.f32 %v1379_v52  ;;  %v737_v1 = vmul.f32 %v2454_v32, %v2625_v43  ;;  %v3307_v57 = vld [vmem:[#allocation26_spill] sm:$0xff]  ;;  %v3312_v52 = vld [vmem:[#allocation37_spill] sm:$0xff] }
  0xa5   : >> { %v1428_v46 = vadd.f32 1.0, %v1420_v35  ;;  %2039 = vpow2.f32 %v1381_v38  ;;  %v738_v45 = vmul.f32 %v2454_v32, %v2628_v50  ;;  %v768_v34 = vmul.f32 %v3308_v54, %v3307_v57 }
  0xa6   : >> { %v1435_v2 = vmul.f32 %v1427_v31, %v2810_v3  ;;  %v745_v63 = vadd.f32 %v737_v1, %v675_v12  ;;  %v769_v3 = vmul.f32 %v3310_v22, %v3307_v57  ;;  %v788_v23 = vmul.f32 %v3308_v54, %v3311_v18 }
  0xa7   : >> { %v1436_v42 = vmul.f32 %v1428_v46, %v2814_v51  ;;  %v746_v19 = vadd.f32 %v738_v45, %v676_v58  ;;  %v776_v51 = vadd.f32 %v768_v34, %v705_v20  ;;  %v789_v37 = vmul.f32 %v3310_v22, %v3311_v18 }
  0xa8   : >> { %v1443_v24 = vadd.f32 %v3309_v0, %v1435_v2  ;;  %v777_v50 = vadd.f32 %v769_v3, %v706_v49  ;;  %v796_v55 = vadd.f32 %v788_v23, %v725_v4  ;;  %v808_v13 = vmul.f32 %v3308_v54, %v2470_v8 }
  0xa9   : >> { %v1444_v43 = vadd.f32 %v3308_v54, %v1436_v42  ;;  %v809_v12 = vmul.f32 %v3310_v22, %v2470_v8  ;;  %v797_v35 = vadd.f32 %v789_v37, %v726_v59  ;;  %v838_v31 = vmul.f32 %v3310_v22, %v2474_v36 }
  0xaa   : >> { %v839_v58 = vmul.f32 %v3312_v52, %v2474_v36  ;;  %v816_v20 = vadd.f32 %v808_v13, %v745_v63  ;;  %v858_v49 = vmul.f32 %v3310_v22, %v2508_v9  ;;  %v859_v38 = vmul.f32 %v3312_v52, %v2508_v9 }
  0xab   : >> { %v1451_v56 = vpack.c.bf16 %v1444_v43, %v1443_v24  ;;  %v817_v46 = vadd.f32 %v809_v12, %v746_v19  ;;  %v846_v4 = vadd.f32 %v838_v31, %v776_v51  ;;  %v878_v59 = vmul.f32 %v3310_v22, %v2518_v39 }
  0xac   : >> { %v847_v2 = vadd.f32 %v839_v58, %v777_v50  ;;  %v879_v1 = vmul.f32 %v3312_v52, %v2518_v39  ;;  %v2908_v42 = vpop.eup %2033  ;;  %v866_v45 = vadd.f32 %v858_v49, %v796_v55  ;;  %v867_v54 = vadd.f32 %v859_v38, %v797_v35  ;;  %v3314_v49 = vld [vmem:[#allocation34_spill] sm:$0xff] }
  0xad   : >> { %1984 = vmatprep.mubr.bf16.mxu0 %v1451_v56  ;;  %v908_v34 = vmul.f32 %v3312_v52, %v2522_v40  ;;  %v909_v0 = vmul.f32 %v2687_v53, %v2522_v40  ;;  %v2914_v24 = vpop.eup %2035  ;;  %v1287_v63 = vmul.f32 1.0614054, %v2908_v42  ;;  %v886_v3 = vadd.f32 %v878_v59, %v816_v20  ;;  %v3313_v20 = vld [vmem:[#allocation30_spill] sm:$0xff] }
  0xae   : >> { %v887_v23 = vadd.f32 %v879_v1, %v817_v46  ;;  %v928_v22 = vmul.f32 %v3312_v52, %v2526_v11  ;;  %v2919_v43 = vpop.eup %2037  ;;  %v1288_v19 = vmul.f32 1.0614054, %v2914_v24  ;;  %v929_v50 = vmul.f32 %v2687_v53, %v2526_v11 }
  0xaf   : >> { %v916_v51 = vadd.f32 %v908_v34, %v846_v4  ;;  %v917_v37 = vadd.f32 %v909_v0, %v847_v2  ;;  %v2924_v55 = vpop.eup %2039  ;;  %v1295_v13 = vadd.f32 -1.4531521, %v1287_v63  ;;  %v948_v56 = vmul.f32 %v3312_v52, %v2530_v14 }
  0xb0   : >> { %v936_v12 = vadd.f32 %v928_v22, %v866_v45  ;;  %v949_v35 = vmul.f32 %v2687_v53, %v2530_v14  ;;  %v1296_v31 = vadd.f32 -1.4531521, %v1288_v19  ;;  %v937_v58 = vadd.f32 %v929_v50, %v867_v54 }
  0xb1   : >> { %v979_v46 = vmul.f32 %v3313_v20, %v2534_v15  ;;  %v980_v38 = vmul.f32 %v3314_v49, %v2534_v15  ;;  %v1303_v4 = vmul.f32 %v2908_v42, %v1295_v13  ;;  %v956_v2 = vadd.f32 %v948_v56, %v886_v3  ;;  %v3315_v13 = vld [vmem:[#allocation40_spill] sm:$0xff] }
  0xb2   : >> { %v957_v59 = vadd.f32 %v949_v35, %v887_v23  ;;  %v999_v1 = vmul.f32 %v3313_v20, %v2569_v33  ;;  %v1304_v52 = vmul.f32 %v2914_v24, %v1296_v31  ;;  %v1000_v54 = vmul.f32 %v3314_v49, %v2569_v33  ;;  %v3316_v31 = vld [vmem:[#allocation31_spill] sm:$0xff] }
  0xb3   : >> { %v987_v45 = vadd.f32 %v979_v46, %v916_v51  ;;  %v988_v34 = vadd.f32 %v980_v38, %v917_v37  ;;  %v1311_v0 = vadd.f32 1.4214138, %v1303_v4  ;;  %v1019_v22 = vmul.f32 %v3313_v20, %v2573_v41 }
  0xb4   : >> { %v1007_v63 = vadd.f32 %v999_v1, %v936_v12  ;;  %v1020_v19 = vmul.f32 %v3314_v49, %v2573_v41  ;;  %v1312_v3 = vadd.f32 1.4214138, %v1304_v52  ;;  %v1008_v23 = vadd.f32 %v1000_v54, %v937_v58  ;;  %v3317_v52 = vld [vmem:[#allocation32_spill] sm:$0xff] }
  0xb5   : >> { %v1049_v50 = vmul.f32 %v3314_v49, %v2580_v16  ;;  %v1050_v51 = vmul.f32 %v3315_v13, %v2580_v16  ;;  %v1319_v37 = vmul.f32 %v2908_v42, %v1311_v0  ;;  %v1027_v56 = vadd.f32 %v1019_v22, %v956_v2  ;;  %v3318_v22 = vld [vmem:[#allocation33_spill] sm:$0xff] }
  0xb6   : >> { %v1028_v35 = vadd.f32 %v1020_v19, %v957_v59  ;;  %v1069_v12 = vmul.f32 %v3314_v49, %v3316_v31  ;;  %v1320_v20 = vmul.f32 %v2914_v24, %v1312_v3  ;;  %v1070_v58 = vmul.f32 %v3315_v13, %v3316_v31  ;;  %v3319_v3 = vld [vmem:[#allocation41_spill] sm:$0xff] }
  0xb7   : >> { %v1057_v46 = vadd.f32 %v1049_v50, %v987_v45  ;;  %v1058_v38 = vadd.f32 %v1050_v51, %v988_v34  ;;  %v1327_v4 = vadd.f32 -0.28449672, %v1319_v37  ;;  %v1089_v54 = vmul.f32 %v3314_v49, %v3317_v52 }
  0xb8   : >> { %v1077_v1 = vadd.f32 %v1069_v12, %v1007_v63  ;;  %v1090_v0 = vmul.f32 %v3315_v13, %v3317_v52  ;;  %v1328_v2 = vadd.f32 -0.28449672, %v1320_v20  ;;  %v1078_v59 = vadd.f32 %v1070_v58, %v1008_v23 }
  0xb9   : >> { %v1119_v19 = vmul.f32 %v3315_v13, %v3318_v22  ;;  %v1120_v45 = vmul.f32 %v3319_v3, %v3318_v22  ;;  %v1335_v34 = vmul.f32 %v2908_v42, %v1327_v4  ;;  %v1097_v50 = vadd.f32 %v1089_v54, %v1027_v56 }
  0xba   : >> { %v1098_v51 = vadd.f32 %v1090_v0, %v1028_v35  ;;  %v1139_v63 = vmul.f32 %v3315_v13, %v2618_v21  ;;  %v1336_v49 = vmul.f32 %v2914_v24, %v1328_v2  ;;  %v1140_v23 = vmul.f32 %v3319_v3, %v2618_v21 }
  0xbb   : >> { %v1127_v37 = vadd.f32 %v1119_v19, %v1057_v46  ;;  %v1128_v12 = vadd.f32 %v1120_v45, %v1058_v38  ;;  %v1343_v20 = vadd.f32 0.2548296, %v1335_v34  ;;  %v1159_v52 = vmul.f32 %v3315_v13, %v2622_v48 }
  0xbc   : >> { %v1147_v58 = vadd.f32 %v1139_v63, %v1077_v1  ;;  %v1160_v4 = vmul.f32 %v3319_v3, %v2622_v48  ;;  %v1344_v56 = vadd.f32 0.2548296, %v1336_v49  ;;  %v1148_v35 = vadd.f32 %v1140_v23, %v1078_v59  ;;  %v3320_v63 = vld [vmem:[#allocation35_spill] sm:$0xff] }
  0xbd   : >> { %v1175_v54 = vrot.slane %v1127_v37, 7  ;;  %v1176_v0 = vrot.slane %v1128_v12, 7  ;;  %v1239_v22 = vmul.f32 0.5, %v2839_v44  ;;  %v1351_v46 = vmul.f32 %v2908_v42, %v1343_v20  ;;  %v3321_v37 = vld [vmem:[#allocation36_spill] sm:$0xff] }
  0xbe   : >> { %v1167_v38 = vadd.f32 %v1159_v52, %v1097_v50  ;;  %v1168_v2 = vadd.f32 %v1160_v4, %v1098_v51  ;;  %v1240_v19 = vmul.f32 0.5, %v2842_v7  ;;  %v1352_v1 = vmul.f32 %v2914_v24, %v1344_v56  ;;  %v1724_v50 = vld [vmem:[%s2398_s13 + $0x40] sm:$0xff] }
  0xbf   : >> { %v1183_v13 = vmul.f32 %v2281_v25, %v1175_v54  ;;  %v1184_v45 = vmul.f32 %v2281_v25, %v1176_v0  ;;  %v1391_v3 = vmul.f32 %v2919_v43, %v1351_v46  ;;  %vm1407_vm4 = vcmp.ge.f32.partialorder %v2855_v47, 0.0 }
  0xc0   : >> { %v1199_v59 = vrot.slane %v1167_v38, 1  ;;  %v1200_v34 = vrot.slane %v1168_v2, 1  ;;  %v1392_v44 = vmul.f32 %v2924_v55, %v1352_v1  ;;  %vm1408_vm5 = vcmp.ge.f32.partialorder %v2859_v17, 0.0 }
  0xc1   : >> { %v1191_v42 = vadd.f32 %v1183_v13, %v1147_v58  ;;  %v1192_v52 = vadd.f32 %v1184_v45, %v1148_v35  ;;  %v1399_v7 = vsub.f32 1.0, %v1391_v3  ;;  %v561_v49 = vmul.f32 %v3320_v63, %v2388_v60 }
  0xc2   : >> { %v1207_v24 = vmul.f32 %v2284_v26, %v1199_v59  ;;  %v1208_v51 = vmul.f32 %v2284_v26, %v1200_v34  ;;  %v1400_v43 = vsub.f32 1.0, %v1392_v44  ;;  %v562_v12 = vmul.f32 %v3321_v37, %v2388_v60 }
  0xc3   : >> { %v581_v55 = vmul.f32 %v3320_v63, %v2392_v61  ;;  %v631_v23 = vmul.f32 %v3321_v37, %v2407_v27  ;;  %v1415_v20 = vsub.f32 0.0, %v1399_v7  ;;  %v632_v56 = vmul.f32 %v1724_v50, %v2407_v27 }
  0xc4   : >> { %v1215_v58 = vadd.f32 %v1207_v24, %v1191_v42  ;;  %v1216_v4 = vadd.f32 %v1208_v51, %v1192_v52  ;;  %v1416_v35 = vsub.f32 0.0, %v1400_v43  ;;  %v582_v54 = vmul.f32 %v3321_v37, %v2392_v61  ;;  %v1732_v52 = vld [vmem:[%s2398_s13 + $0x48] sm:$0xff] }
  0xc5   : >> { %v601_v0 = vmul.f32 %v3320_v63, %v2396_v62  ;;  %v651_v60 = vmul.f32 %v3321_v37, %v2411_v28  ;;  %v1423_v46 = vsel %vm1407_vm4, %v1399_v7, %v1415_v20  ;;  %v652_v27 = vmul.f32 %v1724_v50, %v2411_v28 }
  0xc6   : >> { %v3003_v38 = vadd.f32 %v2185_v5, %v1215_v58  ;;  %v3006_v2 = vadd.f32 %v2185_v5, %v1216_v4  ;;  %v1424_v61 = vsel %vm1408_vm5, %v1400_v43, %v1416_v35  ;;  %v1431_v1 = vadd.f32 1.0, %v1423_v46 }
  0xc7   : >> { %v602_v13 = vmul.f32 %v3321_v37, %v2396_v62  ;;  %v671_v47 = vmul.f32 %v3321_v37, %v2415_v29  ;;  %v1432_v45 = vadd.f32 1.0, %v1424_v61  ;;  %v639_v59 = vadd.f32 %v631_v23, %v561_v49 }
  0xc8   : >> { %v3016_v3 = vmul.f32 0.70710677, %v3003_v38  ;;  %v640_v34 = vadd.f32 %v632_v56, %v562_v12  ;;  %v1439_v44 = vmul.f32 %v1431_v1, %v1239_v22  ;;  %v3019_v42 = vmul.f32 0.70710677, %v3006_v2  ;;  %v3322_v22 = vld [vmem:[#allocation38_spill] sm:$0xff] }
  0xc9   : >> { %v659_v28 = vadd.f32 %v651_v60, %v581_v55  ;;  %v672_v17 = vmul.f32 %v1724_v50, %v2415_v29  ;;  %v1440_v7 = vmul.f32 %v1432_v45, %v1240_v19  ;;  %v660_v24 = vadd.f32 %v652_v27, %v582_v54 }
  0xca   : >> { %v1253_v62 = vand.u32 2147483647, %v3016_v3  ;;  %v701_v51 = vmul.f32 %v1724_v50, %v2419_v30  ;;  %v1447_v63 = vadd.f32 %v2687_v53, %v1439_v44  ;;  %v1254_v43 = vand.u32 2147483647, %v3019_v42 }
  0xcb   : >> { %v679_v49 = vadd.f32 %v671_v47, %v601_v0  ;;  %v680_v37 = vadd.f32 %v672_v17, %v602_v13  ;;  %v1448_v12 = vadd.f32 %v3322_v22, %v1440_v7  ;;  %v702_v55 = vmul.f32 %v1732_v52, %v2419_v30 }
  0xcc   : >> { %v1261_v23 = vmul.f32 0.3275911, %v1253_v62  ;;  %v1357_v20 = vsub.f32 0.0, %v1253_v62  ;;  %v1262_v29 = vmul.f32 0.3275911, %v1254_v43  ;;  %v1358_v58 = vsub.f32 0.0, %v1254_v43 }
  0xcd   : >> { %v709_v19 = vadd.f32 %v701_v51, %v639_v59  ;;  %v721_v4 = vmul.f32 %v1724_v50, %v2450_v10  ;;  %v1453_v56 = vpack.c.bf16 %v1448_v12, %v1447_v63  ;;  %v710_v60 = vadd.f32 %v702_v55, %v640_v34 }
  0xce   : >> { %v1269_v35 = vadd.f32 1.0, %v1261_v23  ;;  %v1365_v54 = vmul.f32 %v1357_v20, %v1253_v62  ;;  %v1270_v53 = vadd.f32 1.0, %v1262_v29  ;;  %v1366_v46 = vmul.f32 %v1358_v58, %v1254_v43 }
  0xcf   : >> { %v722_v0 = vmul.f32 %v1732_v52, %v2450_v10  ;;  %v729_v27 = vadd.f32 %v721_v4, %v659_v28  ;;  %1988 = vmatprep.mubr.bf16.mxu1 %v1453_v56  ;;  %v741_v30 = vmul.f32 %v1724_v50, %v2454_v32  ;;  %v742_v1 = vmul.f32 %v1732_v52, %v2454_v32  ;;  %v3323_v10 = vld [vmem:[#allocation39_spill] sm:$0xff]  ;;  %v3038_v28 = vld [vmem:[%s2398_s13 + $0x90] sm:$0xff] }
  0xd0   : >> { %2041 = vrcp.f32 %v1269_v35  ;;  %v1375_v61 = vmul.f32 1.442695, %v1365_v54  ;;  %v1377_v13 = vmul.f32 1.442695, %v1366_v46  ;;  %v772_v45 = vmul.f32 %v3322_v22, %v3307_v57 }
  0xd1   : >> { %2043 = vrcp.f32 %v1270_v53  ;;  %v730_v47 = vadd.f32 %v722_v0, %v660_v24  ;;  %v749_v59 = vadd.f32 %v741_v30, %v679_v49  ;;  %v750_v34 = vadd.f32 %v742_v1, %v680_v37  ;;  %v1756_v49 = vld [vmem:[%s2398_s13 + $0x98] sm:$0xff] }
  0xd2   : >> { %2045 = vpow2.f32 %v1375_v61  ;;  %v773_v44 = vmul.f32 %v3323_v10, %v3307_v57  ;;  %v780_v17 = vadd.f32 %v772_v45, %v709_v19  ;;  %v792_v32 = vmul.f32 %v3322_v22, %v3311_v18 }
  0xd3   : >> { %2047 = vpow2.f32 %v1377_v13  ;;  %v793_v50 = vmul.f32 %v3323_v10, %v3311_v18  ;;  %v812_v7 = vmul.f32 %v3322_v22, %v2470_v8  ;;  %v813_v62 = vmul.f32 %v3323_v10, %v2470_v8 }
  0xd4   : >> { %v781_v52 = vadd.f32 %v773_v44, %v710_v60  ;;  %v842_v57 = vmul.f32 %v3323_v10, %v2474_v36  ;;  %v800_v24 = vadd.f32 %v792_v32, %v729_v27  ;;  %v843_v63 = vmul.f32 %v3038_v28, %v2474_v36  ;;  %v1772_v32 = vld [vmem:[%s2398_s13 + $0xe0] sm:$0xff] }
  0xd5   : >> { %v801_v51 = vadd.f32 %v793_v50, %v730_v47  ;;  %v862_v43 = vmul.f32 %v3323_v10, %v2508_v9  ;;  %v820_v18 = vadd.f32 %v812_v7, %v749_v59  ;;  %v821_v37 = vadd.f32 %v813_v62, %v750_v34  ;;  %v3324_v47 = vld [vmem:[#allocation42_spill] sm:$0xff] }
  0xd6   : >> { %v850_v12 = vadd.f32 %v842_v57, %v780_v17  ;;  %v863_v22 = vmul.f32 %v3038_v28, %v2508_v9  ;;  %v851_v23 = vadd.f32 %v843_v63, %v781_v52  ;;  %v882_v20 = vmul.f32 %v3323_v10, %v2518_v39 }
  0xd7   : >> { %v870_v8 = vadd.f32 %v862_v43, %v800_v24  ;;  %v883_v55 = vmul.f32 %v3038_v28, %v2518_v39  ;;  %v912_v36 = vmul.f32 %v3038_v28, %v2522_v40  ;;  %v913_v58 = vmul.f32 %v1756_v49, %v2522_v40 }
  0xd8   : >> { %v871_v29 = vadd.f32 %v863_v22, %v801_v51  ;;  %v932_v19 = vmul.f32 %v3038_v28, %v2526_v11  ;;  %v890_v4 = vadd.f32 %v882_v20, %v820_v18  ;;  %v933_v9 = vmul.f32 %v1756_v49, %v2526_v11  ;;  %v1780_v22 = vld [vmem:[%s2398_s13 + $0xe8] sm:$0xff] }
  0xd9   : >> { %v891_v56 = vadd.f32 %v883_v55, %v821_v37  ;;  %v952_v35 = vmul.f32 %v3038_v28, %v2530_v14  ;;  %v920_v60 = vadd.f32 %v912_v36, %v850_v12  ;;  %v921_v39 = vadd.f32 %v913_v58, %v851_v23  ;;  %v3326_v58 = vld [vmem:[#allocation33_spill] sm:$0xff] }
  0xda   : >> { %v3069_v54 = vpop.eup %2041  ;;  %v940_v53 = vadd.f32 %v932_v19, %v870_v8  ;;  %v953_v46 = vmul.f32 %v1756_v49, %v2530_v14  ;;  %v941_v27 = vadd.f32 %v933_v9, %v871_v29  ;;  %v983_v11 = vmul.f32 %v2755_v6, %v2534_v15 }
  0xdb   : >> { %v3072_v0 = vpop.eup %2043  ;;  %v1285_v40 = vmul.f32 1.0614054, %v3069_v54  ;;  %v960_v61 = vadd.f32 %v952_v35, %v890_v4  ;;  %v984_v45 = vmul.f32 %v3324_v47, %v2534_v15  ;;  %v1003_v14 = vmul.f32 %v2755_v6, %v2569_v33 }
  0xdc   : >> { %v3077_v30 = vpop.eup %2045  ;;  %v1286_v1 = vmul.f32 1.0614054, %v3072_v0  ;;  %v961_v13 = vadd.f32 %v953_v46, %v891_v56  ;;  %v991_v10 = vadd.f32 %v983_v11, %v920_v60  ;;  %v1004_v44 = vmul.f32 %v3324_v47, %v2569_v33 }
  0xdd   : >> { %v3084_v59 = vpop.eup %2047  ;;  %v1293_v34 = vadd.f32 -1.4531521, %v1285_v40  ;;  %v1023_v17 = vmul.f32 %v2755_v6, %v2573_v41  ;;  %v992_v52 = vadd.f32 %v984_v45, %v921_v39  ;;  %v1011_v7 = vadd.f32 %v1003_v14, %v940_v53 }
  0xde   : >> { %v1294_v50 = vadd.f32 -1.4531521, %v1286_v1  ;;  %v1024_v15 = vmul.f32 %v3324_v47, %v2573_v41  ;;  %v1012_v57 = vadd.f32 %v1004_v44, %v941_v27  ;;  %v1053_v51 = vmul.f32 %v3324_v47, %v2580_v16  ;;  %v3325_v41 = vld [vmem:[#allocation32_spill] sm:$0xff] }
  0xdf   : >> { %v1301_v62 = vmul.f32 %v3069_v54, %v1293_v34  ;;  %v1031_v24 = vadd.f32 %v1023_v17, %v960_v61  ;;  %v1054_v6 = vmul.f32 %v1772_v32, %v2580_v16  ;;  %v1073_v43 = vmul.f32 %v3324_v47, %v3316_v31 }
  0xe0   : >> { %v1302_v33 = vmul.f32 %v3072_v0, %v1294_v50  ;;  %v1032_v63 = vadd.f32 %v1024_v15, %v961_v13  ;;  %v1061_v18 = vadd.f32 %v1053_v51, %v991_v10  ;;  %v1074_v37 = vmul.f32 %v1772_v32, %v3316_v31 }
  0xe1   : >> { %v1309_v49 = vadd.f32 1.4214138, %v1301_v62  ;;  %v1093_v12 = vmul.f32 %v3324_v47, %v3325_v41  ;;  %v1062_v8 = vadd.f32 %v1054_v6, %v992_v52  ;;  %v1081_v20 = vadd.f32 %v1073_v43, %v1011_v7 }
  0xe2   : >> { %v1310_v23 = vadd.f32 1.4214138, %v1302_v33  ;;  %v1094_v55 = vmul.f32 %v1772_v32, %v3325_v41  ;;  %v1082_v36 = vadd.f32 %v1074_v37, %v1012_v57  ;;  %v1123_v19 = vmul.f32 %v1772_v32, %v3326_v58 }
  0xe3   : >> { %v1317_v29 = vmul.f32 %v3069_v54, %v1309_v49  ;;  %v1101_v16 = vadd.f32 %v1093_v12, %v1031_v24  ;;  %v1124_v31 = vmul.f32 %v1780_v22, %v3326_v58  ;;  %v1143_v9 = vmul.f32 %v1772_v32, %v2618_v21 }
  0xe4   : >> { %v1318_v4 = vmul.f32 %v3072_v0, %v1310_v23  ;;  %v1102_v56 = vadd.f32 %v1094_v55, %v1032_v63  ;;  %v1131_v60 = vadd.f32 %v1123_v19, %v1061_v18  ;;  %v1144_v39 = vmul.f32 %v1780_v22, %v2618_v21 }
  0xe5   : >> { %v1325_v35 = vadd.f32 -0.28449672, %v1317_v29  ;;  %v1163_v53 = vmul.f32 %v1772_v32, %v2622_v48  ;;  %v1132_v40 = vadd.f32 %v1124_v31, %v1062_v8  ;;  %v1164_v27 = vmul.f32 %v1780_v22, %v2622_v48 }
  0xe6   : >> { %v1326_v46 = vadd.f32 -0.28449672, %v1318_v4  ;;  %v1151_v11 = vadd.f32 %v1143_v9, %v1081_v20  ;;  %v1179_v13 = vrot.slane %v1131_v60, 7  ;;  %v1152_v45 = vadd.f32 %v1144_v39, %v1082_v36  ;;  %v2058_v4 = vld [vmem:[%s2398_s13 + $0x70] sm:$0xff] }
  0xe7   : >> { %v1333_v61 = vmul.f32 %v3069_v54, %v1325_v35  ;;  %v1171_v1 = vadd.f32 %v1163_v53, %v1101_v16  ;;  %v1172_v14 = vadd.f32 %v1164_v27, %v1102_v56  ;;  %v1180_v34 = vrot.slane %v1132_v40, 7  ;;  %v2057_v16 = vld [vmem:[%s2398_s13 + $0x68] sm:$0xff] }
  0xe8   : >> { %v1334_v47 = vmul.f32 %v3072_v0, %v1326_v46  ;;  %v1187_v44 = vmul.f32 %v2281_v25, %v1179_v13  ;;  %vm1405_vm6 = vcmp.ge.f32.partialorder %v3016_v3, 0.0  ;;  %vm1406_vm7 = vcmp.ge.f32.partialorder %v3019_v42, 0.0 }
  0xe9   : >> { %v1341_v10 = vadd.f32 0.2548296, %v1333_v61  ;;  %v1203_v21 = vrot.slane %v1171_v1, 1  ;;  %v1188_v32 = vmul.f32 %v2281_v25, %v1180_v34  ;;  %v1204_v50 = vrot.slane %v1172_v14, 1 }
  0xea   : >> { %v1342_v17 = vadd.f32 0.2548296, %v1334_v47  ;;  %v1195_v52 = vadd.f32 %v1187_v44, %v1151_v11  ;;  %v1238_v41 = vmul.f32 0.5, %v3006_v2 }
  0xeb   : >> { %v1349_v48 = vmul.f32 %v3069_v54, %v1341_v10  ;;  %v1211_v7 = vmul.f32 %v2284_v26, %v1203_v21  ;;  %v1196_v62 = vadd.f32 %v1188_v32, %v1152_v45  ;;  %v1212_v57 = vmul.f32 %v2284_v26, %v1204_v50 }
  0xec   : >> { %v1350_v15 = vmul.f32 %v3072_v0, %v1342_v17 }
  0xed   : >> { %v1389_v24 = vmul.f32 %v3077_v30, %v1349_v48  ;;  %v1219_v51 = vadd.f32 %v1211_v7, %v1195_v52  ;;  %v1220_v63 = vadd.f32 %v1212_v57, %v1196_v62  ;;  %v1237_v30 = vmul.f32 0.5, %v3003_v38 }
  0xee   : >> { %v1390_v33 = vmul.f32 %v3084_v59, %v1350_v15 }
  0xef   : >> { %v1397_v6 = vsub.f32 1.0, %v1389_v24  ;;  %v3124_v43 = vadd.f32 %v2185_v5, %v1219_v51  ;;  %v3128_v54 = vadd.f32 %v2185_v5, %v1220_v63 }
  0xf0   : >> { %v1398_v49 = vsub.f32 1.0, %v1390_v33 }
  0xf1   : >> { %v1413_v0 = vsub.f32 0.0, %v1397_v6  ;;  %v3132_v18 = vmul.f32 0.70710677, %v3124_v43  ;;  %v3136_v37 = vmul.f32 0.70710677, %v3128_v54 }
  0xf2   : >> { %v1414_v59 = vsub.f32 0.0, %v1398_v49 }
  0xf3   : >> { %v1421_v3 = vsel %vm1405_vm6, %v1397_v6, %v1413_v0  ;;  %v1257_v12 = vand.u32 2147483647, %v3132_v18  ;;  %v1258_v42 = vand.u32 2147483647, %v3136_v37  ;;  %vm1409_vm8 = vcmp.ge.f32.partialorder %v3132_v18, 0.0 }
  0xf4   : >> { %v1422_v22 = vsel %vm1406_vm7, %v1398_v49, %v1414_v59  ;;  %v1429_v23 = vadd.f32 1.0, %v1421_v3  ;;  %vm1410_vm9 = vcmp.ge.f32.partialorder %v3136_v37, 0.0  ;;  %v1241_v6 = vmul.f32 0.5, %v3124_v43 }
  0xf5   : >> { %v1430_v8 = vadd.f32 1.0, %v1422_v22  ;;  %v1265_v20 = vmul.f32 0.3275911, %v1257_v12  ;;  %v1266_v29 = vmul.f32 0.3275911, %v1258_v42  ;;  %v1361_v31 = vsub.f32 0.0, %v1257_v12 }
  0xf6   : >> { %v1437_v55 = vmul.f32 %v1429_v23, %v1237_v30  ;;  %v1362_v9 = vsub.f32 0.0, %v1258_v42  ;;  %v1242_v0 = vmul.f32 0.5, %v3128_v54  ;;  %v2059_v23 = vld [vmem:[%s2398_s13 + $0x88] sm:$0xff]  ;;  %v1578_v54 = vld [vmem:[%s3151_s15 + $0x10] sm:$0xff] }
  0xf7   : >> { %v1438_v36 = vmul.f32 %v1430_v8, %v1238_v41  ;;  %v1273_v38 = vadd.f32 1.0, %v1265_v20  ;;  %v1274_v19 = vadd.f32 1.0, %v1266_v29  ;;  %v1369_v35 = vmul.f32 %v1361_v31, %v1257_v12  ;;  %v3327_v8 = vld [vmem:[#allocation23_spill] sm:$0xff] }
  0xf8   : >> { %v1445_v58 = vadd.f32 %v2057_v16, %v1437_v55  ;;  %v1370_v60 = vmul.f32 %v1362_v9, %v1258_v42  ;;  %v1576_v29 = vld [vmem:[%s3151_s15] sm:$0xff] }
  0xf9   : >> { %v1446_v56 = vadd.f32 %v2058_v4, %v1438_v36  ;;  %2049 = vrcp.f32 %v1273_v38  ;;  %v1383_v27 = vmul.f32 1.442695, %v1369_v35  ;;  %v1579_v38 = vld [vmem:[%s3151_s15 + $0x18] sm:$0xff]  ;;  %v1577_v4 = vld [vmem:[%s3151_s15 + $0x8] sm:$0xff] }
  0xfa   : >> { %2051 = vrcp.f32 %v1274_v19  ;;  %v1385_v11 = vmul.f32 1.442695, %v1370_v60  ;;  %v1582_v60 = vld [vmem:[%s3151_s15 + $0x30] sm:$0xff] }
  0xfb   : >> { %v1452_v2 = vpack.c.bf16 %v1446_v56, %v1445_v58  ;;  %2053 = vpow2.f32 %v1383_v27 }
  0xfc   : >> { %2055 = vpow2.f32 %v1385_v11 }
  0xfd   : >> { %1985 = vmatmul.mubr.bf16.vlgmr.msra.gmra.mrb[0].mxu0 %v1452_v2 }
 0x103   : >> { %v2050_v39 = vpop.eup %2049 }
 0x104   : >> { %v2052_v53 = vpop.eup %2051  ;;  %v1289_v46 = vmul.f32 1.0614054, %v2050_v39 }
 0x105   : >> { %v1290_v40 = vmul.f32 1.0614054, %v2052_v53  ;;  %v2054_v48 = vpop.eup %2053 }
 0x106   : >> { %v1297_v61 = vadd.f32 -1.4531521, %v1289_v46  ;;  %v2056_v7 = vpop.eup %2055  ;;  %v1580_v46 = vld [vmem:[%s3151_s15 + $0x20] sm:$0xff] }
 0x107   : >> { %v1298_v1 = vadd.f32 -1.4531521, %v1290_v40 }
 0x108   : >> { %v1305_v13 = vmul.f32 %v2050_v39, %v1297_v61  ;;  %v1583_v61 = vld [vmem:[%s3151_s15 + $0x38] sm:$0xff] }
 0x109   : >> { %v1306_v47 = vmul.f32 %v2052_v53, %v1298_v1 }
 0x10a   : >> { %v1313_v45 = vadd.f32 1.4214138, %v1305_v13 }
 0x10b   : >> { %v1314_v14 = vadd.f32 1.4214138, %v1306_v47  ;;  %v1581_v47 = vld [vmem:[%s3151_s15 + $0x28] sm:$0xff] }
 0x10c   : >> { %v1321_v34 = vmul.f32 %v2050_v39, %v1313_v45 }
 0x10d   : >> { %v1322_v10 = vmul.f32 %v2052_v53, %v1314_v14 }
 0x10e   : >> { %v1329_v44 = vadd.f32 -0.28449672, %v1321_v34 }
 0x10f   : >> { %v1330_v21 = vadd.f32 -0.28449672, %v1322_v10 }
 0x110   : >> { %v1337_v17 = vmul.f32 %v2050_v39, %v1329_v44 }
 0x111   : >> { %v1338_v32 = vmul.f32 %v2052_v53, %v1330_v21 }
 0x112   : >> { %v1345_v50 = vadd.f32 0.2548296, %v1337_v17 }
 0x113   : >> { %v1346_v52 = vadd.f32 0.2548296, %v1338_v32 }
 0x114   : >> { %v1353_v15 = vmul.f32 %v2050_v39, %v1345_v50 }
 0x115   : >> { %v1354_v62 = vmul.f32 %v2052_v53, %v1346_v52 }
 0x116   : >> { %v1393_v57 = vmul.f32 %v2054_v48, %v1353_v15 }
 0x117   : >> { %v1394_v24 = vmul.f32 %v2056_v7, %v1354_v62 }
 0x118   : >> { %v1401_v51 = vsub.f32 1.0, %v1393_v57 }
 0x119   : >> { %v1402_v33 = vsub.f32 1.0, %v1394_v24 }
 0x11a   : >> { %v1417_v63 = vsub.f32 0.0, %v1401_v51 }
 0x11b   : >> { %v1418_v49 = vsub.f32 0.0, %v1402_v33 }
 0x11c   : >> { %v1425_v30 = vsel %vm1409_vm8, %v1401_v51, %v1417_v63 }
 0x11d   : >> { %v1426_v59 = vsel %vm1410_vm9, %v1402_v33, %v1418_v49  ;;  %v1433_v41 = vadd.f32 1.0, %v1425_v30 }
 0x11e   : >> { %v1434_v3 = vadd.f32 1.0, %v1426_v59 }
 0x11f   : >> { %v1441_v12 = vmul.f32 %v1433_v41, %v1241_v6 }
 0x120   : >> { %v1442_v22 = vmul.f32 %v1434_v3, %v1242_v0 }
 0x121   : >> { %v1449_v42 = vadd.f32 %v2059_v23, %v1441_v12 }
 0x122   : >> { %v1450_v18 = vadd.f32 %v3038_v28, %v1442_v22 }
 0x124   : >> { %v1454_v37 = vpack.c.bf16 %v1450_v18, %v1449_v42 }
 0x126   : >> { %1989 = vmatmul.mubr.bf16.vlgmr.msra.gmra.mrb[0].mxu1 %v1454_v37 }
 0x1d0   : >> { %v1986_v43 = vpop.f32.mrb[0].mxu0 }
 0x1d1   : >> { %v1552_v20 = vadd.f32 %v1986_v43, %v3327_v8  ;;  %v1543_v55 = vpop.f32.mrb[1].mxu0 }
 0x1d2   : >> { %v1544_v28 = vadd.f32 %v3327_v8, %v1543_v55  ;;  %v1987_v36 = vpop.f32.mrb[2].mxu0 }
 0x1d3   : >> { %v1586_v16 = vadd.f32 %v1578_v54, %v1552_v20  ;;  %v1555_v58 = vadd.f32 %v1987_v36, %v3327_v8  ;;  %v1546_v19 = vpop.f32.mrb[3].mxu0 }
 0x1d4   : >> { %v1584_v56 = vadd.f32 %v1576_v29, %v1544_v28  ;;  %v1547_v2 = vadd.f32 %v3327_v8, %v1546_v19 }
 0x1d5   : >> { %1596 = vst.msk [vmem:[%s3157_s16 + $0x10] sm:$0xff] %vm1593_vm10, %v1586_v16  ;;  %v1587_v31 = vadd.f32 %v1579_v38, %v1555_v58 }
 0x1d6   : >> { %1594 = vst.msk [vmem:[%s3157_s16] sm:$0xff] %vm1593_vm10, %v1584_v56  ;;  %v1585_v9 = vadd.f32 %v1577_v4, %v1547_v2 }
 0x1d7   : >> { %1597 = vst.msk [vmem:[%s3157_s16 + $0x18] sm:$0xff] %vm1593_vm10, %v1587_v31 }
 0x1d8   : >> { %1595 = vst.msk [vmem:[%s3157_s16 + $0x8] sm:$0xff] %vm1593_vm10, %v1585_v9 }
 0x1f9   : >> { %v1990_v35 = vpop.f32.mrb[0].mxu1 }
 0x1fa   : >> { %v1568_v39 = vadd.f32 %v1990_v35, %v3327_v8  ;;  %v1559_v53 = vpop.f32.mrb[1].mxu1 }
 0x1fb   : >> { %v1560_v40 = vadd.f32 %v3327_v8, %v1559_v53  ;;  %v1991_v27 = vpop.f32.mrb[2].mxu1  ;;  %539 = sbr.rel (!%p537_p4) target bundleno = 67 (0x43), region = 99 }
 0x1fc   : >> { %v1590_v11 = vadd.f32 %v1582_v60, %v1568_v39  ;;  %v1571_v1 = vadd.f32 %v1991_v27, %v3327_v8  ;;  %v1562_v13 = vpop.f32.mrb[3].mxu1 }
 0x1fd   : >> { %v1588_v45 = vadd.f32 %v1580_v46, %v1560_v40  ;;  %v1563_v14 = vadd.f32 %v3327_v8, %v1562_v13 }
 0x1fe   : >> { %1600 = vst.msk [vmem:[%s3157_s16 + $0x30] sm:$0xff] %vm1593_vm10, %v1590_v11  ;;  %v1591_v34 = vadd.f32 %v1583_v61, %v1571_v1 }
 0x1ff   : >> { %1598 = vst.msk [vmem:[%s3157_s16 + $0x20] sm:$0xff] %vm1593_vm10, %v1588_v45  ;;  %v1589_v10 = vadd.f32 %v1581_v47, %v1563_v14 }
 0x200   : >> { %1601 = vst.msk [vmem:[%s3157_s16 + $0x38] sm:$0xff] %vm1593_vm10, %v1591_v34 }
 0x201   : >> { %1599 = vst.msk [vmem:[%s3157_s16 + $0x28] sm:$0xff] %vm1593_vm10, %v1589_v10 }
 0x202 PF: > { %s16_s21 = sadd.s32 1, %s2070_s21  }
 0x203   : > { %p13_p5 = scmp.ge.s32.totalorder %s16_s21, 4  }
 0x205   :  { %15 = sbr.rel (!%p13_p5) target bundleno = 1 (0x1), region = 110 }

</bundles_post_ra>
